<compile_context>
chip_gen: v7x
topology: tpu7x:2x2x1
jax: 0.10.0
libtpu: 0.0.40
codegen_flags: <defaults>
</compile_context>

<pallas_src>
import functools

import numpy as np
import jax
import jax.numpy as jnp
from jax.experimental import pallas as pl
from jax.experimental.pallas import tpu as pltpu

BN_EPS = 1e-5
VMEM_LIMIT = 32 * 1024 * 1024


# ----------------------------------------------------------------------------
# Tiling helper: largest tile <= pref that is a multiple of `align` and divides
# `dim`; otherwise the full extent (allowed by the (8,128) rule).
# ----------------------------------------------------------------------------
def _pick_tile(dim, pref, align):
    if dim <= pref:
        return dim
    t = (pref // align) * align
    while t >= align:
        if dim % t == 0:
            return t
        t -= align
    return dim


# ----------------------------------------------------------------------------
# Fused matmul + folded-BN scale/bias (+ optional residual add) (+ optional ReLU)
# ----------------------------------------------------------------------------
def _matmul_bn_kernel(*refs, relu, has_res):
    if has_res:
        x_ref, w_ref, s_ref, b_ref, r_ref, o_ref, acc_ref = refs
    else:
        x_ref, w_ref, s_ref, b_ref, o_ref, acc_ref = refs
        r_ref = None

    @pl.when(pl.program_id(2) == 0)
    def _():
        acc_ref[...] = jnp.zeros_like(acc_ref)

    acc_ref[...] += jnp.dot(x_ref[...], w_ref[...],
                            preferred_element_type=jnp.float32)

    @pl.when(pl.program_id(2) == pl.num_programs(2) - 1)
    def _():
        acc = acc_ref[...] * s_ref[...] + b_ref[...]
        if has_res:
            acc = acc + r_ref[...].astype(jnp.float32)
        if relu:
            acc = jnp.maximum(acc, 0.0)
        o_ref[...] = acc.astype(o_ref.dtype)


def matmul_bn(x, w, scale, bias, relu, residual=None, out_dtype=jnp.bfloat16):
    """out = maybe_relu((x @ w) * scale + bias [+ residual])  on a tiled grid.

    x: (M, K) bf16,  w: (K, N) bf16,  scale/bias: (1, N) f32,
    residual: optional (M, N) bf16.
    """
    M, K = x.shape
    K2, N = w.shape
    assert K == K2

    tm = _pick_tile(M, 256, 8)
    tn = _pick_tile(N, 256, 128)
    tk = _pick_tile(K, 512, 128)
    nm, nn, nk = M // tm, N // tn, K // tk
    has_res = residual is not None

    in_specs = [
        pl.BlockSpec((tm, tk), lambda i, j, k: (i, k)),
        pl.BlockSpec((tk, tn), lambda i, j, k: (k, j)),
        pl.BlockSpec((1, tn), lambda i, j, k: (0, j)),
        pl.BlockSpec((1, tn), lambda i, j, k: (0, j)),
    ]
    args = [x, w, scale, bias]
    if has_res:
        in_specs.append(pl.BlockSpec((tm, tn), lambda i, j, k: (i, j)))
        args.append(residual)

    bytes_accessed = (M * K * x.dtype.itemsize
                      + K * N * w.dtype.itemsize
                      + M * N * np.dtype(out_dtype).itemsize
                      + (M * N * residual.dtype.itemsize if has_res else 0)
                      + 2 * N * 4)
    cost = pl.CostEstimate(flops=2 * M * N * K, transcendentals=0,
                           bytes_accessed=bytes_accessed)

    return pl.pallas_call(
        functools.partial(_matmul_bn_kernel, relu=relu, has_res=has_res),
        out_shape=jax.ShapeDtypeStruct((M, N), out_dtype),
        grid=(nm, nn, nk),
        in_specs=in_specs,
        out_specs=pl.BlockSpec((tm, tn), lambda i, j, k: (i, j)),
        scratch_shapes=[pltpu.VMEM((tm, tn), jnp.float32)],
        compiler_params=pltpu.CompilerParams(
            dimension_semantics=("parallel", "parallel", "arbitrary"),
            vmem_limit_bytes=VMEM_LIMIT),
        cost_estimate=cost,
    )(*args)


# ----------------------------------------------------------------------------
# MaxPool2d(kernel=3, stride=2, padding=1): 9-tap window max, tiled over rows.
# ----------------------------------------------------------------------------
def _max9_kernel(x_ref, o_ref):
    o_ref[...] = jnp.max(x_ref[...], axis=0)


def maxpool_3x3_s2_p1(x):
    N, H, W, C = x.shape
    Ho = (H + 2 - 3) // 2 + 1
    Wo = (W + 2 - 3) // 2 + 1
    xp = jnp.pad(x, ((0, 0), (1, 1), (1, 1), (0, 0)),
                 constant_values=float("-inf"))
    taps = []
    for i in range(3):
        for j in range(3):
            taps.append(xp[:, i:i + 2 * (Ho - 1) + 1:2,
                           j:j + 2 * (Wo - 1) + 1:2, :])
    M = N * Ho * Wo
    stacked = jnp.stack(taps, axis=0).reshape(9, M, C)
    tm = _pick_tile(M, 512, 8)
    out = pl.pallas_call(
        _max9_kernel,
        out_shape=jax.ShapeDtypeStruct((M, C), x.dtype),
        grid=(M // tm,),
        in_specs=[pl.BlockSpec((9, tm, C), lambda i: (0, i, 0))],
        out_specs=pl.BlockSpec((tm, C), lambda i: (i, 0)),
        compiler_params=pltpu.CompilerParams(
            dimension_semantics=("parallel",),
            vmem_limit_bytes=VMEM_LIMIT),
    )(stacked)
    return out.reshape(N, Ho, Wo, C)


# ----------------------------------------------------------------------------
# Conv = im2col (glue, static kernel sizes) + tiled fused Pallas matmul
# ----------------------------------------------------------------------------
def im2col(x, kh, kw, stride, pad):
    """x: NHWC -> patches (N*Ho*Wo, kh*kw*C), feature order (kh, kw, cin)."""
    N, H, W, C = x.shape
    if pad > 0:
        x = jnp.pad(x, ((0, 0), (pad, pad), (pad, pad), (0, 0)))
    Ho = (H + 2 * pad - kh) // stride + 1
    Wo = (W + 2 * pad - kw) // stride + 1
    cols = []
    for i in range(kh):
        for j in range(kw):
            cols.append(x[:, i:i + stride * (Ho - 1) + 1:stride,
                          j:j + stride * (Wo - 1) + 1:stride, :])
    patches = jnp.concatenate(cols, axis=-1)           # (N, Ho, Wo, kh*kw*C)
    return patches.reshape(N * Ho * Wo, kh * kw * C), (N, Ho, Wo)


def conv_bn(x, p, kh, kw, stride, pad, relu, residual=None):
    patches, (N, Ho, Wo) = im2col(x, kh, kw, stride, pad)
    res2 = residual.reshape(N * Ho * Wo, -1) if residual is not None else None
    out = matmul_bn(patches, p["w"], p["scale"], p["bias"], relu=relu,
                    residual=res2, out_dtype=jnp.bfloat16)
    return out.reshape(N, Ho, Wo, -1)


def basic_block(x, p, stride):
    if "down" in p:
        identity = conv_bn(x, p["down"], kh=1, kw=1, stride=stride, pad=0,
                           relu=False)
    else:
        identity = x
    out = conv_bn(x, p["conv1"], kh=3, kw=3, stride=stride, pad=1, relu=True)
    # residual add + ReLU fused into the conv2 matmul epilogue
    out = conv_bn(out, p["conv2"], kh=3, kw=3, stride=1, pad=1, relu=True,
                  residual=identity)
    return out


# ----------------------------------------------------------------------------
# Deterministic parameter construction (ResNet-18 shapes, fc -> 2 classes).
# Weights pre-cast to bf16, BN folded into f32 (1, N) scale/bias at init.
# ----------------------------------------------------------------------------
def conv_bn_params(key, kh, kw, cin, cout):
    kkey, g_key, b_key, m_key, v_key = jax.random.split(key, 5)
    fan_in = kh * kw * cin
    w = jax.random.normal(kkey, (kh, kw, cin, cout), jnp.float32)
    w = w * (1.0 / jnp.sqrt(float(fan_in)))
    gamma = 1.0 + 0.1 * jax.random.normal(g_key, (cout,), jnp.float32)
    beta = 0.1 * jax.random.normal(b_key, (cout,), jnp.float32)
    run_mean = 0.1 * jax.random.normal(m_key, (cout,), jnp.float32)
    run_var = 0.5 + jax.random.uniform(v_key, (cout,), jnp.float32)
    scale = gamma / jnp.sqrt(run_var + BN_EPS)            # fold eval-mode BN
    bias = beta - run_mean * scale
    return {"w": w.reshape(kh * kw * cin, cout).astype(jnp.bfloat16),
            "scale": scale.reshape(1, cout),
            "bias": bias.reshape(1, cout)}


def init_params(key):
    keys = iter(jax.random.split(key, 64))
    params = {"conv1": conv_bn_params(next(keys), 7, 7, 3, 64)}

    def make_layer(cin, cout, downsample):
        b0 = {"conv1": conv_bn_params(next(keys), 3, 3, cin, cout),
              "conv2": conv_bn_params(next(keys), 3, 3, cout, cout)}
        if downsample:
            b0["down"] = conv_bn_params(next(keys), 1, 1, cin, cout)
        b1 = {"conv1": conv_bn_params(next(keys), 3, 3, cout, cout),
              "conv2": conv_bn_params(next(keys), 3, 3, cout, cout)}
        return [b0, b1]

    params["layer1"] = make_layer(64, 64, False)
    params["layer2"] = make_layer(64, 128, True)
    params["layer3"] = make_layer(128, 256, True)
    params["layer4"] = make_layer(256, 512, True)

    fc_w_key, fc_b_key = jax.random.split(next(keys))
    fc_w = jax.random.normal(fc_w_key, (512, 2), jnp.float32) / jnp.sqrt(512.0)
    params["fc"] = {
        "w": fc_w.astype(jnp.bfloat16),
        "scale": jnp.ones((1, 2), jnp.float32),
        "bias": 0.01 * jax.random.normal(fc_b_key, (1, 2), jnp.float32),
    }
    return params


# ----------------------------------------------------------------------------
# Full ResNet-18 forward (PotholeDetector.forward)
# ----------------------------------------------------------------------------
def pothole_detector_forward(params, x_nchw):
    x = jnp.transpose(x_nchw, (0, 2, 3, 1)).astype(jnp.bfloat16)  # NCHW->NHWC
    x = conv_bn(x, params["conv1"], kh=7, kw=7, stride=2, pad=3, relu=True)
    x = maxpool_3x3_s2_p1(x)
    for layer_name, stride in (("layer1", 1), ("layer2", 2),
                               ("layer3", 2), ("layer4", 2)):
        blocks = params[layer_name]
        x = basic_block(x, blocks[0], stride)
        x = basic_block(x, blocks[1], 1)
    feat = jnp.mean(x.astype(jnp.float32), axis=(1, 2))   # adaptive avg pool
    logits = matmul_bn(feat.astype(jnp.bfloat16), params["fc"]["w"],
                       params["fc"]["scale"], params["fc"]["bias"],
                       relu=False, out_dtype=jnp.float32)  # fc: 512 -> 2
    return logits


if __name__ == "__main__":
    key = jax.random.PRNGKey(0)
    pkey, xkey = jax.random.split(key)
    params = init_params(pkey)
    # PyTorch-style NCHW input (small, ImageNet-like 3 channels).
    x = jax.random.normal(xkey, (2, 3, 32, 32), jnp.float32)
    fwd = jax.jit(pothole_detector_forward)
    logits = fwd(params, x)
    jax.block_until_ready(logits)
    assert logits.shape == (2, 2) and logits.dtype == jnp.float32
    print("KERNEL_OK")
</pallas_src>

<mosaic_0001>
module attributes {stable_mosaic.version = 11 : i64} {
  func.func @_matmul_bn_kernel(%arg0: i32, %arg1: i32, %arg2: i32, %arg3: memref<256x147xbf16, #tpu.memory_space<vmem>>, %arg4: memref<147x64xbf16, #tpu.memory_space<vmem>>, %arg5: memref<1x64xf32, #tpu.memory_space<vmem>>, %arg6: memref<1x64xf32, #tpu.memory_space<vmem>>, %arg7: memref<256x64xbf16, #tpu.memory_space<vmem>>, %arg8: memref<256x64xf32, #tpu.memory_space<vmem>>) attributes {dimension_semantics = [#tpu.dimension_semantics<parallel>, #tpu.dimension_semantics<parallel>, #tpu.dimension_semantics<arbitrary>], iteration_bounds = array<i64: 2, 1, 1>, scalar_prefetch = 0 : i64, scratch_operands = 1 : i64, tpu.core_type = #tpu.core_type<tc>, window_params = [{transform_indices = @transform_0, window_bounds = array<i64: 256, 147>}, {transform_indices = @transform_1, window_bounds = array<i64: 147, 64>}, {transform_indices = @transform_2, window_bounds = array<i64: 1, 64>}, {transform_indices = @transform_3, window_bounds = array<i64: 1, 64>}, {transform_indices = @transform_4, window_bounds = array<i64: 256, 64>}]} {
    %c0_i32 = arith.constant 0 : i32
    %0 = arith.cmpi eq, %arg2, %c0_i32 : i32
    %1 = arith.extui %0 : i1 to i32
    %c0_i32_0 = arith.constant 0 : i32
    %2 = arith.cmpi ne, %1, %c0_i32_0 : i32
    scf.if %2 {
      %cst_10 = arith.constant 0.000000e+00 : f32
      %12 = vector.broadcast %cst_10 : f32 to vector<256x64xf32>
      %c0_11 = arith.constant 0 : index
      %c0_12 = arith.constant 0 : index
      %13 = vector.load %arg8[%c0_11, %c0_12] : memref<256x64xf32, #tpu.memory_space<vmem>>, vector<256x64xf32>
      tpu.vector_store %arg8[%c0_11, %c0_12], %12 {strides = array<i32>} : memref<256x64xf32, #tpu.memory_space<vmem>>, vector<256x64xf32>,
    } else {
    }
    %c0 = arith.constant 0 : index
    %c0_1 = arith.constant 0 : index
    %3 = vector.load %arg8[%c0, %c0_1] : memref<256x64xf32, #tpu.memory_space<vmem>>, vector<256x64xf32>
    %c0_2 = arith.constant 0 : index
    %c0_3 = arith.constant 0 : index
    %4 = vector.load %arg3[%c0_2, %c0_3] : memref<256x147xbf16, #tpu.memory_space<vmem>>, vector<256x147xbf16>
    %c0_4 = arith.constant 0 : index
    %c0_5 = arith.constant 0 : index
    %5 = vector.load %arg4[%c0_4, %c0_5] : memref<147x64xbf16, #tpu.memory_space<vmem>>, vector<147x64xbf16>
    %cst = arith.constant dense<0.000000e+00> : vector<256x64xf32>
    %6 = tpu.matmul %4, %5, %cst {dimension_numbers = #tpu.dot_dimension_numbers<[1], [0], [0], [1], [0, 0, 1, 1], [], []>} : vector<256x147xbf16>, vector<147x64xbf16>, vector<256x64xf32> -> vector<256x64xf32>
    %7 = arith.addf %3, %6 : vector<256x64xf32>
    %c0_6 = arith.constant 0 : index
    %c0_7 = arith.constant 0 : index
    %8 = vector.load %arg8[%c0_6, %c0_7] : memref<256x64xf32, #tpu.memory_space<vmem>>, vector<256x64xf32>
    tpu.vector_store %arg8[%c0_6, %c0_7], %7 {strides = array<i32>} : memref<256x64xf32, #tpu.memory_space<vmem>>, vector<256x64xf32>,
    %c0_i32_8 = arith.constant 0 : i32
    %9 = arith.cmpi eq, %arg2, %c0_i32_8 : i32
    %10 = arith.extui %9 : i1 to i32
    %c0_i32_9 = arith.constant 0 : i32
    %11 = arith.cmpi ne, %10, %c0_i32_9 : i32
    scf.if %11 {
      %c0_10 = arith.constant 0 : index
      %c0_11 = arith.constant 0 : index
      %12 = vector.load %arg8[%c0_10, %c0_11] : memref<256x64xf32, #tpu.memory_space<vmem>>, vector<256x64xf32>
      %c0_12 = arith.constant 0 : index
      %c0_13 = arith.constant 0 : index
      %13 = vector.load %arg5[%c0_12, %c0_13] : memref<1x64xf32, #tpu.memory_space<vmem>>, vector<1x64xf32>
      %14 = vector.broadcast %13 : vector<1x64xf32> to vector<256x64xf32>
      %15 = arith.mulf %12, %14 : vector<256x64xf32>
      %c0_14 = arith.constant 0 : index
      %c0_15 = arith.constant 0 : index
      %16 = vector.load %arg6[%c0_14, %c0_15] : memref<1x64xf32, #tpu.memory_space<vmem>>, vector<1x64xf32>
      %17 = vector.broadcast %16 : vector<1x64xf32> to vector<256x64xf32>
      %18 = arith.addf %15, %17 : vector<256x64xf32>
      %cst_16 = arith.constant 0.000000e+00 : f32
      %19 = vector.broadcast %cst_16 : f32 to vector<256x64xf32>
      %20 = arith.maximumf %18, %19 : vector<256x64xf32>
      %21 = arith.truncf %20 : vector<256x64xf32> to vector<256x64xbf16>
      %c0_17 = arith.constant 0 : index
      %c0_18 = arith.constant 0 : index
      %22 = vector.load %arg7[%c0_17, %c0_18] : memref<256x64xbf16, #tpu.memory_space<vmem>>, vector<256x64xbf16>
      tpu.vector_store %arg7[%c0_17, %c0_18], %21 {strides = array<i32>} : memref<256x64xbf16, #tpu.memory_space<vmem>>, vector<256x64xbf16>,
    } else {
    }
    return
  }
  func.func @transform_0(%arg0: i32, %arg1: i32, %arg2: i32) -> (i32, i32) {
    %c0_i32 = arith.constant 0 : i32
    return %arg0, %arg2 : i32, i32
  }
  func.func @transform_1(%arg0: i32, %arg1: i32, %arg2: i32) -> (i32, i32) {
    %c0_i32 = arith.constant 0 : i32
    return %arg2, %arg1 : i32, i32
  }
  func.func @transform_2(%arg0: i32, %arg1: i32, %arg2: i32) -> (i32, i32) {
    %c0_i32 = arith.constant 0 : i32
    %c0_i32_0 = arith.constant 0 : i32
    return %c0_i32, %arg1 : i32, i32
  }
  func.func @transform_3(%arg0: i32, %arg1: i32, %arg2: i32) -> (i32, i32) {
    %c0_i32 = arith.constant 0 : i32
    %c0_i32_0 = arith.constant 0 : i32
    return %c0_i32, %arg1 : i32, i32
  }
  func.func @transform_4(%arg0: i32, %arg1: i32, %arg2: i32) -> (i32, i32) {
    %c0_i32 = arith.constant 0 : i32
    return %arg0, %arg1 : i32, i32
  }
}

module attributes {stable_mosaic.version = 11 : i64} {
  func.func @_max9_kernel(%arg0: i32, %arg1: memref<9x128x64xbf16, #tpu.memory_space<vmem>>, %arg2: memref<128x64xbf16, #tpu.memory_space<vmem>>) attributes {dimension_semantics = [#tpu.dimension_semantics<parallel>], iteration_bounds = array<i64: 1>, scalar_prefetch = 0 : i64, scratch_operands = 0 : i64, tpu.core_type = #tpu.core_type<tc>, window_params = [{transform_indices = @transform_0, window_bounds = array<i64: 9, 128, 64>}, {transform_indices = @transform_1, window_bounds = array<i64: 128, 64>}]} {
    %c0 = arith.constant 0 : index
    %c0_0 = arith.constant 0 : index
    %c0_1 = arith.constant 0 : index
    %0 = vector.load %arg1[%c0, %c0_0, %c0_1] : memref<9x128x64xbf16, #tpu.memory_space<vmem>>, vector<9x128x64xbf16>
    %cst = arith.constant dense<0xFF80> : vector<128x64xbf16>
    %1 = vector.multi_reduction <maximumf>, %0, %cst [0] : vector<9x128x64xbf16> to vector<128x64xbf16>
    %c0_2 = arith.constant 0 : index
    %c0_3 = arith.constant 0 : index
    %2 = vector.load %arg2[%c0_2, %c0_3] : memref<128x64xbf16, #tpu.memory_space<vmem>>, vector<128x64xbf16>
    tpu.vector_store %arg2[%c0_2, %c0_3], %1 {strides = array<i32>} : memref<128x64xbf16, #tpu.memory_space<vmem>>, vector<128x64xbf16>,
    return
  }
  func.func @transform_0(%arg0: i32) -> (i32, i32, i32) {
    %c0_i32 = arith.constant 0 : i32
    %c0_i32_0 = arith.constant 0 : i32
    %c0_i32_1 = arith.constant 0 : i32
    return %c0_i32, %arg0, %c0_i32_0 : i32, i32, i32
  }
  func.func @transform_1(%arg0: i32) -> (i32, i32) {
    %c0_i32 = arith.constant 0 : i32
    %c0_i32_0 = arith.constant 0 : i32
    return %arg0, %c0_i32 : i32, i32
  }
}

module attributes {stable_mosaic.version = 11 : i64} {
  func.func @_matmul_bn_kernel(%arg0: i32, %arg1: i32, %arg2: i32, %arg3: memref<128x576xbf16, #tpu.memory_space<vmem>>, %arg4: memref<576x64xbf16, #tpu.memory_space<vmem>>, %arg5: memref<1x64xf32, #tpu.memory_space<vmem>>, %arg6: memref<1x64xf32, #tpu.memory_space<vmem>>, %arg7: memref<128x64xbf16, #tpu.memory_space<vmem>>, %arg8: memref<128x64xf32, #tpu.memory_space<vmem>>) attributes {dimension_semantics = [#tpu.dimension_semantics<parallel>, #tpu.dimension_semantics<parallel>, #tpu.dimension_semantics<arbitrary>], iteration_bounds = array<i64: 1, 1, 1>, scalar_prefetch = 0 : i64, scratch_operands = 1 : i64, tpu.core_type = #tpu.core_type<tc>, window_params = [{transform_indices = @transform_0, window_bounds = array<i64: 128, 576>}, {transform_indices = @transform_1, window_bounds = array<i64: 576, 64>}, {transform_indices = @transform_2, window_bounds = array<i64: 1, 64>}, {transform_indices = @transform_3, window_bounds = array<i64: 1, 64>}, {transform_indices = @transform_4, window_bounds = array<i64: 128, 64>}]} {
    %c0_i32 = arith.constant 0 : i32
    %0 = arith.cmpi eq, %arg2, %c0_i32 : i32
    %1 = arith.extui %0 : i1 to i32
    %c0_i32_0 = arith.constant 0 : i32
    %2 = arith.cmpi ne, %1, %c0_i32_0 : i32
    scf.if %2 {
      %cst_10 = arith.constant 0.000000e+00 : f32
      %12 = vector.broadcast %cst_10 : f32 to vector<128x64xf32>
      %c0_11 = arith.constant 0 : index
      %c0_12 = arith.constant 0 : index
      %13 = vector.load %arg8[%c0_11, %c0_12] : memref<128x64xf32, #tpu.memory_space<vmem>>, vector<128x64xf32>
      tpu.vector_store %arg8[%c0_11, %c0_12], %12 {strides = array<i32>} : memref<128x64xf32, #tpu.memory_space<vmem>>, vector<128x64xf32>,
    } else {
    }
    %c0 = arith.constant 0 : index
    %c0_1 = arith.constant 0 : index
    %3 = vector.load %arg8[%c0, %c0_1] : memref<128x64xf32, #tpu.memory_space<vmem>>, vector<128x64xf32>
    %c0_2 = arith.constant 0 : index
    %c0_3 = arith.constant 0 : index
    %4 = vector.load %arg3[%c0_2, %c0_3] : memref<128x576xbf16, #tpu.memory_space<vmem>>, vector<128x576xbf16>
    %c0_4 = arith.constant 0 : index
    %c0_5 = arith.constant 0 : index
    %5 = vector.load %arg4[%c0_4, %c0_5] : memref<576x64xbf16, #tpu.memory_space<vmem>>, vector<576x64xbf16>
    %cst = arith.constant dense<0.000000e+00> : vector<128x64xf32>
    %6 = tpu.matmul %4, %5, %cst {dimension_numbers = #tpu.dot_dimension_numbers<[1], [0], [0], [1], [0, 0, 1, 1], [], []>} : vector<128x576xbf16>, vector<576x64xbf16>, vector<128x64xf32> -> vector<128x64xf32>
    %7 = arith.addf %3, %6 : vector<128x64xf32>
    %c0_6 = arith.constant 0 : index
    %c0_7 = arith.constant 0 : index
    %8 = vector.load %arg8[%c0_6, %c0_7] : memref<128x64xf32, #tpu.memory_space<vmem>>, vector<128x64xf32>
    tpu.vector_store %arg8[%c0_6, %c0_7], %7 {strides = array<i32>} : memref<128x64xf32, #tpu.memory_space<vmem>>, vector<128x64xf32>,
    %c0_i32_8 = arith.constant 0 : i32
    %9 = arith.cmpi eq, %arg2, %c0_i32_8 : i32
    %10 = arith.extui %9 : i1 to i32
    %c0_i32_9 = arith.constant 0 : i32
    %11 = arith.cmpi ne, %10, %c0_i32_9 : i32
    scf.if %11 {
      %c0_10 = arith.constant 0 : index
      %c0_11 = arith.constant 0 : index
      %12 = vector.load %arg8[%c0_10, %c0_11] : memref<128x64xf32, #tpu.memory_space<vmem>>, vector<128x64xf32>
      %c0_12 = arith.constant 0 : index
      %c0_13 = arith.constant 0 : index
      %13 = vector.load %arg5[%c0_12, %c0_13] : memref<1x64xf32, #tpu.memory_space<vmem>>, vector<1x64xf32>
      %14 = vector.broadcast %13 : vector<1x64xf32> to vector<128x64xf32>
      %15 = arith.mulf %12, %14 : vector<128x64xf32>
      %c0_14 = arith.constant 0 : index
      %c0_15 = arith.constant 0 : index
      %16 = vector.load %arg6[%c0_14, %c0_15] : memref<1x64xf32, #tpu.memory_space<vmem>>, vector<1x64xf32>
      %17 = vector.broadcast %16 : vector<1x64xf32> to vector<128x64xf32>
      %18 = arith.addf %15, %17 : vector<128x64xf32>
      %cst_16 = arith.constant 0.000000e+00 : f32
      %19 = vector.broadcast %cst_16 : f32 to vector<128x64xf32>
      %20 = arith.maximumf %18, %19 : vector<128x64xf32>
      %21 = arith.truncf %20 : vector<128x64xf32> to vector<128x64xbf16>
      %c0_17 = arith.constant 0 : index
      %c0_18 = arith.constant 0 : index
      %22 = vector.load %arg7[%c0_17, %c0_18] : memref<128x64xbf16, #tpu.memory_space<vmem>>, vector<128x64xbf16>
      tpu.vector_store %arg7[%c0_17, %c0_18], %21 {strides = array<i32>} : memref<128x64xbf16, #tpu.memory_space<vmem>>, vector<128x64xbf16>,
    } else {
    }
    return
  }
  func.func @transform_0(%arg0: i32, %arg1: i32, %arg2: i32) -> (i32, i32) {
    %c0_i32 = arith.constant 0 : i32
    return %arg0, %arg2 : i32, i32
  }
  func.func @transform_1(%arg0: i32, %arg1: i32, %arg2: i32) -> (i32, i32) {
    %c0_i32 = arith.constant 0 : i32
    return %arg2, %arg1 : i32, i32
  }
  func.func @transform_2(%arg0: i32, %arg1: i32, %arg2: i32) -> (i32, i32) {
    %c0_i32 = arith.constant 0 : i32
    %c0_i32_0 = arith.constant 0 : i32
    return %c0_i32, %arg1 : i32, i32
  }
  func.func @transform_3(%arg0: i32, %arg1: i32, %arg2: i32) -> (i32, i32) {
    %c0_i32 = arith.constant 0 : i32
    %c0_i32_0 = arith.constant 0 : i32
    return %c0_i32, %arg1 : i32, i32
  }
  func.func @transform_4(%arg0: i32, %arg1: i32, %arg2: i32) -> (i32, i32) {
    %c0_i32 = arith.constant 0 : i32
    return %arg0, %arg1 : i32, i32
  }
}

module attributes {stable_mosaic.version = 11 : i64} {
  func.func @_matmul_bn_kernel(%arg0: i32, %arg1: i32, %arg2: i32, %arg3: memref<128x576xbf16, #tpu.memory_space<vmem>>, %arg4: memref<576x64xbf16, #tpu.memory_space<vmem>>, %arg5: memref<1x64xf32, #tpu.memory_space<vmem>>, %arg6: memref<1x64xf32, #tpu.memory_space<vmem>>, %arg7: memref<128x64xbf16, #tpu.memory_space<vmem>>, %arg8: memref<128x64xbf16, #tpu.memory_space<vmem>>, %arg9: memref<128x64xf32, #tpu.memory_space<vmem>>) attributes {dimension_semantics = [#tpu.dimension_semantics<parallel>, #tpu.dimension_semantics<parallel>, #tpu.dimension_semantics<arbitrary>], iteration_bounds = array<i64: 1, 1, 1>, scalar_prefetch = 0 : i64, scratch_operands = 1 : i64, tpu.core_type = #tpu.core_type<tc>, window_params = [{transform_indices = @transform_0, window_bounds = array<i64: 128, 576>}, {transform_indices = @transform_1, window_bounds = array<i64: 576, 64>}, {transform_indices = @transform_2, window_bounds = array<i64: 1, 64>}, {transform_indices = @transform_3, window_bounds = array<i64: 1, 64>}, {transform_indices = @transform_4, window_bounds = array<i64: 128, 64>}, {transform_indices = @transform_5, window_bounds = array<i64: 128, 64>}]} {
    %c0_i32 = arith.constant 0 : i32
    %0 = arith.cmpi eq, %arg2, %c0_i32 : i32
    %1 = arith.extui %0 : i1 to i32
    %c0_i32_0 = arith.constant 0 : i32
    %2 = arith.cmpi ne, %1, %c0_i32_0 : i32
    scf.if %2 {
      %cst_10 = arith.constant 0.000000e+00 : f32
      %12 = vector.broadcast %cst_10 : f32 to vector<128x64xf32>
      %c0_11 = arith.constant 0 : index
      %c0_12 = arith.constant 0 : index
      %13 = vector.load %arg9[%c0_11, %c0_12] : memref<128x64xf32, #tpu.memory_space<vmem>>, vector<128x64xf32>
      tpu.vector_store %arg9[%c0_11, %c0_12], %12 {strides = array<i32>} : memref<128x64xf32, #tpu.memory_space<vmem>>, vector<128x64xf32>,
    } else {
    }
    %c0 = arith.constant 0 : index
    %c0_1 = arith.constant 0 : index
    %3 = vector.load %arg9[%c0, %c0_1] : memref<128x64xf32, #tpu.memory_space<vmem>>, vector<128x64xf32>
    %c0_2 = arith.constant 0 : index
    %c0_3 = arith.constant 0 : index
    %4 = vector.load %arg3[%c0_2, %c0_3] : memref<128x576xbf16, #tpu.memory_space<vmem>>, vector<128x576xbf16>
    %c0_4 = arith.constant 0 : index
    %c0_5 = arith.constant 0 : index
    %5 = vector.load %arg4[%c0_4, %c0_5] : memref<576x64xbf16, #tpu.memory_space<vmem>>, vector<576x64xbf16>
    %cst = arith.constant dense<0.000000e+00> : vector<128x64xf32>
    %6 = tpu.matmul %4, %5, %cst {dimension_numbers = #tpu.dot_dimension_numbers<[1], [0], [0], [1], [0, 0, 1, 1], [], []>} : vector<128x576xbf16>, vector<576x64xbf16>, vector<128x64xf32> -> vector<128x64xf32>
    %7 = arith.addf %3, %6 : vector<128x64xf32>
    %c0_6 = arith.constant 0 : index
    %c0_7 = arith.constant 0 : index
    %8 = vector.load %arg9[%c0_6, %c0_7] : memref<128x64xf32, #tpu.memory_space<vmem>>, vector<128x64xf32>
    tpu.vector_store %arg9[%c0_6, %c0_7], %7 {strides = array<i32>} : memref<128x64xf32, #tpu.memory_space<vmem>>, vector<128x64xf32>,
    %c0_i32_8 = arith.constant 0 : i32
    %9 = arith.cmpi eq, %arg2, %c0_i32_8 : i32
    %10 = arith.extui %9 : i1 to i32
    %c0_i32_9 = arith.constant 0 : i32
    %11 = arith.cmpi ne, %10, %c0_i32_9 : i32
    scf.if %11 {
      %c0_10 = arith.constant 0 : index
      %c0_11 = arith.constant 0 : index
      %12 = vector.load %arg9[%c0_10, %c0_11] : memref<128x64xf32, #tpu.memory_space<vmem>>, vector<128x64xf32>
      %c0_12 = arith.constant 0 : index
      %c0_13 = arith.constant 0 : index
      %13 = vector.load %arg5[%c0_12, %c0_13] : memref<1x64xf32, #tpu.memory_space<vmem>>, vector<1x64xf32>
      %14 = vector.broadcast %13 : vector<1x64xf32> to vector<128x64xf32>
      %15 = arith.mulf %12, %14 : vector<128x64xf32>
      %c0_14 = arith.constant 0 : index
      %c0_15 = arith.constant 0 : index
      %16 = vector.load %arg6[%c0_14, %c0_15] : memref<1x64xf32, #tpu.memory_space<vmem>>, vector<1x64xf32>
      %17 = vector.broadcast %16 : vector<1x64xf32> to vector<128x64xf32>
      %18 = arith.addf %15, %17 : vector<128x64xf32>
      %c0_16 = arith.constant 0 : index
      %c0_17 = arith.constant 0 : index
      %19 = vector.load %arg7[%c0_16, %c0_17] : memref<128x64xbf16, #tpu.memory_space<vmem>>, vector<128x64xbf16>
      %20 = arith.extf %19 : vector<128x64xbf16> to vector<128x64xf32>
      %21 = arith.addf %18, %20 : vector<128x64xf32>
      %cst_18 = arith.constant 0.000000e+00 : f32
      %22 = vector.broadcast %cst_18 : f32 to vector<128x64xf32>
      %23 = arith.maximumf %21, %22 : vector<128x64xf32>
      %24 = arith.truncf %23 : vector<128x64xf32> to vector<128x64xbf16>
      %c0_19 = arith.constant 0 : index
      %c0_20 = arith.constant 0 : index
      %25 = vector.load %arg8[%c0_19, %c0_20] : memref<128x64xbf16, #tpu.memory_space<vmem>>, vector<128x64xbf16>
      tpu.vector_store %arg8[%c0_19, %c0_20], %24 {strides = array<i32>} : memref<128x64xbf16, #tpu.memory_space<vmem>>, vector<128x64xbf16>,
    } else {
    }
    return
  }
  func.func @transform_0(%arg0: i32, %arg1: i32, %arg2: i32) -> (i32, i32) {
    %c0_i32 = arith.constant 0 : i32
    return %arg0, %arg2 : i32, i32
  }
  func.func @transform_1(%arg0: i32, %arg1: i32, %arg2: i32) -> (i32, i32) {
    %c0_i32 = arith.constant 0 : i32
    return %arg2, %arg1 : i32, i32
  }
  func.func @transform_2(%arg0: i32, %arg1: i32, %arg2: i32) -> (i32, i32) {
    %c0_i32 = arith.constant 0 : i32
    %c0_i32_0 = arith.constant 0 : i32
    return %c0_i32, %arg1 : i32, i32
  }
  func.func @transform_3(%arg0: i32, %arg1: i32, %arg2: i32) -> (i32, i32) {
    %c0_i32 = arith.constant 0 : i32
    %c0_i32_0 = arith.constant 0 : i32
    return %c0_i32, %arg1 : i32, i32
  }
  func.func @transform_4(%arg0: i32, %arg1: i32, %arg2: i32) -> (i32, i32) {
    %c0_i32 = arith.constant 0 : i32
    return %arg0, %arg1 : i32, i32
  }
  func.func @transform_5(%arg0: i32, %arg1: i32, %arg2: i32) -> (i32, i32) {
    %c0_i32 = arith.constant 0 : i32
    return %arg0, %arg1 : i32, i32
  }
}

module attributes {stable_mosaic.version = 11 : i64} {
  func.func @_matmul_bn_kernel(%arg0: i32, %arg1: i32, %arg2: i32, %arg3: memref<32x576xbf16, #tpu.memory_space<vmem>>, %arg4: memref<576x128xbf16, #tpu.memory_space<vmem>>, %arg5: memref<1x128xf32, #tpu.memory_space<vmem>>, %arg6: memref<1x128xf32, #tpu.memory_space<vmem>>, %arg7: memref<32x128xbf16, #tpu.memory_space<vmem>>, %arg8: memref<32x128xf32, #tpu.memory_space<vmem>>) attributes {dimension_semantics = [#tpu.dimension_semantics<parallel>, #tpu.dimension_semantics<parallel>, #tpu.dimension_semantics<arbitrary>], iteration_bounds = array<i64: 1, 1, 1>, scalar_prefetch = 0 : i64, scratch_operands = 1 : i64, tpu.core_type = #tpu.core_type<tc>, window_params = [{transform_indices = @transform_0, window_bounds = array<i64: 32, 576>}, {transform_indices = @transform_1, window_bounds = array<i64: 576, 128>}, {transform_indices = @transform_2, window_bounds = array<i64: 1, 128>}, {transform_indices = @transform_3, window_bounds = array<i64: 1, 128>}, {transform_indices = @transform_4, window_bounds = array<i64: 32, 128>}]} {
    %c0_i32 = arith.constant 0 : i32
    %0 = arith.cmpi eq, %arg2, %c0_i32 : i32
    %1 = arith.extui %0 : i1 to i32
    %c0_i32_0 = arith.constant 0 : i32
    %2 = arith.cmpi ne, %1, %c0_i32_0 : i32
    scf.if %2 {
      %cst_10 = arith.constant 0.000000e+00 : f32
      %12 = vector.broadcast %cst_10 : f32 to vector<32x128xf32>
      %c0_11 = arith.constant 0 : index
      %c0_12 = arith.constant 0 : index
      %13 = vector.load %arg8[%c0_11, %c0_12] : memref<32x128xf32, #tpu.memory_space<vmem>>, vector<32x128xf32>
      tpu.vector_store %arg8[%c0_11, %c0_12], %12 {strides = array<i32>} : memref<32x128xf32, #tpu.memory_space<vmem>>, vector<32x128xf32>,
    } else {
    }
    %c0 = arith.constant 0 : index
    %c0_1 = arith.constant 0 : index
    %3 = vector.load %arg8[%c0, %c0_1] : memref<32x128xf32, #tpu.memory_space<vmem>>, vector<32x128xf32>
    %c0_2 = arith.constant 0 : index
    %c0_3 = arith.constant 0 : index
    %4 = vector.load %arg3[%c0_2, %c0_3] : memref<32x576xbf16, #tpu.memory_space<vmem>>, vector<32x576xbf16>
    %c0_4 = arith.constant 0 : index
    %c0_5 = arith.constant 0 : index
    %5 = vector.load %arg4[%c0_4, %c0_5] : memref<576x128xbf16, #tpu.memory_space<vmem>>, vector<576x128xbf16>
    %cst = arith.constant dense<0.000000e+00> : vector<32x128xf32>
    %6 = tpu.matmul %4, %5, %cst {dimension_numbers = #tpu.dot_dimension_numbers<[1], [0], [0], [1], [0, 0, 1, 1], [], []>} : vector<32x576xbf16>, vector<576x128xbf16>, vector<32x128xf32> -> vector<32x128xf32>
    %7 = arith.addf %3, %6 : vector<32x128xf32>
    %c0_6 = arith.constant 0 : index
    %c0_7 = arith.constant 0 : index
    %8 = vector.load %arg8[%c0_6, %c0_7] : memref<32x128xf32, #tpu.memory_space<vmem>>, vector<32x128xf32>
    tpu.vector_store %arg8[%c0_6, %c0_7], %7 {strides = array<i32>} : memref<32x128xf32, #tpu.memory_space<vmem>>, vector<32x128xf32>,
    %c0_i32_8 = arith.constant 0 : i32
    %9 = arith.cmpi eq, %arg2, %c0_i32_8 : i32
    %10 = arith.extui %9 : i1 to i32
    %c0_i32_9 = arith.constant 0 : i32
    %11 = arith.cmpi ne, %10, %c0_i32_9 : i32
    scf.if %11 {
      %c0_10 = arith.constant 0 : index
      %c0_11 = arith.constant 0 : index
      %12 = vector.load %arg8[%c0_10, %c0_11] : memref<32x128xf32, #tpu.memory_space<vmem>>, vector<32x128xf32>
      %c0_12 = arith.constant 0 : index
      %c0_13 = arith.constant 0 : index
      %13 = vector.load %arg5[%c0_12, %c0_13] : memref<1x128xf32, #tpu.memory_space<vmem>>, vector<1x128xf32>
      %14 = vector.broadcast %13 : vector<1x128xf32> to vector<32x128xf32>
      %15 = arith.mulf %12, %14 : vector<32x128xf32>
      %c0_14 = arith.constant 0 : index
      %c0_15 = arith.constant 0 : index
      %16 = vector.load %arg6[%c0_14, %c0_15] : memref<1x128xf32, #tpu.memory_space<vmem>>, vector<1x128xf32>
      %17 = vector.broadcast %16 : vector<1x128xf32> to vector<32x128xf32>
      %18 = arith.addf %15, %17 : vector<32x128xf32>
      %cst_16 = arith.constant 0.000000e+00 : f32
      %19 = vector.broadcast %cst_16 : f32 to vector<32x128xf32>
      %20 = arith.maximumf %18, %19 : vector<32x128xf32>
      %21 = arith.truncf %20 : vector<32x128xf32> to vector<32x128xbf16>
      %c0_17 = arith.constant 0 : index
      %c0_18 = arith.constant 0 : index
      %22 = vector.load %arg7[%c0_17, %c0_18] : memref<32x128xbf16, #tpu.memory_space<vmem>>, vector<32x128xbf16>
      tpu.vector_store %arg7[%c0_17, %c0_18], %21 {strides = array<i32>} : memref<32x128xbf16, #tpu.memory_space<vmem>>, vector<32x128xbf16>,
    } else {
    }
    return
  }
  func.func @transform_0(%arg0: i32, %arg1: i32, %arg2: i32) -> (i32, i32) {
    %c0_i32 = arith.constant 0 : i32
    return %arg0, %arg2 : i32, i32
  }
  func.func @transform_1(%arg0: i32, %arg1: i32, %arg2: i32) -> (i32, i32) {
    %c0_i32 = arith.constant 0 : i32
    return %arg2, %arg1 : i32, i32
  }
  func.func @transform_2(%arg0: i32, %arg1: i32, %arg2: i32) -> (i32, i32) {
    %c0_i32 = arith.constant 0 : i32
    %c0_i32_0 = arith.constant 0 : i32
    return %c0_i32, %arg1 : i32, i32
  }
  func.func @transform_3(%arg0: i32, %arg1: i32, %arg2: i32) -> (i32, i32) {
    %c0_i32 = arith.constant 0 : i32
    %c0_i32_0 = arith.constant 0 : i32
    return %c0_i32, %arg1 : i32, i32
  }
  func.func @transform_4(%arg0: i32, %arg1: i32, %arg2: i32) -> (i32, i32) {
    %c0_i32 = arith.constant 0 : i32
    return %arg0, %arg1 : i32, i32
  }
}

module attributes {stable_mosaic.version = 11 : i64} {
  func.func @_matmul_bn_kernel(%arg0: i32, %arg1: i32, %arg2: i32, %arg3: memref<32x384xbf16, #tpu.memory_space<vmem>>, %arg4: memref<384x128xbf16, #tpu.memory_space<vmem>>, %arg5: memref<1x128xf32, #tpu.memory_space<vmem>>, %arg6: memref<1x128xf32, #tpu.memory_space<vmem>>, %arg7: memref<32x128xbf16, #tpu.memory_space<vmem>>, %arg8: memref<32x128xbf16, #tpu.memory_space<vmem>>, %arg9: memref<32x128xf32, #tpu.memory_space<vmem>>) attributes {dimension_semantics = [#tpu.dimension_semantics<parallel>, #tpu.dimension_semantics<parallel>, #tpu.dimension_semantics<arbitrary>], iteration_bounds = array<i64: 1, 1, 3>, scalar_prefetch = 0 : i64, scratch_operands = 1 : i64, tpu.core_type = #tpu.core_type<tc>, window_params = [{transform_indices = @transform_0, window_bounds = array<i64: 32, 384>}, {transform_indices = @transform_1, window_bounds = array<i64: 384, 128>}, {transform_indices = @transform_2, window_bounds = array<i64: 1, 128>}, {transform_indices = @transform_3, window_bounds = array<i64: 1, 128>}, {transform_indices = @transform_4, window_bounds = array<i64: 32, 128>}, {transform_indices = @transform_5, window_bounds = array<i64: 32, 128>}]} {
    %c0_i32 = arith.constant 0 : i32
    %0 = arith.cmpi eq, %arg2, %c0_i32 : i32
    %1 = arith.extui %0 : i1 to i32
    %c0_i32_0 = arith.constant 0 : i32
    %2 = arith.cmpi ne, %1, %c0_i32_0 : i32
    scf.if %2 {
      %cst_9 = arith.constant 0.000000e+00 : f32
      %12 = vector.broadcast %cst_9 : f32 to vector<32x128xf32>
      %c0_10 = arith.constant 0 : index
      %c0_11 = arith.constant 0 : index
      %13 = vector.load %arg9[%c0_10, %c0_11] : memref<32x128xf32, #tpu.memory_space<vmem>>, vector<32x128xf32>
      tpu.vector_store %arg9[%c0_10, %c0_11], %12 {strides = array<i32>} : memref<32x128xf32, #tpu.memory_space<vmem>>, vector<32x128xf32>,
    } else {
    }
    %c0 = arith.constant 0 : index
    %c0_1 = arith.constant 0 : index
    %3 = vector.load %arg9[%c0, %c0_1] : memref<32x128xf32, #tpu.memory_space<vmem>>, vector<32x128xf32>
    %c0_2 = arith.constant 0 : index
    %c0_3 = arith.constant 0 : index
    %4 = vector.load %arg3[%c0_2, %c0_3] : memref<32x384xbf16, #tpu.memory_space<vmem>>, vector<32x384xbf16>
    %c0_4 = arith.constant 0 : index
    %c0_5 = arith.constant 0 : index
    %5 = vector.load %arg4[%c0_4, %c0_5] : memref<384x128xbf16, #tpu.memory_space<vmem>>, vector<384x128xbf16>
    %cst = arith.constant dense<0.000000e+00> : vector<32x128xf32>
    %6 = tpu.matmul %4, %5, %cst {dimension_numbers = #tpu.dot_dimension_numbers<[1], [0], [0], [1], [0, 0, 1, 1], [], []>} : vector<32x384xbf16>, vector<384x128xbf16>, vector<32x128xf32> -> vector<32x128xf32>
    %7 = arith.addf %3, %6 : vector<32x128xf32>
    %c0_6 = arith.constant 0 : index
    %c0_7 = arith.constant 0 : index
    %8 = vector.load %arg9[%c0_6, %c0_7] : memref<32x128xf32, #tpu.memory_space<vmem>>, vector<32x128xf32>
    tpu.vector_store %arg9[%c0_6, %c0_7], %7 {strides = array<i32>} : memref<32x128xf32, #tpu.memory_space<vmem>>, vector<32x128xf32>,
    %c2_i32 = arith.constant 2 : i32
    %9 = arith.cmpi eq, %arg2, %c2_i32 : i32
    %10 = arith.extui %9 : i1 to i32
    %c0_i32_8 = arith.constant 0 : i32
    %11 = arith.cmpi ne, %10, %c0_i32_8 : i32
    scf.if %11 {
      %c0_9 = arith.constant 0 : index
      %c0_10 = arith.constant 0 : index
      %12 = vector.load %arg9[%c0_9, %c0_10] : memref<32x128xf32, #tpu.memory_space<vmem>>, vector<32x128xf32>
      %c0_11 = arith.constant 0 : index
      %c0_12 = arith.constant 0 : index
      %13 = vector.load %arg5[%c0_11, %c0_12] : memref<1x128xf32, #tpu.memory_space<vmem>>, vector<1x128xf32>
      %14 = vector.broadcast %13 : vector<1x128xf32> to vector<32x128xf32>
      %15 = arith.mulf %12, %14 : vector<32x128xf32>
      %c0_13 = arith.constant 0 : index
      %c0_14 = arith.constant 0 : index
      %16 = vector.load %arg6[%c0_13, %c0_14] : memref<1x128xf32, #tpu.memory_space<vmem>>, vector<1x128xf32>
      %17 = vector.broadcast %16 : vector<1x128xf32> to vector<32x128xf32>
      %18 = arith.addf %15, %17 : vector<32x128xf32>
      %c0_15 = arith.constant 0 : index
      %c0_16 = arith.constant 0 : index
      %19 = vector.load %arg7[%c0_15, %c0_16] : memref<32x128xbf16, #tpu.memory_space<vmem>>, vector<32x128xbf16>
      %20 = arith.extf %19 : vector<32x128xbf16> to vector<32x128xf32>
      %21 = arith.addf %18, %20 : vector<32x128xf32>
      %cst_17 = arith.constant 0.000000e+00 : f32
      %22 = vector.broadcast %cst_17 : f32 to vector<32x128xf32>
      %23 = arith.maximumf %21, %22 : vector<32x128xf32>
      %24 = arith.truncf %23 : vector<32x128xf32> to vector<32x128xbf16>
      %c0_18 = arith.constant 0 : index
      %c0_19 = arith.constant 0 : index
      %25 = vector.load %arg8[%c0_18, %c0_19] : memref<32x128xbf16, #tpu.memory_space<vmem>>, vector<32x128xbf16>
      tpu.vector_store %arg8[%c0_18, %c0_19], %24 {strides = array<i32>} : memref<32x128xbf16, #tpu.memory_space<vmem>>, vector<32x128xbf16>,
    } else {
    }
    return
  }
  func.func @transform_0(%arg0: i32, %arg1: i32, %arg2: i32) -> (i32, i32) {
    %c0_i32 = arith.constant 0 : i32
    return %arg0, %arg2 : i32, i32
  }
  func.func @transform_1(%arg0: i32, %arg1: i32, %arg2: i32) -> (i32, i32) {
    %c0_i32 = arith.constant 0 : i32
    return %arg2, %arg1 : i32, i32
  }
  func.func @transform_2(%arg0: i32, %arg1: i32, %arg2: i32) -> (i32, i32) {
    %c0_i32 = arith.constant 0 : i32
    %c0_i32_0 = arith.constant 0 : i32
    return %c0_i32, %arg1 : i32, i32
  }
  func.func @transform_3(%arg0: i32, %arg1: i32, %arg2: i32) -> (i32, i32) {
    %c0_i32 = arith.constant 0 : i32
    %c0_i32_0 = arith.constant 0 : i32
    return %c0_i32, %arg1 : i32, i32
  }
  func.func @transform_4(%arg0: i32, %arg1: i32, %arg2: i32) -> (i32, i32) {
    %c0_i32 = arith.constant 0 : i32
    return %arg0, %arg1 : i32, i32
  }
  func.func @transform_5(%arg0: i32, %arg1: i32, %arg2: i32) -> (i32, i32) {
    %c0_i32 = arith.constant 0 : i32
    return %arg0, %arg1 : i32, i32
  }
}

module attributes {stable_mosaic.version = 11 : i64} {
  func.func @_matmul_bn_kernel(%arg0: i32, %arg1: i32, %arg2: i32, %arg3: memref<32x384xbf16, #tpu.memory_space<vmem>>, %arg4: memref<384x128xbf16, #tpu.memory_space<vmem>>, %arg5: memref<1x128xf32, #tpu.memory_space<vmem>>, %arg6: memref<1x128xf32, #tpu.memory_space<vmem>>, %arg7: memref<32x128xbf16, #tpu.memory_space<vmem>>, %arg8: memref<32x128xf32, #tpu.memory_space<vmem>>) attributes {dimension_semantics = [#tpu.dimension_semantics<parallel>, #tpu.dimension_semantics<parallel>, #tpu.dimension_semantics<arbitrary>], iteration_bounds = array<i64: 1, 1, 3>, scalar_prefetch = 0 : i64, scratch_operands = 1 : i64, tpu.core_type = #tpu.core_type<tc>, window_params = [{transform_indices = @transform_0, window_bounds = array<i64: 32, 384>}, {transform_indices = @transform_1, window_bounds = array<i64: 384, 128>}, {transform_indices = @transform_2, window_bounds = array<i64: 1, 128>}, {transform_indices = @transform_3, window_bounds = array<i64: 1, 128>}, {transform_indices = @transform_4, window_bounds = array<i64: 32, 128>}]} {
    %c0_i32 = arith.constant 0 : i32
    %0 = arith.cmpi eq, %arg2, %c0_i32 : i32
    %1 = arith.extui %0 : i1 to i32
    %c0_i32_0 = arith.constant 0 : i32
    %2 = arith.cmpi ne, %1, %c0_i32_0 : i32
    scf.if %2 {
      %cst_9 = arith.constant 0.000000e+00 : f32
      %12 = vector.broadcast %cst_9 : f32 to vector<32x128xf32>
      %c0_10 = arith.constant 0 : index
      %c0_11 = arith.constant 0 : index
      %13 = vector.load %arg8[%c0_10, %c0_11] : memref<32x128xf32, #tpu.memory_space<vmem>>, vector<32x128xf32>
      tpu.vector_store %arg8[%c0_10, %c0_11], %12 {strides = array<i32>} : memref<32x128xf32, #tpu.memory_space<vmem>>, vector<32x128xf32>,
    } else {
    }
    %c0 = arith.constant 0 : index
    %c0_1 = arith.constant 0 : index
    %3 = vector.load %arg8[%c0, %c0_1] : memref<32x128xf32, #tpu.memory_space<vmem>>, vector<32x128xf32>
    %c0_2 = arith.constant 0 : index
    %c0_3 = arith.constant 0 : index
    %4 = vector.load %arg3[%c0_2, %c0_3] : memref<32x384xbf16, #tpu.memory_space<vmem>>, vector<32x384xbf16>
    %c0_4 = arith.constant 0 : index
    %c0_5 = arith.constant 0 : index
    %5 = vector.load %arg4[%c0_4, %c0_5] : memref<384x128xbf16, #tpu.memory_space<vmem>>, vector<384x128xbf16>
    %cst = arith.constant dense<0.000000e+00> : vector<32x128xf32>
    %6 = tpu.matmul %4, %5, %cst {dimension_numbers = #tpu.dot_dimension_numbers<[1], [0], [0], [1], [0, 0, 1, 1], [], []>} : vector<32x384xbf16>, vector<384x128xbf16>, vector<32x128xf32> -> vector<32x128xf32>
    %7 = arith.addf %3, %6 : vector<32x128xf32>
    %c0_6 = arith.constant 0 : index
    %c0_7 = arith.constant 0 : index
    %8 = vector.load %arg8[%c0_6, %c0_7] : memref<32x128xf32, #tpu.memory_space<vmem>>, vector<32x128xf32>
    tpu.vector_store %arg8[%c0_6, %c0_7], %7 {strides = array<i32>} : memref<32x128xf32, #tpu.memory_space<vmem>>, vector<32x128xf32>,
    %c2_i32 = arith.constant 2 : i32
    %9 = arith.cmpi eq, %arg2, %c2_i32 : i32
    %10 = arith.extui %9 : i1 to i32
    %c0_i32_8 = arith.constant 0 : i32
    %11 = arith.cmpi ne, %10, %c0_i32_8 : i32
    scf.if %11 {
      %c0_9 = arith.constant 0 : index
      %c0_10 = arith.constant 0 : index
      %12 = vector.load %arg8[%c0_9, %c0_10] : memref<32x128xf32, #tpu.memory_space<vmem>>, vector<32x128xf32>
      %c0_11 = arith.constant 0 : index
      %c0_12 = arith.constant 0 : index
      %13 = vector.load %arg5[%c0_11, %c0_12] : memref<1x128xf32, #tpu.memory_space<vmem>>, vector<1x128xf32>
      %14 = vector.broadcast %13 : vector<1x128xf32> to vector<32x128xf32>
      %15 = arith.mulf %12, %14 : vector<32x128xf32>
      %c0_13 = arith.constant 0 : index
      %c0_14 = arith.constant 0 : index
      %16 = vector.load %arg6[%c0_13, %c0_14] : memref<1x128xf32, #tpu.memory_space<vmem>>, vector<1x128xf32>
      %17 = vector.broadcast %16 : vector<1x128xf32> to vector<32x128xf32>
      %18 = arith.addf %15, %17 : vector<32x128xf32>
      %cst_15 = arith.constant 0.000000e+00 : f32
      %19 = vector.broadcast %cst_15 : f32 to vector<32x128xf32>
      %20 = arith.maximumf %18, %19 : vector<32x128xf32>
      %21 = arith.truncf %20 : vector<32x128xf32> to vector<32x128xbf16>
      %c0_16 = arith.constant 0 : index
      %c0_17 = arith.constant 0 : index
      %22 = vector.load %arg7[%c0_16, %c0_17] : memref<32x128xbf16, #tpu.memory_space<vmem>>, vector<32x128xbf16>
      tpu.vector_store %arg7[%c0_16, %c0_17], %21 {strides = array<i32>} : memref<32x128xbf16, #tpu.memory_space<vmem>>, vector<32x128xbf16>,
    } else {
    }
    return
  }
  func.func @transform_0(%arg0: i32, %arg1: i32, %arg2: i32) -> (i32, i32) {
    %c0_i32 = arith.constant 0 : i32
    return %arg0, %arg2 : i32, i32
  }
  func.func @transform_1(%arg0: i32, %arg1: i32, %arg2: i32) -> (i32, i32) {
    %c0_i32 = arith.constant 0 : i32
    return %arg2, %arg1 : i32, i32
  }
  func.func @transform_2(%arg0: i32, %arg1: i32, %arg2: i32) -> (i32, i32) {
    %c0_i32 = arith.constant 0 : i32
    %c0_i32_0 = arith.constant 0 : i32
    return %c0_i32, %arg1 : i32, i32
  }
  func.func @transform_3(%arg0: i32, %arg1: i32, %arg2: i32) -> (i32, i32) {
    %c0_i32 = arith.constant 0 : i32
    %c0_i32_0 = arith.constant 0 : i32
    return %c0_i32, %arg1 : i32, i32
  }
  func.func @transform_4(%arg0: i32, %arg1: i32, %arg2: i32) -> (i32, i32) {
    %c0_i32 = arith.constant 0 : i32
    return %arg0, %arg1 : i32, i32
  }
}

module attributes {stable_mosaic.version = 11 : i64} {
  func.func @_matmul_bn_kernel(%arg0: i32, %arg1: i32, %arg2: i32, %arg3: memref<32x64xbf16, #tpu.memory_space<vmem>>, %arg4: memref<64x128xbf16, #tpu.memory_space<vmem>>, %arg5: memref<1x128xf32, #tpu.memory_space<vmem>>, %arg6: memref<1x128xf32, #tpu.memory_space<vmem>>, %arg7: memref<32x128xbf16, #tpu.memory_space<vmem>>, %arg8: memref<32x128xf32, #tpu.memory_space<vmem>>) attributes {dimension_semantics = [#tpu.dimension_semantics<parallel>, #tpu.dimension_semantics<parallel>, #tpu.dimension_semantics<arbitrary>], iteration_bounds = array<i64: 1, 1, 1>, scalar_prefetch = 0 : i64, scratch_operands = 1 : i64, tpu.core_type = #tpu.core_type<tc>, window_params = [{transform_indices = @transform_0, window_bounds = array<i64: 32, 64>}, {transform_indices = @transform_1, window_bounds = array<i64: 64, 128>}, {transform_indices = @transform_2, window_bounds = array<i64: 1, 128>}, {transform_indices = @transform_3, window_bounds = array<i64: 1, 128>}, {transform_indices = @transform_4, window_bounds = array<i64: 32, 128>}]} {
    %c0_i32 = arith.constant 0 : i32
    %0 = arith.cmpi eq, %arg2, %c0_i32 : i32
    %1 = arith.extui %0 : i1 to i32
    %c0_i32_0 = arith.constant 0 : i32
    %2 = arith.cmpi ne, %1, %c0_i32_0 : i32
    scf.if %2 {
      %cst_10 = arith.constant 0.000000e+00 : f32
      %12 = vector.broadcast %cst_10 : f32 to vector<32x128xf32>
      %c0_11 = arith.constant 0 : index
      %c0_12 = arith.constant 0 : index
      %13 = vector.load %arg8[%c0_11, %c0_12] : memref<32x128xf32, #tpu.memory_space<vmem>>, vector<32x128xf32>
      tpu.vector_store %arg8[%c0_11, %c0_12], %12 {strides = array<i32>} : memref<32x128xf32, #tpu.memory_space<vmem>>, vector<32x128xf32>,
    } else {
    }
    %c0 = arith.constant 0 : index
    %c0_1 = arith.constant 0 : index
    %3 = vector.load %arg8[%c0, %c0_1] : memref<32x128xf32, #tpu.memory_space<vmem>>, vector<32x128xf32>
    %c0_2 = arith.constant 0 : index
    %c0_3 = arith.constant 0 : index
    %4 = vector.load %arg3[%c0_2, %c0_3] : memref<32x64xbf16, #tpu.memory_space<vmem>>, vector<32x64xbf16>
    %c0_4 = arith.constant 0 : index
    %c0_5 = arith.constant 0 : index
    %5 = vector.load %arg4[%c0_4, %c0_5] : memref<64x128xbf16, #tpu.memory_space<vmem>>, vector<64x128xbf16>
    %cst = arith.constant dense<0.000000e+00> : vector<32x128xf32>
    %6 = tpu.matmul %4, %5, %cst {dimension_numbers = #tpu.dot_dimension_numbers<[1], [0], [0], [1], [0, 0, 1, 1], [], []>} : vector<32x64xbf16>, vector<64x128xbf16>, vector<32x128xf32> -> vector<32x128xf32>
    %7 = arith.addf %3, %6 : vector<32x128xf32>
    %c0_6 = arith.constant 0 : index
    %c0_7 = arith.constant 0 : index
    %8 = vector.load %arg8[%c0_6, %c0_7] : memref<32x128xf32, #tpu.memory_space<vmem>>, vector<32x128xf32>
    tpu.vector_store %arg8[%c0_6, %c0_7], %7 {strides = array<i32>} : memref<32x128xf32, #tpu.memory_space<vmem>>, vector<32x128xf32>,
    %c0_i32_8 = arith.constant 0 : i32
    %9 = arith.cmpi eq, %arg2, %c0_i32_8 : i32
    %10 = arith.extui %9 : i1 to i32
    %c0_i32_9 = arith.constant 0 : i32
    %11 = arith.cmpi ne, %10, %c0_i32_9 : i32
    scf.if %11 {
      %c0_10 = arith.constant 0 : index
      %c0_11 = arith.constant 0 : index
      %12 = vector.load %arg8[%c0_10, %c0_11] : memref<32x128xf32, #tpu.memory_space<vmem>>, vector<32x128xf32>
      %c0_12 = arith.constant 0 : index
      %c0_13 = arith.constant 0 : index
      %13 = vector.load %arg5[%c0_12, %c0_13] : memref<1x128xf32, #tpu.memory_space<vmem>>, vector<1x128xf32>
      %14 = vector.broadcast %13 : vector<1x128xf32> to vector<32x128xf32>
      %15 = arith.mulf %12, %14 : vector<32x128xf32>
      %c0_14 = arith.constant 0 : index
      %c0_15 = arith.constant 0 : index
      %16 = vector.load %arg6[%c0_14, %c0_15] : memref<1x128xf32, #tpu.memory_space<vmem>>, vector<1x128xf32>
      %17 = vector.broadcast %16 : vector<1x128xf32> to vector<32x128xf32>
      %18 = arith.addf %15, %17 : vector<32x128xf32>
      %19 = arith.truncf %18 : vector<32x128xf32> to vector<32x128xbf16>
      %c0_16 = arith.constant 0 : index
      %c0_17 = arith.constant 0 : index
      %20 = vector.load %arg7[%c0_16, %c0_17] : memref<32x128xbf16, #tpu.memory_space<vmem>>, vector<32x128xbf16>
      tpu.vector_store %arg7[%c0_16, %c0_17], %19 {strides = array<i32>} : memref<32x128xbf16, #tpu.memory_space<vmem>>, vector<32x128xbf16>,
    } else {
    }
    return
  }
  func.func @transform_0(%arg0: i32, %arg1: i32, %arg2: i32) -> (i32, i32) {
    %c0_i32 = arith.constant 0 : i32
    return %arg0, %arg2 : i32, i32
  }
  func.func @transform_1(%arg0: i32, %arg1: i32, %arg2: i32) -> (i32, i32) {
    %c0_i32 = arith.constant 0 : i32
    return %arg2, %arg1 : i32, i32
  }
  func.func @transform_2(%arg0: i32, %arg1: i32, %arg2: i32) -> (i32, i32) {
    %c0_i32 = arith.constant 0 : i32
    %c0_i32_0 = arith.constant 0 : i32
    return %c0_i32, %arg1 : i32, i32
  }
  func.func @transform_3(%arg0: i32, %arg1: i32, %arg2: i32) -> (i32, i32) {
    %c0_i32 = arith.constant 0 : i32
    %c0_i32_0 = arith.constant 0 : i32
    return %c0_i32, %arg1 : i32, i32
  }
  func.func @transform_4(%arg0: i32, %arg1: i32, %arg2: i32) -> (i32, i32) {
    %c0_i32 = arith.constant 0 : i32
    return %arg0, %arg1 : i32, i32
  }
}

module attributes {stable_mosaic.version = 11 : i64} {
  func.func @_matmul_bn_kernel(%arg0: i32, %arg1: i32, %arg2: i32, %arg3: memref<32x384xbf16, #tpu.memory_space<vmem>>, %arg4: memref<384x128xbf16, #tpu.memory_space<vmem>>, %arg5: memref<1x128xf32, #tpu.memory_space<vmem>>, %arg6: memref<1x128xf32, #tpu.memory_space<vmem>>, %arg7: memref<32x128xbf16, #tpu.memory_space<vmem>>, %arg8: memref<32x128xbf16, #tpu.memory_space<vmem>>, %arg9: memref<32x128xf32, #tpu.memory_space<vmem>>) attributes {dimension_semantics = [#tpu.dimension_semantics<parallel>, #tpu.dimension_semantics<parallel>, #tpu.dimension_semantics<arbitrary>], iteration_bounds = array<i64: 1, 1, 3>, scalar_prefetch = 0 : i64, scratch_operands = 1 : i64, tpu.core_type = #tpu.core_type<tc>, window_params = [{transform_indices = @transform_0, window_bounds = array<i64: 32, 384>}, {transform_indices = @transform_1, window_bounds = array<i64: 384, 128>}, {transform_indices = @transform_2, window_bounds = array<i64: 1, 128>}, {transform_indices = @transform_3, window_bounds = array<i64: 1, 128>}, {transform_indices = @transform_4, window_bounds = array<i64: 32, 128>}, {transform_indices = @transform_5, window_bounds = array<i64: 32, 128>}]} {
    %c0_i32 = arith.constant 0 : i32
    %0 = arith.cmpi eq, %arg2, %c0_i32 : i32
    %1 = arith.extui %0 : i1 to i32
    %c0_i32_0 = arith.constant 0 : i32
    %2 = arith.cmpi ne, %1, %c0_i32_0 : i32
    scf.if %2 {
      %cst_9 = arith.constant 0.000000e+00 : f32
      %12 = vector.broadcast %cst_9 : f32 to vector<32x128xf32>
      %c0_10 = arith.constant 0 : index
      %c0_11 = arith.constant 0 : index
      %13 = vector.load %arg9[%c0_10, %c0_11] : memref<32x128xf32, #tpu.memory_space<vmem>>, vector<32x128xf32>
      tpu.vector_store %arg9[%c0_10, %c0_11], %12 {strides = array<i32>} : memref<32x128xf32, #tpu.memory_space<vmem>>, vector<32x128xf32>,
    } else {
    }
    %c0 = arith.constant 0 : index
    %c0_1 = arith.constant 0 : index
    %3 = vector.load %arg9[%c0, %c0_1] : memref<32x128xf32, #tpu.memory_space<vmem>>, vector<32x128xf32>
    %c0_2 = arith.constant 0 : index
    %c0_3 = arith.constant 0 : index
    %4 = vector.load %arg3[%c0_2, %c0_3] : memref<32x384xbf16, #tpu.memory_space<vmem>>, vector<32x384xbf16>
    %c0_4 = arith.constant 0 : index
    %c0_5 = arith.constant 0 : index
    %5 = vector.load %arg4[%c0_4, %c0_5] : memref<384x128xbf16, #tpu.memory_space<vmem>>, vector<384x128xbf16>
    %cst = arith.constant dense<0.000000e+00> : vector<32x128xf32>
    %6 = tpu.matmul %4, %5, %cst {dimension_numbers = #tpu.dot_dimension_numbers<[1], [0], [0], [1], [0, 0, 1, 1], [], []>} : vector<32x384xbf16>, vector<384x128xbf16>, vector<32x128xf32> -> vector<32x128xf32>
    %7 = arith.addf %3, %6 : vector<32x128xf32>
    %c0_6 = arith.constant 0 : index
    %c0_7 = arith.constant 0 : index
    %8 = vector.load %arg9[%c0_6, %c0_7] : memref<32x128xf32, #tpu.memory_space<vmem>>, vector<32x128xf32>
    tpu.vector_store %arg9[%c0_6, %c0_7], %7 {strides = array<i32>} : memref<32x128xf32, #tpu.memory_space<vmem>>, vector<32x128xf32>,
    %c2_i32 = arith.constant 2 : i32
    %9 = arith.cmpi eq, %arg2, %c2_i32 : i32
    %10 = arith.extui %9 : i1 to i32
    %c0_i32_8 = arith.constant 0 : i32
    %11 = arith.cmpi ne, %10, %c0_i32_8 : i32
    scf.if %11 {
      %c0_9 = arith.constant 0 : index
      %c0_10 = arith.constant 0 : index
      %12 = vector.load %arg9[%c0_9, %c0_10] : memref<32x128xf32, #tpu.memory_space<vmem>>, vector<32x128xf32>
      %c0_11 = arith.constant 0 : index
      %c0_12 = arith.constant 0 : index
      %13 = vector.load %arg5[%c0_11, %c0_12] : memref<1x128xf32, #tpu.memory_space<vmem>>, vector<1x128xf32>
      %14 = vector.broadcast %13 : vector<1x128xf32> to vector<32x128xf32>
      %15 = arith.mulf %12, %14 : vector<32x128xf32>
      %c0_13 = arith.constant 0 : index
      %c0_14 = arith.constant 0 : index
      %16 = vector.load %arg6[%c0_13, %c0_14] : memref<1x128xf32, #tpu.memory_space<vmem>>, vector<1x128xf32>
      %17 = vector.broadcast %16 : vector<1x128xf32> to vector<32x128xf32>
      %18 = arith.addf %15, %17 : vector<32x128xf32>
      %c0_15 = arith.constant 0 : index
      %c0_16 = arith.constant 0 : index
      %19 = vector.load %arg7[%c0_15, %c0_16] : memref<32x128xbf16, #tpu.memory_space<vmem>>, vector<32x128xbf16>
      %20 = arith.extf %19 : vector<32x128xbf16> to vector<32x128xf32>
      %21 = arith.addf %18, %20 : vector<32x128xf32>
      %cst_17 = arith.constant 0.000000e+00 : f32
      %22 = vector.broadcast %cst_17 : f32 to vector<32x128xf32>
      %23 = arith.maximumf %21, %22 : vector<32x128xf32>
      %24 = arith.truncf %23 : vector<32x128xf32> to vector<32x128xbf16>
      %c0_18 = arith.constant 0 : index
      %c0_19 = arith.constant 0 : index
      %25 = vector.load %arg8[%c0_18, %c0_19] : memref<32x128xbf16, #tpu.memory_space<vmem>>, vector<32x128xbf16>
      tpu.vector_store %arg8[%c0_18, %c0_19], %24 {strides = array<i32>} : memref<32x128xbf16, #tpu.memory_space<vmem>>, vector<32x128xbf16>,
    } else {
    }
    return
  }
  func.func @transform_0(%arg0: i32, %arg1: i32, %arg2: i32) -> (i32, i32) {
    %c0_i32 = arith.constant 0 : i32
    return %arg0, %arg2 : i32, i32
  }
  func.func @transform_1(%arg0: i32, %arg1: i32, %arg2: i32) -> (i32, i32) {
    %c0_i32 = arith.constant 0 : i32
    return %arg2, %arg1 : i32, i32
  }
  func.func @transform_2(%arg0: i32, %arg1: i32, %arg2: i32) -> (i32, i32) {
    %c0_i32 = arith.constant 0 : i32
    %c0_i32_0 = arith.constant 0 : i32
    return %c0_i32, %arg1 : i32, i32
  }
  func.func @transform_3(%arg0: i32, %arg1: i32, %arg2: i32) -> (i32, i32) {
    %c0_i32 = arith.constant 0 : i32
    %c0_i32_0 = arith.constant 0 : i32
    return %c0_i32, %arg1 : i32, i32
  }
  func.func @transform_4(%arg0: i32, %arg1: i32, %arg2: i32) -> (i32, i32) {
    %c0_i32 = arith.constant 0 : i32
    return %arg0, %arg1 : i32, i32
  }
  func.func @transform_5(%arg0: i32, %arg1: i32, %arg2: i32) -> (i32, i32) {
    %c0_i32 = arith.constant 0 : i32
    return %arg0, %arg1 : i32, i32
  }
}

module attributes {stable_mosaic.version = 11 : i64} {
  func.func @_matmul_bn_kernel(%arg0: i32, %arg1: i32, %arg2: i32, %arg3: memref<8x384xbf16, #tpu.memory_space<vmem>>, %arg4: memref<384x256xbf16, #tpu.memory_space<vmem>>, %arg5: memref<1x256xf32, #tpu.memory_space<vmem>>, %arg6: memref<1x256xf32, #tpu.memory_space<vmem>>, %arg7: memref<8x256xbf16, #tpu.memory_space<vmem>>, %arg8: memref<8x256xf32, #tpu.memory_space<vmem>>) attributes {dimension_semantics = [#tpu.dimension_semantics<parallel>, #tpu.dimension_semantics<parallel>, #tpu.dimension_semantics<arbitrary>], iteration_bounds = array<i64: 1, 1, 3>, scalar_prefetch = 0 : i64, scratch_operands = 1 : i64, tpu.core_type = #tpu.core_type<tc>, window_params = [{transform_indices = @transform_0, window_bounds = array<i64: 8, 384>}, {transform_indices = @transform_1, window_bounds = array<i64: 384, 256>}, {transform_indices = @transform_2, window_bounds = array<i64: 1, 256>}, {transform_indices = @transform_3, window_bounds = array<i64: 1, 256>}, {transform_indices = @transform_4, window_bounds = array<i64: 8, 256>}]} {
    %c0_i32 = arith.constant 0 : i32
    %0 = arith.cmpi eq, %arg2, %c0_i32 : i32
    %1 = arith.extui %0 : i1 to i32
    %c0_i32_0 = arith.constant 0 : i32
    %2 = arith.cmpi ne, %1, %c0_i32_0 : i32
    scf.if %2 {
      %cst_9 = arith.constant 0.000000e+00 : f32
      %12 = vector.broadcast %cst_9 : f32 to vector<8x256xf32>
      %c0_10 = arith.constant 0 : index
      %c0_11 = arith.constant 0 : index
      %13 = vector.load %arg8[%c0_10, %c0_11] : memref<8x256xf32, #tpu.memory_space<vmem>>, vector<8x256xf32>
      tpu.vector_store %arg8[%c0_10, %c0_11], %12 {strides = array<i32>} : memref<8x256xf32, #tpu.memory_space<vmem>>, vector<8x256xf32>,
    } else {
    }
    %c0 = arith.constant 0 : index
    %c0_1 = arith.constant 0 : index
    %3 = vector.load %arg8[%c0, %c0_1] : memref<8x256xf32, #tpu.memory_space<vmem>>, vector<8x256xf32>
    %c0_2 = arith.constant 0 : index
    %c0_3 = arith.constant 0 : index
    %4 = vector.load %arg3[%c0_2, %c0_3] : memref<8x384xbf16, #tpu.memory_space<vmem>>, vector<8x384xbf16>
    %c0_4 = arith.constant 0 : index
    %c0_5 = arith.constant 0 : index
    %5 = vector.load %arg4[%c0_4, %c0_5] : memref<384x256xbf16, #tpu.memory_space<vmem>>, vector<384x256xbf16>
    %cst = arith.constant dense<0.000000e+00> : vector<8x256xf32>
    %6 = tpu.matmul %4, %5, %cst {dimension_numbers = #tpu.dot_dimension_numbers<[1], [0], [0], [1], [0, 0, 1, 1], [], []>} : vector<8x384xbf16>, vector<384x256xbf16>, vector<8x256xf32> -> vector<8x256xf32>
    %7 = arith.addf %3, %6 : vector<8x256xf32>
    %c0_6 = arith.constant 0 : index
    %c0_7 = arith.constant 0 : index
    %8 = vector.load %arg8[%c0_6, %c0_7] : memref<8x256xf32, #tpu.memory_space<vmem>>, vector<8x256xf32>
    tpu.vector_store %arg8[%c0_6, %c0_7], %7 {strides = array<i32>} : memref<8x256xf32, #tpu.memory_space<vmem>>, vector<8x256xf32>,
    %c2_i32 = arith.constant 2 : i32
    %9 = arith.cmpi eq, %arg2, %c2_i32 : i32
    %10 = arith.extui %9 : i1 to i32
    %c0_i32_8 = arith.constant 0 : i32
    %11 = arith.cmpi ne, %10, %c0_i32_8 : i32
    scf.if %11 {
      %c0_9 = arith.constant 0 : index
      %c0_10 = arith.constant 0 : index
      %12 = vector.load %arg8[%c0_9, %c0_10] : memref<8x256xf32, #tpu.memory_space<vmem>>, vector<8x256xf32>
      %c0_11 = arith.constant 0 : index
      %c0_12 = arith.constant 0 : index
      %13 = vector.load %arg5[%c0_11, %c0_12] : memref<1x256xf32, #tpu.memory_space<vmem>>, vector<1x256xf32>
      %14 = vector.broadcast %13 : vector<1x256xf32> to vector<8x256xf32>
      %15 = arith.mulf %12, %14 : vector<8x256xf32>
      %c0_13 = arith.constant 0 : index
      %c0_14 = arith.constant 0 : index
      %16 = vector.load %arg6[%c0_13, %c0_14] : memref<1x256xf32, #tpu.memory_space<vmem>>, vector<1x256xf32>
      %17 = vector.broadcast %16 : vector<1x256xf32> to vector<8x256xf32>
      %18 = arith.addf %15, %17 : vector<8x256xf32>
      %cst_15 = arith.constant 0.000000e+00 : f32
      %19 = vector.broadcast %cst_15 : f32 to vector<8x256xf32>
      %20 = arith.maximumf %18, %19 : vector<8x256xf32>
      %21 = arith.truncf %20 : vector<8x256xf32> to vector<8x256xbf16>
      %c0_16 = arith.constant 0 : index
      %c0_17 = arith.constant 0 : index
      %22 = vector.load %arg7[%c0_16, %c0_17] : memref<8x256xbf16, #tpu.memory_space<vmem>>, vector<8x256xbf16>
      tpu.vector_store %arg7[%c0_16, %c0_17], %21 {strides = array<i32>} : memref<8x256xbf16, #tpu.memory_space<vmem>>, vector<8x256xbf16>,
    } else {
    }
    return
  }
  func.func @transform_0(%arg0: i32, %arg1: i32, %arg2: i32) -> (i32, i32) {
    %c0_i32 = arith.constant 0 : i32
    return %arg0, %arg2 : i32, i32
  }
  func.func @transform_1(%arg0: i32, %arg1: i32, %arg2: i32) -> (i32, i32) {
    %c0_i32 = arith.constant 0 : i32
    return %arg2, %arg1 : i32, i32
  }
  func.func @transform_2(%arg0: i32, %arg1: i32, %arg2: i32) -> (i32, i32) {
    %c0_i32 = arith.constant 0 : i32
    %c0_i32_0 = arith.constant 0 : i32
    return %c0_i32, %arg1 : i32, i32
  }
  func.func @transform_3(%arg0: i32, %arg1: i32, %arg2: i32) -> (i32, i32) {
    %c0_i32 = arith.constant 0 : i32
    %c0_i32_0 = arith.constant 0 : i32
    return %c0_i32, %arg1 : i32, i32
  }
  func.func @transform_4(%arg0: i32, %arg1: i32, %arg2: i32) -> (i32, i32) {
    %c0_i32 = arith.constant 0 : i32
    return %arg0, %arg1 : i32, i32
  }
}

module attributes {stable_mosaic.version = 11 : i64} {
  func.func @_matmul_bn_kernel(%arg0: i32, %arg1: i32, %arg2: i32, %arg3: memref<8x384xbf16, #tpu.memory_space<vmem>>, %arg4: memref<384x256xbf16, #tpu.memory_space<vmem>>, %arg5: memref<1x256xf32, #tpu.memory_space<vmem>>, %arg6: memref<1x256xf32, #tpu.memory_space<vmem>>, %arg7: memref<8x256xbf16, #tpu.memory_space<vmem>>, %arg8: memref<8x256xbf16, #tpu.memory_space<vmem>>, %arg9: memref<8x256xf32, #tpu.memory_space<vmem>>) attributes {dimension_semantics = [#tpu.dimension_semantics<parallel>, #tpu.dimension_semantics<parallel>, #tpu.dimension_semantics<arbitrary>], iteration_bounds = array<i64: 1, 1, 6>, scalar_prefetch = 0 : i64, scratch_operands = 1 : i64, tpu.core_type = #tpu.core_type<tc>, window_params = [{transform_indices = @transform_0, window_bounds = array<i64: 8, 384>}, {transform_indices = @transform_1, window_bounds = array<i64: 384, 256>}, {transform_indices = @transform_2, window_bounds = array<i64: 1, 256>}, {transform_indices = @transform_3, window_bounds = array<i64: 1, 256>}, {transform_indices = @transform_4, window_bounds = array<i64: 8, 256>}, {transform_indices = @transform_5, window_bounds = array<i64: 8, 256>}]} {
    %c0_i32 = arith.constant 0 : i32
    %0 = arith.cmpi eq, %arg2, %c0_i32 : i32
    %1 = arith.extui %0 : i1 to i32
    %c0_i32_0 = arith.constant 0 : i32
    %2 = arith.cmpi ne, %1, %c0_i32_0 : i32
    scf.if %2 {
      %cst_9 = arith.constant 0.000000e+00 : f32
      %12 = vector.broadcast %cst_9 : f32 to vector<8x256xf32>
      %c0_10 = arith.constant 0 : index
      %c0_11 = arith.constant 0 : index
      %13 = vector.load %arg9[%c0_10, %c0_11] : memref<8x256xf32, #tpu.memory_space<vmem>>, vector<8x256xf32>
      tpu.vector_store %arg9[%c0_10, %c0_11], %12 {strides = array<i32>} : memref<8x256xf32, #tpu.memory_space<vmem>>, vector<8x256xf32>,
    } else {
    }
    %c0 = arith.constant 0 : index
    %c0_1 = arith.constant 0 : index
    %3 = vector.load %arg9[%c0, %c0_1] : memref<8x256xf32, #tpu.memory_space<vmem>>, vector<8x256xf32>
    %c0_2 = arith.constant 0 : index
    %c0_3 = arith.constant 0 : index
    %4 = vector.load %arg3[%c0_2, %c0_3] : memref<8x384xbf16, #tpu.memory_space<vmem>>, vector<8x384xbf16>
    %c0_4 = arith.constant 0 : index
    %c0_5 = arith.constant 0 : index
    %5 = vector.load %arg4[%c0_4, %c0_5] : memref<384x256xbf16, #tpu.memory_space<vmem>>, vector<384x256xbf16>
    %cst = arith.constant dense<0.000000e+00> : vector<8x256xf32>
    %6 = tpu.matmul %4, %5, %cst {dimension_numbers = #tpu.dot_dimension_numbers<[1], [0], [0], [1], [0, 0, 1, 1], [], []>} : vector<8x384xbf16>, vector<384x256xbf16>, vector<8x256xf32> -> vector<8x256xf32>
    %7 = arith.addf %3, %6 : vector<8x256xf32>
    %c0_6 = arith.constant 0 : index
    %c0_7 = arith.constant 0 : index
    %8 = vector.load %arg9[%c0_6, %c0_7] : memref<8x256xf32, #tpu.memory_space<vmem>>, vector<8x256xf32>
    tpu.vector_store %arg9[%c0_6, %c0_7], %7 {strides = array<i32>} : memref<8x256xf32, #tpu.memory_space<vmem>>, vector<8x256xf32>,
    %c5_i32 = arith.constant 5 : i32
    %9 = arith.cmpi eq, %arg2, %c5_i32 : i32
    %10 = arith.extui %9 : i1 to i32
    %c0_i32_8 = arith.constant 0 : i32
    %11 = arith.cmpi ne, %10, %c0_i32_8 : i32
    scf.if %11 {
      %c0_9 = arith.constant 0 : index
      %c0_10 = arith.constant 0 : index
      %12 = vector.load %arg9[%c0_9, %c0_10] : memref<8x256xf32, #tpu.memory_space<vmem>>, vector<8x256xf32>
      %c0_11 = arith.constant 0 : index
      %c0_12 = arith.constant 0 : index
      %13 = vector.load %arg5[%c0_11, %c0_12] : memref<1x256xf32, #tpu.memory_space<vmem>>, vector<1x256xf32>
      %14 = vector.broadcast %13 : vector<1x256xf32> to vector<8x256xf32>
      %15 = arith.mulf %12, %14 : vector<8x256xf32>
      %c0_13 = arith.constant 0 : index
      %c0_14 = arith.constant 0 : index
      %16 = vector.load %arg6[%c0_13, %c0_14] : memref<1x256xf32, #tpu.memory_space<vmem>>, vector<1x256xf32>
      %17 = vector.broadcast %16 : vector<1x256xf32> to vector<8x256xf32>
      %18 = arith.addf %15, %17 : vector<8x256xf32>
      %c0_15 = arith.constant 0 : index
      %c0_16 = arith.constant 0 : index
      %19 = vector.load %arg7[%c0_15, %c0_16] : memref<8x256xbf16, #tpu.memory_space<vmem>>, vector<8x256xbf16>
      %20 = arith.extf %19 : vector<8x256xbf16> to vector<8x256xf32>
      %21 = arith.addf %18, %20 : vector<8x256xf32>
      %cst_17 = arith.constant 0.000000e+00 : f32
      %22 = vector.broadcast %cst_17 : f32 to vector<8x256xf32>
      %23 = arith.maximumf %21, %22 : vector<8x256xf32>
      %24 = arith.truncf %23 : vector<8x256xf32> to vector<8x256xbf16>
      %c0_18 = arith.constant 0 : index
      %c0_19 = arith.constant 0 : index
      %25 = vector.load %arg8[%c0_18, %c0_19] : memref<8x256xbf16, #tpu.memory_space<vmem>>, vector<8x256xbf16>
      tpu.vector_store %arg8[%c0_18, %c0_19], %24 {strides = array<i32>} : memref<8x256xbf16, #tpu.memory_space<vmem>>, vector<8x256xbf16>,
    } else {
    }
    return
  }
  func.func @transform_0(%arg0: i32, %arg1: i32, %arg2: i32) -> (i32, i32) {
    %c0_i32 = arith.constant 0 : i32
    return %arg0, %arg2 : i32, i32
  }
  func.func @transform_1(%arg0: i32, %arg1: i32, %arg2: i32) -> (i32, i32) {
    %c0_i32 = arith.constant 0 : i32
    return %arg2, %arg1 : i32, i32
  }
  func.func @transform_2(%arg0: i32, %arg1: i32, %arg2: i32) -> (i32, i32) {
    %c0_i32 = arith.constant 0 : i32
    %c0_i32_0 = arith.constant 0 : i32
    return %c0_i32, %arg1 : i32, i32
  }
  func.func @transform_3(%arg0: i32, %arg1: i32, %arg2: i32) -> (i32, i32) {
    %c0_i32 = arith.constant 0 : i32
    %c0_i32_0 = arith.constant 0 : i32
    return %c0_i32, %arg1 : i32, i32
  }
  func.func @transform_4(%arg0: i32, %arg1: i32, %arg2: i32) -> (i32, i32) {
    %c0_i32 = arith.constant 0 : i32
    return %arg0, %arg1 : i32, i32
  }
  func.func @transform_5(%arg0: i32, %arg1: i32, %arg2: i32) -> (i32, i32) {
    %c0_i32 = arith.constant 0 : i32
    return %arg0, %arg1 : i32, i32
  }
}

module attributes {stable_mosaic.version = 11 : i64} {
  func.func @_matmul_bn_kernel(%arg0: i32, %arg1: i32, %arg2: i32, %arg3: memref<8x128xbf16, #tpu.memory_space<vmem>>, %arg4: memref<128x256xbf16, #tpu.memory_space<vmem>>, %arg5: memref<1x256xf32, #tpu.memory_space<vmem>>, %arg6: memref<1x256xf32, #tpu.memory_space<vmem>>, %arg7: memref<8x256xbf16, #tpu.memory_space<vmem>>, %arg8: memref<8x256xf32, #tpu.memory_space<vmem>>) attributes {dimension_semantics = [#tpu.dimension_semantics<parallel>, #tpu.dimension_semantics<parallel>, #tpu.dimension_semantics<arbitrary>], iteration_bounds = array<i64: 1, 1, 1>, scalar_prefetch = 0 : i64, scratch_operands = 1 : i64, tpu.core_type = #tpu.core_type<tc>, window_params = [{transform_indices = @transform_0, window_bounds = array<i64: 8, 128>}, {transform_indices = @transform_1, window_bounds = array<i64: 128, 256>}, {transform_indices = @transform_2, window_bounds = array<i64: 1, 256>}, {transform_indices = @transform_3, window_bounds = array<i64: 1, 256>}, {transform_indices = @transform_4, window_bounds = array<i64: 8, 256>}]} {
    %c0_i32 = arith.constant 0 : i32
    %0 = arith.cmpi eq, %arg2, %c0_i32 : i32
    %1 = arith.extui %0 : i1 to i32
    %c0_i32_0 = arith.constant 0 : i32
    %2 = arith.cmpi ne, %1, %c0_i32_0 : i32
    scf.if %2 {
      %cst_10 = arith.constant 0.000000e+00 : f32
      %12 = vector.broadcast %cst_10 : f32 to vector<8x256xf32>
      %c0_11 = arith.constant 0 : index
      %c0_12 = arith.constant 0 : index
      %13 = vector.load %arg8[%c0_11, %c0_12] : memref<8x256xf32, #tpu.memory_space<vmem>>, vector<8x256xf32>
      tpu.vector_store %arg8[%c0_11, %c0_12], %12 {strides = array<i32>} : memref<8x256xf32, #tpu.memory_space<vmem>>, vector<8x256xf32>,
    } else {
    }
    %c0 = arith.constant 0 : index
    %c0_1 = arith.constant 0 : index
    %3 = vector.load %arg8[%c0, %c0_1] : memref<8x256xf32, #tpu.memory_space<vmem>>, vector<8x256xf32>
    %c0_2 = arith.constant 0 : index
    %c0_3 = arith.constant 0 : index
    %4 = vector.load %arg3[%c0_2, %c0_3] : memref<8x128xbf16, #tpu.memory_space<vmem>>, vector<8x128xbf16>
    %c0_4 = arith.constant 0 : index
    %c0_5 = arith.constant 0 : index
    %5 = vector.load %arg4[%c0_4, %c0_5] : memref<128x256xbf16, #tpu.memory_space<vmem>>, vector<128x256xbf16>
    %cst = arith.constant dense<0.000000e+00> : vector<8x256xf32>
    %6 = tpu.matmul %4, %5, %cst {dimension_numbers = #tpu.dot_dimension_numbers<[1], [0], [0], [1], [0, 0, 1, 1], [], []>} : vector<8x128xbf16>, vector<128x256xbf16>, vector<8x256xf32> -> vector<8x256xf32>
    %7 = arith.addf %3, %6 : vector<8x256xf32>
    %c0_6 = arith.constant 0 : index
    %c0_7 = arith.constant 0 : index
    %8 = vector.load %arg8[%c0_6, %c0_7] : memref<8x256xf32, #tpu.memory_space<vmem>>, vector<8x256xf32>
    tpu.vector_store %arg8[%c0_6, %c0_7], %7 {strides = array<i32>} : memref<8x256xf32, #tpu.memory_space<vmem>>, vector<8x256xf32>,
    %c0_i32_8 = arith.constant 0 : i32
    %9 = arith.cmpi eq, %arg2, %c0_i32_8 : i32
    %10 = arith.extui %9 : i1 to i32
    %c0_i32_9 = arith.constant 0 : i32
    %11 = arith.cmpi ne, %10, %c0_i32_9 : i32
    scf.if %11 {
      %c0_10 = arith.constant 0 : index
      %c0_11 = arith.constant 0 : index
      %12 = vector.load %arg8[%c0_10, %c0_11] : memref<8x256xf32, #tpu.memory_space<vmem>>, vector<8x256xf32>
      %c0_12 = arith.constant 0 : index
      %c0_13 = arith.constant 0 : index
      %13 = vector.load %arg5[%c0_12, %c0_13] : memref<1x256xf32, #tpu.memory_space<vmem>>, vector<1x256xf32>
      %14 = vector.broadcast %13 : vector<1x256xf32> to vector<8x256xf32>
      %15 = arith.mulf %12, %14 : vector<8x256xf32>
      %c0_14 = arith.constant 0 : index
      %c0_15 = arith.constant 0 : index
      %16 = vector.load %arg6[%c0_14, %c0_15] : memref<1x256xf32, #tpu.memory_space<vmem>>, vector<1x256xf32>
      %17 = vector.broadcast %16 : vector<1x256xf32> to vector<8x256xf32>
      %18 = arith.addf %15, %17 : vector<8x256xf32>
      %19 = arith.truncf %18 : vector<8x256xf32> to vector<8x256xbf16>
      %c0_16 = arith.constant 0 : index
      %c0_17 = arith.constant 0 : index
      %20 = vector.load %arg7[%c0_16, %c0_17] : memref<8x256xbf16, #tpu.memory_space<vmem>>, vector<8x256xbf16>
      tpu.vector_store %arg7[%c0_16, %c0_17], %19 {strides = array<i32>} : memref<8x256xbf16, #tpu.memory_space<vmem>>, vector<8x256xbf16>,
    } else {
    }
    return
  }
  func.func @transform_0(%arg0: i32, %arg1: i32, %arg2: i32) -> (i32, i32) {
    %c0_i32 = arith.constant 0 : i32
    return %arg0, %arg2 : i32, i32
  }
  func.func @transform_1(%arg0: i32, %arg1: i32, %arg2: i32) -> (i32, i32) {
    %c0_i32 = arith.constant 0 : i32
    return %arg2, %arg1 : i32, i32
  }
  func.func @transform_2(%arg0: i32, %arg1: i32, %arg2: i32) -> (i32, i32) {
    %c0_i32 = arith.constant 0 : i32
    %c0_i32_0 = arith.constant 0 : i32
    return %c0_i32, %arg1 : i32, i32
  }
  func.func @transform_3(%arg0: i32, %arg1: i32, %arg2: i32) -> (i32, i32) {
    %c0_i32 = arith.constant 0 : i32
    %c0_i32_0 = arith.constant 0 : i32
    return %c0_i32, %arg1 : i32, i32
  }
  func.func @transform_4(%arg0: i32, %arg1: i32, %arg2: i32) -> (i32, i32) {
    %c0_i32 = arith.constant 0 : i32
    return %arg0, %arg1 : i32, i32
  }
}

module attributes {stable_mosaic.version = 11 : i64} {
  func.func @_matmul_bn_kernel(%arg0: i32, %arg1: i32, %arg2: i32, %arg3: memref<8x384xbf16, #tpu.memory_space<vmem>>, %arg4: memref<384x256xbf16, #tpu.memory_space<vmem>>, %arg5: memref<1x256xf32, #tpu.memory_space<vmem>>, %arg6: memref<1x256xf32, #tpu.memory_space<vmem>>, %arg7: memref<8x256xbf16, #tpu.memory_space<vmem>>, %arg8: memref<8x256xf32, #tpu.memory_space<vmem>>) attributes {dimension_semantics = [#tpu.dimension_semantics<parallel>, #tpu.dimension_semantics<parallel>, #tpu.dimension_semantics<arbitrary>], iteration_bounds = array<i64: 1, 1, 6>, scalar_prefetch = 0 : i64, scratch_operands = 1 : i64, tpu.core_type = #tpu.core_type<tc>, window_params = [{transform_indices = @transform_0, window_bounds = array<i64: 8, 384>}, {transform_indices = @transform_1, window_bounds = array<i64: 384, 256>}, {transform_indices = @transform_2, window_bounds = array<i64: 1, 256>}, {transform_indices = @transform_3, window_bounds = array<i64: 1, 256>}, {transform_indices = @transform_4, window_bounds = array<i64: 8, 256>}]} {
    %c0_i32 = arith.constant 0 : i32
    %0 = arith.cmpi eq, %arg2, %c0_i32 : i32
    %1 = arith.extui %0 : i1 to i32
    %c0_i32_0 = arith.constant 0 : i32
    %2 = arith.cmpi ne, %1, %c0_i32_0 : i32
    scf.if %2 {
      %cst_9 = arith.constant 0.000000e+00 : f32
      %12 = vector.broadcast %cst_9 : f32 to vector<8x256xf32>
      %c0_10 = arith.constant 0 : index
      %c0_11 = arith.constant 0 : index
      %13 = vector.load %arg8[%c0_10, %c0_11] : memref<8x256xf32, #tpu.memory_space<vmem>>, vector<8x256xf32>
      tpu.vector_store %arg8[%c0_10, %c0_11], %12 {strides = array<i32>} : memref<8x256xf32, #tpu.memory_space<vmem>>, vector<8x256xf32>,
    } else {
    }
    %c0 = arith.constant 0 : index
    %c0_1 = arith.constant 0 : index
    %3 = vector.load %arg8[%c0, %c0_1] : memref<8x256xf32, #tpu.memory_space<vmem>>, vector<8x256xf32>
    %c0_2 = arith.constant 0 : index
    %c0_3 = arith.constant 0 : index
    %4 = vector.load %arg3[%c0_2, %c0_3] : memref<8x384xbf16, #tpu.memory_space<vmem>>, vector<8x384xbf16>
    %c0_4 = arith.constant 0 : index
    %c0_5 = arith.constant 0 : index
    %5 = vector.load %arg4[%c0_4, %c0_5] : memref<384x256xbf16, #tpu.memory_space<vmem>>, vector<384x256xbf16>
    %cst = arith.constant dense<0.000000e+00> : vector<8x256xf32>
    %6 = tpu.matmul %4, %5, %cst {dimension_numbers = #tpu.dot_dimension_numbers<[1], [0], [0], [1], [0, 0, 1, 1], [], []>} : vector<8x384xbf16>, vector<384x256xbf16>, vector<8x256xf32> -> vector<8x256xf32>
    %7 = arith.addf %3, %6 : vector<8x256xf32>
    %c0_6 = arith.constant 0 : index
    %c0_7 = arith.constant 0 : index
    %8 = vector.load %arg8[%c0_6, %c0_7] : memref<8x256xf32, #tpu.memory_space<vmem>>, vector<8x256xf32>
    tpu.vector_store %arg8[%c0_6, %c0_7], %7 {strides = array<i32>} : memref<8x256xf32, #tpu.memory_space<vmem>>, vector<8x256xf32>,
    %c5_i32 = arith.constant 5 : i32
    %9 = arith.cmpi eq, %arg2, %c5_i32 : i32
    %10 = arith.extui %9 : i1 to i32
    %c0_i32_8 = arith.constant 0 : i32
    %11 = arith.cmpi ne, %10, %c0_i32_8 : i32
    scf.if %11 {
      %c0_9 = arith.constant 0 : index
      %c0_10 = arith.constant 0 : index
      %12 = vector.load %arg8[%c0_9, %c0_10] : memref<8x256xf32, #tpu.memory_space<vmem>>, vector<8x256xf32>
      %c0_11 = arith.constant 0 : index
      %c0_12 = arith.constant 0 : index
      %13 = vector.load %arg5[%c0_11, %c0_12] : memref<1x256xf32, #tpu.memory_space<vmem>>, vector<1x256xf32>
      %14 = vector.broadcast %13 : vector<1x256xf32> to vector<8x256xf32>
      %15 = arith.mulf %12, %14 : vector<8x256xf32>
      %c0_13 = arith.constant 0 : index
      %c0_14 = arith.constant 0 : index
      %16 = vector.load %arg6[%c0_13, %c0_14] : memref<1x256xf32, #tpu.memory_space<vmem>>, vector<1x256xf32>
      %17 = vector.broadcast %16 : vector<1x256xf32> to vector<8x256xf32>
      %18 = arith.addf %15, %17 : vector<8x256xf32>
      %cst_15 = arith.constant 0.000000e+00 : f32
      %19 = vector.broadcast %cst_15 : f32 to vector<8x256xf32>
      %20 = arith.maximumf %18, %19 : vector<8x256xf32>
      %21 = arith.truncf %20 : vector<8x256xf32> to vector<8x256xbf16>
      %c0_16 = arith.constant 0 : index
      %c0_17 = arith.constant 0 : index
      %22 = vector.load %arg7[%c0_16, %c0_17] : memref<8x256xbf16, #tpu.memory_space<vmem>>, vector<8x256xbf16>
      tpu.vector_store %arg7[%c0_16, %c0_17], %21 {strides = array<i32>} : memref<8x256xbf16, #tpu.memory_space<vmem>>, vector<8x256xbf16>,
    } else {
    }
    return
  }
  func.func @transform_0(%arg0: i32, %arg1: i32, %arg2: i32) -> (i32, i32) {
    %c0_i32 = arith.constant 0 : i32
    return %arg0, %arg2 : i32, i32
  }
  func.func @transform_1(%arg0: i32, %arg1: i32, %arg2: i32) -> (i32, i32) {
    %c0_i32 = arith.constant 0 : i32
    return %arg2, %arg1 : i32, i32
  }
  func.func @transform_2(%arg0: i32, %arg1: i32, %arg2: i32) -> (i32, i32) {
    %c0_i32 = arith.constant 0 : i32
    %c0_i32_0 = arith.constant 0 : i32
    return %c0_i32, %arg1 : i32, i32
  }
  func.func @transform_3(%arg0: i32, %arg1: i32, %arg2: i32) -> (i32, i32) {
    %c0_i32 = arith.constant 0 : i32
    %c0_i32_0 = arith.constant 0 : i32
    return %c0_i32, %arg1 : i32, i32
  }
  func.func @transform_4(%arg0: i32, %arg1: i32, %arg2: i32) -> (i32, i32) {
    %c0_i32 = arith.constant 0 : i32
    return %arg0, %arg1 : i32, i32
  }
}

module attributes {stable_mosaic.version = 11 : i64} {
  func.func @_matmul_bn_kernel(%arg0: i32, %arg1: i32, %arg2: i32, %arg3: memref<2x384xbf16, #tpu.memory_space<vmem>>, %arg4: memref<384x256xbf16, #tpu.memory_space<vmem>>, %arg5: memref<1x256xf32, #tpu.memory_space<vmem>>, %arg6: memref<1x256xf32, #tpu.memory_space<vmem>>, %arg7: memref<2x256xbf16, #tpu.memory_space<vmem>>, %arg8: memref<2x256xf32, #tpu.memory_space<vmem>>) attributes {dimension_semantics = [#tpu.dimension_semantics<parallel>, #tpu.dimension_semantics<parallel>, #tpu.dimension_semantics<arbitrary>], iteration_bounds = array<i64: 1, 2, 6>, scalar_prefetch = 0 : i64, scratch_operands = 1 : i64, tpu.core_type = #tpu.core_type<tc>, window_params = [{transform_indices = @transform_0, window_bounds = array<i64: 2, 384>}, {transform_indices = @transform_1, window_bounds = array<i64: 384, 256>}, {transform_indices = @transform_2, window_bounds = array<i64: 1, 256>}, {transform_indices = @transform_3, window_bounds = array<i64: 1, 256>}, {transform_indices = @transform_4, window_bounds = array<i64: 2, 256>}]} {
    %c0_i32 = arith.constant 0 : i32
    %0 = arith.cmpi eq, %arg2, %c0_i32 : i32
    %1 = arith.extui %0 : i1 to i32
    %c0_i32_0 = arith.constant 0 : i32
    %2 = arith.cmpi ne, %1, %c0_i32_0 : i32
    scf.if %2 {
      %cst_9 = arith.constant 0.000000e+00 : f32
      %12 = vector.broadcast %cst_9 : f32 to vector<2x256xf32>
      %c0_10 = arith.constant 0 : index
      %c0_11 = arith.constant 0 : index
      %13 = vector.load %arg8[%c0_10, %c0_11] : memref<2x256xf32, #tpu.memory_space<vmem>>, vector<2x256xf32>
      tpu.vector_store %arg8[%c0_10, %c0_11], %12 {strides = array<i32>} : memref<2x256xf32, #tpu.memory_space<vmem>>, vector<2x256xf32>,
    } else {
    }
    %c0 = arith.constant 0 : index
    %c0_1 = arith.constant 0 : index
    %3 = vector.load %arg8[%c0, %c0_1] : memref<2x256xf32, #tpu.memory_space<vmem>>, vector<2x256xf32>
    %c0_2 = arith.constant 0 : index
    %c0_3 = arith.constant 0 : index
    %4 = vector.load %arg3[%c0_2, %c0_3] : memref<2x384xbf16, #tpu.memory_space<vmem>>, vector<2x384xbf16>
    %c0_4 = arith.constant 0 : index
    %c0_5 = arith.constant 0 : index
    %5 = vector.load %arg4[%c0_4, %c0_5] : memref<384x256xbf16, #tpu.memory_space<vmem>>, vector<384x256xbf16>
    %cst = arith.constant dense<0.000000e+00> : vector<2x256xf32>
    %6 = tpu.matmul %4, %5, %cst {dimension_numbers = #tpu.dot_dimension_numbers<[1], [0], [0], [1], [0, 0, 1, 1], [], []>} : vector<2x384xbf16>, vector<384x256xbf16>, vector<2x256xf32> -> vector<2x256xf32>
    %7 = arith.addf %3, %6 : vector<2x256xf32>
    %c0_6 = arith.constant 0 : index
    %c0_7 = arith.constant 0 : index
    %8 = vector.load %arg8[%c0_6, %c0_7] : memref<2x256xf32, #tpu.memory_space<vmem>>, vector<2x256xf32>
    tpu.vector_store %arg8[%c0_6, %c0_7], %7 {strides = array<i32>} : memref<2x256xf32, #tpu.memory_space<vmem>>, vector<2x256xf32>,
    %c5_i32 = arith.constant 5 : i32
    %9 = arith.cmpi eq, %arg2, %c5_i32 : i32
    %10 = arith.extui %9 : i1 to i32
    %c0_i32_8 = arith.constant 0 : i32
    %11 = arith.cmpi ne, %10, %c0_i32_8 : i32
    scf.if %11 {
      %c0_9 = arith.constant 0 : index
      %c0_10 = arith.constant 0 : index
      %12 = vector.load %arg8[%c0_9, %c0_10] : memref<2x256xf32, #tpu.memory_space<vmem>>, vector<2x256xf32>
      %c0_11 = arith.constant 0 : index
      %c0_12 = arith.constant 0 : index
      %13 = vector.load %arg5[%c0_11, %c0_12] : memref<1x256xf32, #tpu.memory_space<vmem>>, vector<1x256xf32>
      %14 = vector.broadcast %13 : vector<1x256xf32> to vector<2x256xf32>
      %15 = arith.mulf %12, %14 : vector<2x256xf32>
      %c0_13 = arith.constant 0 : index
      %c0_14 = arith.constant 0 : index
      %16 = vector.load %arg6[%c0_13, %c0_14] : memref<1x256xf32, #tpu.memory_space<vmem>>, vector<1x256xf32>
      %17 = vector.broadcast %16 : vector<1x256xf32> to vector<2x256xf32>
      %18 = arith.addf %15, %17 : vector<2x256xf32>
      %cst_15 = arith.constant 0.000000e+00 : f32
      %19 = vector.broadcast %cst_15 : f32 to vector<2x256xf32>
      %20 = arith.maximumf %18, %19 : vector<2x256xf32>
      %21 = arith.truncf %20 : vector<2x256xf32> to vector<2x256xbf16>
      %c0_16 = arith.constant 0 : index
      %c0_17 = arith.constant 0 : index
      %22 = vector.load %arg7[%c0_16, %c0_17] : memref<2x256xbf16, #tpu.memory_space<vmem>>, vector<2x256xbf16>
      tpu.vector_store %arg7[%c0_16, %c0_17], %21 {strides = array<i32>} : memref<2x256xbf16, #tpu.memory_space<vmem>>, vector<2x256xbf16>,
    } else {
    }
    return
  }
  func.func @transform_0(%arg0: i32, %arg1: i32, %arg2: i32) -> (i32, i32) {
    %c0_i32 = arith.constant 0 : i32
    return %arg0, %arg2 : i32, i32
  }
  func.func @transform_1(%arg0: i32, %arg1: i32, %arg2: i32) -> (i32, i32) {
    %c0_i32 = arith.constant 0 : i32
    return %arg2, %arg1 : i32, i32
  }
  func.func @transform_2(%arg0: i32, %arg1: i32, %arg2: i32) -> (i32, i32) {
    %c0_i32 = arith.constant 0 : i32
    %c0_i32_0 = arith.constant 0 : i32
    return %c0_i32, %arg1 : i32, i32
  }
  func.func @transform_3(%arg0: i32, %arg1: i32, %arg2: i32) -> (i32, i32) {
    %c0_i32 = arith.constant 0 : i32
    %c0_i32_0 = arith.constant 0 : i32
    return %c0_i32, %arg1 : i32, i32
  }
  func.func @transform_4(%arg0: i32, %arg1: i32, %arg2: i32) -> (i32, i32) {
    %c0_i32 = arith.constant 0 : i32
    return %arg0, %arg1 : i32, i32
  }
}

module attributes {stable_mosaic.version = 11 : i64} {
  func.func @_matmul_bn_kernel(%arg0: i32, %arg1: i32, %arg2: i32, %arg3: memref<2x512xbf16, #tpu.memory_space<vmem>>, %arg4: memref<512x256xbf16, #tpu.memory_space<vmem>>, %arg5: memref<1x256xf32, #tpu.memory_space<vmem>>, %arg6: memref<1x256xf32, #tpu.memory_space<vmem>>, %arg7: memref<2x256xbf16, #tpu.memory_space<vmem>>, %arg8: memref<2x256xbf16, #tpu.memory_space<vmem>>, %arg9: memref<2x256xf32, #tpu.memory_space<vmem>>) attributes {dimension_semantics = [#tpu.dimension_semantics<parallel>, #tpu.dimension_semantics<parallel>, #tpu.dimension_semantics<arbitrary>], iteration_bounds = array<i64: 1, 2, 9>, scalar_prefetch = 0 : i64, scratch_operands = 1 : i64, tpu.core_type = #tpu.core_type<tc>, window_params = [{transform_indices = @transform_0, window_bounds = array<i64: 2, 512>}, {transform_indices = @transform_1, window_bounds = array<i64: 512, 256>}, {transform_indices = @transform_2, window_bounds = array<i64: 1, 256>}, {transform_indices = @transform_3, window_bounds = array<i64: 1, 256>}, {transform_indices = @transform_4, window_bounds = array<i64: 2, 256>}, {transform_indices = @transform_5, window_bounds = array<i64: 2, 256>}]} {
    %c0_i32 = arith.constant 0 : i32
    %0 = arith.cmpi eq, %arg2, %c0_i32 : i32
    %1 = arith.extui %0 : i1 to i32
    %c0_i32_0 = arith.constant 0 : i32
    %2 = arith.cmpi ne, %1, %c0_i32_0 : i32
    scf.if %2 {
      %cst_9 = arith.constant 0.000000e+00 : f32
      %12 = vector.broadcast %cst_9 : f32 to vector<2x256xf32>
      %c0_10 = arith.constant 0 : index
      %c0_11 = arith.constant 0 : index
      %13 = vector.load %arg9[%c0_10, %c0_11] : memref<2x256xf32, #tpu.memory_space<vmem>>, vector<2x256xf32>
      tpu.vector_store %arg9[%c0_10, %c0_11], %12 {strides = array<i32>} : memref<2x256xf32, #tpu.memory_space<vmem>>, vector<2x256xf32>,
    } else {
    }
    %c0 = arith.constant 0 : index
    %c0_1 = arith.constant 0 : index
    %3 = vector.load %arg9[%c0, %c0_1] : memref<2x256xf32, #tpu.memory_space<vmem>>, vector<2x256xf32>
    %c0_2 = arith.constant 0 : index
    %c0_3 = arith.constant 0 : index
    %4 = vector.load %arg3[%c0_2, %c0_3] : memref<2x512xbf16, #tpu.memory_space<vmem>>, vector<2x512xbf16>
    %c0_4 = arith.constant 0 : index
    %c0_5 = arith.constant 0 : index
    %5 = vector.load %arg4[%c0_4, %c0_5] : memref<512x256xbf16, #tpu.memory_space<vmem>>, vector<512x256xbf16>
    %cst = arith.constant dense<0.000000e+00> : vector<2x256xf32>
    %6 = tpu.matmul %4, %5, %cst {dimension_numbers = #tpu.dot_dimension_numbers<[1], [0], [0], [1], [0, 0, 1, 1], [], []>} : vector<2x512xbf16>, vector<512x256xbf16>, vector<2x256xf32> -> vector<2x256xf32>
    %7 = arith.addf %3, %6 : vector<2x256xf32>
    %c0_6 = arith.constant 0 : index
    %c0_7 = arith.constant 0 : index
    %8 = vector.load %arg9[%c0_6, %c0_7] : memref<2x256xf32, #tpu.memory_space<vmem>>, vector<2x256xf32>
    tpu.vector_store %arg9[%c0_6, %c0_7], %7 {strides = array<i32>} : memref<2x256xf32, #tpu.memory_space<vmem>>, vector<2x256xf32>,
    %c8_i32 = arith.constant 8 : i32
    %9 = arith.cmpi eq, %arg2, %c8_i32 : i32
    %10 = arith.extui %9 : i1 to i32
    %c0_i32_8 = arith.constant 0 : i32
    %11 = arith.cmpi ne, %10, %c0_i32_8 : i32
    scf.if %11 {
      %c0_9 = arith.constant 0 : index
      %c0_10 = arith.constant 0 : index
      %12 = vector.load %arg9[%c0_9, %c0_10] : memref<2x256xf32, #tpu.memory_space<vmem>>, vector<2x256xf32>
      %c0_11 = arith.constant 0 : index
      %c0_12 = arith.constant 0 : index
      %13 = vector.load %arg5[%c0_11, %c0_12] : memref<1x256xf32, #tpu.memory_space<vmem>>, vector<1x256xf32>
      %14 = vector.broadcast %13 : vector<1x256xf32> to vector<2x256xf32>
      %15 = arith.mulf %12, %14 : vector<2x256xf32>
      %c0_13 = arith.constant 0 : index
      %c0_14 = arith.constant 0 : index
      %16 = vector.load %arg6[%c0_13, %c0_14] : memref<1x256xf32, #tpu.memory_space<vmem>>, vector<1x256xf32>
      %17 = vector.broadcast %16 : vector<1x256xf32> to vector<2x256xf32>
      %18 = arith.addf %15, %17 : vector<2x256xf32>
      %c0_15 = arith.constant 0 : index
      %c0_16 = arith.constant 0 : index
      %19 = vector.load %arg7[%c0_15, %c0_16] : memref<2x256xbf16, #tpu.memory_space<vmem>>, vector<2x256xbf16>
      %20 = arith.extf %19 : vector<2x256xbf16> to vector<2x256xf32>
      %21 = arith.addf %18, %20 : vector<2x256xf32>
      %cst_17 = arith.constant 0.000000e+00 : f32
      %22 = vector.broadcast %cst_17 : f32 to vector<2x256xf32>
      %23 = arith.maximumf %21, %22 : vector<2x256xf32>
      %24 = arith.truncf %23 : vector<2x256xf32> to vector<2x256xbf16>
      %c0_18 = arith.constant 0 : index
      %c0_19 = arith.constant 0 : index
      %25 = vector.load %arg8[%c0_18, %c0_19] : memref<2x256xbf16, #tpu.memory_space<vmem>>, vector<2x256xbf16>
      tpu.vector_store %arg8[%c0_18, %c0_19], %24 {strides = array<i32>} : memref<2x256xbf16, #tpu.memory_space<vmem>>, vector<2x256xbf16>,
    } else {
    }
    return
  }
  func.func @transform_0(%arg0: i32, %arg1: i32, %arg2: i32) -> (i32, i32) {
    %c0_i32 = arith.constant 0 : i32
    return %arg0, %arg2 : i32, i32
  }
  func.func @transform_1(%arg0: i32, %arg1: i32, %arg2: i32) -> (i32, i32) {
    %c0_i32 = arith.constant 0 : i32
    return %arg2, %arg1 : i32, i32
  }
  func.func @transform_2(%arg0: i32, %arg1: i32, %arg2: i32) -> (i32, i32) {
    %c0_i32 = arith.constant 0 : i32
    %c0_i32_0 = arith.constant 0 : i32
    return %c0_i32, %arg1 : i32, i32
  }
  func.func @transform_3(%arg0: i32, %arg1: i32, %arg2: i32) -> (i32, i32) {
    %c0_i32 = arith.constant 0 : i32
    %c0_i32_0 = arith.constant 0 : i32
    return %c0_i32, %arg1 : i32, i32
  }
  func.func @transform_4(%arg0: i32, %arg1: i32, %arg2: i32) -> (i32, i32) {
    %c0_i32 = arith.constant 0 : i32
    return %arg0, %arg1 : i32, i32
  }
  func.func @transform_5(%arg0: i32, %arg1: i32, %arg2: i32) -> (i32, i32) {
    %c0_i32 = arith.constant 0 : i32
    return %arg0, %arg1 : i32, i32
  }
}

module attributes {stable_mosaic.version = 11 : i64} {
  func.func @_matmul_bn_kernel(%arg0: i32, %arg1: i32, %arg2: i32, %arg3: memref<2x512xbf16, #tpu.memory_space<vmem>>, %arg4: memref<512x256xbf16, #tpu.memory_space<vmem>>, %arg5: memref<1x256xf32, #tpu.memory_space<vmem>>, %arg6: memref<1x256xf32, #tpu.memory_space<vmem>>, %arg7: memref<2x256xbf16, #tpu.memory_space<vmem>>, %arg8: memref<2x256xf32, #tpu.memory_space<vmem>>) attributes {dimension_semantics = [#tpu.dimension_semantics<parallel>, #tpu.dimension_semantics<parallel>, #tpu.dimension_semantics<arbitrary>], iteration_bounds = array<i64: 1, 2, 9>, scalar_prefetch = 0 : i64, scratch_operands = 1 : i64, tpu.core_type = #tpu.core_type<tc>, window_params = [{transform_indices = @transform_0, window_bounds = array<i64: 2, 512>}, {transform_indices = @transform_1, window_bounds = array<i64: 512, 256>}, {transform_indices = @transform_2, window_bounds = array<i64: 1, 256>}, {transform_indices = @transform_3, window_bounds = array<i64: 1, 256>}, {transform_indices = @transform_4, window_bounds = array<i64: 2, 256>}]} {
    %c0_i32 = arith.constant 0 : i32
    %0 = arith.cmpi eq, %arg2, %c0_i32 : i32
    %1 = arith.extui %0 : i1 to i32
    %c0_i32_0 = arith.constant 0 : i32
    %2 = arith.cmpi ne, %1, %c0_i32_0 : i32
    scf.if %2 {
      %cst_9 = arith.constant 0.000000e+00 : f32
      %12 = vector.broadcast %cst_9 : f32 to vector<2x256xf32>
      %c0_10 = arith.constant 0 : index
      %c0_11 = arith.constant 0 : index
      %13 = vector.load %arg8[%c0_10, %c0_11] : memref<2x256xf32, #tpu.memory_space<vmem>>, vector<2x256xf32>
      tpu.vector_store %arg8[%c0_10, %c0_11], %12 {strides = array<i32>} : memref<2x256xf32, #tpu.memory_space<vmem>>, vector<2x256xf32>,
    } else {
    }
    %c0 = arith.constant 0 : index
    %c0_1 = arith.constant 0 : index
    %3 = vector.load %arg8[%c0, %c0_1] : memref<2x256xf32, #tpu.memory_space<vmem>>, vector<2x256xf32>
    %c0_2 = arith.constant 0 : index
    %c0_3 = arith.constant 0 : index
    %4 = vector.load %arg3[%c0_2, %c0_3] : memref<2x512xbf16, #tpu.memory_space<vmem>>, vector<2x512xbf16>
    %c0_4 = arith.constant 0 : index
    %c0_5 = arith.constant 0 : index
    %5 = vector.load %arg4[%c0_4, %c0_5] : memref<512x256xbf16, #tpu.memory_space<vmem>>, vector<512x256xbf16>
    %cst = arith.constant dense<0.000000e+00> : vector<2x256xf32>
    %6 = tpu.matmul %4, %5, %cst {dimension_numbers = #tpu.dot_dimension_numbers<[1], [0], [0], [1], [0, 0, 1, 1], [], []>} : vector<2x512xbf16>, vector<512x256xbf16>, vector<2x256xf32> -> vector<2x256xf32>
    %7 = arith.addf %3, %6 : vector<2x256xf32>
    %c0_6 = arith.constant 0 : index
    %c0_7 = arith.constant 0 : index
    %8 = vector.load %arg8[%c0_6, %c0_7] : memref<2x256xf32, #tpu.memory_space<vmem>>, vector<2x256xf32>
    tpu.vector_store %arg8[%c0_6, %c0_7], %7 {strides = array<i32>} : memref<2x256xf32, #tpu.memory_space<vmem>>, vector<2x256xf32>,
    %c8_i32 = arith.constant 8 : i32
    %9 = arith.cmpi eq, %arg2, %c8_i32 : i32
    %10 = arith.extui %9 : i1 to i32
    %c0_i32_8 = arith.constant 0 : i32
    %11 = arith.cmpi ne, %10, %c0_i32_8 : i32
    scf.if %11 {
      %c0_9 = arith.constant 0 : index
      %c0_10 = arith.constant 0 : index
      %12 = vector.load %arg8[%c0_9, %c0_10] : memref<2x256xf32, #tpu.memory_space<vmem>>, vector<2x256xf32>
      %c0_11 = arith.constant 0 : index
      %c0_12 = arith.constant 0 : index
      %13 = vector.load %arg5[%c0_11, %c0_12] : memref<1x256xf32, #tpu.memory_space<vmem>>, vector<1x256xf32>
      %14 = vector.broadcast %13 : vector<1x256xf32> to vector<2x256xf32>
      %15 = arith.mulf %12, %14 : vector<2x256xf32>
      %c0_13 = arith.constant 0 : index
      %c0_14 = arith.constant 0 : index
      %16 = vector.load %arg6[%c0_13, %c0_14] : memref<1x256xf32, #tpu.memory_space<vmem>>, vector<1x256xf32>
      %17 = vector.broadcast %16 : vector<1x256xf32> to vector<2x256xf32>
      %18 = arith.addf %15, %17 : vector<2x256xf32>
      %cst_15 = arith.constant 0.000000e+00 : f32
      %19 = vector.broadcast %cst_15 : f32 to vector<2x256xf32>
      %20 = arith.maximumf %18, %19 : vector<2x256xf32>
      %21 = arith.truncf %20 : vector<2x256xf32> to vector<2x256xbf16>
      %c0_16 = arith.constant 0 : index
      %c0_17 = arith.constant 0 : index
      %22 = vector.load %arg7[%c0_16, %c0_17] : memref<2x256xbf16, #tpu.memory_space<vmem>>, vector<2x256xbf16>
      tpu.vector_store %arg7[%c0_16, %c0_17], %21 {strides = array<i32>} : memref<2x256xbf16, #tpu.memory_space<vmem>>, vector<2x256xbf16>,
    } else {
    }
    return
  }
  func.func @transform_0(%arg0: i32, %arg1: i32, %arg2: i32) -> (i32, i32) {
    %c0_i32 = arith.constant 0 : i32
    return %arg0, %arg2 : i32, i32
  }
  func.func @transform_1(%arg0: i32, %arg1: i32, %arg2: i32) -> (i32, i32) {
    %c0_i32 = arith.constant 0 : i32
    return %arg2, %arg1 : i32, i32
  }
  func.func @transform_2(%arg0: i32, %arg1: i32, %arg2: i32) -> (i32, i32) {
    %c0_i32 = arith.constant 0 : i32
    %c0_i32_0 = arith.constant 0 : i32
    return %c0_i32, %arg1 : i32, i32
  }
  func.func @transform_3(%arg0: i32, %arg1: i32, %arg2: i32) -> (i32, i32) {
    %c0_i32 = arith.constant 0 : i32
    %c0_i32_0 = arith.constant 0 : i32
    return %c0_i32, %arg1 : i32, i32
  }
  func.func @transform_4(%arg0: i32, %arg1: i32, %arg2: i32) -> (i32, i32) {
    %c0_i32 = arith.constant 0 : i32
    return %arg0, %arg1 : i32, i32
  }
}

module attributes {stable_mosaic.version = 11 : i64} {
  func.func @_matmul_bn_kernel(%arg0: i32, %arg1: i32, %arg2: i32, %arg3: memref<2x256xbf16, #tpu.memory_space<vmem>>, %arg4: memref<256x256xbf16, #tpu.memory_space<vmem>>, %arg5: memref<1x256xf32, #tpu.memory_space<vmem>>, %arg6: memref<1x256xf32, #tpu.memory_space<vmem>>, %arg7: memref<2x256xbf16, #tpu.memory_space<vmem>>, %arg8: memref<2x256xf32, #tpu.memory_space<vmem>>) attributes {dimension_semantics = [#tpu.dimension_semantics<parallel>, #tpu.dimension_semantics<parallel>, #tpu.dimension_semantics<arbitrary>], iteration_bounds = array<i64: 1, 2, 1>, scalar_prefetch = 0 : i64, scratch_operands = 1 : i64, tpu.core_type = #tpu.core_type<tc>, window_params = [{transform_indices = @transform_0, window_bounds = array<i64: 2, 256>}, {transform_indices = @transform_1, window_bounds = array<i64: 256, 256>}, {transform_indices = @transform_2, window_bounds = array<i64: 1, 256>}, {transform_indices = @transform_3, window_bounds = array<i64: 1, 256>}, {transform_indices = @transform_4, window_bounds = array<i64: 2, 256>}]} {
    %c0_i32 = arith.constant 0 : i32
    %0 = arith.cmpi eq, %arg2, %c0_i32 : i32
    %1 = arith.extui %0 : i1 to i32
    %c0_i32_0 = arith.constant 0 : i32
    %2 = arith.cmpi ne, %1, %c0_i32_0 : i32
    scf.if %2 {
      %cst_10 = arith.constant 0.000000e+00 : f32
      %12 = vector.broadcast %cst_10 : f32 to vector<2x256xf32>
      %c0_11 = arith.constant 0 : index
      %c0_12 = arith.constant 0 : index
      %13 = vector.load %arg8[%c0_11, %c0_12] : memref<2x256xf32, #tpu.memory_space<vmem>>, vector<2x256xf32>
      tpu.vector_store %arg8[%c0_11, %c0_12], %12 {strides = array<i32>} : memref<2x256xf32, #tpu.memory_space<vmem>>, vector<2x256xf32>,
    } else {
    }
    %c0 = arith.constant 0 : index
    %c0_1 = arith.constant 0 : index
    %3 = vector.load %arg8[%c0, %c0_1] : memref<2x256xf32, #tpu.memory_space<vmem>>, vector<2x256xf32>
    %c0_2 = arith.constant 0 : index
    %c0_3 = arith.constant 0 : index
    %4 = vector.load %arg3[%c0_2, %c0_3] : memref<2x256xbf16, #tpu.memory_space<vmem>>, vector<2x256xbf16>
    %c0_4 = arith.constant 0 : index
    %c0_5 = arith.constant 0 : index
    %5 = vector.load %arg4[%c0_4, %c0_5] : memref<256x256xbf16, #tpu.memory_space<vmem>>, vector<256x256xbf16>
    %cst = arith.constant dense<0.000000e+00> : vector<2x256xf32>
    %6 = tpu.matmul %4, %5, %cst {dimension_numbers = #tpu.dot_dimension_numbers<[1], [0], [0], [1], [0, 0, 1, 1], [], []>} : vector<2x256xbf16>, vector<256x256xbf16>, vector<2x256xf32> -> vector<2x256xf32>
    %7 = arith.addf %3, %6 : vector<2x256xf32>
    %c0_6 = arith.constant 0 : index
    %c0_7 = arith.constant 0 : index
    %8 = vector.load %arg8[%c0_6, %c0_7] : memref<2x256xf32, #tpu.memory_space<vmem>>, vector<2x256xf32>
    tpu.vector_store %arg8[%c0_6, %c0_7], %7 {strides = array<i32>} : memref<2x256xf32, #tpu.memory_space<vmem>>, vector<2x256xf32>,
    %c0_i32_8 = arith.constant 0 : i32
    %9 = arith.cmpi eq, %arg2, %c0_i32_8 : i32
    %10 = arith.extui %9 : i1 to i32
    %c0_i32_9 = arith.constant 0 : i32
    %11 = arith.cmpi ne, %10, %c0_i32_9 : i32
    scf.if %11 {
      %c0_10 = arith.constant 0 : index
      %c0_11 = arith.constant 0 : index
      %12 = vector.load %arg8[%c0_10, %c0_11] : memref<2x256xf32, #tpu.memory_space<vmem>>, vector<2x256xf32>
      %c0_12 = arith.constant 0 : index
      %c0_13 = arith.constant 0 : index
      %13 = vector.load %arg5[%c0_12, %c0_13] : memref<1x256xf32, #tpu.memory_space<vmem>>, vector<1x256xf32>
      %14 = vector.broadcast %13 : vector<1x256xf32> to vector<2x256xf32>
      %15 = arith.mulf %12, %14 : vector<2x256xf32>
      %c0_14 = arith.constant 0 : index
      %c0_15 = arith.constant 0 : index
      %16 = vector.load %arg6[%c0_14, %c0_15] : memref<1x256xf32, #tpu.memory_space<vmem>>, vector<1x256xf32>
      %17 = vector.broadcast %16 : vector<1x256xf32> to vector<2x256xf32>
      %18 = arith.addf %15, %17 : vector<2x256xf32>
      %19 = arith.truncf %18 : vector<2x256xf32> to vector<2x256xbf16>
      %c0_16 = arith.constant 0 : index
      %c0_17 = arith.constant 0 : index
      %20 = vector.load %arg7[%c0_16, %c0_17] : memref<2x256xbf16, #tpu.memory_space<vmem>>, vector<2x256xbf16>
      tpu.vector_store %arg7[%c0_16, %c0_17], %19 {strides = array<i32>} : memref<2x256xbf16, #tpu.memory_space<vmem>>, vector<2x256xbf16>,
    } else {
    }
    return
  }
  func.func @transform_0(%arg0: i32, %arg1: i32, %arg2: i32) -> (i32, i32) {
    %c0_i32 = arith.constant 0 : i32
    return %arg0, %arg2 : i32, i32
  }
  func.func @transform_1(%arg0: i32, %arg1: i32, %arg2: i32) -> (i32, i32) {
    %c0_i32 = arith.constant 0 : i32
    return %arg2, %arg1 : i32, i32
  }
  func.func @transform_2(%arg0: i32, %arg1: i32, %arg2: i32) -> (i32, i32) {
    %c0_i32 = arith.constant 0 : i32
    %c0_i32_0 = arith.constant 0 : i32
    return %c0_i32, %arg1 : i32, i32
  }
  func.func @transform_3(%arg0: i32, %arg1: i32, %arg2: i32) -> (i32, i32) {
    %c0_i32 = arith.constant 0 : i32
    %c0_i32_0 = arith.constant 0 : i32
    return %c0_i32, %arg1 : i32, i32
  }
  func.func @transform_4(%arg0: i32, %arg1: i32, %arg2: i32) -> (i32, i32) {
    %c0_i32 = arith.constant 0 : i32
    return %arg0, %arg1 : i32, i32
  }
}

module attributes {stable_mosaic.version = 11 : i64} {
  func.func @_matmul_bn_kernel(%arg0: i32, %arg1: i32, %arg2: i32, %arg3: memref<2x512xbf16, #tpu.memory_space<vmem>>, %arg4: memref<512x2xbf16, #tpu.memory_space<vmem>>, %arg5: memref<1x2xf32, #tpu.memory_space<vmem>>, %arg6: memref<1x2xf32, #tpu.memory_space<vmem>>, %arg7: memref<2x2xf32, #tpu.memory_space<vmem>>, %arg8: memref<2x2xf32, #tpu.memory_space<vmem>>) attributes {dimension_semantics = [#tpu.dimension_semantics<parallel>, #tpu.dimension_semantics<parallel>, #tpu.dimension_semantics<arbitrary>], iteration_bounds = array<i64: 1, 1, 1>, scalar_prefetch = 0 : i64, scratch_operands = 1 : i64, tpu.core_type = #tpu.core_type<tc>, window_params = [{transform_indices = @transform_0, window_bounds = array<i64: 2, 512>}, {transform_indices = @transform_1, window_bounds = array<i64: 512, 2>}, {transform_indices = @transform_2, window_bounds = array<i64: 1, 2>}, {transform_indices = @transform_3, window_bounds = array<i64: 1, 2>}, {transform_indices = @transform_4, window_bounds = array<i64: 2, 2>}]} {
    %c0_i32 = arith.constant 0 : i32
    %0 = arith.cmpi eq, %arg2, %c0_i32 : i32
    %1 = arith.extui %0 : i1 to i32
    %c0_i32_0 = arith.constant 0 : i32
    %2 = arith.cmpi ne, %1, %c0_i32_0 : i32
    scf.if %2 {
      %cst_10 = arith.constant 0.000000e+00 : f32
      %12 = vector.broadcast %cst_10 : f32 to vector<2x2xf32>
      %c0_11 = arith.constant 0 : index
      %c0_12 = arith.constant 0 : index
      %13 = vector.load %arg8[%c0_11, %c0_12] : memref<2x2xf32, #tpu.memory_space<vmem>>, vector<2x2xf32>
      tpu.vector_store %arg8[%c0_11, %c0_12], %12 {strides = array<i32>} : memref<2x2xf32, #tpu.memory_space<vmem>>, vector<2x2xf32>,
    } else {
    }
    %c0 = arith.constant 0 : index
    %c0_1 = arith.constant 0 : index
    %3 = vector.load %arg8[%c0, %c0_1] : memref<2x2xf32, #tpu.memory_space<vmem>>, vector<2x2xf32>
    %c0_2 = arith.constant 0 : index
    %c0_3 = arith.constant 0 : index
    %4 = vector.load %arg3[%c0_2, %c0_3] : memref<2x512xbf16, #tpu.memory_space<vmem>>, vector<2x512xbf16>
    %c0_4 = arith.constant 0 : index
    %c0_5 = arith.constant 0 : index
    %5 = vector.load %arg4[%c0_4, %c0_5] : memref<512x2xbf16, #tpu.memory_space<vmem>>, vector<512x2xbf16>
    %cst = arith.constant dense<0.000000e+00> : vector<2x2xf32>
    %6 = tpu.matmul %4, %5, %cst {dimension_numbers = #tpu.dot_dimension_numbers<[1], [0], [0], [1], [0, 0, 1, 1], [], []>} : vector<2x512xbf16>, vector<512x2xbf16>, vector<2x2xf32> -> vector<2x2xf32>
    %7 = arith.addf %3, %6 : vector<2x2xf32>
    %c0_6 = arith.constant 0 : index
    %c0_7 = arith.constant 0 : index
    %8 = vector.load %arg8[%c0_6, %c0_7] : memref<2x2xf32, #tpu.memory_space<vmem>>, vector<2x2xf32>
    tpu.vector_store %arg8[%c0_6, %c0_7], %7 {strides = array<i32>} : memref<2x2xf32, #tpu.memory_space<vmem>>, vector<2x2xf32>,
    %c0_i32_8 = arith.constant 0 : i32
    %9 = arith.cmpi eq, %arg2, %c0_i32_8 : i32
    %10 = arith.extui %9 : i1 to i32
    %c0_i32_9 = arith.constant 0 : i32
    %11 = arith.cmpi ne, %10, %c0_i32_9 : i32
    scf.if %11 {
      %c0_10 = arith.constant 0 : index
      %c0_11 = arith.constant 0 : index
      %12 = vector.load %arg8[%c0_10, %c0_11] : memref<2x2xf32, #tpu.memory_space<vmem>>, vector<2x2xf32>
      %c0_12 = arith.constant 0 : index
      %c0_13 = arith.constant 0 : index
      %13 = vector.load %arg5[%c0_12, %c0_13] : memref<1x2xf32, #tpu.memory_space<vmem>>, vector<1x2xf32>
      %14 = vector.broadcast %13 : vector<1x2xf32> to vector<2x2xf32>
      %15 = arith.mulf %12, %14 : vector<2x2xf32>
      %c0_14 = arith.constant 0 : index
      %c0_15 = arith.constant 0 : index
      %16 = vector.load %arg6[%c0_14, %c0_15] : memref<1x2xf32, #tpu.memory_space<vmem>>, vector<1x2xf32>
      %17 = vector.broadcast %16 : vector<1x2xf32> to vector<2x2xf32>
      %18 = arith.addf %15, %17 : vector<2x2xf32>
      %c0_16 = arith.constant 0 : index
      %c0_17 = arith.constant 0 : index
      %19 = vector.load %arg7[%c0_16, %c0_17] : memref<2x2xf32, #tpu.memory_space<vmem>>, vector<2x2xf32>
      tpu.vector_store %arg7[%c0_16, %c0_17], %18 {strides = array<i32>} : memref<2x2xf32, #tpu.memory_space<vmem>>, vector<2x2xf32>,
    } else {
    }
    return
  }
  func.func @transform_0(%arg0: i32, %arg1: i32, %arg2: i32) -> (i32, i32) {
    %c0_i32 = arith.constant 0 : i32
    return %arg0, %arg2 : i32, i32
  }
  func.func @transform_1(%arg0: i32, %arg1: i32, %arg2: i32) -> (i32, i32) {
    %c0_i32 = arith.constant 0 : i32
    return %arg2, %arg1 : i32, i32
  }
  func.func @transform_2(%arg0: i32, %arg1: i32, %arg2: i32) -> (i32, i32) {
    %c0_i32 = arith.constant 0 : i32
    %c0_i32_0 = arith.constant 0 : i32
    return %c0_i32, %arg1 : i32, i32
  }
  func.func @transform_3(%arg0: i32, %arg1: i32, %arg2: i32) -> (i32, i32) {
    %c0_i32 = arith.constant 0 : i32
    %c0_i32_0 = arith.constant 0 : i32
    return %c0_i32, %arg1 : i32, i32
  }
  func.func @transform_4(%arg0: i32, %arg1: i32, %arg2: i32) -> (i32, i32) {
    %c0_i32 = arith.constant 0 : i32
    return %arg0, %arg1 : i32, i32
  }
}

</mosaic_0001>

<bundles_post_ra>
// kernel: pothole_detector_forward.22
= control target key start
LH: loop header
LB: loop body
LE: loop exit
PB: predicated region body
PF: predicated region fallthrough
CT: control target
= control target key end

     0   :  { %s1641_s15 = smov 0   ;;  %s1643_s16 = smov 0   ;;  %s1984_s0 = inlined_call_operand.vmem [shape: bf16[512,147], index: 0, kind: input, shape index: {}]   ;;  %s1985_s1 = inlined_call_operand.vmem [shape: bf16[147,64], index: 1, kind: input, shape index: {}]   ;;  %s1986_s2 = inlined_call_operand.vmem [shape: f32[1,64], index: 2, kind: input, shape index: {}]   ;;  %s1987_s3 = inlined_call_operand.vmem [shape: f32[1,64], index: 3, kind: input, shape index: {}]   ;;  %s1988_s4 = inlined_call_operand.vmem [shape: bf16[512,64], index: 4, kind: output, shape index: {}]  }
   0x1   :  { %s1645_s17 = smov 0  }
   0x2 LB: > { %s33_s18 = sadd.s32 1, %s1607_s16  ;;  %p1351_p0 = scmp.ge.s32.totalorder %s1611_s17, 1  ;;  %s1611_s17 = sphi %s1645_s17, %s14_s17   ;;  %s1607_s16 = sphi %s1643_s16, %s1990_s16   ;;  %s1603_s15 = sphi %s1641_s15, %s1989_s15  }
   0x3   : > { %p35_p1 = scmp.ge.s32.totalorder %s33_s18, 2  ;;  %p224_p2 = scmp.lt.s32.totalorder %s1611_s17, 3 }
   0x5   : > { %s1992_s18 = smov (%p35_p1, %s33_s18), 0  ;;  %p225_p3 = pnand %p1351_p0, %p224_p2 }
   0x6   : > { %v1531_v0 = vld [vmem:[%s1985_s1] sm:$0xff] (!%p225_p3)   ;;  %v1613_v1 = vmov (!%p225_p3), 0   ;;  %v1532_v2 = vld [vmem:[%s1985_s1 + $0x8] sm:$0xff] (!%p225_p3)   ;;  %v1533_v3 = vld [vmem:[%s1985_s1 + $0x10] sm:$0xff] (!%p225_p3)   ;;  %s1352_s25 = sshll.u32 (!%p225_p3), %s1603_s15, 5  ;;  %vm313_vm0 = vcmask (!%p225_p3), 523264  }
   0x7   : > { %228 = sbr.rel (%p225_p3) target bundleno = 338 (0x152), region = 36  ;;  %686 = vmatprep.subr.bf16.mxu0 (!%p225_p3), %v1613_v1  ;;  %1484 = vmatprep.subr.bf16.mxu1 (!%p225_p3), %v1613_v1  ;;  %p274_p4 = scmp.lt.s32.totalorder (!%p225_p3), %s1352_s25, 63  ;;  %v1534_v4 = vld [vmem:[%s1985_s1 + $0x18] sm:$0xff] (!%p225_p3)   ;;  %v1614_v5 = vmov (!%p225_p3), 0.0   ;;  %v1535_v6 = vld [vmem:[%s1985_s1 + $0x20] sm:$0xff] (!%p225_p3)   ;;  %vm630_vm1 = vcmask (!%p225_p3), 154624  }
   0x8   : > { %687 = vmatpush1.bf16.msra.mxu0 (!%p225_p3), %v1531_v0  ;;  %1494 = vmatpush1.bf16.msra.mxu1 (!%p225_p3), %v1531_v0  ;;  %314 = vst.msk [vmem:[#allocation2] sm:$0xff] (!%p225_p3), %vm313_vm0, %v1614_v5  ;;  %315 = vst.msk [vmem:[#allocation2 + $0x8] sm:$0xff] (!%p225_p3), %vm313_vm0, %v1614_v5  ;;  %v1536_v9 = vld [vmem:[%s1985_s1 + $0x28] sm:$0xff] (!%p225_p3)   ;;  %v1537_v10 = vld [vmem:[%s1985_s1 + $0x30] sm:$0xff] (!%p225_p3)   ;;  %vm679_vm2 = vcmask (!%p225_p3), 1040384   ;;  %vm680_vm3 = vcmask (!%p225_p3), 1041408  }
   0x9   : > { %688 = vmatprep.subr.bf16.mxu0 (!%p225_p3), %v1613_v1  ;;  %1485 = vmatprep.subr.bf16.mxu1 (!%p225_p3), %v1613_v1  ;;  %316 = vst.msk [vmem:[#allocation2 + $0x10] sm:$0xff] (!%p225_p3), %vm313_vm0, %v1614_v5  ;;  %317 = vst.msk [vmem:[#allocation2 + $0x18] sm:$0xff] (!%p225_p3), %vm313_vm0, %v1614_v5  ;;  %v1538_v11 = vld [vmem:[%s1985_s1 + $0x38] sm:$0xff] (!%p225_p3)   ;;  %v1615_v12 = vmov (!%p225_p3), 65535   ;;  %v1539_v14 = vld [vmem:[%s1985_s1 + $0x40] sm:$0xff] (!%p225_p3)   ;;  %vm1185_vm4 = vcmask (!%p225_p3), 519168  }
   0xa   : > { %318 = vst.msk [vmem:[#allocation2 + $0x20] sm:$0xff] (!%p225_p3), %vm313_vm0, %v1614_v5  ;;  %319 = vst.msk [vmem:[#allocation2 + $0x28] sm:$0xff] (!%p225_p3), %vm313_vm0, %v1614_v5  ;;  %v681_v13 = vsel (!%p225_p3), %vm679_vm2, 4294967295, %v1615_v12  ;;  %v1540_v15 = vld [vmem:[%s1985_s1 + $0x48] ss:$0 sps:$4 sm:$0x33] (!%p225_p3)  }
   0xb   : > { %320 = vst.msk [vmem:[#allocation2 + $0x30] sm:$0xff] (!%p225_p3), %vm313_vm0, %v1614_v5  ;;  %321 = vst.msk [vmem:[#allocation2 + $0x38] sm:$0xff] (!%p225_p3), %vm313_vm0, %v1614_v5  ;;  %v682_v16 = vsel (!%p225_p3), %vm680_vm3, %v681_v13, 0  ;;  %v1811_v12 = vld [vmem:[%s1987_s3] ss:$0 sm:$0xff] (!%p225_p3) }
   0xc   : > { %689 = vmatpush1.bf16.msra.mxu0 (!%p225_p3), %v1532_v2  ;;  %1495 = vmatpush1.bf16.msra.mxu1 (!%p225_p3), %v1532_v2  ;;  %322 = vst.msk [vmem:[#allocation2 + $0x40] sm:$0xff] (!%p225_p3), %vm313_vm0, %v1614_v5  ;;  %323 = vst.msk [vmem:[#allocation2 + $0x48] sm:$0xff] (!%p225_p3), %vm313_vm0, %v1614_v5  ;;  %v684_v17 = vand.u32 (!%p225_p3), %v1540_v15, %v682_v16  ;;  %v1806_v2 = vld [vmem:[%s1986_s2] ss:$0 sm:$0xff] (!%p225_p3) }
   0xd   : > { %690 = vmatprep.subr.bf16.mxu0 (!%p225_p3), %v1613_v1  ;;  %1486 = vmatprep.subr.bf16.mxu1 (!%p225_p3), %v1613_v1  ;;  %324 = vst.msk [vmem:[#allocation2 + $0x50] sm:$0xff] (!%p225_p3), %vm313_vm0, %v1614_v5  ;;  %325 = vst.msk [vmem:[#allocation2 + $0x58] sm:$0xff] (!%p225_p3), %vm313_vm0, %v1614_v5 }
   0xe   : > { %s1994_s25 = smov (!%p274_p4, %s1352_s25), 63  ;;  %326 = vst.msk [vmem:[#allocation2 + $0x60] sm:$0xff] %vm313_vm0, %v1614_v5  ;;  %327 = vst.msk [vmem:[#allocation2 + $0x68] sm:$0xff] %vm313_vm0, %v1614_v5 }
   0xf   : > { %s1451_s28 = sshll.u32 %s1994_s25, 3  ;;  %328 = vst.msk [vmem:[#allocation2 + $0x70] sm:$0xff] %vm313_vm0, %v1614_v5  ;;  %329 = vst.msk [vmem:[#allocation2 + $0x78] sm:$0xff] %vm313_vm0, %v1614_v5  ;;  %v346_v48 = vld [vmem:[#allocation2] sm:$0xff]  ;;  %v347_v52 = vld [vmem:[#allocation2 + $0x8] sm:$0xff]  ;;  %s1356_s26 = sshll.u32 %s1994_s25, 2 }
  0x10   : > { %691 = vmatpush1.bf16.msra.mxu0 %v1533_v3  ;;  %1496 = vmatpush1.bf16.msra.mxu1 %v1533_v3  ;;  %330 = vst.msk [vmem:[#allocation2 + $0x80] sm:$0xff] %vm313_vm0, %v1614_v5  ;;  %331 = vst.msk [vmem:[#allocation2 + $0x88] sm:$0xff] %vm313_vm0, %v1614_v5  ;;  %s1719_s5 = scalar_lea.vmem %s1984_s0, %s1451_s28  ;;  %v348_v0 = vld [vmem:[#allocation2 + $0x10] sm:$0xff]  ;;  %s1829_s28 = scalar_lea.vmem %s1988_s4, %s1356_s26 }
  0x11   : > { %692 = vmatprep.subr.bf16.mxu0 %v1613_v1  ;;  %1487 = vmatprep.subr.bf16.mxu1 %v1613_v1  ;;  %332 = vst.msk [vmem:[#allocation2 + $0x90] sm:$0xff] %vm313_vm0, %v1614_v5  ;;  %333 = vst.msk [vmem:[#allocation2 + $0x98] sm:$0xff] %vm313_vm0, %v1614_v5  ;;  %v1543_v7 = vld [vmem:[%s1719_s5 + $0x4] ss:$8 sps:$4 sm:$0xff]   ;;  %v1541_v18 = vld [vmem:[%s1719_s5] ss:$8 sps:$4 sm:$0xff]  }
  0x12   : > { %334 = vst.msk [vmem:[#allocation2 + $0xa0] sm:$0xff] %vm313_vm0, %v1614_v5  ;;  %335 = vst.msk [vmem:[#allocation2 + $0xa8] sm:$0xff] %vm313_vm0, %v1614_v5  ;;  %v1546_v8 = vld [vmem:[%s1719_s5 + $0x84] ss:$8 sps:$4 sm:$0xff]   ;;  %1399 = vmatprep.mubr.msk.bf16.mxu0 %vm630_vm1, %v1543_v7  ;;  %v1544_v19 = vld [vmem:[%s1719_s5 + $0x80] ss:$8 sps:$4 sm:$0xff]  }
  0x13   : > { %336 = vst.msk [vmem:[#allocation2 + $0xb0] sm:$0xff] %vm313_vm0, %v1614_v5  ;;  %337 = vst.msk [vmem:[#allocation2 + $0xb8] sm:$0xff] %vm313_vm0, %v1614_v5  ;;  %1407 = vmatprep.mubr.msk.bf16.mxu1 %vm630_vm1, %v1546_v8  ;;  %v1547_v20 = vld [vmem:[%s1719_s5 + $0x14] ss:$8 sps:$4 sm:$0xff]   ;;  %v1551_v22 = vld [vmem:[%s1719_s5 + $0x10] ss:$8 sps:$4 sm:$0xff]  }
  0x14   : > { %338 = vst.msk [vmem:[#allocation2 + $0xc0] sm:$0xff] %vm313_vm0, %v1614_v5  ;;  %339 = vst.msk [vmem:[#allocation2 + $0xc8] sm:$0xff] %vm313_vm0, %v1614_v5  ;;  %693 = vmatpush1.bf16.msra.mxu0 %v1534_v4  ;;  %1497 = vmatpush1.bf16.msra.mxu1 %v1534_v4  ;;  %v1549_v21 = vld [vmem:[%s1719_s5 + $0x94] ss:$8 sps:$4 sm:$0xff]   ;;  %v1552_v23 = vld [vmem:[%s1719_s5 + $0x90] ss:$8 sps:$4 sm:$0xff]  }
  0x15   : > { %340 = vst.msk [vmem:[#allocation2 + $0xd0] sm:$0xff] %vm313_vm0, %v1614_v5  ;;  %341 = vst.msk [vmem:[#allocation2 + $0xd8] sm:$0xff] %vm313_vm0, %v1614_v5  ;;  %694 = vmatprep.subr.bf16.mxu0 %v1613_v1  ;;  %1488 = vmatprep.subr.bf16.mxu1 %v1613_v1  ;;  %v1553_v24 = vld [vmem:[%s1719_s5 + $0x24] ss:$8 sps:$4 sm:$0xff]   ;;  %v1557_v26 = vld [vmem:[%s1719_s5 + $0x20] ss:$8 sps:$4 sm:$0xff]  }
  0x16   : > { %342 = vst.msk [vmem:[#allocation2 + $0xe0] sm:$0xff] %vm313_vm0, %v1614_v5  ;;  %343 = vst.msk [vmem:[#allocation2 + $0xe8] sm:$0xff] %vm313_vm0, %v1614_v5  ;;  %v1555_v25 = vld [vmem:[%s1719_s5 + $0xa4] ss:$8 sps:$4 sm:$0xff]   ;;  %v1558_v27 = vld [vmem:[%s1719_s5 + $0xa0] ss:$8 sps:$4 sm:$0xff]  }
  0x17   : > { %344 = vst.msk [vmem:[#allocation2 + $0xf0] sm:$0xff] %vm313_vm0, %v1614_v5  ;;  %345 = vst.msk [vmem:[#allocation2 + $0xf8] sm:$0xff] %vm313_vm0, %v1614_v5  ;;  %v1559_v28 = vld [vmem:[%s1719_s5 + $0x34] ss:$8 sps:$4 sm:$0xff]   ;;  %v1563_v30 = vld [vmem:[%s1719_s5 + $0x30] ss:$8 sps:$4 sm:$0xff]  }
  0x18   : > { %695 = vmatpush1.bf16.msra.mxu0 %v1535_v6  ;;  %1498 = vmatpush1.bf16.msra.mxu1 %v1535_v6  ;;  %v1561_v29 = vld [vmem:[%s1719_s5 + $0xb4] ss:$8 sps:$4 sm:$0xff]   ;;  %v1564_v31 = vld [vmem:[%s1719_s5 + $0xb0] ss:$8 sps:$4 sm:$0xff]   ;;  %v1565_v32 = vld [vmem:[%s1719_s5 + $0x44] ss:$8 sps:$4 sm:$0xff]  }
  0x19   : > { %696 = vmatprep.subr.bf16.mxu0 %v1613_v1  ;;  %1489 = vmatprep.subr.bf16.mxu1 %v1613_v1  ;;  %v1567_v33 = vld [vmem:[%s1719_s5 + $0xc4] ss:$8 sps:$4 sm:$0xff]   ;;  %v1569_v34 = vld [vmem:[%s1719_s5 + $0x40] ss:$8 sps:$4 sm:$0xff]   ;;  %v1571_v36 = vld [vmem:[%s1719_s5 + $0x54] ss:$8 sps:$4 sm:$0xff]  }
  0x1a   : > { %v1570_v35 = vld [vmem:[%s1719_s5 + $0xc0] ss:$8 sps:$4 sm:$0xff]   ;;  %v1573_v37 = vld [vmem:[%s1719_s5 + $0xd4] ss:$8 sps:$4 sm:$0xff]   ;;  %v1575_v38 = vld [vmem:[%s1719_s5 + $0x50] ss:$8 sps:$4 sm:$0xff]  }
  0x1b   : > { %v1576_v39 = vld [vmem:[%s1719_s5 + $0xd0] ss:$8 sps:$4 sm:$0xff]   ;;  %v1577_v40 = vld [vmem:[%s1719_s5 + $0x64] ss:$8 sps:$4 sm:$0xff]   ;;  %v1581_v42 = vld [vmem:[%s1719_s5 + $0x60] ss:$8 sps:$4 sm:$0xff]  }
  0x1c   : > { %697 = vmatpush1.bf16.msra.mxu0 %v1536_v9  ;;  %1499 = vmatpush1.bf16.msra.mxu1 %v1536_v9  ;;  %v1579_v41 = vld [vmem:[%s1719_s5 + $0xe4] ss:$8 sps:$4 sm:$0xff]   ;;  %v1582_v43 = vld [vmem:[%s1719_s5 + $0xe0] ss:$8 sps:$4 sm:$0xff]   ;;  %v1583_v44 = vld [vmem:[%s1719_s5 + $0x74] ss:$8 sps:$4 sm:$0xff]  }
  0x1d   : > { %698 = vmatprep.subr.bf16.mxu0 %v1613_v1  ;;  %1490 = vmatprep.subr.bf16.mxu1 %v1613_v1  ;;  %v1585_v45 = vld [vmem:[%s1719_s5 + $0xf4] ss:$8 sps:$4 sm:$0xff]   ;;  %v1587_v46 = vld [vmem:[%s1719_s5 + $0x70] ss:$8 sps:$4 sm:$0xff]   ;;  %v362_v49 = vld [vmem:[#allocation2 + $0x80] sm:$0xff] }
  0x1e   : > { %v1588_v47 = vld [vmem:[%s1719_s5 + $0xf0] ss:$8 sps:$4 sm:$0xff]   ;;  %v363_v53 = vld [vmem:[#allocation2 + $0x88] sm:$0xff] }
  0x1f   : > { %v349_v5 = vld [vmem:[#allocation2 + $0x18] sm:$0xff] }
  0x20   : > { %699 = vmatpush1.bf16.msra.mxu0 %v1537_v10  ;;  %1500 = vmatpush1.bf16.msra.mxu1 %v1537_v10  ;;  %v365_v6 = vld [vmem:[#allocation2 + $0x98] sm:$0xff] }
  0x21   : > { %700 = vmatprep.subr.bf16.mxu0 %v1613_v1  ;;  %1491 = vmatprep.subr.bf16.mxu1 %v1613_v1 }
  0x24   : > { %701 = vmatpush1.bf16.msra.mxu0 %v1538_v11  ;;  %1501 = vmatpush1.bf16.msra.mxu1 %v1538_v11 }
  0x25   : > { %702 = vmatprep.subr.bf16.mxu0 %v1613_v1  ;;  %1492 = vmatprep.subr.bf16.mxu1 %v1613_v1 }
  0x28   : > { %703 = vmatpush1.bf16.msra.mxu0 %v1539_v14  ;;  %1502 = vmatpush1.bf16.msra.mxu1 %v1539_v14 }
  0x29   : > { %704 = vmatprep.subr.bf16.mxu0 %v1613_v1  ;;  %1493 = vmatprep.subr.bf16.mxu1 %v1613_v1  ;;  %v364_v1 = vld [vmem:[#allocation2 + $0x90] sm:$0xff] }
  0x2c   : > { %705 = vmatpush1.bf16.msra.mxu0 %v684_v17  ;;  %1503 = vmatpush1.bf16.msra.mxu1 %v684_v17 }
  0x2f   : > { %719 = vmatmul.mubr.bf16.vlgmr.msra.gmra.mrb[0].mxu0 %v1541_v18  ;;  %783 = vmatmul.mubr.bf16.vlgmr.msra.gmra.mrb[0].mxu1 %v1544_v19 }
  0x30   : > { %1400 = vmatprep.mubr.msk.bf16.mxu0 %vm630_vm1, %v1547_v20  ;;  %1408 = vmatprep.mubr.msk.bf16.mxu1 %vm630_vm1, %v1549_v21 }
  0x37   : > { %727 = vmatmul.mubr.bf16.gmra.mrb[4].mxu0 %v1551_v22  ;;  %791 = vmatmul.mubr.bf16.gmra.mrb[4].mxu1 %v1552_v23 }
  0x38   : > { %1401 = vmatprep.mubr.msk.bf16.mxu0 %vm630_vm1, %v1553_v24  ;;  %1409 = vmatprep.mubr.msk.bf16.mxu1 %vm630_vm1, %v1555_v25 }
  0x3f   : > { %735 = vmatmul.mubr.bf16.gmra.mrb[8].mxu0 %v1557_v26  ;;  %799 = vmatmul.mubr.bf16.gmra.mrb[8].mxu1 %v1558_v27 }
  0x40   : > { %1402 = vmatprep.mubr.msk.bf16.mxu0 %vm630_vm1, %v1559_v28  ;;  %1410 = vmatprep.mubr.msk.bf16.mxu1 %vm630_vm1, %v1561_v29 }
  0x47   : > { %743 = vmatmul.mubr.bf16.gmra.mrb[12].mxu0 %v1563_v30  ;;  %807 = vmatmul.mubr.bf16.gmra.mrb[12].mxu1 %v1564_v31 }
  0x48   : > { %1403 = vmatprep.mubr.msk.bf16.mxu0 %vm630_vm1, %v1565_v32  ;;  %1411 = vmatprep.mubr.msk.bf16.mxu1 %vm630_vm1, %v1567_v33  ;;  %v350_v32 = vld [vmem:[#allocation2 + $0x20] sm:$0xff] }
  0x49   : > { %v366_v33 = vld [vmem:[#allocation2 + $0xa0] sm:$0xff] }
  0x4f   : > { %751 = vmatmul.mubr.bf16.gmra.mrb[16].mxu0 %v1569_v34  ;;  %815 = vmatmul.mubr.bf16.gmra.mrb[16].mxu1 %v1570_v35 }
  0x50   : > { %1404 = vmatprep.mubr.msk.bf16.mxu0 %vm630_vm1, %v1571_v36  ;;  %1412 = vmatprep.mubr.msk.bf16.mxu1 %vm630_vm1, %v1573_v37 }
  0x57   : > { %759 = vmatmul.mubr.bf16.gmra.mrb[20].mxu0 %v1575_v38  ;;  %823 = vmatmul.mubr.bf16.gmra.mrb[20].mxu1 %v1576_v39 }
  0x58   : > { %1405 = vmatprep.mubr.msk.bf16.mxu0 %vm630_vm1, %v1577_v40  ;;  %1413 = vmatprep.mubr.msk.bf16.mxu1 %vm630_vm1, %v1579_v41 }
  0x5f   : > { %767 = vmatmul.mubr.bf16.gmra.mrb[24].mxu0 %v1581_v42  ;;  %831 = vmatmul.mubr.bf16.gmra.mrb[24].mxu1 %v1582_v43  ;;  %v351_v42 = vld [vmem:[#allocation2 + $0x28] sm:$0xff] }
  0x60   : > { %1406 = vmatprep.mubr.msk.bf16.mxu0 %vm630_vm1, %v1583_v44  ;;  %1414 = vmatprep.mubr.msk.bf16.mxu1 %vm630_vm1, %v1585_v45  ;;  %v367_v43 = vld [vmem:[#allocation2 + $0xa8] sm:$0xff] }
  0x67   : > { %775 = vmatmul.mubr.bf16.gmra.mrb[28].mxu0 %v1587_v46  ;;  %839 = vmatmul.mubr.bf16.gmra.mrb[28].mxu1 %v1588_v47 }
 0x102   : > { %v720_v50 = vpop.f32.mrb[0].mxu0  ;;  %v784_v51 = vpop.f32.mrb[0].mxu1 }
 0x103   : > { %v847_v54 = vadd.f32 %v720_v50, %v346_v48  ;;  %v863_v55 = vadd.f32 %v784_v51, %v362_v49  ;;  %v722_v56 = vpop.f32.mrb[1].mxu0  ;;  %v786_v57 = vpop.f32.mrb[1].mxu1 }
 0x104   : > { %v723_v58 = vpop.f32.mrb[2].mxu0  ;;  %v787_v59 = vpop.f32.mrb[2].mxu1 }
 0x105   : > { %880 = vst.msk [vmem:[#allocation2] sm:$0xff] %vm313_vm0, %v847_v54  ;;  %896 = vst.msk [vmem:[#allocation2 + $0x80] sm:$0xff] %vm313_vm0, %v863_v55  ;;  %v848_v60 = vadd.f32 %v723_v58, %v347_v52  ;;  %v864_v61 = vadd.f32 %v787_v59, %v363_v53  ;;  %v725_v62 = vpop.f32.mrb[3].mxu0  ;;  %v789_v63 = vpop.f32.mrb[3].mxu1 }
 0x107   : > { %881 = vst.msk [vmem:[#allocation2 + $0x8] sm:$0xff] %vm313_vm0, %v848_v60  ;;  %897 = vst.msk [vmem:[#allocation2 + $0x88] sm:$0xff] %vm313_vm0, %v864_v61 }
 0x10a   : > { %v728_v3 = vpop.f32.mrb[4].mxu0  ;;  %v792_v4 = vpop.f32.mrb[4].mxu1 }
 0x10b   : > { %v849_v7 = vadd.f32 %v728_v3, %v348_v0  ;;  %v865_v8 = vadd.f32 %v792_v4, %v364_v1  ;;  %v730_v9 = vpop.f32.mrb[5].mxu0  ;;  %v794_v10 = vpop.f32.mrb[5].mxu1 }
 0x10c   : > { %v915_v11 = vld [vmem:[#allocation2] sm:$0xff]  ;;  %v731_v14 = vpop.f32.mrb[6].mxu0  ;;  %v795_v15 = vpop.f32.mrb[6].mxu1  ;;  %v353_v9 = vld [vmem:[#allocation2 + $0x38] sm:$0xff] }
 0x10d   : > { %v931_v13 = vld [vmem:[#allocation2 + $0x80] sm:$0xff]  ;;  %v954_v16 = vmul.f32 %v1806_v2, %v915_v11  ;;  %882 = vst.msk [vmem:[#allocation2 + $0x10] sm:$0xff] %vm313_vm0, %v849_v7  ;;  %898 = vst.msk [vmem:[#allocation2 + $0x90] sm:$0xff] %vm313_vm0, %v865_v8  ;;  %v850_v18 = vadd.f32 %v731_v14, %v349_v5  ;;  %v866_v19 = vadd.f32 %v795_v15, %v365_v6  ;;  %v733_v20 = vpop.f32.mrb[7].mxu0  ;;  %v797_v21 = vpop.f32.mrb[7].mxu1  ;;  %v352_v5 = vld [vmem:[#allocation2 + $0x30] sm:$0xff] }
 0x10e   : > { %v970_v17 = vmul.f32 %v1806_v2, %v931_v13  ;;  %v916_v22 = vld [vmem:[#allocation2 + $0x8] sm:$0xff]  ;;  %v368_v6 = vld [vmem:[#allocation2 + $0xb0] sm:$0xff]  ;;  %v369_v10 = vld [vmem:[#allocation2 + $0xb8] sm:$0xff] }
 0x10f   : > { %v932_v23 = vld [vmem:[#allocation2 + $0x88] sm:$0xff]  ;;  %v993_v24 = vadd.f32 %v1811_v12, %v954_v16  ;;  %v955_v26 = vmul.f32 %v1806_v2, %v916_v22  ;;  %883 = vst.msk [vmem:[#allocation2 + $0x18] sm:$0xff] %vm313_vm0, %v850_v18  ;;  %899 = vst.msk [vmem:[#allocation2 + $0x98] sm:$0xff] %vm313_vm0, %v866_v19 }
 0x110   : > { %v1009_v25 = vadd.f32 %v1811_v12, %v970_v17  ;;  %v971_v27 = vmul.f32 %v1806_v2, %v932_v23 }
 0x111   : > { %v1025_v28 = vmax.f32 %v993_v24, 0.0  ;;  %v994_v30 = vadd.f32 %v1811_v12, %v955_v26 }
 0x112   : > { %v1041_v29 = vmax.f32 %v1009_v25, 0.0  ;;  %v1010_v31 = vadd.f32 %v1811_v12, %v971_v27  ;;  %v736_v34 = vpop.f32.mrb[8].mxu0  ;;  %v800_v35 = vpop.f32.mrb[8].mxu1 }
 0x113   : > { %v1452_v36 = vpack.c.bf16 %v1025_v28, %v1025_v28  ;;  %v1026_v38 = vmax.f32 %v994_v30, 0.0  ;;  %v738_v40 = vpop.f32.mrb[9].mxu0  ;;  %v802_v41 = vpop.f32.mrb[9].mxu1  ;;  %v851_v46 = vadd.f32 %v736_v34, %v350_v32  ;;  %v867_v47 = vadd.f32 %v800_v35, %v366_v33 }
 0x114   : > { %v1468_v37 = vpack.c.bf16 %v1041_v29, %v1041_v29  ;;  %v1042_v39 = vmax.f32 %v1010_v31, 0.0  ;;  %v917_v44 = vld [vmem:[#allocation2 + $0x10] sm:$0xff]  ;;  %v739_v48 = vpop.f32.mrb[10].mxu0  ;;  %v803_v49 = vpop.f32.mrb[10].mxu1 }
 0x115   : > { %v933_v45 = vld [vmem:[#allocation2 + $0x90] sm:$0xff]  ;;  %1186 = vst.msk [vmem:[%s1829_s28] sm:$0xf] %vm1185_vm4, %v1452_v36  ;;  %v1453_v50 = vpack.c.bf16 %v1026_v38, %v1026_v38  ;;  %v956_v52 = vmul.f32 %v1806_v2, %v917_v44  ;;  %v741_v54 = vpop.f32.mrb[11].mxu0  ;;  %v805_v55 = vpop.f32.mrb[11].mxu1  ;;  %v852_v58 = vadd.f32 %v739_v48, %v351_v42  ;;  %v868_v59 = vadd.f32 %v803_v49, %v367_v43  ;;  %v354_v38 = vld [vmem:[#allocation2 + $0x40] sm:$0xff] }
 0x116   : > { %1202 = vst.msk [vmem:[%s1829_s28 + $0x40] sm:$0xf] %vm1185_vm4, %v1468_v37  ;;  %v1469_v51 = vpack.c.bf16 %v1042_v39, %v1042_v39  ;;  %v972_v53 = vmul.f32 %v1806_v2, %v933_v45  ;;  %v918_v56 = vld [vmem:[#allocation2 + $0x18] sm:$0xff]  ;;  %v370_v39 = vld [vmem:[#allocation2 + $0xc0] sm:$0xff] }
 0x117   : > { %v934_v57 = vld [vmem:[#allocation2 + $0x98] sm:$0xff]  ;;  %884 = vst.msk [vmem:[#allocation2 + $0x20] sm:$0xff] %vm313_vm0, %v851_v46  ;;  %900 = vst.msk [vmem:[#allocation2 + $0xa0] sm:$0xff] %vm313_vm0, %v867_v47  ;;  %v995_v60 = vadd.f32 %v1811_v12, %v956_v52  ;;  %v957_v62 = vmul.f32 %v1806_v2, %v918_v56  ;;  %v355_v46 = vld [vmem:[#allocation2 + $0x48] sm:$0xff] }
 0x118   : > { %1187 = vst.msk [vmem:[%s1829_s28 + $0x4] sm:$0xf] %vm1185_vm4, %v1453_v50  ;;  %1203 = vst.msk [vmem:[%s1829_s28 + $0x44] sm:$0xf] %vm1185_vm4, %v1469_v51  ;;  %v1011_v61 = vadd.f32 %v1811_v12, %v972_v53  ;;  %v973_v63 = vmul.f32 %v1806_v2, %v934_v57  ;;  %v371_v47 = vld [vmem:[#allocation2 + $0xc8] sm:$0xff] }
 0x119   : > { %885 = vst.msk [vmem:[#allocation2 + $0x28] sm:$0xff] %vm313_vm0, %v852_v58  ;;  %901 = vst.msk [vmem:[#allocation2 + $0xa8] sm:$0xff] %vm313_vm0, %v868_v59  ;;  %v1027_v0 = vmax.f32 %v995_v60, 0.0  ;;  %v996_v3 = vadd.f32 %v1811_v12, %v957_v62 }
 0x11a   : > { %v1043_v1 = vmax.f32 %v1011_v61, 0.0  ;;  %v1012_v4 = vadd.f32 %v1811_v12, %v973_v63  ;;  %v744_v7 = vpop.f32.mrb[12].mxu0  ;;  %v808_v8 = vpop.f32.mrb[12].mxu1 }
 0x11b   : > { %v1454_v11 = vpack.c.bf16 %v1027_v0, %v1027_v0  ;;  %v1028_v14 = vmax.f32 %v996_v3, 0.0  ;;  %v746_v16 = vpop.f32.mrb[13].mxu0  ;;  %v810_v17 = vpop.f32.mrb[13].mxu1  ;;  %v853_v18 = vadd.f32 %v744_v7, %v352_v5  ;;  %v869_v19 = vadd.f32 %v808_v8, %v368_v6 }
 0x11c   : > { %v1470_v13 = vpack.c.bf16 %v1043_v1, %v1043_v1  ;;  %v1044_v15 = vmax.f32 %v1012_v4, 0.0  ;;  %v747_v20 = vpop.f32.mrb[14].mxu0  ;;  %v811_v21 = vpop.f32.mrb[14].mxu1 }
 0x11d   : > { %1188 = vst.msk [vmem:[%s1829_s28 + $0x8] sm:$0xf] %vm1185_vm4, %v1454_v11  ;;  %v1455_v22 = vpack.c.bf16 %v1028_v14, %v1028_v14  ;;  %v854_v26 = vadd.f32 %v747_v20, %v353_v9  ;;  %v870_v27 = vadd.f32 %v811_v21, %v369_v10  ;;  %v749_v28 = vpop.f32.mrb[15].mxu0  ;;  %v813_v29 = vpop.f32.mrb[15].mxu1  ;;  %v356_v11 = vld [vmem:[#allocation2 + $0x50] sm:$0xff] }
 0x11e   : > { %1204 = vst.msk [vmem:[%s1829_s28 + $0x48] sm:$0xf] %vm1185_vm4, %v1470_v13  ;;  %v1471_v23 = vpack.c.bf16 %v1044_v15, %v1044_v15  ;;  %v919_v24 = vld [vmem:[#allocation2 + $0x20] sm:$0xff]  ;;  %v372_v13 = vld [vmem:[#allocation2 + $0xd0] sm:$0xff] }
 0x11f   : > { %v935_v25 = vld [vmem:[#allocation2 + $0xa0] sm:$0xff]  ;;  %v958_v30 = vmul.f32 %v1806_v2, %v919_v24  ;;  %886 = vst.msk [vmem:[#allocation2 + $0x30] sm:$0xff] %vm313_vm0, %v853_v18  ;;  %902 = vst.msk [vmem:[#allocation2 + $0xb0] sm:$0xff] %vm313_vm0, %v869_v19 }
 0x120   : > { %v974_v31 = vmul.f32 %v1806_v2, %v935_v25  ;;  %1189 = vst.msk [vmem:[%s1829_s28 + $0xc] sm:$0xf] %vm1185_vm4, %v1455_v22  ;;  %1205 = vst.msk [vmem:[%s1829_s28 + $0x4c] sm:$0xf] %vm1185_vm4, %v1471_v23  ;;  %v920_v32 = vld [vmem:[#allocation2 + $0x28] sm:$0xff] }
 0x121   : > { %v936_v33 = vld [vmem:[#allocation2 + $0xa8] sm:$0xff]  ;;  %887 = vst.msk [vmem:[#allocation2 + $0x38] sm:$0xff] %vm313_vm0, %v854_v26  ;;  %903 = vst.msk [vmem:[#allocation2 + $0xb8] sm:$0xff] %vm313_vm0, %v870_v27  ;;  %v997_v34 = vadd.f32 %v1811_v12, %v958_v30  ;;  %v959_v36 = vmul.f32 %v1806_v2, %v920_v32  ;;  %v357_v26 = vld [vmem:[#allocation2 + $0x58] sm:$0xff] }
 0x122   : > { %v1013_v35 = vadd.f32 %v1811_v12, %v974_v31  ;;  %v975_v37 = vmul.f32 %v1806_v2, %v936_v33  ;;  %v752_v44 = vpop.f32.mrb[16].mxu0  ;;  %v816_v45 = vpop.f32.mrb[16].mxu1  ;;  %v373_v27 = vld [vmem:[#allocation2 + $0xd8] sm:$0xff] }
 0x123   : > { %v1029_v40 = vmax.f32 %v997_v34, 0.0  ;;  %v998_v42 = vadd.f32 %v1811_v12, %v959_v36  ;;  %v855_v48 = vadd.f32 %v752_v44, %v354_v38  ;;  %v871_v49 = vadd.f32 %v816_v45, %v370_v39  ;;  %v754_v50 = vpop.f32.mrb[17].mxu0  ;;  %v818_v51 = vpop.f32.mrb[17].mxu1 }
 0x124   : > { %v1045_v41 = vmax.f32 %v1013_v35, 0.0  ;;  %v1014_v43 = vadd.f32 %v1811_v12, %v975_v37  ;;  %v755_v56 = vpop.f32.mrb[18].mxu0  ;;  %v819_v57 = vpop.f32.mrb[18].mxu1 }
 0x125   : > { %v1456_v52 = vpack.c.bf16 %v1029_v40, %v1029_v40  ;;  %v1030_v54 = vmax.f32 %v998_v42, 0.0  ;;  %888 = vst.msk [vmem:[#allocation2 + $0x40] sm:$0xff] %vm313_vm0, %v855_v48  ;;  %904 = vst.msk [vmem:[#allocation2 + $0xc0] sm:$0xff] %vm313_vm0, %v871_v49  ;;  %v856_v60 = vadd.f32 %v755_v56, %v355_v46  ;;  %v872_v61 = vadd.f32 %v819_v57, %v371_v47  ;;  %v757_v62 = vpop.f32.mrb[19].mxu0  ;;  %v821_v63 = vpop.f32.mrb[19].mxu1 }
 0x126   : > { %v1472_v53 = vpack.c.bf16 %v1045_v41, %v1045_v41  ;;  %v1046_v55 = vmax.f32 %v1014_v43, 0.0  ;;  %v921_v58 = vld [vmem:[#allocation2 + $0x30] sm:$0xff]  ;;  %v359_v62 = vld [vmem:[#allocation2 + $0x68] sm:$0xff] }
 0x127   : > { %v937_v59 = vld [vmem:[#allocation2 + $0xb0] sm:$0xff]  ;;  %1190 = vst.msk [vmem:[%s1829_s28 + $0x10] sm:$0xf] %vm1185_vm4, %v1456_v52  ;;  %v1457_v0 = vpack.c.bf16 %v1030_v54, %v1030_v54  ;;  %v960_v3 = vmul.f32 %v1806_v2, %v921_v58  ;;  %v358_v52 = vld [vmem:[#allocation2 + $0x60] sm:$0xff]  ;;  %v375_v63 = vld [vmem:[#allocation2 + $0xe8] sm:$0xff] }
 0x128   : > { %1206 = vst.msk [vmem:[%s1829_s28 + $0x50] sm:$0xf] %vm1185_vm4, %v1472_v53  ;;  %v1473_v1 = vpack.c.bf16 %v1046_v55, %v1046_v55  ;;  %v976_v4 = vmul.f32 %v1806_v2, %v937_v59  ;;  %v922_v5 = vld [vmem:[#allocation2 + $0x38] sm:$0xff]  ;;  %v374_v53 = vld [vmem:[#allocation2 + $0xe0] sm:$0xff] }
 0x129   : > { %v938_v6 = vld [vmem:[#allocation2 + $0xb8] sm:$0xff]  ;;  %v961_v7 = vmul.f32 %v1806_v2, %v922_v5  ;;  %889 = vst.msk [vmem:[#allocation2 + $0x48] sm:$0xff] %vm313_vm0, %v856_v60  ;;  %905 = vst.msk [vmem:[#allocation2 + $0xc8] sm:$0xff] %vm313_vm0, %v872_v61  ;;  %v999_v9 = vadd.f32 %v1811_v12, %v960_v3 }
 0x12a   : > { %v977_v8 = vmul.f32 %v1806_v2, %v938_v6  ;;  %1191 = vst.msk [vmem:[%s1829_s28 + $0x14] sm:$0xf] %vm1185_vm4, %v1457_v0  ;;  %1207 = vst.msk [vmem:[%s1829_s28 + $0x54] sm:$0xf] %vm1185_vm4, %v1473_v1  ;;  %v1015_v10 = vadd.f32 %v1811_v12, %v976_v4  ;;  %v760_v18 = vpop.f32.mrb[20].mxu0  ;;  %v824_v19 = vpop.f32.mrb[20].mxu1 }
 0x12b   : > { %v1000_v14 = vadd.f32 %v1811_v12, %v961_v7  ;;  %v1031_v16 = vmax.f32 %v999_v9, 0.0  ;;  %v857_v22 = vadd.f32 %v760_v18, %v356_v11  ;;  %v873_v23 = vadd.f32 %v824_v19, %v372_v13  ;;  %v762_v24 = vpop.f32.mrb[21].mxu0  ;;  %v826_v25 = vpop.f32.mrb[21].mxu1 }
 0x12c   : > { %v1016_v15 = vadd.f32 %v1811_v12, %v977_v8  ;;  %v1047_v17 = vmax.f32 %v1015_v10, 0.0  ;;  %v923_v30 = vld [vmem:[#allocation2 + $0x40] sm:$0xff]  ;;  %v763_v32 = vpop.f32.mrb[22].mxu0  ;;  %v827_v33 = vpop.f32.mrb[22].mxu1 }
 0x12d   : > { %v1032_v20 = vmax.f32 %v1000_v14, 0.0  ;;  %v1458_v28 = vpack.c.bf16 %v1031_v16, %v1031_v16  ;;  %v939_v31 = vld [vmem:[#allocation2 + $0xc0] sm:$0xff]  ;;  %v962_v36 = vmul.f32 %v1806_v2, %v923_v30  ;;  %890 = vst.msk [vmem:[#allocation2 + $0x50] sm:$0xff] %vm313_vm0, %v857_v22  ;;  %906 = vst.msk [vmem:[#allocation2 + $0xd0] sm:$0xff] %vm313_vm0, %v873_v23  ;;  %v765_v38 = vpop.f32.mrb[23].mxu0  ;;  %v829_v39 = vpop.f32.mrb[23].mxu1  ;;  %v858_v42 = vadd.f32 %v763_v32, %v357_v26 }
 0x12e   : > { %v1048_v21 = vmax.f32 %v1016_v15, 0.0  ;;  %v1474_v29 = vpack.c.bf16 %v1047_v17, %v1047_v17  ;;  %v978_v37 = vmul.f32 %v1806_v2, %v939_v31  ;;  %v874_v43 = vadd.f32 %v827_v33, %v373_v27  ;;  %v360_v22 = vld [vmem:[#allocation2 + $0x70] sm:$0xff]  ;;  %v361_v30 = vld [vmem:[#allocation2 + $0x78] sm:$0xff] }
 0x12f   : > { %v1459_v34 = vpack.c.bf16 %v1032_v20, %v1032_v20  ;;  %1192 = vst.msk [vmem:[%s1829_s28 + $0x18] sm:$0xf] %vm1185_vm4, %v1458_v28  ;;  %v1001_v44 = vadd.f32 %v1811_v12, %v962_v36  ;;  %v376_v23 = vld [vmem:[#allocation2 + $0xf0] sm:$0xff]  ;;  %v377_v31 = vld [vmem:[#allocation2 + $0xf8] sm:$0xff] }
 0x130   : > { %v1475_v35 = vpack.c.bf16 %v1048_v21, %v1048_v21  ;;  %1208 = vst.msk [vmem:[%s1829_s28 + $0x58] sm:$0xf] %vm1185_vm4, %v1474_v29  ;;  %v924_v40 = vld [vmem:[#allocation2 + $0x48] sm:$0xff]  ;;  %v1017_v45 = vadd.f32 %v1811_v12, %v978_v37 }
 0x131   : > { %v940_v41 = vld [vmem:[#allocation2 + $0xc8] sm:$0xff]  ;;  %1193 = vst.msk [vmem:[%s1829_s28 + $0x1c] sm:$0xf] %vm1185_vm4, %v1459_v34  ;;  %v963_v46 = vmul.f32 %v1806_v2, %v924_v40  ;;  %v1033_v48 = vmax.f32 %v1001_v44, 0.0 }
 0x132   : > { %1209 = vst.msk [vmem:[%s1829_s28 + $0x5c] sm:$0xf] %vm1185_vm4, %v1475_v35  ;;  %v979_v47 = vmul.f32 %v1806_v2, %v940_v41  ;;  %v1049_v49 = vmax.f32 %v1017_v45, 0.0  ;;  %v768_v54 = vpop.f32.mrb[24].mxu0  ;;  %v832_v55 = vpop.f32.mrb[24].mxu1 }
 0x133   : > { %891 = vst.msk [vmem:[#allocation2 + $0x58] sm:$0xff] %vm313_vm0, %v858_v42  ;;  %907 = vst.msk [vmem:[#allocation2 + $0xd8] sm:$0xff] %vm313_vm0, %v874_v43  ;;  %v1002_v50 = vadd.f32 %v1811_v12, %v963_v46  ;;  %v1460_v56 = vpack.c.bf16 %v1033_v48, %v1033_v48  ;;  %v770_v60 = vpop.f32.mrb[25].mxu0  ;;  %v834_v61 = vpop.f32.mrb[25].mxu1  ;;  %v859_v3 = vadd.f32 %v768_v54, %v358_v52 }
 0x134   : > { %v1018_v51 = vadd.f32 %v1811_v12, %v979_v47  ;;  %v1476_v57 = vpack.c.bf16 %v1049_v49, %v1049_v49  ;;  %v925_v0 = vld [vmem:[#allocation2 + $0x50] sm:$0xff]  ;;  %v875_v4 = vadd.f32 %v832_v55, %v374_v53  ;;  %v771_v5 = vpop.f32.mrb[26].mxu0  ;;  %v835_v6 = vpop.f32.mrb[26].mxu1 }
 0x135   : > { %v1034_v58 = vmax.f32 %v1002_v50, 0.0  ;;  %v941_v1 = vld [vmem:[#allocation2 + $0xd0] sm:$0xff]  ;;  %1194 = vst.msk [vmem:[%s1829_s28 + $0x20] sm:$0xf] %vm1185_vm4, %v1460_v56  ;;  %v964_v9 = vmul.f32 %v1806_v2, %v925_v0  ;;  %v773_v11 = vpop.f32.mrb[27].mxu0  ;;  %v837_v13 = vpop.f32.mrb[27].mxu1  ;;  %v860_v14 = vadd.f32 %v771_v5, %v359_v62  ;;  %v876_v15 = vadd.f32 %v835_v6, %v375_v63 }
 0x136   : > { %v1050_v59 = vmax.f32 %v1018_v51, 0.0  ;;  %1210 = vst.msk [vmem:[%s1829_s28 + $0x60] sm:$0xf] %vm1185_vm4, %v1476_v57  ;;  %v980_v10 = vmul.f32 %v1806_v2, %v941_v1 }
 0x137   : > { %v1461_v7 = vpack.c.bf16 %v1034_v58, %v1034_v58  ;;  %892 = vst.msk [vmem:[#allocation2 + $0x60] sm:$0xff] %vm313_vm0, %v859_v3  ;;  %908 = vst.msk [vmem:[#allocation2 + $0xe0] sm:$0xff] %vm313_vm0, %v875_v4  ;;  %v1003_v16 = vadd.f32 %v1811_v12, %v964_v9 }
 0x138   : > { %v1477_v8 = vpack.c.bf16 %v1050_v59, %v1050_v59  ;;  %v1019_v17 = vadd.f32 %v1811_v12, %v980_v10  ;;  %893 = vst.msk [vmem:[#allocation2 + $0x68] sm:$0xff] %vm313_vm0, %v860_v14  ;;  %909 = vst.msk [vmem:[#allocation2 + $0xe8] sm:$0xff] %vm313_vm0, %v876_v15 }
 0x139   : > { %1195 = vst.msk [vmem:[%s1829_s28 + $0x24] sm:$0xf] %vm1185_vm4, %v1461_v7  ;;  %v1035_v24 = vmax.f32 %v1003_v16, 0.0 }
 0x13a   : > { %1211 = vst.msk [vmem:[%s1829_s28 + $0x64] sm:$0xf] %vm1185_vm4, %v1477_v8  ;;  %v926_v18 = vld [vmem:[#allocation2 + $0x58] sm:$0xff]  ;;  %v1051_v25 = vmax.f32 %v1019_v17, 0.0  ;;  %v776_v28 = vpop.f32.mrb[28].mxu0  ;;  %v840_v29 = vpop.f32.mrb[28].mxu1 }
 0x13b   : > { %v942_v19 = vld [vmem:[#allocation2 + $0xd8] sm:$0xff]  ;;  %v965_v20 = vmul.f32 %v1806_v2, %v926_v18  ;;  %v1462_v32 = vpack.c.bf16 %v1035_v24, %v1035_v24  ;;  %v861_v34 = vadd.f32 %v776_v28, %v360_v22  ;;  %v877_v35 = vadd.f32 %v840_v29, %v376_v23  ;;  %v778_v36 = vpop.f32.mrb[29].mxu0  ;;  %v842_v37 = vpop.f32.mrb[29].mxu1 }
 0x13c   : > { %v981_v21 = vmul.f32 %v1806_v2, %v942_v19  ;;  %v1478_v33 = vpack.c.bf16 %v1051_v25, %v1051_v25  ;;  %v779_v40 = vpop.f32.mrb[30].mxu0  ;;  %v843_v41 = vpop.f32.mrb[30].mxu1 }
 0x13d   : > { %v1004_v26 = vadd.f32 %v1811_v12, %v965_v20  ;;  %1196 = vst.msk [vmem:[%s1829_s28 + $0x28] sm:$0xf] %vm1185_vm4, %v1462_v32  ;;  %v862_v44 = vadd.f32 %v779_v40, %v361_v30  ;;  %v878_v45 = vadd.f32 %v843_v41, %v377_v31  ;;  %v781_v46 = vpop.f32.mrb[31].mxu0  ;;  %v845_v47 = vpop.f32.mrb[31].mxu1 }
 0x13e   : > { %v1020_v27 = vadd.f32 %v1811_v12, %v981_v21  ;;  %1212 = vst.msk [vmem:[%s1829_s28 + $0x68] sm:$0xf] %vm1185_vm4, %v1478_v33  ;;  %v927_v42 = vld [vmem:[#allocation2 + $0x60] sm:$0xff] }
 0x13f   : > { %v1036_v38 = vmax.f32 %v1004_v26, 0.0  ;;  %v943_v43 = vld [vmem:[#allocation2 + $0xe0] sm:$0xff]  ;;  %894 = vst.msk [vmem:[#allocation2 + $0x70] sm:$0xff] %vm313_vm0, %v861_v34  ;;  %910 = vst.msk [vmem:[#allocation2 + $0xf0] sm:$0xff] %vm313_vm0, %v877_v35  ;;  %v966_v50 = vmul.f32 %v1806_v2, %v927_v42  ;;  %v928_v52 = vld [vmem:[#allocation2 + $0x68] sm:$0xff] }
 0x140   : > { %v1052_v39 = vmax.f32 %v1020_v27, 0.0  ;;  %v982_v51 = vmul.f32 %v1806_v2, %v943_v43  ;;  %v944_v53 = vld [vmem:[#allocation2 + $0xe8] sm:$0xff]  ;;  %895 = vst.msk [vmem:[#allocation2 + $0x78] sm:$0xff] %vm313_vm0, %v862_v44  ;;  %911 = vst.msk [vmem:[#allocation2 + $0xf8] sm:$0xff] %vm313_vm0, %v878_v45  ;;  %v967_v56 = vmul.f32 %v1806_v2, %v928_v52 }
 0x141   : > { %v1463_v48 = vpack.c.bf16 %v1036_v38, %v1036_v38  ;;  %v1005_v54 = vadd.f32 %v1811_v12, %v966_v50  ;;  %v983_v57 = vmul.f32 %v1806_v2, %v944_v53 }
 0x142   : > { %v1479_v49 = vpack.c.bf16 %v1052_v39, %v1052_v39  ;;  %v1021_v55 = vadd.f32 %v1811_v12, %v982_v51  ;;  %v1006_v60 = vadd.f32 %v1811_v12, %v967_v56 }
 0x143   : > { %1197 = vst.msk [vmem:[%s1829_s28 + $0x2c] sm:$0xf] %vm1185_vm4, %v1463_v48  ;;  %v1037_v58 = vmax.f32 %v1005_v54, 0.0  ;;  %v1022_v61 = vadd.f32 %v1811_v12, %v983_v57 }
 0x144   : > { %1213 = vst.msk [vmem:[%s1829_s28 + $0x6c] sm:$0xf] %vm1185_vm4, %v1479_v49  ;;  %v1053_v59 = vmax.f32 %v1021_v55, 0.0  ;;  %v1038_v0 = vmax.f32 %v1006_v60, 0.0 }
 0x145   : > { %v1464_v62 = vpack.c.bf16 %v1037_v58, %v1037_v58  ;;  %v1054_v1 = vmax.f32 %v1022_v61, 0.0 }
 0x146   : > { %v1480_v63 = vpack.c.bf16 %v1053_v59, %v1053_v59  ;;  %v929_v3 = vld [vmem:[#allocation2 + $0x70] sm:$0xff]  ;;  %v1465_v7 = vpack.c.bf16 %v1038_v0, %v1038_v0 }
 0x147   : > { %v945_v4 = vld [vmem:[#allocation2 + $0xf0] sm:$0xff]  ;;  %v968_v5 = vmul.f32 %v1806_v2, %v929_v3  ;;  %1198 = vst.msk [vmem:[%s1829_s28 + $0x30] sm:$0xf] %vm1185_vm4, %v1464_v62  ;;  %v1481_v8 = vpack.c.bf16 %v1054_v1, %v1054_v1  ;;  %v930_v9 = vld [vmem:[#allocation2 + $0x78] sm:$0xff] }
 0x148   : > { %v984_v6 = vmul.f32 %v1806_v2, %v945_v4  ;;  %1214 = vst.msk [vmem:[%s1829_s28 + $0x70] sm:$0xf] %vm1185_vm4, %v1480_v63  ;;  %v946_v10 = vld [vmem:[#allocation2 + $0xf8] sm:$0xff]  ;;  %v969_v14 = vmul.f32 %v1806_v2, %v930_v9  ;;  %1199 = vst.msk [vmem:[%s1829_s28 + $0x34] sm:$0xf] %vm1185_vm4, %v1465_v7 }
 0x149   : > { %v1007_v11 = vadd.f32 %v1811_v12, %v968_v5  ;;  %v985_v15 = vmul.f32 %v1806_v2, %v946_v10  ;;  %1215 = vst.msk [vmem:[%s1829_s28 + $0x74] sm:$0xf] %vm1185_vm4, %v1481_v8 }
 0x14a   : > { %v1023_v13 = vadd.f32 %v1811_v12, %v984_v6  ;;  %v1008_v18 = vadd.f32 %v1811_v12, %v969_v14 }
 0x14b   : > { %v1039_v16 = vmax.f32 %v1007_v11, 0.0  ;;  %v1024_v19 = vadd.f32 %v1811_v12, %v985_v15 }
 0x14c   : > { %v1055_v17 = vmax.f32 %v1023_v13, 0.0  ;;  %v1040_v22 = vmax.f32 %v1008_v18, 0.0 }
 0x14d   : > { %v1466_v20 = vpack.c.bf16 %v1039_v16, %v1039_v16  ;;  %v1056_v23 = vmax.f32 %v1024_v19, 0.0 }
 0x14e   : > { %v1482_v21 = vpack.c.bf16 %v1055_v17, %v1055_v17  ;;  %v1467_v2 = vpack.c.bf16 %v1040_v22, %v1040_v22 }
 0x14f   : > { %1200 = vst.msk [vmem:[%s1829_s28 + $0x38] sm:$0xf] %vm1185_vm4, %v1466_v20  ;;  %v1483_v24 = vpack.c.bf16 %v1056_v23, %v1056_v23 }
 0x150   : > { %1216 = vst.msk [vmem:[%s1829_s28 + $0x78] sm:$0xf] %vm1185_vm4, %v1482_v21  ;;  %1201 = vst.msk [vmem:[%s1829_s28 + $0x3c] sm:$0xf] %vm1185_vm4, %v1467_v2 }
 0x151   : > { %1217 = vst.msk [vmem:[%s1829_s28 + $0x7c] sm:$0xf] %vm1185_vm4, %v1483_v24 }
 0x152 PF: > { %s14_s17 = sadd.s32 1, %s1611_s17   ;;  %s1989_s15 = smov %s1607_s16 }
 0x153   : > { %p11_p5 = scmp.ge.s32.totalorder %s14_s17, 4   ;;  %s1990_s16 = smov %s1992_s18 }
 0x155   :  { %13 = sbr.rel (!%p11_p5) target bundleno = 2 (0x2), region = 83 }

// kernel: pothole_detector_forward.23
= control target key start
LH: loop header
LB: loop body
LE: loop exit
PB: predicated region body
PF: predicated region fallthrough
CT: control target
= control target key end

     0   :  { %vm153_vm0 = vcmask 519168   ;;  %s1385_s0 = inlined_call_operand.vmem [shape: bf16[9,128,64], index: 0, kind: input, shape index: {}]   ;;  %s1386_s1 = inlined_call_operand.vmem [shape: bf16[128,64], index: 1, kind: output, shape index: {}]  }
   0x1   :  { %v9_v0 = vld [vmem:[%s1385_s0] sm:$0xf]  ;;  %v10_v12 = vld [vmem:[%s1385_s0 + $0x4] sm:$0xf]  ;;  %v11_v33 = vld [vmem:[%s1385_s0 + $0x8] sm:$0xf] }
   0x2   :  { %v25_v1 = vld [vmem:[%s1385_s0 + $0x40] sm:$0xf]  ;;  %v156_v4 = vsel %vm153_vm0, %v9_v0, 4286644096  ;;  %v26_v13 = vld [vmem:[%s1385_s0 + $0x44] sm:$0xf] }
   0x3   :  { %v41_v2 = vld [vmem:[%s1385_s0 + $0x80] sm:$0xf]  ;;  %v159_v5 = vsel %vm153_vm0, %v25_v1, 4286644096  ;;  %v42_v14 = vld [vmem:[%s1385_s0 + $0x84] sm:$0xf] }
   0x4   :  { %v57_v3 = vld [vmem:[%s1385_s0 + $0xc0] sm:$0xf]  ;;  %v163_v6 = vsel %vm153_vm0, %v41_v2, 4286644096  ;;  %v161_v8 = vmax.bf16 %v159_v5, %v156_v4  ;;  %v58_v19 = vld [vmem:[%s1385_s0 + $0xc4] sm:$0xf] }
   0x5   :  { %v73_v7 = vld [vmem:[%s1385_s0 + $0x100] sm:$0xf]  ;;  %v167_v10 = vsel %vm153_vm0, %v57_v3, 4286644096  ;;  %v191_v20 = vsel %vm153_vm0, %v10_v12, 4286644096 }
   0x6   :  { %v89_v9 = vld [vmem:[%s1385_s0 + $0x140] sm:$0xf]  ;;  %v165_v11 = vmax.bf16 %v163_v6, %v161_v8  ;;  %v171_v15 = vsel %vm153_vm0, %v73_v7, 4286644096  ;;  %v194_v21 = vsel %vm153_vm0, %v26_v13, 4286644096 }
   0x7   :  { %v105_v16 = vld [vmem:[%s1385_s0 + $0x180] sm:$0xf]  ;;  %v175_v18 = vsel %vm153_vm0, %v89_v9, 4286644096  ;;  %v198_v22 = vsel %vm153_vm0, %v42_v14, 4286644096  ;;  %v196_v27 = vmax.bf16 %v194_v21, %v191_v20 }
   0x8   :  { %v169_v17 = vmax.bf16 %v167_v10, %v165_v11  ;;  %v121_v23 = vld [vmem:[%s1385_s0 + $0x1c0] sm:$0xf]  ;;  %v74_v26 = vld [vmem:[%s1385_s0 + $0x104] sm:$0xf]  ;;  %v179_v28 = vsel %vm153_vm0, %v105_v16, 4286644096 }
   0x9   :  { %v137_v24 = vld [vmem:[%s1385_s0 + $0x200] sm:$0xf]  ;;  %v90_v29 = vld [vmem:[%s1385_s0 + $0x144] sm:$0xf]  ;;  %v202_v30 = vsel %vm153_vm0, %v58_v19, 4286644096  ;;  %v200_v32 = vmax.bf16 %v198_v22, %v196_v27 }
   0xa   :  { %v173_v25 = vmax.bf16 %v171_v15, %v169_v17  ;;  %v27_v34 = vld [vmem:[%s1385_s0 + $0x48] sm:$0xf]  ;;  %v183_v36 = vsel %vm153_vm0, %v121_v23, 4286644096  ;;  %v187_v37 = vsel %vm153_vm0, %v137_v24, 4286644096 }
   0xb   :  { %v43_v35 = vld [vmem:[%s1385_s0 + $0x88] sm:$0xf]  ;;  %v206_v38 = vsel %vm153_vm0, %v74_v26, 4286644096  ;;  %v106_v40 = vld [vmem:[%s1385_s0 + $0x184] sm:$0xf]  ;;  %v204_v41 = vmax.bf16 %v202_v30, %v200_v32 }
   0xc   :  { %v177_v31 = vmax.bf16 %v175_v18, %v173_v25  ;;  %v210_v42 = vsel %vm153_vm0, %v90_v29, 4286644096  ;;  %v59_v43 = vld [vmem:[%s1385_s0 + $0xc8] sm:$0xf]  ;;  %v226_v44 = vsel %vm153_vm0, %v11_v33, 4286644096 }
   0xd   :  { %v229_v45 = vsel %vm153_vm0, %v27_v34, 4286644096  ;;  %v233_v46 = vsel %vm153_vm0, %v43_v35, 4286644096  ;;  %v122_v48 = vld [vmem:[%s1385_s0 + $0x1c4] sm:$0xf]  ;;  %v208_v50 = vmax.bf16 %v206_v38, %v204_v41 }
   0xe   :  { %v181_v39 = vmax.bf16 %v179_v28, %v177_v31  ;;  %v138_v49 = vld [vmem:[%s1385_s0 + $0x204] sm:$0xf]  ;;  %v75_v51 = vld [vmem:[%s1385_s0 + $0x108] sm:$0xf]  ;;  %v231_v52 = vmax.bf16 %v229_v45, %v226_v44  ;;  %v214_v53 = vsel %vm153_vm0, %v106_v40, 4286644096 }
   0xf   :  { %v91_v54 = vld [vmem:[%s1385_s0 + $0x148] sm:$0xf]  ;;  %v237_v55 = vsel %vm153_vm0, %v59_v43, 4286644096  ;;  %v212_v57 = vmax.bf16 %v210_v42, %v208_v50  ;;  %v12_v59 = vld [vmem:[%s1385_s0 + $0xc] sm:$0xf] }
  0x10   :  { %v185_v47 = vmax.bf16 %v183_v36, %v181_v39  ;;  %v235_v58 = vmax.bf16 %v233_v46, %v231_v52  ;;  %v28_v60 = vld [vmem:[%s1385_s0 + $0x4c] sm:$0xf]  ;;  %v218_v62 = vsel %vm153_vm0, %v122_v48, 4286644096  ;;  %v222_v63 = vsel %vm153_vm0, %v138_v49, 4286644096 }
  0x11   :  { %v44_v61 = vld [vmem:[%s1385_s0 + $0x8c] sm:$0xf]  ;;  %v241_v0 = vsel %vm153_vm0, %v75_v51, 4286644096  ;;  %v216_v1 = vmax.bf16 %v214_v53, %v212_v57  ;;  %v107_v2 = vld [vmem:[%s1385_s0 + $0x188] sm:$0xf] }
  0x12   :  { %v189_v56 = vmax.bf16 %v187_v37, %v185_v47  ;;  %v239_v3 = vmax.bf16 %v237_v55, %v235_v58  ;;  %v245_v4 = vsel %vm153_vm0, %v91_v54, 4286644096  ;;  %v60_v5 = vld [vmem:[%s1385_s0 + $0xcc] sm:$0xf]  ;;  %v261_v6 = vsel %vm153_vm0, %v12_v59, 4286644096 }
  0x13   :  { %v264_v7 = vsel %vm153_vm0, %v28_v60, 4286644096  ;;  %v268_v8 = vsel %vm153_vm0, %v44_v61, 4286644096  ;;  %v220_v9 = vmax.bf16 %v218_v62, %v216_v1  ;;  %v123_v10 = vld [vmem:[%s1385_s0 + $0x1c8] sm:$0xf] }
  0x14   :  { %715 = vst.msk [vmem:[%s1386_s1] sm:$0xf] %vm153_vm0, %v189_v56  ;;  %v139_v11 = vld [vmem:[%s1385_s0 + $0x208] sm:$0xf]  ;;  %v243_v12 = vmax.bf16 %v241_v0, %v239_v3  ;;  %v76_v13 = vld [vmem:[%s1385_s0 + $0x10c] sm:$0xf]  ;;  %v266_v14 = vmax.bf16 %v264_v7, %v261_v6 }
  0x15   :  { %v249_v15 = vsel %vm153_vm0, %v107_v2, 4286644096  ;;  %v92_v16 = vld [vmem:[%s1385_s0 + $0x14c] sm:$0xf]  ;;  %v272_v17 = vsel %vm153_vm0, %v60_v5, 4286644096  ;;  %v224_v18 = vmax.bf16 %v222_v63, %v220_v9 }
  0x16   :  { %v247_v19 = vmax.bf16 %v245_v4, %v243_v12  ;;  %v270_v20 = vmax.bf16 %v268_v8, %v266_v14  ;;  %v13_v21 = vld [vmem:[%s1385_s0 + $0x10] sm:$0xf]  ;;  %v253_v24 = vsel %vm153_vm0, %v123_v10, 4286644096  ;;  %v257_v25 = vsel %vm153_vm0, %v139_v11, 4286644096 }
  0x17   :  { %v29_v22 = vld [vmem:[%s1385_s0 + $0x50] sm:$0xf]  ;;  %v276_v26 = vsel %vm153_vm0, %v76_v13, 4286644096  ;;  %716 = vst.msk [vmem:[%s1386_s1 + $0x4] sm:$0xf] %vm153_vm0, %v224_v18 }
  0x18   :  { %v45_v23 = vld [vmem:[%s1385_s0 + $0x90] sm:$0xf]  ;;  %v251_v27 = vmax.bf16 %v249_v15, %v247_v19  ;;  %v108_v28 = vld [vmem:[%s1385_s0 + $0x18c] sm:$0xf]  ;;  %v274_v29 = vmax.bf16 %v272_v17, %v270_v20  ;;  %v280_v30 = vsel %vm153_vm0, %v92_v16, 4286644096 }
  0x19   :  { %v61_v31 = vld [vmem:[%s1385_s0 + $0xd0] sm:$0xf]  ;;  %v296_v32 = vsel %vm153_vm0, %v13_v21, 4286644096  ;;  %v299_v33 = vsel %vm153_vm0, %v29_v22, 4286644096 }
  0x1a   :  { %v303_v34 = vsel %vm153_vm0, %v45_v23, 4286644096  ;;  %v255_v35 = vmax.bf16 %v253_v24, %v251_v27  ;;  %v124_v36 = vld [vmem:[%s1385_s0 + $0x1cc] sm:$0xf]  ;;  %v278_v38 = vmax.bf16 %v276_v26, %v274_v29  ;;  %v77_v39 = vld [vmem:[%s1385_s0 + $0x110] sm:$0xf]  ;;  %v301_v40 = vmax.bf16 %v299_v33, %v296_v32 }
  0x1b   :  { %v140_v37 = vld [vmem:[%s1385_s0 + $0x20c] sm:$0xf]  ;;  %v284_v41 = vsel %vm153_vm0, %v108_v28, 4286644096  ;;  %v93_v42 = vld [vmem:[%s1385_s0 + $0x150] sm:$0xf] }
  0x1c   :  { %v307_v43 = vsel %vm153_vm0, %v61_v31, 4286644096  ;;  %v259_v44 = vmax.bf16 %v257_v25, %v255_v35  ;;  %v282_v45 = vmax.bf16 %v280_v30, %v278_v38  ;;  %v305_v46 = vmax.bf16 %v303_v34, %v301_v40  ;;  %v14_v47 = vld [vmem:[%s1385_s0 + $0x14] sm:$0xf]  ;;  %v109_v54 = vld [vmem:[%s1385_s0 + $0x190] sm:$0xf] }
  0x1d   :  { %v30_v48 = vld [vmem:[%s1385_s0 + $0x54] sm:$0xf]  ;;  %v288_v50 = vsel %vm153_vm0, %v124_v36, 4286644096  ;;  %v292_v51 = vsel %vm153_vm0, %v140_v37, 4286644096 }
  0x1e   :  { %v46_v49 = vld [vmem:[%s1385_s0 + $0x94] sm:$0xf]  ;;  %v311_v52 = vsel %vm153_vm0, %v77_v39, 4286644096  ;;  %717 = vst.msk [vmem:[%s1386_s1 + $0x8] sm:$0xf] %vm153_vm0, %v259_v44  ;;  %v286_v53 = vmax.bf16 %v284_v41, %v282_v45  ;;  %v309_v55 = vmax.bf16 %v307_v43, %v305_v46 }
  0x1f   :  { %v315_v56 = vsel %vm153_vm0, %v93_v42, 4286644096  ;;  %v62_v57 = vld [vmem:[%s1385_s0 + $0xd4] sm:$0xf]  ;;  %v331_v58 = vsel %vm153_vm0, %v14_v47, 4286644096 }
  0x20   :  { %v334_v59 = vsel %vm153_vm0, %v30_v48, 4286644096  ;;  %v338_v60 = vsel %vm153_vm0, %v46_v49, 4286644096  ;;  %v290_v61 = vmax.bf16 %v288_v50, %v286_v53  ;;  %v125_v62 = vld [vmem:[%s1385_s0 + $0x1d0] sm:$0xf]  ;;  %v313_v0 = vmax.bf16 %v311_v52, %v309_v55 }
  0x21   :  { %v141_v63 = vld [vmem:[%s1385_s0 + $0x210] sm:$0xf]  ;;  %v78_v1 = vld [vmem:[%s1385_s0 + $0x114] sm:$0xf]  ;;  %v336_v2 = vmax.bf16 %v334_v59, %v331_v58  ;;  %v319_v3 = vsel %vm153_vm0, %v109_v54, 4286644096 }
  0x22   :  { %v94_v4 = vld [vmem:[%s1385_s0 + $0x154] sm:$0xf]  ;;  %v342_v5 = vsel %vm153_vm0, %v62_v57, 4286644096  ;;  %v294_v6 = vmax.bf16 %v292_v51, %v290_v61  ;;  %v317_v7 = vmax.bf16 %v315_v56, %v313_v0  ;;  %v15_v9 = vld [vmem:[%s1385_s0 + $0x18] sm:$0xf] }
  0x23   :  { %v340_v8 = vmax.bf16 %v338_v60, %v336_v2  ;;  %v31_v10 = vld [vmem:[%s1385_s0 + $0x58] sm:$0xf]  ;;  %v323_v12 = vsel %vm153_vm0, %v125_v62, 4286644096  ;;  %v327_v13 = vsel %vm153_vm0, %v141_v63, 4286644096 }
  0x24   :  { %v47_v11 = vld [vmem:[%s1385_s0 + $0x98] sm:$0xf]  ;;  %v346_v14 = vsel %vm153_vm0, %v78_v1, 4286644096  ;;  %718 = vst.msk [vmem:[%s1386_s1 + $0xc] sm:$0xf] %vm153_vm0, %v294_v6  ;;  %v321_v15 = vmax.bf16 %v319_v3, %v317_v7 }
  0x25   :  { %v110_v16 = vld [vmem:[%s1385_s0 + $0x194] sm:$0xf]  ;;  %v344_v17 = vmax.bf16 %v342_v5, %v340_v8  ;;  %v350_v18 = vsel %vm153_vm0, %v94_v4, 4286644096  ;;  %v63_v19 = vld [vmem:[%s1385_s0 + $0xd8] sm:$0xf] }
  0x26   :  { %v366_v20 = vsel %vm153_vm0, %v15_v9, 4286644096  ;;  %v369_v21 = vsel %vm153_vm0, %v31_v10, 4286644096  ;;  %v373_v22 = vsel %vm153_vm0, %v47_v11, 4286644096  ;;  %v325_v23 = vmax.bf16 %v323_v12, %v321_v15 }
  0x27   :  { %v126_v24 = vld [vmem:[%s1385_s0 + $0x1d4] sm:$0xf]  ;;  %v348_v26 = vmax.bf16 %v346_v14, %v344_v17  ;;  %v79_v27 = vld [vmem:[%s1385_s0 + $0x118] sm:$0xf]  ;;  %v371_v28 = vmax.bf16 %v369_v21, %v366_v20  ;;  %v354_v29 = vsel %vm153_vm0, %v110_v16, 4286644096 }
  0x28   :  { %v142_v25 = vld [vmem:[%s1385_s0 + $0x214] sm:$0xf]  ;;  %v95_v30 = vld [vmem:[%s1385_s0 + $0x158] sm:$0xf]  ;;  %v377_v31 = vsel %vm153_vm0, %v63_v19, 4286644096  ;;  %v329_v32 = vmax.bf16 %v327_v13, %v325_v23 }
  0x29   :  { %v352_v33 = vmax.bf16 %v350_v18, %v348_v26  ;;  %v375_v34 = vmax.bf16 %v373_v22, %v371_v28  ;;  %v16_v35 = vld [vmem:[%s1385_s0 + $0x1c] sm:$0xf]  ;;  %v358_v38 = vsel %vm153_vm0, %v126_v24, 4286644096  ;;  %v362_v39 = vsel %vm153_vm0, %v142_v25, 4286644096 }
  0x2a   :  { %v32_v36 = vld [vmem:[%s1385_s0 + $0x5c] sm:$0xf]  ;;  %v381_v40 = vsel %vm153_vm0, %v79_v27, 4286644096  ;;  %719 = vst.msk [vmem:[%s1386_s1 + $0x10] sm:$0xf] %vm153_vm0, %v329_v32 }
  0x2b   :  { %v48_v37 = vld [vmem:[%s1385_s0 + $0x9c] sm:$0xf]  ;;  %v356_v41 = vmax.bf16 %v354_v29, %v352_v33  ;;  %v111_v42 = vld [vmem:[%s1385_s0 + $0x198] sm:$0xf]  ;;  %v379_v43 = vmax.bf16 %v377_v31, %v375_v34  ;;  %v385_v44 = vsel %vm153_vm0, %v95_v30, 4286644096 }
  0x2c   :  { %v64_v45 = vld [vmem:[%s1385_s0 + $0xdc] sm:$0xf]  ;;  %v401_v46 = vsel %vm153_vm0, %v16_v35, 4286644096  ;;  %v404_v47 = vsel %vm153_vm0, %v32_v36, 4286644096 }
  0x2d   :  { %v408_v48 = vsel %vm153_vm0, %v48_v37, 4286644096  ;;  %v360_v49 = vmax.bf16 %v358_v38, %v356_v41  ;;  %v127_v50 = vld [vmem:[%s1385_s0 + $0x1d8] sm:$0xf]  ;;  %v383_v52 = vmax.bf16 %v381_v40, %v379_v43  ;;  %v80_v53 = vld [vmem:[%s1385_s0 + $0x11c] sm:$0xf]  ;;  %v406_v54 = vmax.bf16 %v404_v47, %v401_v46 }
  0x2e   :  { %v143_v51 = vld [vmem:[%s1385_s0 + $0x218] sm:$0xf]  ;;  %v389_v55 = vsel %vm153_vm0, %v111_v42, 4286644096  ;;  %v96_v56 = vld [vmem:[%s1385_s0 + $0x15c] sm:$0xf] }
  0x2f   :  { %v412_v57 = vsel %vm153_vm0, %v64_v45, 4286644096  ;;  %v364_v58 = vmax.bf16 %v362_v39, %v360_v49  ;;  %v387_v59 = vmax.bf16 %v385_v44, %v383_v52  ;;  %v410_v60 = vmax.bf16 %v408_v48, %v406_v54  ;;  %v17_v61 = vld [vmem:[%s1385_s0 + $0x20] sm:$0xf]  ;;  %v112_v4 = vld [vmem:[%s1385_s0 + $0x19c] sm:$0xf] }
  0x30   :  { %v33_v62 = vld [vmem:[%s1385_s0 + $0x60] sm:$0xf]  ;;  %v393_v0 = vsel %vm153_vm0, %v127_v50, 4286644096  ;;  %v397_v1 = vsel %vm153_vm0, %v143_v51, 4286644096 }
  0x31   :  { %v49_v63 = vld [vmem:[%s1385_s0 + $0xa0] sm:$0xf]  ;;  %v416_v2 = vsel %vm153_vm0, %v80_v53, 4286644096  ;;  %720 = vst.msk [vmem:[%s1386_s1 + $0x14] sm:$0xf] %vm153_vm0, %v364_v58  ;;  %v391_v3 = vmax.bf16 %v389_v55, %v387_v59  ;;  %v414_v5 = vmax.bf16 %v412_v57, %v410_v60 }
  0x32   :  { %v420_v6 = vsel %vm153_vm0, %v96_v56, 4286644096  ;;  %v65_v7 = vld [vmem:[%s1385_s0 + $0xe0] sm:$0xf]  ;;  %v436_v8 = vsel %vm153_vm0, %v17_v61, 4286644096 }
  0x33   :  { %v439_v9 = vsel %vm153_vm0, %v33_v62, 4286644096  ;;  %v443_v10 = vsel %vm153_vm0, %v49_v63, 4286644096  ;;  %v395_v11 = vmax.bf16 %v393_v0, %v391_v3  ;;  %v128_v12 = vld [vmem:[%s1385_s0 + $0x1dc] sm:$0xf]  ;;  %v418_v14 = vmax.bf16 %v416_v2, %v414_v5 }
  0x34   :  { %v144_v13 = vld [vmem:[%s1385_s0 + $0x21c] sm:$0xf]  ;;  %v81_v15 = vld [vmem:[%s1385_s0 + $0x120] sm:$0xf]  ;;  %v441_v16 = vmax.bf16 %v439_v9, %v436_v8  ;;  %v424_v17 = vsel %vm153_vm0, %v112_v4, 4286644096 }
  0x35   :  { %v97_v18 = vld [vmem:[%s1385_s0 + $0x160] sm:$0xf]  ;;  %v447_v19 = vsel %vm153_vm0, %v65_v7, 4286644096  ;;  %v399_v20 = vmax.bf16 %v397_v1, %v395_v11  ;;  %v422_v21 = vmax.bf16 %v420_v6, %v418_v14  ;;  %v18_v23 = vld [vmem:[%s1385_s0 + $0x24] sm:$0xf] }
  0x36   :  { %v445_v22 = vmax.bf16 %v443_v10, %v441_v16  ;;  %v34_v24 = vld [vmem:[%s1385_s0 + $0x64] sm:$0xf]  ;;  %v428_v26 = vsel %vm153_vm0, %v128_v12, 4286644096  ;;  %v432_v27 = vsel %vm153_vm0, %v144_v13, 4286644096 }
  0x37   :  { %v50_v25 = vld [vmem:[%s1385_s0 + $0xa4] sm:$0xf]  ;;  %v451_v28 = vsel %vm153_vm0, %v81_v15, 4286644096  ;;  %721 = vst.msk [vmem:[%s1386_s1 + $0x18] sm:$0xf] %vm153_vm0, %v399_v20  ;;  %v426_v29 = vmax.bf16 %v424_v17, %v422_v21 }
  0x38   :  { %v113_v30 = vld [vmem:[%s1385_s0 + $0x1a0] sm:$0xf]  ;;  %v449_v31 = vmax.bf16 %v447_v19, %v445_v22  ;;  %v455_v32 = vsel %vm153_vm0, %v97_v18, 4286644096  ;;  %v66_v33 = vld [vmem:[%s1385_s0 + $0xe4] sm:$0xf] }
  0x39   :  { %v471_v34 = vsel %vm153_vm0, %v18_v23, 4286644096  ;;  %v474_v35 = vsel %vm153_vm0, %v34_v24, 4286644096  ;;  %v478_v36 = vsel %vm153_vm0, %v50_v25, 4286644096  ;;  %v430_v37 = vmax.bf16 %v428_v26, %v426_v29 }
  0x3a   :  { %v129_v38 = vld [vmem:[%s1385_s0 + $0x1e0] sm:$0xf]  ;;  %v453_v40 = vmax.bf16 %v451_v28, %v449_v31  ;;  %v82_v41 = vld [vmem:[%s1385_s0 + $0x124] sm:$0xf]  ;;  %v476_v42 = vmax.bf16 %v474_v35, %v471_v34  ;;  %v459_v43 = vsel %vm153_vm0, %v113_v30, 4286644096 }
  0x3b   :  { %v145_v39 = vld [vmem:[%s1385_s0 + $0x220] sm:$0xf]  ;;  %v98_v44 = vld [vmem:[%s1385_s0 + $0x164] sm:$0xf]  ;;  %v482_v45 = vsel %vm153_vm0, %v66_v33, 4286644096  ;;  %v434_v46 = vmax.bf16 %v432_v27, %v430_v37 }
  0x3c   :  { %v457_v47 = vmax.bf16 %v455_v32, %v453_v40  ;;  %v480_v48 = vmax.bf16 %v478_v36, %v476_v42  ;;  %v19_v49 = vld [vmem:[%s1385_s0 + $0x28] sm:$0xf]  ;;  %v463_v52 = vsel %vm153_vm0, %v129_v38, 4286644096  ;;  %v467_v53 = vsel %vm153_vm0, %v145_v39, 4286644096 }
  0x3d   :  { %v35_v50 = vld [vmem:[%s1385_s0 + $0x68] sm:$0xf]  ;;  %v486_v54 = vsel %vm153_vm0, %v82_v41, 4286644096  ;;  %722 = vst.msk [vmem:[%s1386_s1 + $0x1c] sm:$0xf] %vm153_vm0, %v434_v46 }
  0x3e   :  { %v51_v51 = vld [vmem:[%s1385_s0 + $0xa8] sm:$0xf]  ;;  %v461_v55 = vmax.bf16 %v459_v43, %v457_v47  ;;  %v114_v56 = vld [vmem:[%s1385_s0 + $0x1a4] sm:$0xf]  ;;  %v484_v57 = vmax.bf16 %v482_v45, %v480_v48  ;;  %v490_v58 = vsel %vm153_vm0, %v98_v44, 4286644096 }
  0x3f   :  { %v67_v59 = vld [vmem:[%s1385_s0 + $0xe8] sm:$0xf]  ;;  %v506_v60 = vsel %vm153_vm0, %v19_v49, 4286644096  ;;  %v509_v61 = vsel %vm153_vm0, %v35_v50, 4286644096 }
  0x40   :  { %v513_v62 = vsel %vm153_vm0, %v51_v51, 4286644096  ;;  %v465_v63 = vmax.bf16 %v463_v52, %v461_v55  ;;  %v130_v0 = vld [vmem:[%s1385_s0 + $0x1e4] sm:$0xf]  ;;  %v488_v2 = vmax.bf16 %v486_v54, %v484_v57  ;;  %v83_v3 = vld [vmem:[%s1385_s0 + $0x128] sm:$0xf]  ;;  %v511_v4 = vmax.bf16 %v509_v61, %v506_v60 }
  0x41   :  { %v146_v1 = vld [vmem:[%s1385_s0 + $0x224] sm:$0xf]  ;;  %v494_v5 = vsel %vm153_vm0, %v114_v56, 4286644096  ;;  %v99_v6 = vld [vmem:[%s1385_s0 + $0x168] sm:$0xf] }
  0x42   :  { %v517_v7 = vsel %vm153_vm0, %v67_v59, 4286644096  ;;  %v469_v8 = vmax.bf16 %v467_v53, %v465_v63  ;;  %v492_v9 = vmax.bf16 %v490_v58, %v488_v2  ;;  %v515_v10 = vmax.bf16 %v513_v62, %v511_v4  ;;  %v20_v11 = vld [vmem:[%s1385_s0 + $0x2c] sm:$0xf]  ;;  %v115_v18 = vld [vmem:[%s1385_s0 + $0x1a8] sm:$0xf] }
  0x43   :  { %v36_v12 = vld [vmem:[%s1385_s0 + $0x6c] sm:$0xf]  ;;  %v498_v14 = vsel %vm153_vm0, %v130_v0, 4286644096  ;;  %v502_v15 = vsel %vm153_vm0, %v146_v1, 4286644096 }
  0x44   :  { %v52_v13 = vld [vmem:[%s1385_s0 + $0xac] sm:$0xf]  ;;  %v521_v16 = vsel %vm153_vm0, %v83_v3, 4286644096  ;;  %723 = vst.msk [vmem:[%s1386_s1 + $0x20] sm:$0xf] %vm153_vm0, %v469_v8  ;;  %v496_v17 = vmax.bf16 %v494_v5, %v492_v9  ;;  %v519_v19 = vmax.bf16 %v517_v7, %v515_v10 }
  0x45   :  { %v525_v20 = vsel %vm153_vm0, %v99_v6, 4286644096  ;;  %v68_v21 = vld [vmem:[%s1385_s0 + $0xec] sm:$0xf]  ;;  %v541_v22 = vsel %vm153_vm0, %v20_v11, 4286644096 }
  0x46   :  { %v544_v23 = vsel %vm153_vm0, %v36_v12, 4286644096  ;;  %v548_v24 = vsel %vm153_vm0, %v52_v13, 4286644096  ;;  %v500_v25 = vmax.bf16 %v498_v14, %v496_v17  ;;  %v131_v26 = vld [vmem:[%s1385_s0 + $0x1e8] sm:$0xf]  ;;  %v523_v28 = vmax.bf16 %v521_v16, %v519_v19 }
  0x47   :  { %v147_v27 = vld [vmem:[%s1385_s0 + $0x228] sm:$0xf]  ;;  %v84_v29 = vld [vmem:[%s1385_s0 + $0x12c] sm:$0xf]  ;;  %v546_v30 = vmax.bf16 %v544_v23, %v541_v22  ;;  %v529_v31 = vsel %vm153_vm0, %v115_v18, 4286644096 }
  0x48   :  { %v100_v32 = vld [vmem:[%s1385_s0 + $0x16c] sm:$0xf]  ;;  %v552_v33 = vsel %vm153_vm0, %v68_v21, 4286644096  ;;  %v504_v34 = vmax.bf16 %v502_v15, %v500_v25  ;;  %v527_v35 = vmax.bf16 %v525_v20, %v523_v28  ;;  %v21_v37 = vld [vmem:[%s1385_s0 + $0x30] sm:$0xf] }
  0x49   :  { %v550_v36 = vmax.bf16 %v548_v24, %v546_v30  ;;  %v37_v38 = vld [vmem:[%s1385_s0 + $0x70] sm:$0xf]  ;;  %v533_v40 = vsel %vm153_vm0, %v131_v26, 4286644096  ;;  %v537_v41 = vsel %vm153_vm0, %v147_v27, 4286644096 }
  0x4a   :  { %v53_v39 = vld [vmem:[%s1385_s0 + $0xb0] sm:$0xf]  ;;  %v556_v42 = vsel %vm153_vm0, %v84_v29, 4286644096  ;;  %724 = vst.msk [vmem:[%s1386_s1 + $0x24] sm:$0xf] %vm153_vm0, %v504_v34  ;;  %v531_v43 = vmax.bf16 %v529_v31, %v527_v35 }
  0x4b   :  { %v116_v44 = vld [vmem:[%s1385_s0 + $0x1ac] sm:$0xf]  ;;  %v554_v45 = vmax.bf16 %v552_v33, %v550_v36  ;;  %v560_v46 = vsel %vm153_vm0, %v100_v32, 4286644096  ;;  %v69_v47 = vld [vmem:[%s1385_s0 + $0xf0] sm:$0xf] }
  0x4c   :  { %v576_v48 = vsel %vm153_vm0, %v21_v37, 4286644096  ;;  %v579_v49 = vsel %vm153_vm0, %v37_v38, 4286644096  ;;  %v583_v50 = vsel %vm153_vm0, %v53_v39, 4286644096  ;;  %v535_v51 = vmax.bf16 %v533_v40, %v531_v43 }
  0x4d   :  { %v132_v52 = vld [vmem:[%s1385_s0 + $0x1ec] sm:$0xf]  ;;  %v558_v54 = vmax.bf16 %v556_v42, %v554_v45  ;;  %v85_v55 = vld [vmem:[%s1385_s0 + $0x130] sm:$0xf]  ;;  %v581_v56 = vmax.bf16 %v579_v49, %v576_v48  ;;  %v564_v57 = vsel %vm153_vm0, %v116_v44, 4286644096 }
  0x4e   :  { %v148_v53 = vld [vmem:[%s1385_s0 + $0x22c] sm:$0xf]  ;;  %v101_v58 = vld [vmem:[%s1385_s0 + $0x170] sm:$0xf]  ;;  %v587_v59 = vsel %vm153_vm0, %v69_v47, 4286644096  ;;  %v539_v60 = vmax.bf16 %v537_v41, %v535_v51 }
  0x4f   :  { %v562_v61 = vmax.bf16 %v560_v46, %v558_v54  ;;  %v585_v62 = vmax.bf16 %v583_v50, %v581_v56  ;;  %v22_v63 = vld [vmem:[%s1385_s0 + $0x34] sm:$0xf]  ;;  %v568_v2 = vsel %vm153_vm0, %v132_v52, 4286644096  ;;  %v572_v3 = vsel %vm153_vm0, %v148_v53, 4286644096 }
  0x50   :  { %v38_v0 = vld [vmem:[%s1385_s0 + $0x74] sm:$0xf]  ;;  %v591_v4 = vsel %vm153_vm0, %v85_v55, 4286644096  ;;  %725 = vst.msk [vmem:[%s1386_s1 + $0x28] sm:$0xf] %vm153_vm0, %v539_v60 }
  0x51   :  { %v54_v1 = vld [vmem:[%s1385_s0 + $0xb4] sm:$0xf]  ;;  %v566_v5 = vmax.bf16 %v564_v57, %v562_v61  ;;  %v117_v6 = vld [vmem:[%s1385_s0 + $0x1b0] sm:$0xf]  ;;  %v589_v7 = vmax.bf16 %v587_v59, %v585_v62  ;;  %v595_v8 = vsel %vm153_vm0, %v101_v58, 4286644096 }
  0x52   :  { %v70_v9 = vld [vmem:[%s1385_s0 + $0xf4] sm:$0xf]  ;;  %v611_v10 = vsel %vm153_vm0, %v22_v63, 4286644096  ;;  %v614_v11 = vsel %vm153_vm0, %v38_v0, 4286644096 }
  0x53   :  { %v618_v12 = vsel %vm153_vm0, %v54_v1, 4286644096  ;;  %v570_v13 = vmax.bf16 %v568_v2, %v566_v5  ;;  %v133_v14 = vld [vmem:[%s1385_s0 + $0x1f0] sm:$0xf]  ;;  %v593_v16 = vmax.bf16 %v591_v4, %v589_v7  ;;  %v86_v17 = vld [vmem:[%s1385_s0 + $0x134] sm:$0xf]  ;;  %v616_v18 = vmax.bf16 %v614_v11, %v611_v10 }
  0x54   :  { %v149_v15 = vld [vmem:[%s1385_s0 + $0x230] sm:$0xf]  ;;  %v599_v19 = vsel %vm153_vm0, %v117_v6, 4286644096  ;;  %v102_v20 = vld [vmem:[%s1385_s0 + $0x174] sm:$0xf] }
  0x55   :  { %v622_v21 = vsel %vm153_vm0, %v70_v9, 4286644096  ;;  %v574_v22 = vmax.bf16 %v572_v3, %v570_v13  ;;  %v597_v23 = vmax.bf16 %v595_v8, %v593_v16  ;;  %v620_v24 = vmax.bf16 %v618_v12, %v616_v18  ;;  %v23_v25 = vld [vmem:[%s1385_s0 + $0x38] sm:$0xf]  ;;  %v118_v32 = vld [vmem:[%s1385_s0 + $0x1b4] sm:$0xf] }
  0x56   :  { %v39_v26 = vld [vmem:[%s1385_s0 + $0x78] sm:$0xf]  ;;  %v603_v28 = vsel %vm153_vm0, %v133_v14, 4286644096  ;;  %v607_v29 = vsel %vm153_vm0, %v149_v15, 4286644096 }
  0x57   :  { %v55_v27 = vld [vmem:[%s1385_s0 + $0xb8] sm:$0xf]  ;;  %v626_v30 = vsel %vm153_vm0, %v86_v17, 4286644096  ;;  %726 = vst.msk [vmem:[%s1386_s1 + $0x2c] sm:$0xf] %vm153_vm0, %v574_v22  ;;  %v601_v31 = vmax.bf16 %v599_v19, %v597_v23  ;;  %v624_v33 = vmax.bf16 %v622_v21, %v620_v24 }
  0x58   :  { %v630_v34 = vsel %vm153_vm0, %v102_v20, 4286644096  ;;  %v71_v35 = vld [vmem:[%s1385_s0 + $0xf8] sm:$0xf]  ;;  %v646_v36 = vsel %vm153_vm0, %v23_v25, 4286644096 }
  0x59   :  { %v649_v37 = vsel %vm153_vm0, %v39_v26, 4286644096  ;;  %v653_v38 = vsel %vm153_vm0, %v55_v27, 4286644096  ;;  %v605_v39 = vmax.bf16 %v603_v28, %v601_v31  ;;  %v134_v40 = vld [vmem:[%s1385_s0 + $0x1f4] sm:$0xf]  ;;  %v628_v42 = vmax.bf16 %v626_v30, %v624_v33 }
  0x5a   :  { %v150_v41 = vld [vmem:[%s1385_s0 + $0x234] sm:$0xf]  ;;  %v87_v43 = vld [vmem:[%s1385_s0 + $0x138] sm:$0xf]  ;;  %v651_v44 = vmax.bf16 %v649_v37, %v646_v36  ;;  %v634_v45 = vsel %vm153_vm0, %v118_v32, 4286644096 }
  0x5b   :  { %v103_v46 = vld [vmem:[%s1385_s0 + $0x178] sm:$0xf]  ;;  %v657_v47 = vsel %vm153_vm0, %v71_v35, 4286644096  ;;  %v609_v48 = vmax.bf16 %v607_v29, %v605_v39  ;;  %v632_v49 = vmax.bf16 %v630_v34, %v628_v42  ;;  %v24_v51 = vld [vmem:[%s1385_s0 + $0x3c] sm:$0xf] }
  0x5c   :  { %v655_v50 = vmax.bf16 %v653_v38, %v651_v44  ;;  %v40_v52 = vld [vmem:[%s1385_s0 + $0x7c] sm:$0xf]  ;;  %v638_v54 = vsel %vm153_vm0, %v134_v40, 4286644096  ;;  %v642_v55 = vsel %vm153_vm0, %v150_v41, 4286644096 }
  0x5d   :  { %v56_v53 = vld [vmem:[%s1385_s0 + $0xbc] sm:$0xf]  ;;  %v661_v56 = vsel %vm153_vm0, %v87_v43, 4286644096  ;;  %727 = vst.msk [vmem:[%s1386_s1 + $0x30] sm:$0xf] %vm153_vm0, %v609_v48  ;;  %v636_v57 = vmax.bf16 %v634_v45, %v632_v49 }
  0x5e   :  { %v119_v58 = vld [vmem:[%s1385_s0 + $0x1b8] sm:$0xf]  ;;  %v659_v59 = vmax.bf16 %v657_v47, %v655_v50  ;;  %v665_v60 = vsel %vm153_vm0, %v103_v46, 4286644096  ;;  %v72_v61 = vld [vmem:[%s1385_s0 + $0xfc] sm:$0xf] }
  0x5f   :  { %v681_v62 = vsel %vm153_vm0, %v24_v51, 4286644096  ;;  %v684_v63 = vsel %vm153_vm0, %v40_v52, 4286644096  ;;  %v688_v0 = vsel %vm153_vm0, %v56_v53, 4286644096  ;;  %v640_v1 = vmax.bf16 %v638_v54, %v636_v57 }
  0x60   :  { %v135_v2 = vld [vmem:[%s1385_s0 + $0x1f8] sm:$0xf]  ;;  %v663_v3 = vmax.bf16 %v661_v56, %v659_v59  ;;  %v88_v4 = vld [vmem:[%s1385_s0 + $0x13c] sm:$0xf]  ;;  %v686_v5 = vmax.bf16 %v684_v63, %v681_v62  ;;  %v669_v6 = vsel %vm153_vm0, %v119_v58, 4286644096 }
  0x61   :  { %v692_v7 = vsel %vm153_vm0, %v72_v61, 4286644096  ;;  %v644_v8 = vmax.bf16 %v642_v55, %v640_v1  ;;  %v151_v9 = vld [vmem:[%s1385_s0 + $0x238] sm:$0xf]  ;;  %v104_v11 = vld [vmem:[%s1385_s0 + $0x17c] sm:$0xf] }
  0x62   :  { %v667_v10 = vmax.bf16 %v665_v60, %v663_v3  ;;  %v690_v12 = vmax.bf16 %v688_v0, %v686_v5  ;;  %v673_v13 = vsel %vm153_vm0, %v135_v2, 4286644096  ;;  %v696_v14 = vsel %vm153_vm0, %v88_v4, 4286644096  ;;  %v120_v16 = vld [vmem:[%s1385_s0 + $0x1bc] sm:$0xf] }
  0x63   :  { %728 = vst.msk [vmem:[%s1386_s1 + $0x34] sm:$0xf] %vm153_vm0, %v644_v8  ;;  %v677_v18 = vsel %vm153_vm0, %v151_v9, 4286644096  ;;  %v700_v19 = vsel %vm153_vm0, %v104_v11, 4286644096 }
  0x64   :  { %v671_v15 = vmax.bf16 %v669_v6, %v667_v10  ;;  %v694_v17 = vmax.bf16 %v692_v7, %v690_v12  ;;  %v136_v21 = vld [vmem:[%s1385_s0 + $0x1fc] sm:$0xf]  ;;  %v704_v23 = vsel %vm153_vm0, %v120_v16, 4286644096 }
  0x65   :  { %v152_v25 = vld [vmem:[%s1385_s0 + $0x23c] sm:$0xf]  ;;  %v708_v27 = vsel %vm153_vm0, %v136_v21, 4286644096 }
  0x66   :  { %v675_v20 = vmax.bf16 %v673_v13, %v671_v15  ;;  %v698_v22 = vmax.bf16 %v696_v14, %v694_v17  ;;  %v712_v29 = vsel %vm153_vm0, %v152_v25, 4286644096 }
  0x68   :  { %v679_v24 = vmax.bf16 %v677_v18, %v675_v20  ;;  %v702_v26 = vmax.bf16 %v700_v19, %v698_v22 }
  0x6a   :  { %729 = vst.msk [vmem:[%s1386_s1 + $0x38] sm:$0xf] %vm153_vm0, %v679_v24  ;;  %v706_v28 = vmax.bf16 %v704_v23, %v702_v26 }
  0x6c   :  { %v710_v30 = vmax.bf16 %v708_v27, %v706_v28 }
  0x6e   :  { %v714_v31 = vmax.bf16 %v712_v29, %v710_v30 }
  0x70   :  { %730 = vst.msk [vmem:[%s1386_s1 + $0x3c] sm:$0xf] %vm153_vm0, %v714_v31 }

// kernel: pothole_detector_forward.24
= control target key start
LH: loop header
LB: loop body
LE: loop exit
PB: predicated region body
PF: predicated region fallthrough
CT: control target
= control target key end

     0   :  { %vm22_vm0 = vcmask 523264   ;;  %vm1084_vm1 = vcmask 519168   ;;  %s1924_s1 = inlined_call_operand.vmem [shape: bf16[576,64], index: 1, kind: input, shape index: {}]   ;;  %s1925_s0 = inlined_call_operand.vmem [shape: bf16[128,576], index: 0, kind: input, shape index: {}]   ;;  %s1926_s2 = inlined_call_operand.vmem [shape: f32[1,64], index: 2, kind: input, shape index: {}]   ;;  %s1927_s3 = inlined_call_operand.vmem [shape: f32[1,64], index: 3, kind: input, shape index: {}]   ;;  %s1928_s4 = inlined_call_operand.vmem [shape: bf16[128,64], index: 4, kind: output, shape index: {}]  }
   0x1   :  { %v1396_v0 = vld [vmem:[%s1924_s1 + $0x40] sm:$0xff]   ;;  %v1400_v4 = vld [vmem:[%s1924_s1 + $0x48] sm:$0xff]   ;;  %v1404_v8 = vld [vmem:[%s1924_s1 + $0x50] sm:$0xff]  }
   0x2   :  { %v1397_v1 = vld [vmem:[%s1924_s1 + $0xc0] sm:$0xff]   ;;  %1223 = vmatprep.subr.bf16.mxu0 %v1396_v0  ;;  %v1401_v5 = vld [vmem:[%s1924_s1 + $0xc8] sm:$0xff]   ;;  %v1405_v9 = vld [vmem:[%s1924_s1 + $0xd0] sm:$0xff]  }
   0x3   :  { %v1398_v2 = vld [vmem:[%s1924_s1] sm:$0xff]   ;;  %1287 = vmatprep.subr.bf16.mxu1 %v1397_v1  ;;  %v1402_v6 = vld [vmem:[%s1924_s1 + $0x8] sm:$0xff]   ;;  %v1406_v10 = vld [vmem:[%s1924_s1 + $0x10] sm:$0xff]  }
   0x4   :  { %v1399_v3 = vld [vmem:[%s1924_s1 + $0x80] sm:$0xff]   ;;  %1224 = vmatpush3.bf16.msra.mxu0 %v1398_v2  ;;  %v1403_v7 = vld [vmem:[%s1924_s1 + $0x88] sm:$0xff]   ;;  %v1407_v11 = vld [vmem:[%s1924_s1 + $0x90] sm:$0xff]  }
   0x5   :  { %1288 = vmatpush3.bf16.msra.mxu1 %v1399_v3  ;;  %1225 = vmatprep.subr.bf16.mxu0 %v1400_v4  ;;  %v1408_v12 = vld [vmem:[%s1924_s1 + $0x58] sm:$0xff]   ;;  %v1412_v16 = vld [vmem:[%s1924_s1 + $0x60] sm:$0xff]   ;;  %v1416_v20 = vld [vmem:[%s1924_s1 + $0x68] sm:$0xff]  }
   0x6   :  { %1289 = vmatprep.subr.bf16.mxu1 %v1401_v5  ;;  %v1409_v13 = vld [vmem:[%s1924_s1 + $0xd8] sm:$0xff]   ;;  %v1413_v17 = vld [vmem:[%s1924_s1 + $0xe0] sm:$0xff]   ;;  %v1417_v21 = vld [vmem:[%s1924_s1 + $0xe8] sm:$0xff]  }
   0x7   :  { %v1410_v14 = vld [vmem:[%s1924_s1 + $0x18] sm:$0xff]   ;;  %v1414_v18 = vld [vmem:[%s1924_s1 + $0x20] sm:$0xff]   ;;  %v1418_v22 = vld [vmem:[%s1924_s1 + $0x28] sm:$0xff]  }
   0x8   :  { %1226 = vmatpush3.bf16.msra.mxu0 %v1402_v6  ;;  %v1411_v15 = vld [vmem:[%s1924_s1 + $0x98] sm:$0xff]   ;;  %v1415_v19 = vld [vmem:[%s1924_s1 + $0xa0] sm:$0xff]   ;;  %v1419_v23 = vld [vmem:[%s1924_s1 + $0xa8] sm:$0xff]  }
   0x9   :  { %1290 = vmatpush3.bf16.msra.mxu1 %v1403_v7  ;;  %1227 = vmatprep.subr.bf16.mxu0 %v1404_v8  ;;  %v1420_v24 = vld [vmem:[%s1924_s1 + $0x70] sm:$0xff]   ;;  %v1424_v28 = vld [vmem:[%s1924_s1 + $0x78] sm:$0xff]   ;;  %v1433_v35 = vld [vmem:[%s1925_s0 + $0xc] ss:$20 sps:$4 sm:$0xff]  }
   0xa   :  { %1291 = vmatprep.subr.bf16.mxu1 %v1405_v9  ;;  %v1421_v25 = vld [vmem:[%s1924_s1 + $0xf0] sm:$0xff]   ;;  %v1425_v29 = vld [vmem:[%s1924_s1 + $0xf8] sm:$0xff]   ;;  %v1434_v36 = vld [vmem:[%s1924_s1 + $0x100] sm:$0xff]   ;;  %745 = vmatprep.mubr.bf16.mxu1 %v1433_v35 }
   0xb   :  { %v1422_v26 = vld [vmem:[%s1924_s1 + $0x30] sm:$0xff]   ;;  %v1426_v30 = vld [vmem:[%s1924_s1 + $0x38] sm:$0xff]   ;;  %v1435_v37 = vld [vmem:[%s1925_s0 + $0x2c] ss:$20 sps:$4 sm:$0xff]  }
   0xc   :  { %1228 = vmatpush3.bf16.msra.mxu0 %v1406_v10  ;;  %v1423_v27 = vld [vmem:[%s1924_s1 + $0xb0] sm:$0xff]   ;;  %v1427_v31 = vld [vmem:[%s1924_s1 + $0xb8] sm:$0xff]   ;;  %v1447_v42 = vld [vmem:[%s1924_s1 + $0x108] sm:$0xff]  }
   0xd   :  { %1292 = vmatpush3.bf16.msra.mxu1 %v1407_v11  ;;  %1229 = vmatprep.subr.bf16.mxu0 %v1408_v12  ;;  %v1428_v32 = vld [vmem:[%s1925_s0] ss:$20 sps:$4 sm:$0xff]   ;;  %v1430_v33 = vld [vmem:[%s1925_s0 + $0x4] ss:$20 sps:$4 sm:$0xff]   ;;  %v1431_v34 = vld [vmem:[%s1925_s0 + $0x8] ss:$20 sps:$4 sm:$0xff]  }
   0xe   :  { %1293 = vmatprep.subr.bf16.mxu1 %v1409_v13  ;;  %648 = vmatprep.mubr.bf16.mxu0 %v1430_v33  ;;  %v1437_v38 = vld [vmem:[%s1925_s0 + $0x34] ss:$20 sps:$4 sm:$0xff]   ;;  %v1440_v40 = vld [vmem:[%s1925_s0 + $0x30] ss:$20 sps:$4 sm:$0xff]   ;;  %v1446_v45 = vld [vmem:[%s1925_s0 + $0x58] ss:$20 sps:$4 sm:$0xff]  }
   0xf   :  { %v1439_v39 = vld [vmem:[%s1925_s0 + $0x28] ss:$20 sps:$4 sm:$0xff]   ;;  %v1445_v44 = vld [vmem:[%s1925_s0 + $0x50] ss:$20 sps:$4 sm:$0xff]   ;;  %v1452_v50 = vld [vmem:[%s1925_s0 + $0x78] ss:$20 sps:$4 sm:$0xff]  }
  0x10   :  { %1230 = vmatpush3.bf16.msra.mxu0 %v1410_v14  ;;  %v1441_v41 = vld [vmem:[%s1925_s0 + $0x54] ss:$20 sps:$4 sm:$0xff]   ;;  %v1443_v43 = vld [vmem:[%s1925_s0 + $0x5c] ss:$20 sps:$4 sm:$0xff]   ;;  %v1450_v48 = vld [vmem:[%s1925_s0 + $0x84] ss:$20 sps:$4 sm:$0xff]  }
  0x11   :  { %1294 = vmatpush3.bf16.msra.mxu1 %v1411_v15  ;;  %1231 = vmatprep.subr.bf16.mxu0 %v1412_v16  ;;  %v1460_v46 = vld [vmem:[%s1924_s1 + $0x110] sm:$0xff]   ;;  %v1473_v49 = vld [vmem:[%s1924_s1 + $0x118] sm:$0xff]   ;;  %v1456_v53 = vld [vmem:[%s1925_s0 + $0xac] ss:$20 sps:$4 sm:$0xff]   ;;  %v1488_v12 = vmov 0.0  }
  0x12   :  { %1295 = vmatprep.subr.bf16.mxu1 %v1413_v17  ;;  %v1448_v47 = vld [vmem:[%s1925_s0 + $0x7c] ss:$20 sps:$4 sm:$0xff]   ;;  %v1453_v51 = vld [vmem:[%s1925_s0 + $0x80] ss:$20 sps:$4 sm:$0xff]   ;;  %v1454_v52 = vld [vmem:[%s1925_s0 + $0xa4] ss:$20 sps:$4 sm:$0xff]  }
  0x13   :  { %v1458_v54 = vld [vmem:[%s1925_s0 + $0xa0] ss:$20 sps:$4 sm:$0xff]   ;;  %v1459_v55 = vld [vmem:[%s1925_s0 + $0xa8] ss:$20 sps:$4 sm:$0xff]   ;;  %v1466_v59 = vld [vmem:[%s1925_s0 + $0xd0] ss:$20 sps:$4 sm:$0xff]  }
  0x14   :  { %1232 = vmatpush3.bf16.msra.mxu0 %v1414_v18  ;;  %v1461_v56 = vld [vmem:[%s1925_s0 + $0xcc] ss:$20 sps:$4 sm:$0xff]   ;;  %v1463_v57 = vld [vmem:[%s1925_s0 + $0xd4] ss:$20 sps:$4 sm:$0xff]   ;;  %v1469_v61 = vld [vmem:[%s1925_s0 + $0xfc] ss:$20 sps:$4 sm:$0xff]  }
  0x15   :  { %1296 = vmatpush3.bf16.msra.mxu1 %v1415_v19  ;;  %1233 = vmatprep.subr.bf16.mxu0 %v1416_v20  ;;  %v1465_v58 = vld [vmem:[%s1925_s0 + $0xc8] ss:$20 sps:$4 sm:$0xff]   ;;  %v1471_v62 = vld [vmem:[%s1925_s0 + $0xf0] ss:$20 sps:$4 sm:$0xff]   ;;  %v1472_v63 = vld [vmem:[%s1925_s0 + $0xf8] ss:$20 sps:$4 sm:$0xff]  }
  0x16   :  { %1297 = vmatprep.subr.bf16.mxu1 %v1417_v21  ;;  %v1467_v60 = vld [vmem:[%s1925_s0 + $0xf4] ss:$20 sps:$4 sm:$0xff]   ;;  %v1474_v0 = vld [vmem:[%s1925_s0 + $0x11c] ss:$20 sps:$4 sm:$0xff]   ;;  %v1476_v1 = vld [vmem:[%s1925_s0 + $0x124] ss:$20 sps:$4 sm:$0xff]  }
  0x17   :  { %v1478_v2 = vld [vmem:[%s1925_s0 + $0x118] ss:$20 sps:$4 sm:$0xff]   ;;  %v1479_v3 = vld [vmem:[%s1925_s0 + $0x120] ss:$20 sps:$4 sm:$0xff]   ;;  %v1480_v4 = vld [vmem:[%s1925_s0 + $0x10] ss:$20 sps:$4 sm:$0xff]  }
  0x18   :  { %1234 = vmatpush3.bf16.msra.mxu0 %v1418_v22  ;;  %v1481_v5 = vld [vmem:[%s1925_s0 + $0xb0] ss:$20 sps:$4 sm:$0xff]   ;;  %v1482_v6 = vld [vmem:[%s1925_s0 + $0x38] ss:$20 sps:$4 sm:$0xff]   ;;  %v1484_v8 = vld [vmem:[%s1925_s0 + $0x60] ss:$20 sps:$4 sm:$0xff]  }
  0x19   :  { %1298 = vmatpush3.bf16.msra.mxu1 %v1419_v23  ;;  %1235 = vmatprep.subr.bf16.mxu0 %v1420_v24  ;;  %v1483_v7 = vld [vmem:[%s1925_s0 + $0xd8] ss:$20 sps:$4 sm:$0xff]   ;;  %v1485_v9 = vld [vmem:[%s1925_s0 + $0x100] ss:$20 sps:$4 sm:$0xff]   ;;  %v1486_v10 = vld [vmem:[%s1925_s0 + $0x88] ss:$20 sps:$4 sm:$0xff]  }
  0x1a   :  { %1299 = vmatprep.subr.bf16.mxu1 %v1421_v25  ;;  %v1487_v11 = vld [vmem:[%s1925_s0 + $0x128] ss:$20 sps:$4 sm:$0xff]   ;;  %25 = vst.msk [vmem:[#allocation2 + $0x10] sm:$0xff] %vm22_vm0, %v1488_v12  ;;  %23 = vst.msk [vmem:[#allocation2] sm:$0xff] %vm22_vm0, %v1488_v12 }
  0x1b   :  { %24 = vst.msk [vmem:[#allocation2 + $0x8] sm:$0xff] %vm22_vm0, %v1488_v12  ;;  %26 = vst.msk [vmem:[#allocation2 + $0x18] sm:$0xff] %vm22_vm0, %v1488_v12 }
  0x1c   :  { %1236 = vmatpush3.bf16.msra.mxu0 %v1422_v26  ;;  %27 = vst.msk [vmem:[#allocation2 + $0x20] sm:$0xff] %vm22_vm0, %v1488_v12  ;;  %28 = vst.msk [vmem:[#allocation2 + $0x28] sm:$0xff] %vm22_vm0, %v1488_v12 }
  0x1d   :  { %1300 = vmatpush3.bf16.msra.mxu1 %v1423_v27  ;;  %1237 = vmatprep.subr.bf16.mxu0 %v1424_v28  ;;  %29 = vst.msk [vmem:[#allocation2 + $0x30] sm:$0xff] %vm22_vm0, %v1488_v12  ;;  %30 = vst.msk [vmem:[#allocation2 + $0x38] sm:$0xff] %vm22_vm0, %v1488_v12 }
  0x1e   :  { %1301 = vmatprep.subr.bf16.mxu1 %v1425_v29  ;;  %31 = vst.msk [vmem:[#allocation2 + $0x40] sm:$0xff] %vm22_vm0, %v1488_v12  ;;  %32 = vst.msk [vmem:[#allocation2 + $0x48] sm:$0xff] %vm22_vm0, %v1488_v12 }
  0x1f   :  { %33 = vst.msk [vmem:[#allocation2 + $0x50] sm:$0xff] %vm22_vm0, %v1488_v12  ;;  %34 = vst.msk [vmem:[#allocation2 + $0x58] sm:$0xff] %vm22_vm0, %v1488_v12 }
  0x20   :  { %1238 = vmatpush3.bf16.msra.mxu0 %v1426_v30  ;;  %35 = vst.msk [vmem:[#allocation2 + $0x60] sm:$0xff] %vm22_vm0, %v1488_v12  ;;  %36 = vst.msk [vmem:[#allocation2 + $0x68] sm:$0xff] %vm22_vm0, %v1488_v12 }
  0x21   :  { %1302 = vmatpush3.bf16.msra.mxu1 %v1427_v31  ;;  %1363 = vmatprep.subr.bf16.mxu0 %v1434_v36  ;;  %37 = vst.msk [vmem:[#allocation2 + $0x70] sm:$0xff] %vm22_vm0, %v1488_v12  ;;  %38 = vst.msk [vmem:[#allocation2 + $0x78] sm:$0xff] %vm22_vm0, %v1488_v12 }
  0x22   :  { %1387 = vmatprep.subr.bf16.mxu1 %v1434_v36 }
  0x23   :  { %649 = vmatmul.mubr.bf16.vlgmr.msra.gmra.mrb[0].mxu0 %v1428_v32 }
  0x24   :  { %746 = vmatmul.mubr.bf16.vlgmr.msra.gmra.mrb[0].mxu1 %v1431_v34  ;;  %1364 = vmatpush3.bf16.msra.mxu0 %v1434_v36 }
  0x25   :  { %1391 = vmatpush3.bf16.msra.mxu1 %v1434_v36  ;;  %656 = vmatprep.mubr.bf16.mxu0 %v1435_v37 }
  0x26   :  { %753 = vmatprep.mubr.bf16.mxu1 %v1437_v38  ;;  %1365 = vmatprep.subr.bf16.mxu0 %v1447_v42 }
  0x27   :  { %1388 = vmatprep.subr.bf16.mxu1 %v1447_v42 }
  0x28   :  { %1366 = vmatpush3.bf16.msra.mxu0 %v1447_v42 }
  0x29   :  { %1392 = vmatpush3.bf16.msra.mxu1 %v1447_v42  ;;  %1367 = vmatprep.subr.bf16.mxu0 %v1460_v46 }
  0x2a   :  { %1389 = vmatprep.subr.bf16.mxu1 %v1460_v46 }
  0x2b   :  { %657 = vmatmul.mubr.bf16.gmra.mrb[4].mxu0 %v1439_v39 }
  0x2c   :  { %754 = vmatmul.mubr.bf16.gmra.mrb[4].mxu1 %v1440_v40  ;;  %664 = vmatprep.mubr.bf16.mxu0 %v1441_v41 }
  0x2d   :  { %761 = vmatprep.mubr.bf16.mxu1 %v1443_v43  ;;  %1368 = vmatpush3.bf16.msra.mxu0 %v1460_v46 }
  0x2e   :  { %1393 = vmatpush3.bf16.msra.mxu1 %v1460_v46  ;;  %1369 = vmatprep.subr.bf16.mxu0 %v1473_v49 }
  0x2f   :  { %1390 = vmatprep.subr.bf16.mxu1 %v1473_v49 }
  0x31   :  { %1370 = vmatpush3.bf16.msra.mxu0 %v1473_v49 }
  0x32   :  { %1394 = vmatpush3.bf16.msra.mxu1 %v1473_v49 }
  0x33   :  { %665 = vmatmul.mubr.bf16.gmra.mrb[8].mxu0 %v1445_v44 }
  0x34   :  { %762 = vmatmul.mubr.bf16.gmra.mrb[8].mxu1 %v1446_v45  ;;  %672 = vmatprep.mubr.bf16.mxu0 %v1448_v47 }
  0x35   :  { %769 = vmatprep.mubr.bf16.mxu1 %v1450_v48 }
  0x3b   :  { %673 = vmatmul.mubr.bf16.gmra.mrb[12].mxu0 %v1452_v50 }
  0x3c   :  { %770 = vmatmul.mubr.bf16.gmra.mrb[12].mxu1 %v1453_v51  ;;  %680 = vmatprep.mubr.bf16.mxu0 %v1454_v52 }
  0x3d   :  { %777 = vmatprep.mubr.bf16.mxu1 %v1456_v53 }
  0x43   :  { %681 = vmatmul.mubr.bf16.gmra.mrb[16].mxu0 %v1458_v54 }
  0x44   :  { %778 = vmatmul.mubr.bf16.gmra.mrb[16].mxu1 %v1459_v55  ;;  %688 = vmatprep.mubr.bf16.mxu0 %v1461_v56 }
  0x45   :  { %785 = vmatprep.mubr.bf16.mxu1 %v1463_v57 }
  0x4b   :  { %689 = vmatmul.mubr.bf16.gmra.mrb[20].mxu0 %v1465_v58 }
  0x4c   :  { %786 = vmatmul.mubr.bf16.gmra.mrb[20].mxu1 %v1466_v59  ;;  %696 = vmatprep.mubr.bf16.mxu0 %v1467_v60 }
  0x4d   :  { %793 = vmatprep.mubr.bf16.mxu1 %v1469_v61 }
  0x53   :  { %697 = vmatmul.mubr.bf16.gmra.mrb[24].mxu0 %v1471_v62 }
  0x54   :  { %794 = vmatmul.mubr.bf16.gmra.mrb[24].mxu1 %v1472_v63  ;;  %704 = vmatprep.mubr.bf16.mxu0 %v1474_v0 }
  0x55   :  { %801 = vmatprep.mubr.bf16.mxu1 %v1476_v1 }
  0x5b   :  { %705 = vmatmul.mubr.bf16.gmra.mrb[28].mxu0 %v1478_v2 }
  0x5c   :  { %802 = vmatmul.mubr.bf16.gmra.mrb[28].mxu1 %v1479_v3  ;;  %1371 = vmatprep.mubr.msk.bf16.mxu0 %vm22_vm0, %v1480_v4 }
  0x5d   :  { %1379 = vmatprep.mubr.msk.bf16.mxu1 %vm22_vm0, %v1481_v5 }
  0x63   :  { %1372 = vmatmul.mubr.msk.bf16.vlgmr.msra.gmra.mrb[32].mxu0 %vm22_vm0, %v1482_v6 }
  0x64   :  { %1380 = vmatmul.mubr.msk.bf16.vlgmr.msra.gmra.mrb[32].mxu1 %vm22_vm0, %v1483_v7  ;;  %1375 = vmatprep.mubr.msk.bf16.mxu0 %vm22_vm0, %v1484_v8 }
  0x65   :  { %1383 = vmatprep.mubr.msk.bf16.mxu1 %vm22_vm0, %v1485_v9 }
  0x6b   :  { %1376 = vmatmul.mubr.msk.bf16.gmra.mrb[36].mxu0 %vm22_vm0, %v1486_v10 }
  0x6c   :  { %1384 = vmatmul.mubr.msk.bf16.gmra.mrb[36].mxu1 %vm22_vm0, %v1487_v11 }
  0xf6   :  { %v1239_v13 = vpop.f32.mrb[0].mxu0 }
  0xf7   :  { %v1303_v14 = vpop.f32.mrb[0].mxu1  ;;  %v1240_v15 = vpop.f32.mrb[1].mxu0 }
  0xf8   :  { %v1241_v16 = vadd.f32 %v1240_v15, %v1239_v13  ;;  %v1304_v17 = vpop.f32.mrb[1].mxu1  ;;  %v1242_v18 = vpop.f32.mrb[2].mxu0 }
  0xf9   :  { %v1305_v19 = vadd.f32 %v1304_v17, %v1303_v14  ;;  %v1306_v20 = vpop.f32.mrb[2].mxu1  ;;  %v1243_v21 = vpop.f32.mrb[3].mxu0 }
  0xfa   :  { %v1244_v22 = vadd.f32 %v1243_v21, %v1242_v18  ;;  %v1307_v23 = vpop.f32.mrb[3].mxu1 }
  0xfb   :  { %v1308_v24 = vadd.f32 %v1307_v23, %v1306_v20  ;;  %v1766_v25 = vadd.f32 %v1305_v19, %v1241_v16 }
  0xfd   :  { %v1768_v26 = vadd.f32 %v1308_v24, %v1244_v22 }
  0xfe   :  { %v1245_v27 = vpop.f32.mrb[4].mxu0 }
  0xff   :  { %v1309_v28 = vpop.f32.mrb[4].mxu1  ;;  %v1246_v29 = vpop.f32.mrb[5].mxu0 }
 0x100   :  { %v1247_v30 = vadd.f32 %v1246_v29, %v1245_v27  ;;  %v1310_v31 = vpop.f32.mrb[5].mxu1  ;;  %v1248_v32 = vpop.f32.mrb[6].mxu0 }
 0x101   :  { %v1311_v33 = vadd.f32 %v1310_v31, %v1309_v28  ;;  %v1312_v34 = vpop.f32.mrb[6].mxu1  ;;  %v1249_v35 = vpop.f32.mrb[7].mxu0 }
 0x102   :  { %v1250_v36 = vadd.f32 %v1249_v35, %v1248_v32  ;;  %v1313_v37 = vpop.f32.mrb[7].mxu1 }
 0x103   :  { %v1314_v38 = vadd.f32 %v1313_v37, %v1312_v34  ;;  %v1770_v39 = vadd.f32 %v1311_v33, %v1247_v30 }
 0x105   :  { %v1772_v40 = vadd.f32 %v1314_v38, %v1250_v36 }
 0x106   :  { %v1251_v41 = vpop.f32.mrb[8].mxu0 }
 0x107   :  { %v1315_v42 = vpop.f32.mrb[8].mxu1  ;;  %v1252_v43 = vpop.f32.mrb[9].mxu0 }
 0x108   :  { %v1253_v44 = vadd.f32 %v1252_v43, %v1251_v41  ;;  %v1316_v45 = vpop.f32.mrb[9].mxu1  ;;  %v1254_v46 = vpop.f32.mrb[10].mxu0 }
 0x109   :  { %v1317_v47 = vadd.f32 %v1316_v45, %v1315_v42  ;;  %v1318_v48 = vpop.f32.mrb[10].mxu1  ;;  %v1255_v49 = vpop.f32.mrb[11].mxu0 }
 0x10a   :  { %v1256_v50 = vadd.f32 %v1255_v49, %v1254_v46  ;;  %v1319_v51 = vpop.f32.mrb[11].mxu1 }
 0x10b   :  { %v1320_v52 = vadd.f32 %v1319_v51, %v1318_v48  ;;  %v1774_v53 = vadd.f32 %v1317_v47, %v1253_v44 }
 0x10d   :  { %v1776_v54 = vadd.f32 %v1320_v52, %v1256_v50 }
 0x10e   :  { %v1257_v55 = vpop.f32.mrb[12].mxu0 }
 0x10f   :  { %v1321_v56 = vpop.f32.mrb[12].mxu1  ;;  %v1258_v57 = vpop.f32.mrb[13].mxu0 }
 0x110   :  { %v1259_v58 = vadd.f32 %v1258_v57, %v1257_v55  ;;  %v1322_v59 = vpop.f32.mrb[13].mxu1  ;;  %v1260_v60 = vpop.f32.mrb[14].mxu0 }
 0x111   :  { %v1323_v61 = vadd.f32 %v1322_v59, %v1321_v56  ;;  %v1324_v62 = vpop.f32.mrb[14].mxu1  ;;  %v1261_v63 = vpop.f32.mrb[15].mxu0 }
 0x112   :  { %v1262_v0 = vadd.f32 %v1261_v63, %v1260_v60  ;;  %v1325_v1 = vpop.f32.mrb[15].mxu1 }
 0x113   :  { %v1326_v2 = vadd.f32 %v1325_v1, %v1324_v62  ;;  %v1778_v3 = vadd.f32 %v1323_v61, %v1259_v58 }
 0x115   :  { %v1780_v4 = vadd.f32 %v1326_v2, %v1262_v0 }
 0x116   :  { %v1263_v5 = vpop.f32.mrb[16].mxu0 }
 0x117   :  { %v1327_v6 = vpop.f32.mrb[16].mxu1  ;;  %v1264_v7 = vpop.f32.mrb[17].mxu0 }
 0x118   :  { %v1265_v8 = vadd.f32 %v1264_v7, %v1263_v5  ;;  %v1328_v9 = vpop.f32.mrb[17].mxu1  ;;  %v1266_v10 = vpop.f32.mrb[18].mxu0  ;;  %v41_v5 = vld [vmem:[#allocation2 + $0x10] sm:$0xff] }
 0x119   :  { %v1329_v11 = vadd.f32 %v1328_v9, %v1327_v6  ;;  %v1330_v12 = vpop.f32.mrb[18].mxu1  ;;  %v1267_v13 = vpop.f32.mrb[19].mxu0 }
 0x11a   :  { %v1268_v14 = vadd.f32 %v1267_v13, %v1266_v10  ;;  %v1331_v15 = vpop.f32.mrb[19].mxu1  ;;  %v39_v10 = vld [vmem:[#allocation2] sm:$0xff] }
 0x11b   :  { %v1332_v16 = vadd.f32 %v1331_v15, %v1330_v12  ;;  %v780_v17 = vadd.f32 %v1329_v11, %v1265_v8  ;;  %v49_v8 = vld [vmem:[#allocation2 + $0x50] sm:$0xff] }
 0x11d   :  { %v1782_v18 = vadd.f32 %v1332_v16, %v1268_v14  ;;  %v47_v14 = vld [vmem:[#allocation2 + $0x40] sm:$0xff]  ;;  %v42_v16 = vld [vmem:[#allocation2 + $0x18] sm:$0xff] }
 0x11e   :  { %v1269_v19 = vpop.f32.mrb[20].mxu0 }
 0x11f   :  { %v1333_v20 = vpop.f32.mrb[20].mxu1  ;;  %v1270_v21 = vpop.f32.mrb[21].mxu0 }
 0x120   :  { %v1271_v22 = vadd.f32 %v1270_v21, %v1269_v19  ;;  %v1334_v23 = vpop.f32.mrb[21].mxu1  ;;  %v1272_v24 = vpop.f32.mrb[22].mxu0 }
 0x121   :  { %v1335_v27 = vadd.f32 %v1334_v23, %v1333_v20  ;;  %v1336_v28 = vpop.f32.mrb[22].mxu1  ;;  %v1273_v29 = vpop.f32.mrb[23].mxu0  ;;  %v50_v23 = vld [vmem:[#allocation2 + $0x58] sm:$0xff] }
 0x122   :  { %v1274_v30 = vadd.f32 %v1273_v29, %v1272_v24  ;;  %v1337_v31 = vpop.f32.mrb[23].mxu1 }
 0x123   :  { %v1338_v32 = vadd.f32 %v1337_v31, %v1336_v28  ;;  %v788_v33 = vadd.f32 %v1335_v27, %v1271_v22  ;;  %v40_v27 = vld [vmem:[#allocation2 + $0x8] sm:$0xff] }
 0x125   :  { %v791_v34 = vadd.f32 %v1338_v32, %v1274_v30  ;;  %v48_v32 = vld [vmem:[#allocation2 + $0x48] sm:$0xff] }
 0x126   :  { %v1275_v35 = vpop.f32.mrb[24].mxu0 }
 0x127   :  { %v1339_v36 = vpop.f32.mrb[24].mxu1  ;;  %v1276_v37 = vpop.f32.mrb[25].mxu0 }
 0x128   :  { %v1277_v38 = vadd.f32 %v1276_v37, %v1275_v35  ;;  %v1340_v41 = vpop.f32.mrb[25].mxu1  ;;  %v1278_v42 = vpop.f32.mrb[26].mxu0 }
 0x129   :  { %v1341_v43 = vadd.f32 %v1340_v41, %v1339_v36  ;;  %v1342_v44 = vpop.f32.mrb[26].mxu1  ;;  %v1279_v45 = vpop.f32.mrb[27].mxu0 }
 0x12a   :  { %v1280_v46 = vadd.f32 %v1279_v45, %v1278_v42  ;;  %v1343_v47 = vpop.f32.mrb[27].mxu1  ;;  %v43_v42 = vld [vmem:[#allocation2 + $0x20] sm:$0xff] }
 0x12b   :  { %v1344_v48 = vadd.f32 %v1343_v47, %v1342_v44  ;;  %v1784_v49 = vadd.f32 %v1341_v43, %v1277_v38  ;;  %v53_v38 = vld [vmem:[#allocation2 + $0x70] sm:$0xff]  ;;  %v1807_v44 = vld [vmem:[%s1926_s2] ss:$0 sm:$0xff] }
 0x12c   :  { %v51_v47 = vld [vmem:[#allocation2 + $0x60] sm:$0xff] }
 0x12d   :  { %v1786_v50 = vadd.f32 %v1344_v48, %v1280_v46 }
 0x12e   :  { %v1281_v51 = vpop.f32.mrb[28].mxu0 }
 0x12f   :  { %v1345_v52 = vpop.f32.mrb[28].mxu1  ;;  %v1282_v55 = vpop.f32.mrb[29].mxu0 }
 0x130   :  { %v1283_v56 = vadd.f32 %v1282_v55, %v1281_v51  ;;  %v1346_v57 = vpop.f32.mrb[29].mxu1  ;;  %v1284_v58 = vpop.f32.mrb[30].mxu0  ;;  %v46_v51 = vld [vmem:[#allocation2 + $0x38] sm:$0xff] }
 0x131   :  { %v1347_v59 = vadd.f32 %v1346_v57, %v1345_v52  ;;  %v1348_v60 = vpop.f32.mrb[30].mxu1  ;;  %v1285_v61 = vpop.f32.mrb[31].mxu0  ;;  %v54_v57 = vld [vmem:[#allocation2 + $0x78] sm:$0xff] }
 0x132   :  { %v1286_v62 = vadd.f32 %v1285_v61, %v1284_v58  ;;  %v1349_v63 = vpop.f32.mrb[31].mxu1 }
 0x133   :  { %v1350_v0 = vadd.f32 %v1349_v63, %v1348_v60  ;;  %v804_v1 = vadd.f32 %v1347_v59, %v1283_v56  ;;  %v44_v59 = vld [vmem:[#allocation2 + $0x28] sm:$0xff] }
 0x135   :  { %v1788_v2 = vadd.f32 %v1350_v0, %v1286_v62  ;;  %v1815_v62 = vld [vmem:[%s1927_s3] ss:$0 sm:$0xff] }
 0x136   :  { %v1373_v6 = vpop.f32.mrb[32].mxu0 }
 0x137   :  { %v853_v7 = vadd.f32 %v1373_v6, %v1770_v39  ;;  %v1381_v9 = vpop.f32.mrb[32].mxu1  ;;  %v844_v11 = vpop.f32.mrb[33].mxu0 }
 0x138   :  { %v885_v12 = vadd.f32 %v1381_v9, %v788_v33  ;;  %v845_v13 = vadd.f32 %v844_v11, %v1766_v25  ;;  %v876_v15 = vpop.f32.mrb[33].mxu1  ;;  %v1374_v19 = vpop.f32.mrb[34].mxu0 }
 0x139   :  { %v909_v20 = vadd.f32 %v853_v7, %v41_v5  ;;  %v877_v21 = vadd.f32 %v876_v15, %v780_v17  ;;  %v856_v22 = vadd.f32 %v1374_v19, %v1772_v40  ;;  %v1382_v24 = vpop.f32.mrb[34].mxu1  ;;  %v847_v28 = vpop.f32.mrb[35].mxu0  ;;  %v52_v5 = vld [vmem:[#allocation2 + $0x68] sm:$0xff] }
 0x13a   :  { %v917_v39 = vadd.f32 %v885_v12, %v49_v8  ;;  %v907_v29 = vadd.f32 %v845_v13, %v39_v10  ;;  %v888_v30 = vadd.f32 %v1382_v24, %v791_v34  ;;  %v848_v31 = vadd.f32 %v847_v28, %v1768_v26  ;;  %v879_v33 = vpop.f32.mrb[35].mxu1  ;;  %v45_v26 = vld [vmem:[#allocation2 + $0x30] sm:$0xff] }
 0x13b   :  { %925 = vst.msk [vmem:[#allocation2 + $0x10] sm:$0xff] %vm22_vm0, %v909_v20  ;;  %v915_v25 = vadd.f32 %v877_v21, %v47_v14  ;;  %v910_v35 = vadd.f32 %v856_v22, %v42_v16  ;;  %v880_v36 = vadd.f32 %v879_v33, %v1782_v18 }
 0x13c   :  { %933 = vst.msk [vmem:[#allocation2 + $0x50] sm:$0xff] %vm22_vm0, %v917_v39  ;;  %923 = vst.msk [vmem:[#allocation2] sm:$0xff] %vm22_vm0, %v907_v29  ;;  %v918_v40 = vadd.f32 %v888_v30, %v50_v23  ;;  %v908_v17 = vadd.f32 %v848_v31, %v40_v27 }
 0x13d   :  { %931 = vst.msk [vmem:[#allocation2 + $0x40] sm:$0xff] %vm22_vm0, %v915_v25  ;;  %926 = vst.msk [vmem:[#allocation2 + $0x18] sm:$0xff] %vm22_vm0, %v910_v35  ;;  %v916_v34 = vadd.f32 %v880_v36, %v48_v32 }
 0x13e   :  { %934 = vst.msk [vmem:[#allocation2 + $0x58] sm:$0xff] %vm22_vm0, %v918_v40  ;;  %924 = vst.msk [vmem:[#allocation2 + $0x8] sm:$0xff] %vm22_vm0, %v908_v17  ;;  %v1377_v37 = vpop.f32.mrb[36].mxu0 }
 0x13f   :  { %932 = vst.msk [vmem:[#allocation2 + $0x48] sm:$0xff] %vm22_vm0, %v916_v34  ;;  %v869_v18 = vadd.f32 %v1377_v37, %v1778_v3  ;;  %v1385_v41 = vpop.f32.mrb[36].mxu1  ;;  %v860_v43 = vpop.f32.mrb[37].mxu0 }
 0x140   :  { %v901_v45 = vadd.f32 %v1385_v41, %v804_v1  ;;  %v861_v46 = vadd.f32 %v860_v43, %v1774_v53  ;;  %v892_v48 = vpop.f32.mrb[37].mxu1  ;;  %v1378_v52 = vpop.f32.mrb[38].mxu0 }
 0x141   :  { %v913_v55 = vadd.f32 %v869_v18, %v45_v26  ;;  %v893_v3 = vadd.f32 %v892_v48, %v1784_v49  ;;  %v872_v56 = vadd.f32 %v1378_v52, %v1780_v4  ;;  %v1386_v58 = vpop.f32.mrb[38].mxu1  ;;  %v863_v60 = vpop.f32.mrb[39].mxu0 }
 0x142   :  { %v944_v61 = vld [vmem:[#allocation2 + $0x10] sm:$0xff]  ;;  %v921_v53 = vadd.f32 %v901_v45, %v53_v38  ;;  %v911_v63 = vadd.f32 %v861_v46, %v43_v42  ;;  %v904_v0 = vadd.f32 %v1386_v58, %v1788_v2  ;;  %v864_v1 = vadd.f32 %v863_v60, %v1776_v54  ;;  %v895_v49 = vpop.f32.mrb[39].mxu1 }
 0x143   :  { %v967_v4 = vmul.f32 %v1807_v44, %v944_v61  ;;  %v952_v6 = vld [vmem:[#allocation2 + $0x50] sm:$0xff]  ;;  %v942_v7 = vld [vmem:[#allocation2] sm:$0xff]  ;;  %929 = vst.msk [vmem:[#allocation2 + $0x30] sm:$0xff] %vm22_vm0, %v913_v55  ;;  %v919_v8 = vadd.f32 %v893_v3, %v51_v47  ;;  %v914_v9 = vadd.f32 %v872_v56, %v46_v51  ;;  %v896_v10 = vadd.f32 %v895_v49, %v1786_v50 }
 0x144   :  { %v975_v11 = vmul.f32 %v1807_v44, %v952_v6  ;;  %v965_v12 = vmul.f32 %v1807_v44, %v942_v7  ;;  %v950_v13 = vld [vmem:[#allocation2 + $0x40] sm:$0xff]  ;;  %v945_v2 = vld [vmem:[#allocation2 + $0x18] sm:$0xff]  ;;  %937 = vst.msk [vmem:[#allocation2 + $0x70] sm:$0xff] %vm22_vm0, %v921_v53  ;;  %927 = vst.msk [vmem:[#allocation2 + $0x20] sm:$0xff] %vm22_vm0, %v911_v63  ;;  %v922_v54 = vadd.f32 %v904_v0, %v54_v57 }
 0x145   :  { %v912_v14 = vadd.f32 %v864_v1, %v44_v59  ;;  %v990_v15 = vadd.f32 %v1815_v62, %v967_v4  ;;  %v973_v16 = vmul.f32 %v1807_v44, %v950_v13  ;;  %v968_v19 = vmul.f32 %v1807_v44, %v945_v2  ;;  %v953_v20 = vld [vmem:[#allocation2 + $0x58] sm:$0xff]  ;;  %v943_v50 = vld [vmem:[#allocation2 + $0x8] sm:$0xff]  ;;  %935 = vst.msk [vmem:[#allocation2 + $0x60] sm:$0xff] %vm22_vm0, %v919_v8 }
 0x146   :  { %930 = vst.msk [vmem:[#allocation2 + $0x38] sm:$0xff] %vm22_vm0, %v914_v9  ;;  %v920_v21 = vadd.f32 %v896_v10, %v52_v5  ;;  %v998_v22 = vadd.f32 %v1815_v62, %v975_v11  ;;  %v988_v23 = vadd.f32 %v1815_v62, %v965_v12  ;;  %v976_v24 = vmul.f32 %v1807_v44, %v953_v20  ;;  %v951_v28 = vld [vmem:[#allocation2 + $0x48] sm:$0xff] }
 0x147   :  { %v966_v27 = vmul.f32 %v1807_v44, %v943_v50  ;;  %938 = vst.msk [vmem:[#allocation2 + $0x78] sm:$0xff] %vm22_vm0, %v922_v54  ;;  %928 = vst.msk [vmem:[#allocation2 + $0x28] sm:$0xff] %vm22_vm0, %v912_v14  ;;  %v1006_v39 = vmax.f32 %v990_v15, 0.0  ;;  %v996_v29 = vadd.f32 %v1815_v62, %v973_v16  ;;  %v991_v30 = vadd.f32 %v1815_v62, %v968_v19 }
 0x148   :  { %v974_v31 = vmul.f32 %v1807_v44, %v951_v28  ;;  %936 = vst.msk [vmem:[#allocation2 + $0x68] sm:$0xff] %vm22_vm0, %v920_v21  ;;  %v1014_v32 = vmax.f32 %v998_v22, 0.0  ;;  %v1004_v33 = vmax.f32 %v988_v23, 0.0  ;;  %v999_v25 = vadd.f32 %v1815_v62, %v976_v24 }
 0x149   :  { %v989_v35 = vadd.f32 %v1815_v62, %v966_v27  ;;  %v1209_v36 = vpack.c.bf16 %v1006_v39, %v1006_v39  ;;  %v1012_v40 = vmax.f32 %v996_v29, 0.0  ;;  %v1007_v17 = vmax.f32 %v991_v30, 0.0 }
 0x14a   :  { %v997_v34 = vadd.f32 %v1815_v62, %v974_v31  ;;  %v1217_v26 = vpack.c.bf16 %v1014_v32, %v1014_v32  ;;  %v1207_v37 = vpack.c.bf16 %v1004_v33, %v1004_v33  ;;  %v1015_v18 = vmax.f32 %v999_v25, 0.0  ;;  %v948_v41 = vld [vmem:[#allocation2 + $0x30] sm:$0xff] }
 0x14b   :  { %v1005_v38 = vmax.f32 %v989_v35, 0.0  ;;  %1087 = vst.msk [vmem:[%s1928_s4 + $0x8] sm:$0xf] %vm1084_vm1, %v1209_v36  ;;  %v1215_v42 = vpack.c.bf16 %v1012_v40, %v1012_v40  ;;  %v1210_v43 = vpack.c.bf16 %v1007_v17, %v1007_v17  ;;  %v971_v46 = vmul.f32 %v1807_v44, %v948_v41  ;;  %v956_v47 = vld [vmem:[#allocation2 + $0x70] sm:$0xff]  ;;  %v946_v48 = vld [vmem:[#allocation2 + $0x20] sm:$0xff] }
 0x14c   :  { %v1013_v45 = vmax.f32 %v997_v34, 0.0  ;;  %1095 = vst.msk [vmem:[%s1928_s4 + $0x28] sm:$0xf] %vm1084_vm1, %v1217_v26  ;;  %1085 = vst.msk [vmem:[%s1928_s4] sm:$0xf] %vm1084_vm1, %v1207_v37  ;;  %v1218_v51 = vpack.c.bf16 %v1015_v18, %v1015_v18  ;;  %v979_v55 = vmul.f32 %v1807_v44, %v956_v47  ;;  %v969_v3 = vmul.f32 %v1807_v44, %v946_v48  ;;  %v954_v56 = vld [vmem:[#allocation2 + $0x60] sm:$0xff] }
 0x14d   :  { %v1208_v52 = vpack.c.bf16 %v1005_v38, %v1005_v38  ;;  %v949_v57 = vld [vmem:[#allocation2 + $0x38] sm:$0xff]  ;;  %1093 = vst.msk [vmem:[%s1928_s4 + $0x20] sm:$0xf] %vm1084_vm1, %v1215_v42  ;;  %1088 = vst.msk [vmem:[%s1928_s4 + $0xc] sm:$0xf] %vm1084_vm1, %v1210_v43  ;;  %v994_v59 = vadd.f32 %v1815_v62, %v971_v46  ;;  %v977_v60 = vmul.f32 %v1807_v44, %v954_v56 }
 0x14e   :  { %v1216_v58 = vpack.c.bf16 %v1013_v45, %v1013_v45  ;;  %v972_v61 = vmul.f32 %v1807_v44, %v949_v57  ;;  %v957_v53 = vld [vmem:[#allocation2 + $0x78] sm:$0xff]  ;;  %v947_v63 = vld [vmem:[#allocation2 + $0x28] sm:$0xff]  ;;  %1096 = vst.msk [vmem:[%s1928_s4 + $0x2c] sm:$0xf] %vm1084_vm1, %v1218_v51  ;;  %v1002_v0 = vadd.f32 %v1815_v62, %v979_v55  ;;  %v992_v1 = vadd.f32 %v1815_v62, %v969_v3 }
 0x14f   :  { %1086 = vst.msk [vmem:[%s1928_s4 + $0x4] sm:$0xf] %vm1084_vm1, %v1208_v52  ;;  %v980_v5 = vmul.f32 %v1807_v44, %v957_v53  ;;  %v970_v49 = vmul.f32 %v1807_v44, %v947_v63  ;;  %v955_v4 = vld [vmem:[#allocation2 + $0x68] sm:$0xff]  ;;  %v1010_v6 = vmax.f32 %v994_v59, 0.0  ;;  %v1000_v7 = vadd.f32 %v1815_v62, %v977_v60 }
 0x150   :  { %1094 = vst.msk [vmem:[%s1928_s4 + $0x24] sm:$0xf] %vm1084_vm1, %v1216_v58  ;;  %v995_v8 = vadd.f32 %v1815_v62, %v972_v61  ;;  %v978_v9 = vmul.f32 %v1807_v44, %v955_v4  ;;  %v1018_v10 = vmax.f32 %v1002_v0, 0.0  ;;  %v1008_v11 = vmax.f32 %v992_v1, 0.0 }
 0x151   :  { %v1003_v12 = vadd.f32 %v1815_v62, %v980_v5  ;;  %v993_v13 = vadd.f32 %v1815_v62, %v970_v49  ;;  %v1213_v2 = vpack.c.bf16 %v1010_v6, %v1010_v6  ;;  %v1016_v54 = vmax.f32 %v1000_v7, 0.0 }
 0x152   :  { %v1011_v14 = vmax.f32 %v995_v8, 0.0  ;;  %v1001_v15 = vadd.f32 %v1815_v62, %v978_v9  ;;  %v1221_v16 = vpack.c.bf16 %v1018_v10, %v1018_v10  ;;  %v1211_v19 = vpack.c.bf16 %v1008_v11, %v1008_v11 }
 0x153   :  { %v1019_v20 = vmax.f32 %v1003_v12, 0.0  ;;  %v1009_v50 = vmax.f32 %v993_v13, 0.0  ;;  %1091 = vst.msk [vmem:[%s1928_s4 + $0x18] sm:$0xf] %vm1084_vm1, %v1213_v2  ;;  %v1219_v44 = vpack.c.bf16 %v1016_v54, %v1016_v54 }
 0x154   :  { %v1214_v21 = vpack.c.bf16 %v1011_v14, %v1011_v14  ;;  %v1017_v22 = vmax.f32 %v1001_v15, 0.0  ;;  %1099 = vst.msk [vmem:[%s1928_s4 + $0x38] sm:$0xf] %vm1084_vm1, %v1221_v16  ;;  %1089 = vst.msk [vmem:[%s1928_s4 + $0x10] sm:$0xf] %vm1084_vm1, %v1211_v19 }
 0x155   :  { %v1222_v62 = vpack.c.bf16 %v1019_v20, %v1019_v20  ;;  %v1212_v23 = vpack.c.bf16 %v1009_v50, %v1009_v50  ;;  %1097 = vst.msk [vmem:[%s1928_s4 + $0x30] sm:$0xf] %vm1084_vm1, %v1219_v44 }
 0x156   :  { %1092 = vst.msk [vmem:[%s1928_s4 + $0x1c] sm:$0xf] %vm1084_vm1, %v1214_v21  ;;  %v1220_v24 = vpack.c.bf16 %v1017_v22, %v1017_v22 }
 0x157   :  { %1100 = vst.msk [vmem:[%s1928_s4 + $0x3c] sm:$0xf] %vm1084_vm1, %v1222_v62  ;;  %1090 = vst.msk [vmem:[%s1928_s4 + $0x14] sm:$0xf] %vm1084_vm1, %v1212_v23 }
 0x158   :  { %1098 = vst.msk [vmem:[%s1928_s4 + $0x34] sm:$0xf] %vm1084_vm1, %v1220_v24 }

// kernel: pothole_detector_forward.25
= control target key start
LH: loop header
LB: loop body
LE: loop exit
PB: predicated region body
PF: predicated region fallthrough
CT: control target
= control target key end

     0   :  { %vm25_vm0 = vcmask 523264   ;;  %vm1135_vm1 = vcmask 519168   ;;  %s2113_s1 = inlined_call_operand.vmem [shape: bf16[576,64], index: 1, kind: input, shape index: {}]   ;;  %s2114_s0 = inlined_call_operand.vmem [shape: bf16[128,576], index: 0, kind: input, shape index: {}]   ;;  %s2115_s4 = inlined_call_operand.vmem [shape: bf16[128,64], index: 4, kind: input, shape index: {}]   ;;  %s2116_s2 = inlined_call_operand.vmem [shape: f32[1,64], index: 2, kind: input, shape index: {}]   ;;  %s2117_s3 = inlined_call_operand.vmem [shape: f32[1,64], index: 3, kind: input, shape index: {}]   ;;  %s2118_s5 = inlined_call_operand.vmem [shape: bf16[128,64], index: 5, kind: output, shape index: {}]  }
   0x1   :  { %v1486_v0 = vld [vmem:[%s2113_s1 + $0x40] sm:$0xff]   ;;  %v1490_v4 = vld [vmem:[%s2113_s1 + $0x48] sm:$0xff]   ;;  %v1494_v8 = vld [vmem:[%s2113_s1 + $0x50] sm:$0xff]  }
   0x2   :  { %v1487_v1 = vld [vmem:[%s2113_s1 + $0xc0] sm:$0xff]   ;;  %1313 = vmatprep.subr.bf16.mxu0 %v1486_v0  ;;  %v1491_v5 = vld [vmem:[%s2113_s1 + $0xc8] sm:$0xff]   ;;  %v1495_v9 = vld [vmem:[%s2113_s1 + $0xd0] sm:$0xff]  }
   0x3   :  { %v1488_v2 = vld [vmem:[%s2113_s1] sm:$0xff]   ;;  %1377 = vmatprep.subr.bf16.mxu1 %v1487_v1  ;;  %v1492_v6 = vld [vmem:[%s2113_s1 + $0x8] sm:$0xff]   ;;  %v1496_v10 = vld [vmem:[%s2113_s1 + $0x10] sm:$0xff]  }
   0x4   :  { %v1489_v3 = vld [vmem:[%s2113_s1 + $0x80] sm:$0xff]   ;;  %1314 = vmatpush3.bf16.msra.mxu0 %v1488_v2  ;;  %v1493_v7 = vld [vmem:[%s2113_s1 + $0x88] sm:$0xff]   ;;  %v1497_v11 = vld [vmem:[%s2113_s1 + $0x90] sm:$0xff]  }
   0x5   :  { %1378 = vmatpush3.bf16.msra.mxu1 %v1489_v3  ;;  %1315 = vmatprep.subr.bf16.mxu0 %v1490_v4  ;;  %v1498_v12 = vld [vmem:[%s2113_s1 + $0x58] sm:$0xff]   ;;  %v1502_v16 = vld [vmem:[%s2113_s1 + $0x60] sm:$0xff]   ;;  %v1506_v20 = vld [vmem:[%s2113_s1 + $0x68] sm:$0xff]  }
   0x6   :  { %1379 = vmatprep.subr.bf16.mxu1 %v1491_v5  ;;  %v1499_v13 = vld [vmem:[%s2113_s1 + $0xd8] sm:$0xff]   ;;  %v1503_v17 = vld [vmem:[%s2113_s1 + $0xe0] sm:$0xff]   ;;  %v1507_v21 = vld [vmem:[%s2113_s1 + $0xe8] sm:$0xff]  }
   0x7   :  { %v1500_v14 = vld [vmem:[%s2113_s1 + $0x18] sm:$0xff]   ;;  %v1504_v18 = vld [vmem:[%s2113_s1 + $0x20] sm:$0xff]   ;;  %v1508_v22 = vld [vmem:[%s2113_s1 + $0x28] sm:$0xff]  }
   0x8   :  { %1316 = vmatpush3.bf16.msra.mxu0 %v1492_v6  ;;  %v1501_v15 = vld [vmem:[%s2113_s1 + $0x98] sm:$0xff]   ;;  %v1505_v19 = vld [vmem:[%s2113_s1 + $0xa0] sm:$0xff]   ;;  %v1509_v23 = vld [vmem:[%s2113_s1 + $0xa8] sm:$0xff]  }
   0x9   :  { %1380 = vmatpush3.bf16.msra.mxu1 %v1493_v7  ;;  %1317 = vmatprep.subr.bf16.mxu0 %v1494_v8  ;;  %v1510_v24 = vld [vmem:[%s2113_s1 + $0x70] sm:$0xff]   ;;  %v1514_v28 = vld [vmem:[%s2113_s1 + $0x78] sm:$0xff]   ;;  %v1523_v35 = vld [vmem:[%s2114_s0 + $0xc] ss:$20 sps:$4 sm:$0xff]  }
   0xa   :  { %1381 = vmatprep.subr.bf16.mxu1 %v1495_v9  ;;  %v1511_v25 = vld [vmem:[%s2113_s1 + $0xf0] sm:$0xff]   ;;  %v1515_v29 = vld [vmem:[%s2113_s1 + $0xf8] sm:$0xff]   ;;  %v1524_v36 = vld [vmem:[%s2113_s1 + $0x100] sm:$0xff]   ;;  %748 = vmatprep.mubr.bf16.mxu1 %v1523_v35 }
   0xb   :  { %v1512_v26 = vld [vmem:[%s2113_s1 + $0x30] sm:$0xff]   ;;  %v1516_v30 = vld [vmem:[%s2113_s1 + $0x38] sm:$0xff]   ;;  %v1525_v37 = vld [vmem:[%s2114_s0 + $0x2c] ss:$20 sps:$4 sm:$0xff]  }
   0xc   :  { %1318 = vmatpush3.bf16.msra.mxu0 %v1496_v10  ;;  %v1513_v27 = vld [vmem:[%s2113_s1 + $0xb0] sm:$0xff]   ;;  %v1517_v31 = vld [vmem:[%s2113_s1 + $0xb8] sm:$0xff]   ;;  %v1537_v42 = vld [vmem:[%s2113_s1 + $0x108] sm:$0xff]  }
   0xd   :  { %1382 = vmatpush3.bf16.msra.mxu1 %v1497_v11  ;;  %1319 = vmatprep.subr.bf16.mxu0 %v1498_v12  ;;  %v1518_v32 = vld [vmem:[%s2114_s0] ss:$20 sps:$4 sm:$0xff]   ;;  %v1520_v33 = vld [vmem:[%s2114_s0 + $0x4] ss:$20 sps:$4 sm:$0xff]   ;;  %v1521_v34 = vld [vmem:[%s2114_s0 + $0x8] ss:$20 sps:$4 sm:$0xff]  }
   0xe   :  { %1383 = vmatprep.subr.bf16.mxu1 %v1499_v13  ;;  %651 = vmatprep.mubr.bf16.mxu0 %v1520_v33  ;;  %v1527_v38 = vld [vmem:[%s2114_s0 + $0x34] ss:$20 sps:$4 sm:$0xff]   ;;  %v1530_v40 = vld [vmem:[%s2114_s0 + $0x30] ss:$20 sps:$4 sm:$0xff]   ;;  %v1536_v45 = vld [vmem:[%s2114_s0 + $0x58] ss:$20 sps:$4 sm:$0xff]  }
   0xf   :  { %v1529_v39 = vld [vmem:[%s2114_s0 + $0x28] ss:$20 sps:$4 sm:$0xff]   ;;  %v1535_v44 = vld [vmem:[%s2114_s0 + $0x50] ss:$20 sps:$4 sm:$0xff]   ;;  %v1542_v50 = vld [vmem:[%s2114_s0 + $0x78] ss:$20 sps:$4 sm:$0xff]  }
  0x10   :  { %1320 = vmatpush3.bf16.msra.mxu0 %v1500_v14  ;;  %v1531_v41 = vld [vmem:[%s2114_s0 + $0x54] ss:$20 sps:$4 sm:$0xff]   ;;  %v1533_v43 = vld [vmem:[%s2114_s0 + $0x5c] ss:$20 sps:$4 sm:$0xff]   ;;  %v1540_v48 = vld [vmem:[%s2114_s0 + $0x84] ss:$20 sps:$4 sm:$0xff]  }
  0x11   :  { %1384 = vmatpush3.bf16.msra.mxu1 %v1501_v15  ;;  %1321 = vmatprep.subr.bf16.mxu0 %v1502_v16  ;;  %v1550_v46 = vld [vmem:[%s2113_s1 + $0x110] sm:$0xff]   ;;  %v1563_v49 = vld [vmem:[%s2113_s1 + $0x118] sm:$0xff]   ;;  %v1546_v53 = vld [vmem:[%s2114_s0 + $0xac] ss:$20 sps:$4 sm:$0xff]   ;;  %v1578_v12 = vmov 0.0  }
  0x12   :  { %1385 = vmatprep.subr.bf16.mxu1 %v1503_v17  ;;  %v1538_v47 = vld [vmem:[%s2114_s0 + $0x7c] ss:$20 sps:$4 sm:$0xff]   ;;  %v1543_v51 = vld [vmem:[%s2114_s0 + $0x80] ss:$20 sps:$4 sm:$0xff]   ;;  %v1544_v52 = vld [vmem:[%s2114_s0 + $0xa4] ss:$20 sps:$4 sm:$0xff]  }
  0x13   :  { %v1548_v54 = vld [vmem:[%s2114_s0 + $0xa0] ss:$20 sps:$4 sm:$0xff]   ;;  %v1549_v55 = vld [vmem:[%s2114_s0 + $0xa8] ss:$20 sps:$4 sm:$0xff]   ;;  %v1556_v59 = vld [vmem:[%s2114_s0 + $0xd0] ss:$20 sps:$4 sm:$0xff]  }
  0x14   :  { %1322 = vmatpush3.bf16.msra.mxu0 %v1504_v18  ;;  %v1551_v56 = vld [vmem:[%s2114_s0 + $0xcc] ss:$20 sps:$4 sm:$0xff]   ;;  %v1553_v57 = vld [vmem:[%s2114_s0 + $0xd4] ss:$20 sps:$4 sm:$0xff]   ;;  %v1559_v61 = vld [vmem:[%s2114_s0 + $0xfc] ss:$20 sps:$4 sm:$0xff]  }
  0x15   :  { %1386 = vmatpush3.bf16.msra.mxu1 %v1505_v19  ;;  %1323 = vmatprep.subr.bf16.mxu0 %v1506_v20  ;;  %v1555_v58 = vld [vmem:[%s2114_s0 + $0xc8] ss:$20 sps:$4 sm:$0xff]   ;;  %v1561_v62 = vld [vmem:[%s2114_s0 + $0xf0] ss:$20 sps:$4 sm:$0xff]   ;;  %v1562_v63 = vld [vmem:[%s2114_s0 + $0xf8] ss:$20 sps:$4 sm:$0xff]  }
  0x16   :  { %1387 = vmatprep.subr.bf16.mxu1 %v1507_v21  ;;  %v1557_v60 = vld [vmem:[%s2114_s0 + $0xf4] ss:$20 sps:$4 sm:$0xff]   ;;  %v1564_v0 = vld [vmem:[%s2114_s0 + $0x11c] ss:$20 sps:$4 sm:$0xff]   ;;  %v1566_v1 = vld [vmem:[%s2114_s0 + $0x124] ss:$20 sps:$4 sm:$0xff]  }
  0x17   :  { %v1568_v2 = vld [vmem:[%s2114_s0 + $0x118] ss:$20 sps:$4 sm:$0xff]   ;;  %v1569_v3 = vld [vmem:[%s2114_s0 + $0x120] ss:$20 sps:$4 sm:$0xff]   ;;  %v1570_v4 = vld [vmem:[%s2114_s0 + $0x10] ss:$20 sps:$4 sm:$0xff]  }
  0x18   :  { %1324 = vmatpush3.bf16.msra.mxu0 %v1508_v22  ;;  %v1571_v5 = vld [vmem:[%s2114_s0 + $0xb0] ss:$20 sps:$4 sm:$0xff]   ;;  %v1572_v6 = vld [vmem:[%s2114_s0 + $0x38] ss:$20 sps:$4 sm:$0xff]   ;;  %v1574_v8 = vld [vmem:[%s2114_s0 + $0x60] ss:$20 sps:$4 sm:$0xff]  }
  0x19   :  { %1388 = vmatpush3.bf16.msra.mxu1 %v1509_v23  ;;  %1325 = vmatprep.subr.bf16.mxu0 %v1510_v24  ;;  %v1573_v7 = vld [vmem:[%s2114_s0 + $0xd8] ss:$20 sps:$4 sm:$0xff]   ;;  %v1575_v9 = vld [vmem:[%s2114_s0 + $0x100] ss:$20 sps:$4 sm:$0xff]   ;;  %v1576_v10 = vld [vmem:[%s2114_s0 + $0x88] ss:$20 sps:$4 sm:$0xff]  }
  0x1a   :  { %1389 = vmatprep.subr.bf16.mxu1 %v1511_v25  ;;  %v1577_v11 = vld [vmem:[%s2114_s0 + $0x128] ss:$20 sps:$4 sm:$0xff]   ;;  %28 = vst.msk [vmem:[#allocation2 + $0x10] sm:$0xff] %vm25_vm0, %v1578_v12  ;;  %26 = vst.msk [vmem:[#allocation2] sm:$0xff] %vm25_vm0, %v1578_v12 }
  0x1b   :  { %27 = vst.msk [vmem:[#allocation2 + $0x8] sm:$0xff] %vm25_vm0, %v1578_v12  ;;  %29 = vst.msk [vmem:[#allocation2 + $0x18] sm:$0xff] %vm25_vm0, %v1578_v12 }
  0x1c   :  { %1326 = vmatpush3.bf16.msra.mxu0 %v1512_v26  ;;  %30 = vst.msk [vmem:[#allocation2 + $0x20] sm:$0xff] %vm25_vm0, %v1578_v12  ;;  %31 = vst.msk [vmem:[#allocation2 + $0x28] sm:$0xff] %vm25_vm0, %v1578_v12 }
  0x1d   :  { %1390 = vmatpush3.bf16.msra.mxu1 %v1513_v27  ;;  %1327 = vmatprep.subr.bf16.mxu0 %v1514_v28  ;;  %32 = vst.msk [vmem:[#allocation2 + $0x30] sm:$0xff] %vm25_vm0, %v1578_v12  ;;  %33 = vst.msk [vmem:[#allocation2 + $0x38] sm:$0xff] %vm25_vm0, %v1578_v12 }
  0x1e   :  { %1391 = vmatprep.subr.bf16.mxu1 %v1515_v29  ;;  %34 = vst.msk [vmem:[#allocation2 + $0x40] sm:$0xff] %vm25_vm0, %v1578_v12  ;;  %35 = vst.msk [vmem:[#allocation2 + $0x48] sm:$0xff] %vm25_vm0, %v1578_v12 }
  0x1f   :  { %36 = vst.msk [vmem:[#allocation2 + $0x50] sm:$0xff] %vm25_vm0, %v1578_v12  ;;  %37 = vst.msk [vmem:[#allocation2 + $0x58] sm:$0xff] %vm25_vm0, %v1578_v12 }
  0x20   :  { %1328 = vmatpush3.bf16.msra.mxu0 %v1516_v30  ;;  %38 = vst.msk [vmem:[#allocation2 + $0x60] sm:$0xff] %vm25_vm0, %v1578_v12  ;;  %39 = vst.msk [vmem:[#allocation2 + $0x68] sm:$0xff] %vm25_vm0, %v1578_v12 }
  0x21   :  { %1392 = vmatpush3.bf16.msra.mxu1 %v1517_v31  ;;  %1453 = vmatprep.subr.bf16.mxu0 %v1524_v36  ;;  %40 = vst.msk [vmem:[#allocation2 + $0x70] sm:$0xff] %vm25_vm0, %v1578_v12  ;;  %41 = vst.msk [vmem:[#allocation2 + $0x78] sm:$0xff] %vm25_vm0, %v1578_v12 }
  0x22   :  { %1477 = vmatprep.subr.bf16.mxu1 %v1524_v36 }
  0x23   :  { %652 = vmatmul.mubr.bf16.vlgmr.msra.gmra.mrb[0].mxu0 %v1518_v32 }
  0x24   :  { %749 = vmatmul.mubr.bf16.vlgmr.msra.gmra.mrb[0].mxu1 %v1521_v34  ;;  %1454 = vmatpush3.bf16.msra.mxu0 %v1524_v36 }
  0x25   :  { %1481 = vmatpush3.bf16.msra.mxu1 %v1524_v36  ;;  %659 = vmatprep.mubr.bf16.mxu0 %v1525_v37 }
  0x26   :  { %756 = vmatprep.mubr.bf16.mxu1 %v1527_v38  ;;  %1455 = vmatprep.subr.bf16.mxu0 %v1537_v42 }
  0x27   :  { %1478 = vmatprep.subr.bf16.mxu1 %v1537_v42 }
  0x28   :  { %1456 = vmatpush3.bf16.msra.mxu0 %v1537_v42 }
  0x29   :  { %1482 = vmatpush3.bf16.msra.mxu1 %v1537_v42  ;;  %1457 = vmatprep.subr.bf16.mxu0 %v1550_v46 }
  0x2a   :  { %1479 = vmatprep.subr.bf16.mxu1 %v1550_v46 }
  0x2b   :  { %660 = vmatmul.mubr.bf16.gmra.mrb[4].mxu0 %v1529_v39 }
  0x2c   :  { %757 = vmatmul.mubr.bf16.gmra.mrb[4].mxu1 %v1530_v40  ;;  %667 = vmatprep.mubr.bf16.mxu0 %v1531_v41 }
  0x2d   :  { %764 = vmatprep.mubr.bf16.mxu1 %v1533_v43  ;;  %1458 = vmatpush3.bf16.msra.mxu0 %v1550_v46 }
  0x2e   :  { %1483 = vmatpush3.bf16.msra.mxu1 %v1550_v46  ;;  %1459 = vmatprep.subr.bf16.mxu0 %v1563_v49 }
  0x2f   :  { %1480 = vmatprep.subr.bf16.mxu1 %v1563_v49 }
  0x31   :  { %1460 = vmatpush3.bf16.msra.mxu0 %v1563_v49 }
  0x32   :  { %1484 = vmatpush3.bf16.msra.mxu1 %v1563_v49 }
  0x33   :  { %668 = vmatmul.mubr.bf16.gmra.mrb[8].mxu0 %v1535_v44 }
  0x34   :  { %765 = vmatmul.mubr.bf16.gmra.mrb[8].mxu1 %v1536_v45  ;;  %675 = vmatprep.mubr.bf16.mxu0 %v1538_v47 }
  0x35   :  { %772 = vmatprep.mubr.bf16.mxu1 %v1540_v48 }
  0x3b   :  { %676 = vmatmul.mubr.bf16.gmra.mrb[12].mxu0 %v1542_v50 }
  0x3c   :  { %773 = vmatmul.mubr.bf16.gmra.mrb[12].mxu1 %v1543_v51  ;;  %683 = vmatprep.mubr.bf16.mxu0 %v1544_v52 }
  0x3d   :  { %780 = vmatprep.mubr.bf16.mxu1 %v1546_v53 }
  0x43   :  { %684 = vmatmul.mubr.bf16.gmra.mrb[16].mxu0 %v1548_v54 }
  0x44   :  { %781 = vmatmul.mubr.bf16.gmra.mrb[16].mxu1 %v1549_v55  ;;  %691 = vmatprep.mubr.bf16.mxu0 %v1551_v56 }
  0x45   :  { %788 = vmatprep.mubr.bf16.mxu1 %v1553_v57 }
  0x4b   :  { %692 = vmatmul.mubr.bf16.gmra.mrb[20].mxu0 %v1555_v58 }
  0x4c   :  { %789 = vmatmul.mubr.bf16.gmra.mrb[20].mxu1 %v1556_v59  ;;  %699 = vmatprep.mubr.bf16.mxu0 %v1557_v60 }
  0x4d   :  { %796 = vmatprep.mubr.bf16.mxu1 %v1559_v61 }
  0x53   :  { %700 = vmatmul.mubr.bf16.gmra.mrb[24].mxu0 %v1561_v62 }
  0x54   :  { %797 = vmatmul.mubr.bf16.gmra.mrb[24].mxu1 %v1562_v63  ;;  %707 = vmatprep.mubr.bf16.mxu0 %v1564_v0 }
  0x55   :  { %804 = vmatprep.mubr.bf16.mxu1 %v1566_v1 }
  0x5b   :  { %708 = vmatmul.mubr.bf16.gmra.mrb[28].mxu0 %v1568_v2 }
  0x5c   :  { %805 = vmatmul.mubr.bf16.gmra.mrb[28].mxu1 %v1569_v3  ;;  %1461 = vmatprep.mubr.msk.bf16.mxu0 %vm25_vm0, %v1570_v4 }
  0x5d   :  { %1469 = vmatprep.mubr.msk.bf16.mxu1 %vm25_vm0, %v1571_v5 }
  0x63   :  { %1462 = vmatmul.mubr.msk.bf16.vlgmr.msra.gmra.mrb[32].mxu0 %vm25_vm0, %v1572_v6 }
  0x64   :  { %1470 = vmatmul.mubr.msk.bf16.vlgmr.msra.gmra.mrb[32].mxu1 %vm25_vm0, %v1573_v7  ;;  %1465 = vmatprep.mubr.msk.bf16.mxu0 %vm25_vm0, %v1574_v8 }
  0x65   :  { %1473 = vmatprep.mubr.msk.bf16.mxu1 %vm25_vm0, %v1575_v9 }
  0x6b   :  { %1466 = vmatmul.mubr.msk.bf16.gmra.mrb[36].mxu0 %vm25_vm0, %v1576_v10 }
  0x6c   :  { %1474 = vmatmul.mubr.msk.bf16.gmra.mrb[36].mxu1 %vm25_vm0, %v1577_v11 }
  0xf6   :  { %v1329_v13 = vpop.f32.mrb[0].mxu0 }
  0xf7   :  { %v1393_v14 = vpop.f32.mrb[0].mxu1  ;;  %v1330_v15 = vpop.f32.mrb[1].mxu0 }
  0xf8   :  { %v1331_v16 = vadd.f32 %v1330_v15, %v1329_v13  ;;  %v1394_v17 = vpop.f32.mrb[1].mxu1  ;;  %v1332_v18 = vpop.f32.mrb[2].mxu0 }
  0xf9   :  { %v1395_v19 = vadd.f32 %v1394_v17, %v1393_v14  ;;  %v1396_v20 = vpop.f32.mrb[2].mxu1  ;;  %v1333_v21 = vpop.f32.mrb[3].mxu0 }
  0xfa   :  { %v1334_v22 = vadd.f32 %v1333_v21, %v1332_v18  ;;  %v1397_v23 = vpop.f32.mrb[3].mxu1 }
  0xfb   :  { %v1398_v24 = vadd.f32 %v1397_v23, %v1396_v20  ;;  %v1861_v25 = vadd.f32 %v1395_v19, %v1331_v16 }
  0xfd   :  { %v1863_v26 = vadd.f32 %v1398_v24, %v1334_v22 }
  0xfe   :  { %v1335_v27 = vpop.f32.mrb[4].mxu0 }
  0xff   :  { %v1399_v28 = vpop.f32.mrb[4].mxu1  ;;  %v1336_v29 = vpop.f32.mrb[5].mxu0 }
 0x100   :  { %v1337_v30 = vadd.f32 %v1336_v29, %v1335_v27  ;;  %v1400_v31 = vpop.f32.mrb[5].mxu1  ;;  %v1338_v32 = vpop.f32.mrb[6].mxu0 }
 0x101   :  { %v1401_v33 = vadd.f32 %v1400_v31, %v1399_v28  ;;  %v1402_v34 = vpop.f32.mrb[6].mxu1  ;;  %v1339_v35 = vpop.f32.mrb[7].mxu0 }
 0x102   :  { %v1340_v36 = vadd.f32 %v1339_v35, %v1338_v32  ;;  %v1403_v37 = vpop.f32.mrb[7].mxu1 }
 0x103   :  { %v1404_v38 = vadd.f32 %v1403_v37, %v1402_v34  ;;  %v1865_v39 = vadd.f32 %v1401_v33, %v1337_v30 }
 0x105   :  { %v1867_v40 = vadd.f32 %v1404_v38, %v1340_v36 }
 0x106   :  { %v1341_v41 = vpop.f32.mrb[8].mxu0 }
 0x107   :  { %v1405_v42 = vpop.f32.mrb[8].mxu1  ;;  %v1342_v43 = vpop.f32.mrb[9].mxu0 }
 0x108   :  { %v1343_v44 = vadd.f32 %v1342_v43, %v1341_v41  ;;  %v1406_v45 = vpop.f32.mrb[9].mxu1  ;;  %v1344_v46 = vpop.f32.mrb[10].mxu0 }
 0x109   :  { %v1407_v47 = vadd.f32 %v1406_v45, %v1405_v42  ;;  %v1408_v48 = vpop.f32.mrb[10].mxu1  ;;  %v1345_v49 = vpop.f32.mrb[11].mxu0 }
 0x10a   :  { %v1346_v50 = vadd.f32 %v1345_v49, %v1344_v46  ;;  %v1409_v51 = vpop.f32.mrb[11].mxu1 }
 0x10b   :  { %v1410_v52 = vadd.f32 %v1409_v51, %v1408_v48  ;;  %v1869_v53 = vadd.f32 %v1407_v47, %v1343_v44 }
 0x10d   :  { %v1871_v54 = vadd.f32 %v1410_v52, %v1346_v50 }
 0x10e   :  { %v1347_v55 = vpop.f32.mrb[12].mxu0 }
 0x10f   :  { %v1411_v56 = vpop.f32.mrb[12].mxu1  ;;  %v1348_v57 = vpop.f32.mrb[13].mxu0 }
 0x110   :  { %v1349_v58 = vadd.f32 %v1348_v57, %v1347_v55  ;;  %v1412_v59 = vpop.f32.mrb[13].mxu1  ;;  %v1350_v60 = vpop.f32.mrb[14].mxu0 }
 0x111   :  { %v1413_v61 = vadd.f32 %v1412_v59, %v1411_v56  ;;  %v1414_v62 = vpop.f32.mrb[14].mxu1  ;;  %v1351_v63 = vpop.f32.mrb[15].mxu0 }
 0x112   :  { %v1352_v0 = vadd.f32 %v1351_v63, %v1350_v60  ;;  %v1415_v1 = vpop.f32.mrb[15].mxu1 }
 0x113   :  { %v1416_v2 = vadd.f32 %v1415_v1, %v1414_v62  ;;  %v1873_v3 = vadd.f32 %v1413_v61, %v1349_v58 }
 0x115   :  { %v1875_v4 = vadd.f32 %v1416_v2, %v1352_v0 }
 0x116   :  { %v1353_v5 = vpop.f32.mrb[16].mxu0 }
 0x117   :  { %v1417_v6 = vpop.f32.mrb[16].mxu1  ;;  %v1354_v7 = vpop.f32.mrb[17].mxu0 }
 0x118   :  { %v1355_v8 = vadd.f32 %v1354_v7, %v1353_v5  ;;  %v1418_v9 = vpop.f32.mrb[17].mxu1  ;;  %v1356_v10 = vpop.f32.mrb[18].mxu0  ;;  %v44_v5 = vld [vmem:[#allocation2 + $0x10] sm:$0xff] }
 0x119   :  { %v1419_v11 = vadd.f32 %v1418_v9, %v1417_v6  ;;  %v1420_v12 = vpop.f32.mrb[18].mxu1  ;;  %v1357_v13 = vpop.f32.mrb[19].mxu0 }
 0x11a   :  { %v1358_v14 = vadd.f32 %v1357_v13, %v1356_v10  ;;  %v1421_v15 = vpop.f32.mrb[19].mxu1  ;;  %v42_v10 = vld [vmem:[#allocation2] sm:$0xff]  ;;  %v1893_v13 = vld [vmem:[%s2115_s4 + $0x8] sm:$0xff]  }
 0x11b   :  { %v1422_v16 = vadd.f32 %v1421_v15, %v1420_v12  ;;  %v1877_v17 = vadd.f32 %v1419_v11, %v1355_v8  ;;  %v52_v8 = vld [vmem:[#allocation2 + $0x50] sm:$0xff]  ;;  %v50_v12 = vld [vmem:[#allocation2 + $0x40] sm:$0xff] }
 0x11d   :  { %v1879_v18 = vadd.f32 %v1422_v16, %v1358_v14 }
 0x11e   :  { %v1359_v19 = vpop.f32.mrb[20].mxu0 }
 0x11f   :  { %v1423_v20 = vpop.f32.mrb[20].mxu1  ;;  %v1360_v21 = vpop.f32.mrb[21].mxu0 }
 0x120   :  { %v1361_v22 = vadd.f32 %v1360_v21, %v1359_v19  ;;  %v1424_v23 = vpop.f32.mrb[21].mxu1  ;;  %v1362_v24 = vpop.f32.mrb[22].mxu0  ;;  %v45_v19 = vld [vmem:[#allocation2 + $0x18] sm:$0xff] }
 0x121   :  { %v1425_v27 = vadd.f32 %v1424_v23, %v1423_v20  ;;  %v1426_v28 = vpop.f32.mrb[22].mxu1  ;;  %v1363_v29 = vpop.f32.mrb[23].mxu0  ;;  %v53_v21 = vld [vmem:[#allocation2 + $0x58] sm:$0xff]  ;;  %v1904_v23 = vld [vmem:[%s2115_s4] sm:$0xff]  }
 0x122   :  { %v1364_v30 = vadd.f32 %v1363_v29, %v1362_v24  ;;  %v1427_v31 = vpop.f32.mrb[23].mxu1 }
 0x123   :  { %v1428_v32 = vadd.f32 %v1427_v31, %v1426_v28  ;;  %v791_v33 = vadd.f32 %v1425_v27, %v1361_v22  ;;  %v43_v28 = vld [vmem:[#allocation2 + $0x8] sm:$0xff] }
 0x125   :  { %v794_v34 = vadd.f32 %v1428_v32, %v1364_v30  ;;  %v1911_v32 = vld [vmem:[%s2115_s4 + $0x20] sm:$0xff]  }
 0x126   :  { %v1365_v35 = vpop.f32.mrb[24].mxu0 }
 0x127   :  { %v1429_v36 = vpop.f32.mrb[24].mxu1  ;;  %v1366_v37 = vpop.f32.mrb[25].mxu0 }
 0x128   :  { %v1367_v38 = vadd.f32 %v1366_v37, %v1365_v35  ;;  %v1430_v41 = vpop.f32.mrb[25].mxu1  ;;  %v1368_v42 = vpop.f32.mrb[26].mxu0 }
 0x129   :  { %v1431_v43 = vadd.f32 %v1430_v41, %v1429_v36  ;;  %v1432_v44 = vpop.f32.mrb[26].mxu1  ;;  %v1369_v45 = vpop.f32.mrb[27].mxu0  ;;  %v51_v36 = vld [vmem:[#allocation2 + $0x48] sm:$0xff] }
 0x12a   :  { %v1370_v46 = vadd.f32 %v1369_v45, %v1368_v42  ;;  %v1433_v47 = vpop.f32.mrb[27].mxu1  ;;  %v1920_v42 = vld [vmem:[%s2115_s4 + $0x18] sm:$0xff]   ;;  %v1934_v45 = vld [vmem:[%s2115_s4 + $0x10] sm:$0xff]  }
 0x12b   :  { %v1434_v48 = vadd.f32 %v1433_v47, %v1432_v44  ;;  %v1881_v49 = vadd.f32 %v1431_v43, %v1367_v38  ;;  %v1276_v43 = vunpack.c.l.bf16 %v1904_v23  ;;  %v1292_v47 = vunpack.c.l.bf16 %v1911_v32 }
 0x12d   :  { %v1883_v50 = vadd.f32 %v1434_v48, %v1370_v46  ;;  %v1939_v46 = vld [vmem:[%s2115_s4 + $0x30] sm:$0xff]   ;;  %v1281_v48 = vunpack.c.h.bf16 %v1893_v13 }
 0x12e   :  { %v1371_v51 = vpop.f32.mrb[28].mxu0 }
 0x12f   :  { %v1435_v52 = vpop.f32.mrb[28].mxu1  ;;  %v1372_v55 = vpop.f32.mrb[29].mxu0 }
 0x130   :  { %v1373_v56 = vadd.f32 %v1372_v55, %v1371_v51  ;;  %v1436_v57 = vpop.f32.mrb[29].mxu1  ;;  %v1374_v58 = vpop.f32.mrb[30].mxu0  ;;  %v1277_v55 = vunpack.c.h.bf16 %v1904_v23 }
 0x131   :  { %v1437_v59 = vadd.f32 %v1436_v57, %v1435_v52  ;;  %v1438_v60 = vpop.f32.mrb[30].mxu1  ;;  %v1375_v61 = vpop.f32.mrb[31].mxu0  ;;  %v48_v57 = vld [vmem:[#allocation2 + $0x30] sm:$0xff] }
 0x132   :  { %v1376_v62 = vadd.f32 %v1375_v61, %v1374_v58  ;;  %v1439_v63 = vpop.f32.mrb[31].mxu1 }
 0x133   :  { %v1440_v0 = vadd.f32 %v1439_v63, %v1438_v60  ;;  %v1885_v1 = vadd.f32 %v1437_v59, %v1373_v56  ;;  %v1293_v56 = vunpack.c.h.bf16 %v1911_v32  ;;  %v1288_v59 = vunpack.c.l.bf16 %v1920_v42 }
 0x135   :  { %v1887_v2 = vadd.f32 %v1440_v0, %v1376_v62  ;;  %v56_v62 = vld [vmem:[#allocation2 + $0x70] sm:$0xff]  ;;  %v46_v0 = vld [vmem:[#allocation2 + $0x20] sm:$0xff] }
 0x136   :  { %v1463_v6 = vpop.f32.mrb[32].mxu0 }
 0x137   :  { %v856_v7 = vadd.f32 %v1463_v6, %v1865_v39  ;;  %v1471_v9 = vpop.f32.mrb[32].mxu1  ;;  %v847_v11 = vpop.f32.mrb[33].mxu0  ;;  %v1899_v39 = vld [vmem:[%s2115_s4 + $0x28] sm:$0xff]   ;;  %v1284_v6 = vunpack.c.l.bf16 %v1934_v45 }
 0x138   :  { %v888_v14 = vadd.f32 %v1471_v9, %v791_v33  ;;  %v848_v15 = vadd.f32 %v847_v11, %v1861_v25  ;;  %v879_v16 = vpop.f32.mrb[33].mxu1  ;;  %v1464_v20 = vpop.f32.mrb[34].mxu0  ;;  %v1297_v51 = vunpack.c.h.bf16 %v1899_v39  ;;  %v1960_v9 = vld [vmem:[%s2116_s2] ss:$0 sm:$0xff] }
 0x139   :  { %v912_v22 = vadd.f32 %v856_v7, %v44_v5  ;;  %v880_v24 = vadd.f32 %v879_v16, %v1877_v17  ;;  %v859_v27 = vadd.f32 %v1464_v20, %v1867_v40  ;;  %v1472_v25 = vpop.f32.mrb[34].mxu1  ;;  %v850_v29 = vpop.f32.mrb[35].mxu0  ;;  %v1280_v17 = vunpack.c.l.bf16 %v1893_v13 }
 0x13a   :  { %v920_v30 = vadd.f32 %v888_v14, %v52_v8  ;;  %v910_v31 = vadd.f32 %v848_v15, %v42_v10  ;;  %v891_v33 = vadd.f32 %v1472_v25, %v794_v34  ;;  %v851_v35 = vadd.f32 %v850_v29, %v1863_v26  ;;  %v882_v37 = vpop.f32.mrb[35].mxu1  ;;  %v1925_v34 = vld [vmem:[%s2115_s4 + $0x38] sm:$0xff]   ;;  %v47_v25 = vld [vmem:[#allocation2 + $0x28] sm:$0xff]  ;;  %v1972_v29 = vld [vmem:[%s2117_s3] ss:$0 sm:$0xff] }
 0x13b   :  { %928 = vst.msk [vmem:[#allocation2 + $0x10] sm:$0xff] %vm25_vm0, %v912_v22  ;;  %v918_v40 = vadd.f32 %v880_v24, %v50_v12  ;;  %v913_v38 = vadd.f32 %v859_v27, %v45_v19  ;;  %v883_v41 = vadd.f32 %v882_v37, %v1879_v18  ;;  %v1296_v26 = vunpack.c.l.bf16 %v1899_v39  ;;  %v49_v14 = vld [vmem:[#allocation2 + $0x38] sm:$0xff] }
 0x13c   :  { %936 = vst.msk [vmem:[#allocation2 + $0x50] sm:$0xff] %vm25_vm0, %v920_v30  ;;  %926 = vst.msk [vmem:[#allocation2] sm:$0xff] %vm25_vm0, %v910_v31  ;;  %v921_v44 = vadd.f32 %v891_v33, %v53_v21  ;;  %v911_v18 = vadd.f32 %v851_v35, %v43_v28  ;;  %v1304_v60 = vunpack.c.l.bf16 %v1925_v34  ;;  %v1300_v7 = vunpack.c.l.bf16 %v1939_v46  ;;  %v57_v24 = vld [vmem:[#allocation2 + $0x78] sm:$0xff] }
 0x13d   :  { %934 = vst.msk [vmem:[#allocation2 + $0x40] sm:$0xff] %vm25_vm0, %v918_v40  ;;  %929 = vst.msk [vmem:[#allocation2 + $0x18] sm:$0xff] %vm25_vm0, %v913_v38  ;;  %v919_v52 = vadd.f32 %v883_v41, %v51_v36  ;;  %v1289_v8 = vunpack.c.h.bf16 %v1920_v42  ;;  %v1305_v16 = vunpack.c.h.bf16 %v1925_v34  ;;  %v1285_v19 = vunpack.c.h.bf16 %v1934_v45 }
 0x13e   :  { %937 = vst.msk [vmem:[#allocation2 + $0x58] sm:$0xff] %vm25_vm0, %v921_v44  ;;  %927 = vst.msk [vmem:[#allocation2 + $0x8] sm:$0xff] %vm25_vm0, %v911_v18  ;;  %v1467_v58 = vpop.f32.mrb[36].mxu0 }
 0x13f   :  { %935 = vst.msk [vmem:[#allocation2 + $0x48] sm:$0xff] %vm25_vm0, %v919_v52  ;;  %v872_v61 = vadd.f32 %v1467_v58, %v1873_v3  ;;  %v1475_v63 = vpop.f32.mrb[36].mxu1  ;;  %v863_v5 = vpop.f32.mrb[37].mxu0  ;;  %v54_v3 = vld [vmem:[#allocation2 + $0x60] sm:$0xff] }
 0x140   :  { %v904_v10 = vadd.f32 %v1475_v63, %v1885_v1  ;;  %v864_v11 = vadd.f32 %v863_v5, %v1869_v53  ;;  %v895_v12 = vpop.f32.mrb[37].mxu1  ;;  %v1468_v15 = vpop.f32.mrb[38].mxu0  ;;  %v1301_v1 = vunpack.c.h.bf16 %v1939_v46 }
 0x141   :  { %v916_v20 = vadd.f32 %v872_v61, %v48_v57  ;;  %v896_v21 = vadd.f32 %v895_v12, %v1881_v49  ;;  %v875_v22 = vadd.f32 %v1468_v15, %v1875_v4  ;;  %v1476_v27 = vpop.f32.mrb[38].mxu1  ;;  %v866_v28 = vpop.f32.mrb[39].mxu0  ;;  %v55_v4 = vld [vmem:[#allocation2 + $0x68] sm:$0xff] }
 0x142   :  { %v947_v53 = vld [vmem:[#allocation2 + $0x10] sm:$0xff]  ;;  %v924_v30 = vadd.f32 %v904_v10, %v56_v62  ;;  %v914_v31 = vadd.f32 %v864_v11, %v46_v0  ;;  %v907_v33 = vadd.f32 %v1476_v27, %v1887_v2  ;;  %v867_v49 = vadd.f32 %v866_v28, %v1871_v54  ;;  %v898_v35 = vpop.f32.mrb[39].mxu1 }
 0x143   :  { %v970_v36 = vmul.f32 %v1960_v9, %v947_v53  ;;  %v955_v37 = vld [vmem:[#allocation2 + $0x50] sm:$0xff]  ;;  %v945_v40 = vld [vmem:[#allocation2] sm:$0xff]  ;;  %932 = vst.msk [vmem:[#allocation2 + $0x30] sm:$0xff] %vm25_vm0, %v916_v20  ;;  %v922_v38 = vadd.f32 %v896_v21, %v54_v3  ;;  %v917_v41 = vadd.f32 %v875_v22, %v49_v14  ;;  %v899_v44 = vadd.f32 %v898_v35, %v1883_v50 }
 0x144   :  { %v978_v18 = vmul.f32 %v1960_v9, %v955_v37  ;;  %v968_v52 = vmul.f32 %v1960_v9, %v945_v40  ;;  %v953_v57 = vld [vmem:[#allocation2 + $0x40] sm:$0xff]  ;;  %v948_v2 = vld [vmem:[#allocation2 + $0x18] sm:$0xff]  ;;  %940 = vst.msk [vmem:[#allocation2 + $0x70] sm:$0xff] %vm25_vm0, %v924_v30  ;;  %930 = vst.msk [vmem:[#allocation2 + $0x20] sm:$0xff] %vm25_vm0, %v914_v31  ;;  %v925_v54 = vadd.f32 %v907_v33, %v57_v24 }
 0x145   :  { %v915_v58 = vadd.f32 %v867_v49, %v47_v25  ;;  %v993_v61 = vadd.f32 %v1972_v29, %v970_v36  ;;  %v976_v62 = vmul.f32 %v1960_v9, %v953_v57  ;;  %v971_v63 = vmul.f32 %v1960_v9, %v948_v2  ;;  %v956_v0 = vld [vmem:[#allocation2 + $0x58] sm:$0xff]  ;;  %v946_v50 = vld [vmem:[#allocation2 + $0x8] sm:$0xff]  ;;  %938 = vst.msk [vmem:[#allocation2 + $0x60] sm:$0xff] %vm25_vm0, %v922_v38 }
 0x146   :  { %933 = vst.msk [vmem:[#allocation2 + $0x38] sm:$0xff] %vm25_vm0, %v917_v41  ;;  %v923_v5 = vadd.f32 %v899_v44, %v55_v4  ;;  %v1001_v10 = vadd.f32 %v1972_v29, %v978_v18  ;;  %v991_v11 = vadd.f32 %v1972_v29, %v968_v52  ;;  %v979_v3 = vmul.f32 %v1960_v9, %v956_v0  ;;  %v954_v14 = vld [vmem:[#allocation2 + $0x48] sm:$0xff] }
 0x147   :  { %v969_v12 = vmul.f32 %v1960_v9, %v946_v50  ;;  %941 = vst.msk [vmem:[#allocation2 + $0x78] sm:$0xff] %vm25_vm0, %v925_v54  ;;  %931 = vst.msk [vmem:[#allocation2 + $0x28] sm:$0xff] %vm25_vm0, %v915_v58  ;;  %v1041_v15 = vadd.f32 %v1280_v17, %v993_v61  ;;  %v999_v20 = vadd.f32 %v1972_v29, %v976_v62 }
 0x148   :  { %v994_v21 = vadd.f32 %v1972_v29, %v971_v63  ;;  %v977_v22 = vmul.f32 %v1960_v9, %v954_v14  ;;  %939 = vst.msk [vmem:[#allocation2 + $0x68] sm:$0xff] %vm25_vm0, %v923_v5  ;;  %v1049_v24 = vadd.f32 %v1296_v26, %v1001_v10  ;;  %v1039_v27 = vadd.f32 %v1276_v43, %v991_v11 }
 0x149   :  { %v1002_v25 = vadd.f32 %v1972_v29, %v979_v3  ;;  %v992_v28 = vadd.f32 %v1972_v29, %v969_v12  ;;  %v1057_v53 = vmax.f32 %v1041_v15, 0.0  ;;  %v1047_v17 = vadd.f32 %v1292_v47, %v999_v20 }
 0x14a   :  { %v1042_v30 = vadd.f32 %v1281_v48, %v994_v21  ;;  %v1000_v31 = vadd.f32 %v1972_v29, %v977_v22  ;;  %v1065_v33 = vmax.f32 %v1049_v24, 0.0  ;;  %v1055_v49 = vmax.f32 %v1039_v27, 0.0  ;;  %v951_v4 = vld [vmem:[#allocation2 + $0x30] sm:$0xff] }
 0x14b   :  { %v1050_v26 = vadd.f32 %v1297_v51, %v1002_v25  ;;  %v1040_v43 = vadd.f32 %v1277_v55, %v992_v28  ;;  %v1260_v35 = vpack.c.bf16 %v1057_v53, %v1057_v53  ;;  %v1063_v36 = vmax.f32 %v1047_v17, 0.0  ;;  %v959_v40 = vld [vmem:[#allocation2 + $0x70] sm:$0xff]  ;;  %v949_v13 = vld [vmem:[#allocation2 + $0x20] sm:$0xff] }
 0x14c   :  { %v1058_v37 = vmax.f32 %v1042_v30, 0.0  ;;  %v1048_v47 = vadd.f32 %v1293_v56, %v1000_v31  ;;  %v1268_v48 = vpack.c.bf16 %v1065_v33, %v1065_v33  ;;  %v1258_v38 = vpack.c.bf16 %v1055_v49, %v1055_v49  ;;  %v957_v18 = vld [vmem:[#allocation2 + $0x60] sm:$0xff] }
 0x14d   :  { %v1066_v41 = vmax.f32 %v1050_v26, 0.0  ;;  %v1056_v44 = vmax.f32 %v1040_v43, 0.0  ;;  %v952_v52 = vld [vmem:[#allocation2 + $0x38] sm:$0xff]  ;;  %1138 = vst.msk [vmem:[%s2118_s5 + $0x8] sm:$0xf] %vm1135_vm1, %v1260_v35  ;;  %v1266_v39 = vpack.c.bf16 %v1063_v36, %v1063_v36  ;;  %v974_v55 = vmul.f32 %v1960_v9, %v951_v4 }
 0x14e   :  { %v1261_v23 = vpack.c.bf16 %v1058_v37, %v1058_v37  ;;  %v1064_v51 = vmax.f32 %v1048_v47, 0.0  ;;  %v960_v32 = vld [vmem:[#allocation2 + $0x78] sm:$0xff]  ;;  %v950_v56 = vld [vmem:[#allocation2 + $0x28] sm:$0xff]  ;;  %1146 = vst.msk [vmem:[%s2118_s5 + $0x28] sm:$0xf] %vm1135_vm1, %v1268_v48  ;;  %v982_v54 = vmul.f32 %v1960_v9, %v959_v40  ;;  %v972_v58 = vmul.f32 %v1960_v9, %v949_v13 }
 0x14f   :  { %1136 = vst.msk [vmem:[%s2118_s5] sm:$0xf] %vm1135_vm1, %v1258_v38  ;;  %v1269_v57 = vpack.c.bf16 %v1066_v41, %v1066_v41  ;;  %v1259_v2 = vpack.c.bf16 %v1056_v44, %v1056_v44  ;;  %v958_v61 = vld [vmem:[#allocation2 + $0x68] sm:$0xff]  ;;  %1144 = vst.msk [vmem:[%s2118_s5 + $0x20] sm:$0xf] %vm1135_vm1, %v1266_v39  ;;  %v997_v63 = vadd.f32 %v1972_v29, %v974_v55 }
 0x150   :  { %1139 = vst.msk [vmem:[%s2118_s5 + $0xc] sm:$0xf] %vm1135_vm1, %v1261_v23  ;;  %v1267_v62 = vpack.c.bf16 %v1064_v51, %v1064_v51  ;;  %v980_v0 = vmul.f32 %v1960_v9, %v957_v18  ;;  %v975_v50 = vmul.f32 %v1960_v9, %v952_v52  ;;  %v1005_v5 = vadd.f32 %v1972_v29, %v982_v54 }
 0x151   :  { %1147 = vst.msk [vmem:[%s2118_s5 + $0x2c] sm:$0xf] %vm1135_vm1, %v1269_v57  ;;  %1137 = vst.msk [vmem:[%s2118_s5 + $0x4] sm:$0xf] %vm1135_vm1, %v1259_v2  ;;  %v995_v10 = vadd.f32 %v1972_v29, %v972_v58  ;;  %v983_v11 = vmul.f32 %v1960_v9, %v960_v32  ;;  %v973_v3 = vmul.f32 %v1960_v9, %v950_v56 }
 0x152   :  { %1145 = vst.msk [vmem:[%s2118_s5 + $0x24] sm:$0xf] %vm1135_vm1, %v1267_v62  ;;  %v1045_v12 = vadd.f32 %v1288_v59, %v997_v63  ;;  %v1003_v14 = vadd.f32 %v1972_v29, %v980_v0  ;;  %v998_v15 = vadd.f32 %v1972_v29, %v975_v50  ;;  %v981_v20 = vmul.f32 %v1960_v9, %v958_v61 }
 0x153   :  { %v1053_v21 = vadd.f32 %v1304_v60, %v1005_v5  ;;  %v1043_v22 = vadd.f32 %v1284_v6, %v995_v10  ;;  %v1006_v24 = vadd.f32 %v1972_v29, %v983_v11  ;;  %v996_v27 = vadd.f32 %v1972_v29, %v973_v3 }
 0x154   :  { %v1061_v25 = vmax.f32 %v1045_v12, 0.0  ;;  %v1051_v59 = vadd.f32 %v1300_v7, %v1003_v14  ;;  %v1046_v28 = vadd.f32 %v1289_v8, %v998_v15  ;;  %v1004_v53 = vadd.f32 %v1972_v29, %v981_v20 }
 0x155   :  { %v1069_v9 = vmax.f32 %v1053_v21, 0.0  ;;  %v1059_v17 = vmax.f32 %v1043_v22, 0.0  ;;  %v1054_v60 = vadd.f32 %v1305_v16, %v1006_v24  ;;  %v1044_v6 = vadd.f32 %v1285_v19, %v996_v27 }
 0x156   :  { %v1264_v30 = vpack.c.bf16 %v1061_v25, %v1061_v25  ;;  %v1067_v31 = vmax.f32 %v1051_v59, 0.0  ;;  %v1062_v33 = vmax.f32 %v1046_v28, 0.0  ;;  %v1052_v49 = vadd.f32 %v1301_v1, %v1004_v53 }
 0x157   :  { %v1272_v7 = vpack.c.bf16 %v1069_v9, %v1069_v9  ;;  %v1262_v26 = vpack.c.bf16 %v1059_v17, %v1059_v17  ;;  %v1070_v42 = vmax.f32 %v1054_v60, 0.0  ;;  %v1060_v8 = vmax.f32 %v1044_v6, 0.0 }
 0x158   :  { %1142 = vst.msk [vmem:[%s2118_s5 + $0x18] sm:$0xf] %vm1135_vm1, %v1264_v30  ;;  %v1270_v34 = vpack.c.bf16 %v1067_v31, %v1067_v31  ;;  %v1265_v16 = vpack.c.bf16 %v1062_v33, %v1062_v33  ;;  %v1068_v29 = vmax.f32 %v1052_v49, 0.0 }
 0x159   :  { %1150 = vst.msk [vmem:[%s2118_s5 + $0x38] sm:$0xf] %vm1135_vm1, %v1272_v7  ;;  %1140 = vst.msk [vmem:[%s2118_s5 + $0x10] sm:$0xf] %vm1135_vm1, %v1262_v26  ;;  %v1273_v45 = vpack.c.bf16 %v1070_v42, %v1070_v42  ;;  %v1263_v46 = vpack.c.bf16 %v1060_v8, %v1060_v8 }
 0x15a   :  { %1148 = vst.msk [vmem:[%s2118_s5 + $0x30] sm:$0xf] %vm1135_vm1, %v1270_v34  ;;  %1143 = vst.msk [vmem:[%s2118_s5 + $0x1c] sm:$0xf] %vm1135_vm1, %v1265_v16  ;;  %v1271_v19 = vpack.c.bf16 %v1068_v29, %v1068_v29 }
 0x15b   :  { %1151 = vst.msk [vmem:[%s2118_s5 + $0x3c] sm:$0xf] %vm1135_vm1, %v1273_v45  ;;  %1141 = vst.msk [vmem:[%s2118_s5 + $0x14] sm:$0xf] %vm1135_vm1, %v1263_v46 }
 0x15c   :  { %1149 = vst.msk [vmem:[%s2118_s5 + $0x34] sm:$0xf] %vm1135_vm1, %v1271_v19 }

// kernel: pothole_detector_forward.29
= control target key start
LH: loop header
LB: loop body
LE: loop exit
PB: predicated region body
PF: predicated region fallthrough
CT: control target
= control target key end

     0   :  { %vm380_vm0 = vcmask 523264   ;;  %s967_s1 = inlined_call_operand.vmem [shape: bf16[576,128], index: 1, kind: input, shape index: {}]   ;;  %s968_s0 = inlined_call_operand.vmem [shape: bf16[32,576], index: 0, kind: input, shape index: {}]   ;;  %s969_s2 = inlined_call_operand.vmem [shape: f32[1,128], index: 2, kind: input, shape index: {}]   ;;  %s970_s3 = inlined_call_operand.vmem [shape: f32[1,128], index: 3, kind: input, shape index: {}]   ;;  %s971_s4 = inlined_call_operand.vmem [shape: bf16[32,128], index: 4, kind: output, shape index: {}]  }
   0x1   :  { %v742_v0 = vld [vmem:[%s967_s1 + $0x40] sm:$0xff]   ;;  %v746_v4 = vld [vmem:[%s967_s1 + $0x48] sm:$0xff]   ;;  %v750_v8 = vld [vmem:[%s967_s1 + $0x50] sm:$0xff]  }
   0x2   :  { %v743_v1 = vld [vmem:[%s967_s1 + $0xc0] sm:$0xff]   ;;  %668 = vmatprep.subr.bf16.mxu0 %v742_v0  ;;  %v747_v5 = vld [vmem:[%s967_s1 + $0xc8] sm:$0xff]   ;;  %v751_v9 = vld [vmem:[%s967_s1 + $0xd0] sm:$0xff]  }
   0x3   :  { %v744_v2 = vld [vmem:[%s967_s1] sm:$0xff]   ;;  %696 = vmatprep.subr.bf16.mxu1 %v743_v1  ;;  %v748_v6 = vld [vmem:[%s967_s1 + $0x8] sm:$0xff]   ;;  %v752_v10 = vld [vmem:[%s967_s1 + $0x10] sm:$0xff]  }
   0x4   :  { %v745_v3 = vld [vmem:[%s967_s1 + $0x80] sm:$0xff]   ;;  %669 = vmatpush3.bf16.msra.mxu0 %v744_v2  ;;  %v749_v7 = vld [vmem:[%s967_s1 + $0x88] sm:$0xff]   ;;  %v753_v11 = vld [vmem:[%s967_s1 + $0x90] sm:$0xff]  }
   0x5   :  { %697 = vmatpush3.bf16.msra.mxu1 %v745_v3  ;;  %670 = vmatprep.subr.bf16.mxu0 %v746_v4  ;;  %v754_v12 = vld [vmem:[%s967_s1 + $0x58] sm:$0xff]   ;;  %v758_v16 = vld [vmem:[%s967_s1 + $0x60] sm:$0xff]   ;;  %v762_v20 = vld [vmem:[%s967_s1 + $0x68] sm:$0xff]  }
   0x6   :  { %698 = vmatprep.subr.bf16.mxu1 %v747_v5  ;;  %v755_v13 = vld [vmem:[%s967_s1 + $0xd8] sm:$0xff]   ;;  %v759_v17 = vld [vmem:[%s967_s1 + $0xe0] sm:$0xff]   ;;  %v763_v21 = vld [vmem:[%s967_s1 + $0xe8] sm:$0xff]  }
   0x7   :  { %v756_v14 = vld [vmem:[%s967_s1 + $0x18] sm:$0xff]   ;;  %v760_v18 = vld [vmem:[%s967_s1 + $0x20] sm:$0xff]   ;;  %v764_v22 = vld [vmem:[%s967_s1 + $0x28] sm:$0xff]  }
   0x8   :  { %671 = vmatpush3.bf16.msra.mxu0 %v748_v6  ;;  %v757_v15 = vld [vmem:[%s967_s1 + $0x98] sm:$0xff]   ;;  %v761_v19 = vld [vmem:[%s967_s1 + $0xa0] sm:$0xff]   ;;  %v765_v23 = vld [vmem:[%s967_s1 + $0xa8] sm:$0xff]  }
   0x9   :  { %699 = vmatpush3.bf16.msra.mxu1 %v749_v7  ;;  %672 = vmatprep.subr.bf16.mxu0 %v750_v8  ;;  %v766_v24 = vld [vmem:[%s967_s1 + $0x70] sm:$0xff]   ;;  %v770_v28 = vld [vmem:[%s967_s1 + $0x78] sm:$0xff]   ;;  %v779_v35 = vld [vmem:[%s968_s0 + $0xc] ss:$20 sps:$4 sm:$0xff]  }
   0xa   :  { %700 = vmatprep.subr.bf16.mxu1 %v751_v9  ;;  %v767_v25 = vld [vmem:[%s967_s1 + $0xf0] sm:$0xff]   ;;  %v771_v29 = vld [vmem:[%s967_s1 + $0xf8] sm:$0xff]   ;;  %v780_v36 = vld [vmem:[%s967_s1 + $0x100] sm:$0xff]   ;;  %468 = vmatprep.mubr.bf16.mxu1 %v779_v35 }
   0xb   :  { %v768_v26 = vld [vmem:[%s967_s1 + $0x30] sm:$0xff]   ;;  %v772_v30 = vld [vmem:[%s967_s1 + $0x38] sm:$0xff]   ;;  %v781_v37 = vld [vmem:[%s967_s1 + $0x108] sm:$0xff]  }
   0xc   :  { %673 = vmatpush3.bf16.msra.mxu0 %v752_v10  ;;  %v769_v27 = vld [vmem:[%s967_s1 + $0xb0] sm:$0xff]   ;;  %v773_v31 = vld [vmem:[%s967_s1 + $0xb8] sm:$0xff]   ;;  %v782_v38 = vld [vmem:[%s968_s0 + $0x2c] ss:$20 sps:$4 sm:$0xff]  }
   0xd   :  { %701 = vmatpush3.bf16.msra.mxu1 %v753_v11  ;;  %674 = vmatprep.subr.bf16.mxu0 %v754_v12  ;;  %v774_v32 = vld [vmem:[%s968_s0] ss:$20 sps:$4 sm:$0xff]   ;;  %v776_v33 = vld [vmem:[%s968_s0 + $0x4] ss:$20 sps:$4 sm:$0xff]   ;;  %v777_v34 = vld [vmem:[%s968_s0 + $0x8] ss:$20 sps:$4 sm:$0xff]  }
   0xe   :  { %702 = vmatprep.subr.bf16.mxu1 %v755_v13  ;;  %419 = vmatprep.mubr.bf16.mxu0 %v776_v33  ;;  %v784_v39 = vld [vmem:[%s968_s0 + $0x34] ss:$20 sps:$4 sm:$0xff]   ;;  %v787_v42 = vld [vmem:[%s968_s0 + $0x30] ss:$20 sps:$4 sm:$0xff]   ;;  %v789_v44 = vld [vmem:[%s967_s1 + $0x118] sm:$0xff]  }
   0xf   :  { %v786_v40 = vld [vmem:[%s968_s0 + $0x28] ss:$20 sps:$4 sm:$0xff]   ;;  %v788_v41 = vld [vmem:[%s967_s1 + $0x110] sm:$0xff]   ;;  %v791_v45 = vld [vmem:[%s968_s0 + $0x38] ss:$20 sps:$4 sm:$0xff]  }
  0x10   :  { %675 = vmatpush3.bf16.msra.mxu0 %v756_v14  ;;  %v790_v43 = vld [vmem:[%s968_s0 + $0x10] ss:$20 sps:$4 sm:$0xff]   ;;  %v647_v11 = vld [vmem:[%s969_s2] ss:$0 sm:$0xff] }
  0x11   :  { %703 = vmatpush3.bf16.msra.mxu1 %v757_v15  ;;  %676 = vmatprep.subr.bf16.mxu0 %v758_v16  ;;  %v648_v14 = vld [vmem:[%s970_s3] ss:$0 sm:$0xff] }
  0x12   :  { %704 = vmatprep.subr.bf16.mxu1 %v759_v17 }
  0x14   :  { %677 = vmatpush3.bf16.msra.mxu0 %v760_v18 }
  0x15   :  { %705 = vmatpush3.bf16.msra.mxu1 %v761_v19  ;;  %678 = vmatprep.subr.bf16.mxu0 %v762_v20 }
  0x16   :  { %706 = vmatprep.subr.bf16.mxu1 %v763_v21 }
  0x18   :  { %679 = vmatpush3.bf16.msra.mxu0 %v764_v22 }
  0x19   :  { %707 = vmatpush3.bf16.msra.mxu1 %v765_v23  ;;  %680 = vmatprep.subr.bf16.mxu0 %v766_v24 }
  0x1a   :  { %708 = vmatprep.subr.bf16.mxu1 %v767_v25 }
  0x1c   :  { %681 = vmatpush3.bf16.msra.mxu0 %v768_v26 }
  0x1d   :  { %709 = vmatpush3.bf16.msra.mxu1 %v769_v27  ;;  %682 = vmatprep.subr.bf16.mxu0 %v770_v28 }
  0x1e   :  { %710 = vmatprep.subr.bf16.mxu1 %v771_v29 }
  0x20   :  { %683 = vmatpush3.bf16.msra.mxu0 %v772_v30 }
  0x21   :  { %711 = vmatpush3.bf16.msra.mxu1 %v773_v31  ;;  %730 = vmatprep.subr.bf16.mxu0 %v780_v36 }
  0x23   :  { %420 = vmatmul.mubr.bf16.vlgmr.msra.gmra.mrb[0].mxu0 %v774_v32 }
  0x24   :  { %469 = vmatmul.mubr.bf16.vlgmr.msra.gmra.mrb[0].mxu1 %v777_v34  ;;  %731 = vmatpush3.bf16.msra.mxu0 %v780_v36 }
  0x25   :  { %732 = vmatprep.subr.bf16.mxu0 %v781_v37  ;;  %427 = vmatprep.mubr.bf16.mxu0 %v782_v38 }
  0x26   :  { %476 = vmatprep.mubr.bf16.mxu1 %v784_v39 }
  0x28   :  { %733 = vmatpush3.bf16.msra.mxu0 %v781_v37 }
  0x29   :  { %734 = vmatprep.subr.bf16.mxu0 %v788_v41 }
  0x2b   :  { %428 = vmatmul.mubr.bf16.gmra.mrb[4].mxu0 %v786_v40 }
  0x2c   :  { %477 = vmatmul.mubr.bf16.gmra.mrb[4].mxu1 %v787_v42  ;;  %738 = vmatprep.mubr.msk.bf16.mxu0 %vm380_vm0, %v790_v43 }
  0x2d   :  { %735 = vmatpush3.bf16.msra.mxu0 %v788_v41 }
  0x2e   :  { %736 = vmatprep.subr.bf16.mxu0 %v789_v44 }
  0x31   :  { %737 = vmatpush3.bf16.msra.mxu0 %v789_v44 }
  0x34   :  { %739 = vmatmul.mubr.msk.bf16.vlgmr.msra.gmra.mrb[8].mxu0 %vm380_vm0, %v791_v45 }
  0xf6   :  { %v684_v46 = vpop.f32.mrb[0].mxu0 }
  0xf7   :  { %v712_v47 = vpop.f32.mrb[0].mxu1  ;;  %v685_v48 = vpop.f32.mrb[1].mxu0 }
  0xf8   :  { %v686_v49 = vadd.f32 %v685_v48, %v684_v46  ;;  %v713_v50 = vpop.f32.mrb[1].mxu1  ;;  %v687_v51 = vpop.f32.mrb[2].mxu0 }
  0xf9   :  { %v714_v52 = vadd.f32 %v713_v50, %v712_v47  ;;  %v715_v53 = vpop.f32.mrb[2].mxu1  ;;  %v688_v54 = vpop.f32.mrb[3].mxu0 }
  0xfa   :  { %v689_v55 = vadd.f32 %v688_v54, %v687_v51  ;;  %v716_v56 = vpop.f32.mrb[3].mxu1 }
  0xfb   :  { %v717_v57 = vadd.f32 %v716_v56, %v715_v53  ;;  %v471_v58 = vadd.f32 %v714_v52, %v686_v49 }
  0xfd   :  { %v474_v59 = vadd.f32 %v717_v57, %v689_v55 }
  0xfe   :  { %v690_v60 = vpop.f32.mrb[4].mxu0 }
  0xff   :  { %v718_v61 = vpop.f32.mrb[4].mxu1  ;;  %v691_v62 = vpop.f32.mrb[5].mxu0 }
 0x100   :  { %v692_v63 = vadd.f32 %v691_v62, %v690_v60  ;;  %v719_v0 = vpop.f32.mrb[5].mxu1  ;;  %v693_v1 = vpop.f32.mrb[6].mxu0 }
 0x101   :  { %v720_v2 = vadd.f32 %v719_v0, %v718_v61  ;;  %v721_v3 = vpop.f32.mrb[6].mxu1  ;;  %v694_v4 = vpop.f32.mrb[7].mxu0 }
 0x102   :  { %v695_v5 = vadd.f32 %v694_v4, %v693_v1  ;;  %v722_v6 = vpop.f32.mrb[7].mxu1 }
 0x103   :  { %v723_v7 = vadd.f32 %v722_v6, %v721_v3  ;;  %v479_v8 = vadd.f32 %v720_v2, %v692_v63 }
 0x105   :  { %v482_v9 = vadd.f32 %v723_v7, %v695_v5 }
 0x107   :  { %v740_v10 = vpop.f32.mrb[8].mxu0 }
 0x108   :  { %v528_v12 = vadd.f32 %v740_v10, %v479_v8  ;;  %v519_v13 = vpop.f32.mrb[9].mxu0 }
 0x109   :  { %v520_v15 = vadd.f32 %v519_v13, %v471_v58  ;;  %v741_v16 = vpop.f32.mrb[10].mxu0 }
 0x10a   :  { %v558_v17 = vmul.f32 %v647_v11, %v528_v12  ;;  %v531_v18 = vadd.f32 %v741_v16, %v482_v9  ;;  %v522_v19 = vpop.f32.mrb[11].mxu0 }
 0x10b   :  { %v556_v20 = vmul.f32 %v647_v11, %v520_v15  ;;  %v523_v21 = vadd.f32 %v522_v19, %v474_v59 }
 0x10c   :  { %v569_v22 = vadd.f32 %v648_v14, %v558_v17  ;;  %v559_v23 = vmul.f32 %v647_v11, %v531_v18 }
 0x10d   :  { %v567_v24 = vadd.f32 %v648_v14, %v556_v20  ;;  %v557_v25 = vmul.f32 %v647_v11, %v523_v21 }
 0x10e   :  { %v570_v26 = vadd.f32 %v648_v14, %v559_v23  ;;  %v573_v28 = vmax.f32 %v569_v22, 0.0 }
 0x10f   :  { %v568_v27 = vadd.f32 %v648_v14, %v557_v25  ;;  %v571_v30 = vmax.f32 %v567_v24, 0.0 }
 0x110   :  { %v574_v29 = vmax.f32 %v570_v26, 0.0 }
 0x111   :  { %v572_v31 = vmax.f32 %v568_v27, 0.0 }
 0x112   :  { %v665_v32 = vpack.c.bf16 %v574_v29, %v573_v28 }
 0x113   :  { %v660_v33 = vpack.c.bf16 %v572_v31, %v571_v30 }
 0x114   :  { %667 = vst [vmem:[%s971_s4 + $0x8] sm:$0xff] %v665_v32  }
 0x115   :  { %661 = vst [vmem:[%s971_s4] sm:$0xff] %v660_v33  }

// kernel: pothole_detector_forward.28
= control target key start
LH: loop header
LB: loop body
LE: loop exit
PB: predicated region body
PF: predicated region fallthrough
CT: control target
= control target key end

     0   :  { %vm76_vm0 = vcmask 523264   ;;  %s301_s1 = inlined_call_operand.vmem [shape: bf16[64,128], index: 1, kind: input, shape index: {}]   ;;  %s302_s0 = inlined_call_operand.vmem [shape: bf16[32,64], index: 0, kind: input, shape index: {}]   ;;  %s303_s2 = inlined_call_operand.vmem [shape: f32[1,128], index: 2, kind: input, shape index: {}]   ;;  %s304_s3 = inlined_call_operand.vmem [shape: f32[1,128], index: 3, kind: input, shape index: {}]   ;;  %s305_s4 = inlined_call_operand.vmem [shape: bf16[32,128], index: 4, kind: output, shape index: {}]  }
   0x1   :  { %v240_v0 = vld [vmem:[%s301_s1] sm:$0xff]   ;;  %v241_v1 = vld [vmem:[%s301_s1 + $0x8] sm:$0xff]   ;;  %v242_v2 = vld [vmem:[%s301_s1 + $0x10] sm:$0xff]  }
   0x2   :  { %228 = vmatprep.subr.bf16.mxu0 %v240_v0  ;;  %v244_v3 = vld [vmem:[%s302_s0] sm:$0xff]   ;;  %v243_v4 = vld [vmem:[%s301_s1 + $0x18] sm:$0xff]   ;;  %v245_v5 = vld [vmem:[%s302_s0 + $0x8] sm:$0xff]  }
   0x3   :  { %229 = vmatpush3.bf16.msra.mxu0 %v240_v0  ;;  %236 = vmatprep.mubr.msk.bf16.mxu0 %vm76_vm0, %v244_v3  ;;  %v201_v6 = vld [vmem:[%s303_s2] ss:$0 sm:$0xff] }
   0x4   :  { %230 = vmatprep.subr.bf16.mxu0 %v241_v1  ;;  %v202_v10 = vld [vmem:[%s304_s3] ss:$0 sm:$0xff] }
   0x7   :  { %231 = vmatpush3.bf16.msra.mxu0 %v241_v1 }
   0x8   :  { %232 = vmatprep.subr.bf16.mxu0 %v242_v2 }
   0xb   :  { %233 = vmatpush3.bf16.msra.mxu0 %v242_v2 }
   0xc   :  { %234 = vmatprep.subr.bf16.mxu0 %v243_v4 }
   0xf   :  { %235 = vmatpush3.bf16.msra.mxu0 %v243_v4 }
  0x12   :  { %237 = vmatmul.mubr.msk.bf16.vlgmr.msra.gmra.mrb[0].mxu0 %vm76_vm0, %v245_v5 }
  0xe5   :  { %v238_v7 = vpop.f32.mrb[0].mxu0 }
  0xe6   :  { %v156_v8 = vmul.f32 %v238_v7, %v201_v6  ;;  %v117_v9 = vpop.f32.mrb[1].mxu0 }
  0xe7   :  { %v154_v11 = vmul.f32 %v201_v6, %v117_v9  ;;  %v239_v12 = vpop.f32.mrb[2].mxu0 }
  0xe8   :  { %v157_v13 = vmul.f32 %v239_v12, %v201_v6  ;;  %v120_v14 = vpop.f32.mrb[3].mxu0  ;;  %v167_v16 = vadd.f32 %v202_v10, %v156_v8 }
  0xe9   :  { %v155_v15 = vmul.f32 %v201_v6, %v120_v14  ;;  %v165_v18 = vadd.f32 %v202_v10, %v154_v11 }
  0xea   :  { %v168_v17 = vadd.f32 %v202_v10, %v157_v13 }
  0xeb   :  { %v166_v19 = vadd.f32 %v202_v10, %v155_v15 }
  0xec   :  { %v219_v20 = vpack.c.bf16 %v168_v17, %v167_v16 }
  0xed   :  { %v214_v21 = vpack.c.bf16 %v166_v19, %v165_v18 }
  0xee   :  { %221 = vst [vmem:[%s305_s4 + $0x8] sm:$0xff] %v219_v20  }
  0xef   :  { %215 = vst [vmem:[%s305_s4] sm:$0xff] %v214_v21  }

// kernel: pothole_detector_forward.30
= control target key start
LH: loop header
LB: loop body
LE: loop exit
PB: predicated region body
PF: predicated region fallthrough
CT: control target
= control target key end

     0   :  { %10 = vsyncpa [#allocation5], 0  ;;  %s1300_s18 = smov 0   ;;  %s1302_s19 = smov 0   ;;  %s1461_s0 = inlined_call_operand.vmem [shape: bf16[32,1152], index: 0, kind: input, shape index: {}]   ;;  %s1462_s1 = inlined_call_operand.vmem [shape: bf16[1152,128], index: 1, kind: input, shape index: {}]   ;;  %s1463_s2 = inlined_call_operand.vmem [shape: f32[1,128], index: 2, kind: input, shape index: {}]   ;;  %s1464_s3 = inlined_call_operand.hbm [shape: f32[1,128], index: 3, kind: input, shape index: {}]   ;;  %s1465_s4 = inlined_call_operand.vmem [shape: bf16[32,128], index: 4, kind: input, shape index: {}]   ;;  %s1466_s5 = inlined_call_operand.vmem [shape: bf16[32,128], index: 5, kind: output, shape index: {}]  }
   0x1   :  { %s1304_s20 = smov 0   ;;  %s1306_s21 = smov 0  }
   0x2   :  { %s1308_s22 = smov 0  }
   0x3 LB: > { %s967_s23 = sadd.s32 4294967295, %s1266_s22   ;;  %s28_s24 = sadd.s32 1, %s1262_s21  ;;  %s1266_s22 = sphi %s1308_s22, %s16_s22   ;;  %s1262_s21 = sphi %s1306_s21, %s1480_s21   ;;  %s1258_s20 = sphi %s1304_s20, %s1479_s20   ;;  %s1254_s19 = sphi %s1302_s19, %s1478_s19   ;;  %s1250_s18 = sphi %s1300_s18, %s1477_s18  }
   0x4   : > { %p29_p0 = scmp.ge.s32.totalorder %s28_s24, 3  ;;  %s44_s25 = sadd.s32 1, %s1254_s19 }
   0x5   : > { %p51_p1 = scmp.ne.s32.totalorder %s1254_s19, %s1250_s18  ;;  %p52_p2 = scmp.eq.s32.totalorder %s1266_s22, 0 }
   0x6   : > { %s1482_s24 = smov (%p29_p0, %s28_s24), 0  ;;  %p968_p4 = scmp.ge.s32.totalorder %s1266_s22, 1 }
   0x7   : > { %p1333_p3 = por %p52_p2, %p51_p1  ;;  %s40_s27 = ssub.s32 %s1262_s21, %s1482_s24 }
   0x8   : > { %p204_p5 = scmp.lt.s32.totalorder %s1266_s22, 4  ;;  %p42_p6 = scmp.eq.s32.totalorder %s40_s27, 0 }
   0x9   : > { %s1470_s26 = scalar_select %p1333_p3, 1, 0 }
   0xa   : > { %p1341_p7 = pnand %p968_p4, %p204_p5  ;;  %p1345_p8 = scmp.eq.s32.totalorder %s967_s23, 0 }
   0xb   : > { %s1350_s30 = scalar_select %p42_p6, %s1254_s19, %s44_s25  }
   0xc   : > { %s1471_s28 = scalar_select %p1341_p7, 1, 0 }
   0xd   : > { %s1472_s29 = scalar_select %p1345_p8, 1, 0 }
   0xe   : > { %p1116_p9 = pneg %p1341_p7  ;;  %s1268_s6 = smov [#allocation4]  }
   0xf   : > { %s225_s7 = sshll.u32 %s1268_s6, 4  ;;  %s1196_s11 = scalar_lea.hbm %s1464_s3, 16  ;;  %s226_s7 = int_to_ptr.vmem [resolvable:$true] %s225_s7 }
  0x10   : > { %p1356_p10 = pnand %p1345_p8, %p1116_p9  ;;  %p1197_p11 = scmp.ne.s32.totalorder %s1464_s3, %s1196_s11 }
  0x11   : > { %p1203_p1 = scmp.lt.u32.totalorder %s1196_s11, %s1464_s3 }
  0x12   : > { %p1198_p12 = pneg %p1356_p10 }
  0x14   : > { %p1199_p13 = pnand %p1198_p12, %p1197_p11 }
  0x16   : > { %p1200_p0 = pneg %p1199_p13 }
  0x18   : > { %p1205_p2 = pnand %p1203_p1, %p1200_p0 }
  0x1a   : > { %1208 = shalt.err (!%p1205_p2)
}
  0x1b   : > { %s1209_s16 = scalar_lea.vmem %s226_s7, 16  ;;  %s1216_s17 = scalar_lea.vmem %s226_s7, 32 }
  0x1c   : > { %p1210_p4 = scmp.ne.s32.totalorder %s226_s7, %s1209_s16  ;;  %p1217_p9 = scmp.lt.s32.totalorder %s226_s7, %s226_s7 }
  0x1d   : > { %p1218_p8 = scmp.lt.s32.totalorder %s1216_s17, %s1209_s16 }
  0x1e   : > { %p1212_p5 = pnand %p1210_p4, %p1198_p12 }
  0x1f   : > { %p1219_p7 = por %p1218_p8, %p1217_p9 }
  0x20   : > { %p1213_p6 = pneg %p1212_p5 }
  0x22   : > { %p1220_p3 = pnand %p1219_p7, %p1213_p6 }
  0x24   : > { %1223 = shalt.err (!%p1220_p3)
}
  0x25   : > { %1119 = dma.hbm_to_vmem [thread:$0]  (!%p1356_p10), %s1464_s3, 16, %s226_s7, [#allocation5]  }
  0x26   : > { %p972_p11 = scmp.ge.s32.totalorder %s1266_s22, 3 }
  0x27   : > { %p1474_p13 = scmp.ne.s32.totalorder (!%p972_p11), %s1470_s26, 0 }
  0x28   : > { %244 = sbr.rel (%p972_p11) target bundleno = 56 (0x38), region = 28 }
  0x2f   : > { %247 = sbr.rel (!%p1474_p13) target bundleno = 56 (0x38), region = 32  ;;  %s249_s27 = sand.u32 (%p1474_p13), 1, %s1254_s19  }
  0x30   : > { %s1027_s6 = smul.u32 (%p1474_p13), 12, %s1262_s21 }
  0x31   : > { %s1110_s9 = smul.u32 (%p1474_p13), 48, %s249_s27 }
  0x32   : > { %s257_s12 = scalar_lea.vmem (%p1474_p13), %s1461_s0, %s1027_s6 }
  0x33   : > { %v272_v0 = vld [vmem:[%s257_s12] sm:$0xff] (%p1474_p13)  ;;  %v276_v2 = vld [vmem:[%s257_s12 + $0x48] sm:$0xff] (%p1474_p13)  ;;  %s251_s8 = scalar_lea.vmem (%p1474_p13), [#allocation3], %s1110_s9  ;;  %v978_v6 = vld [vmem:[%s257_s12 + $0x50] sm:$0xf] (%p1474_p13) }
  0x34   : > { %v274_v1 = vld [vmem:[%s257_s12 + $0x24] sm:$0xff] (%p1474_p13)  ;;  %273 = vst [vmem:[%s251_s8] sm:$0xff] (%p1474_p13), %v272_v0  ;;  %277 = vst [vmem:[%s251_s8 + $0x18] sm:$0xff] (%p1474_p13), %v276_v2  ;;  %v278_v3 = vld [vmem:[%s257_s12 + $0x6c] sm:$0xff] (%p1474_p13) }
  0x35   : > { %275 = vst [vmem:[%s251_s8 + $0xc] sm:$0xff] (%p1474_p13), %v274_v1  ;;  %v974_v4 = vld [vmem:[%s257_s12 + $0x8] sm:$0xf] (%p1474_p13)  ;;  %v976_v5 = vld [vmem:[%s257_s12 + $0x2c] sm:$0xf] (%p1474_p13)  ;;  %279 = vst [vmem:[%s251_s8 + $0x24] sm:$0xff] (%p1474_p13), %v278_v3 }
  0x36   : > { %975 = vst [vmem:[%s251_s8 + $0x8] sm:$0xf] %v974_v4  ;;  %977 = vst [vmem:[%s251_s8 + $0x14] sm:$0xf] %v976_v5  ;;  %v980_v7 = vld [vmem:[%s257_s12 + $0x74] sm:$0xf] }
  0x37   : > { %979 = vst [vmem:[%s251_s8 + $0x20] sm:$0xf] %v978_v6  ;;  %981 = vst [vmem:[%s251_s8 + $0x2c] sm:$0xf] %v980_v7 }
  0x38 PF: > { %p1475_p3 = scmp.ne.s32.totalorder %s1471_s28, 0 }
  0x39   : > { %s318_s26 = sand.u32 (!%p1475_p3), 1, %s1250_s18   ;;  %p1476_p7 = scmp.ne.s32.totalorder (!%p1475_p3), %s1472_s29, 0 }
  0x3a   : > { %315 = sbr.rel (%p1475_p3) target bundleno = 356 (0x164), region = 62 }
  0x3b   : > { %s1111_s7 = smul.u32 (!%p1475_p3), 48, %s318_s26 }
  0x3d   : > { %s1387_s13 = scalar_lea.vmem (!%p1475_p3), [#allocation3], %s1111_s7 }
  0x41   : > { %1245 = dma.done.wait (%p1476_p7), [#allocation5], 16  }
  0x42   : > { %1247 = vsyncadd (%p1476_p7), [#allocation5], 4294967280  ;;  %s373_s14 = smul.u32 48, %s1258_s20  ;;  %p985_p10 = scmp.ne.s32.totalorder %s1258_s20, 0 }
  0x43   : > { %v1269_v8 = vmov (!%p985_p10), 0.0  }
  0x44   : > { %p374_p8 = scmp.lt.s32.totalorder %s373_s14, 143  ;;  %407 = sbr.rel (%p985_p10) target bundleno = 75 (0x4b), region = 74  ;;  %408 = vst [vmem:[#allocation2] sm:$0xff] (!%p985_p10), %v1269_v8  ;;  %409 = vst [vmem:[#allocation2 + $0x8] sm:$0xff] (!%p985_p10), %v1269_v8 }
  0x45   : > { %410 = vst [vmem:[#allocation2 + $0x10] sm:$0xff] (!%p985_p10), %v1269_v8  ;;  %411 = vst [vmem:[#allocation2 + $0x18] sm:$0xff] (!%p985_p10), %v1269_v8 }
  0x46   : > { %s1484_s14 = smov (!%p374_p8, %s373_s14), 143 }
  0x47   : > { %s984_s15 = sshll.u32 %s1484_s14, 2 }
  0x48   : > { %s1397_s28 = scalar_lea.vmem %s1462_s1, %s984_s15 }
  0x4b PF: > { %v1164_v9 = vld [vmem:[%s1397_s28 + $0x40] sm:$0xff]   ;;  %v1167_v12 = vld [vmem:[%s1397_s28 + $0x48] sm:$0xff]   ;;  %v1170_v15 = vld [vmem:[%s1397_s28 + $0x50] sm:$0xff]   ;;  %p1016_p12 = scmp.ne.s32.totalorder %s1258_s20, 2 }
  0x4c   : > { %v1165_v10 = vld [vmem:[%s1397_s28] sm:$0xff]   ;;  %1052 = vmatprep.subr.bf16.mxu0 %v1164_v9  ;;  %v1168_v13 = vld [vmem:[%s1397_s28 + $0x8] sm:$0xff]   ;;  %v1171_v16 = vld [vmem:[%s1397_s28 + $0x10] sm:$0xff]  }
  0x4d   : > { %v1166_v11 = vld [vmem:[%s1397_s28 + $0x80] sm:$0xff]   ;;  %1053 = vmatpush3.bf16.msra.mxu0 %v1165_v10  ;;  %v1169_v14 = vld [vmem:[%s1397_s28 + $0x88] sm:$0xff]   ;;  %v1172_v17 = vld [vmem:[%s1397_s28 + $0x90] sm:$0xff]  }
  0x4e   : > { %1090 = vmatprep.subr.bf16.mxu1 %v1166_v11  ;;  %1054 = vmatprep.subr.bf16.mxu0 %v1167_v12  ;;  %v1173_v18 = vld [vmem:[%s1397_s28 + $0x58] sm:$0xff]   ;;  %v1176_v21 = vld [vmem:[%s1397_s28 + $0x60] sm:$0xff]   ;;  %v1179_v24 = vld [vmem:[%s1397_s28 + $0x68] sm:$0xff]  }
  0x4f   : > { %1091 = vmatpush3.bf16.msra.mxu1 %v1166_v11  ;;  %v1174_v19 = vld [vmem:[%s1397_s28 + $0x18] sm:$0xff]   ;;  %v1178_v22 = vld [vmem:[%s1397_s28 + $0xa0] sm:$0xff]   ;;  %v1181_v25 = vld [vmem:[%s1397_s28 + $0xa8] sm:$0xff]  }
  0x50   : > { %1092 = vmatprep.subr.bf16.mxu1 %v1169_v14  ;;  %v1175_v20 = vld [vmem:[%s1397_s28 + $0x98] sm:$0xff]   ;;  %v1177_v23 = vld [vmem:[%s1397_s28 + $0x20] sm:$0xff]   ;;  %v1180_v26 = vld [vmem:[%s1397_s28 + $0x28] sm:$0xff]  }
  0x51   : > { %1055 = vmatpush3.bf16.msra.mxu0 %v1168_v13  ;;  %v1182_v27 = vld [vmem:[%s1397_s28 + $0x70] sm:$0xff]   ;;  %v1185_v30 = vld [vmem:[%s1397_s28 + $0x78] sm:$0xff]   ;;  %v412_v45 = vld [vmem:[#allocation2] sm:$0xff] }
  0x52   : > { %1056 = vmatprep.subr.bf16.mxu0 %v1170_v15  ;;  %v1183_v28 = vld [vmem:[%s1397_s28 + $0x30] sm:$0xff]   ;;  %v1187_v31 = vld [vmem:[%s1397_s28 + $0xb8] sm:$0xff]   ;;  %v413_v50 = vld [vmem:[#allocation2 + $0x8] sm:$0xff] }
  0x53   : > { %1093 = vmatpush3.bf16.msra.mxu1 %v1169_v14  ;;  %v1184_v29 = vld [vmem:[%s1397_s28 + $0xb0] sm:$0xff]   ;;  %v1186_v34 = vld [vmem:[%s1397_s28 + $0x38] sm:$0xff]   ;;  %v1017_v5 = vld [vmem:[%s1463_s2] ss:$0 sm:$0xff] (!%p1016_p12) }
  0x54   : > { %1094 = vmatprep.subr.bf16.mxu1 %v1172_v17  ;;  %v1190_v32 = vld [vmem:[%s1387_s13 + $0x4] ss:$12 sps:$4 sm:$0xff]   ;;  %v1191_v33 = vld [vmem:[%s1387_s13 + $0x8] ss:$12 sps:$4 sm:$0xff]   ;;  %v1188_v35 = vld [vmem:[%s1387_s13] ss:$12 sps:$4 sm:$0xff]  }
  0x55   : > { %1057 = vmatpush3.bf16.msra.mxu0 %v1171_v16  ;;  %680 = vmatprep.mubr.bf16.mxu0 %v1190_v32  ;;  %v1193_v36 = vld [vmem:[%s1387_s13 + $0x1c] ss:$12 sps:$4 sm:$0xff]   ;;  %v1192_v37 = vld [vmem:[%s1387_s13 + $0x20] ss:$12 sps:$4 sm:$0xff]   ;;  %v1195_v38 = vld [vmem:[%s1387_s13 + $0x18] ss:$12 sps:$4 sm:$0xff]  }
  0x56   : > { %1058 = vmatprep.subr.bf16.mxu0 %v1173_v18  ;;  %1106 = vmatprep.mubr.bf16.mxu1 %v1191_v33  ;;  %v414_v59 = vld [vmem:[#allocation2 + $0x10] sm:$0xff]  ;;  %v415_v63 = vld [vmem:[#allocation2 + $0x18] sm:$0xff]  ;;  %v1018_v8 = vld [vmem:[#allocation4] ss:$0 sm:$0xff] (!%p1016_p12) }
  0x57   : > { %1095 = vmatpush3.bf16.msra.mxu1 %v1172_v17  ;;  %v1033_v9 = vld [vmem:[%s1465_s4] sm:$0xff] (!%p1016_p12)   ;;  %v1050_v15 = vld [vmem:[%s1465_s4 + $0x8] sm:$0xff] (!%p1016_p12)  }
  0x58   : > { %1096 = vmatprep.subr.bf16.mxu1 %v1175_v20  ;;  %v1034_v11 = vunpack.c.l.bf16 (!%p1016_p12), %v1033_v9  ;;  %v1035_v12 = vunpack.c.h.bf16 (!%p1016_p12), %v1033_v9 }
  0x59   : > { %1059 = vmatpush3.bf16.msra.mxu0 %v1174_v19  ;;  %v1038_v19 = vunpack.c.l.bf16 (!%p1016_p12), %v1050_v15 }
  0x5a   : > { %1060 = vmatprep.subr.bf16.mxu0 %v1176_v21  ;;  %v1039_v21 = vunpack.c.h.bf16 (!%p1016_p12), %v1050_v15 }
  0x5b   : > { %1097 = vmatpush3.bf16.msra.mxu1 %v1175_v20 }
  0x5c   : > { %1098 = vmatprep.subr.bf16.mxu1 %v1178_v22 }
  0x5d   : > { %1061 = vmatpush3.bf16.msra.mxu0 %v1177_v23 }
  0x5e   : > { %1062 = vmatprep.subr.bf16.mxu0 %v1179_v24 }
  0x5f   : > { %1099 = vmatpush3.bf16.msra.mxu1 %v1178_v22 }
  0x60   : > { %1100 = vmatprep.subr.bf16.mxu1 %v1181_v25 }
  0x61   : > { %1063 = vmatpush3.bf16.msra.mxu0 %v1180_v26 }
  0x62   : > { %1064 = vmatprep.subr.bf16.mxu0 %v1182_v27 }
  0x63   : > { %1101 = vmatpush3.bf16.msra.mxu1 %v1181_v25 }
  0x64   : > { %1102 = vmatprep.subr.bf16.mxu1 %v1184_v29 }
  0x65   : > { %1065 = vmatpush3.bf16.msra.mxu0 %v1183_v28 }
  0x66   : > { %1066 = vmatprep.subr.bf16.mxu0 %v1185_v30 }
  0x67   : > { %1103 = vmatpush3.bf16.msra.mxu1 %v1184_v29 }
  0x68   : > { %1104 = vmatprep.subr.bf16.mxu1 %v1187_v31 }
  0x69   : > { %1067 = vmatpush3.bf16.msra.mxu0 %v1186_v34 }
  0x6b   : > { %1105 = vmatpush3.bf16.msra.mxu1 %v1187_v31 }
  0x6c   : > { %681 = vmatmul.mubr.bf16.vlgmr.msra.gmra.mrb[0].mxu0 %v1188_v35 }
  0x6d   : > { %688 = vmatprep.mubr.bf16.mxu0 %v1193_v36 }
  0x6e   : > { %1107 = vmatmul.mubr.bf16.vlgmr.msra.gmra.mrb[0].mxu1 %v1192_v37 }
  0x74   : > { %689 = vmatmul.mubr.bf16.gmra.mrb[4].mxu0 %v1195_v38 }
 0x13f   : > { %v1068_v39 = vpop.f32.mrb[0].mxu0 }
 0x140   : > { %v1069_v40 = vpop.f32.mrb[1].mxu0 }
 0x141   : > { %v1070_v41 = vadd.f32 %v1069_v40, %v1068_v39  ;;  %v1071_v42 = vpop.f32.mrb[2].mxu0  ;;  %v1108_v43 = vpop.f32.mrb[0].mxu1 }
 0x142   : > { %v1072_v44 = vpop.f32.mrb[3].mxu0  ;;  %v731_v46 = vpop.f32.mrb[1].mxu1 }
 0x143   : > { %v1073_v47 = vadd.f32 %v1072_v44, %v1071_v42  ;;  %v732_v48 = vadd.f32 %v1070_v41, %v731_v46  ;;  %v1109_v49 = vpop.f32.mrb[2].mxu1 }
 0x144   : > { %v734_v51 = vpop.f32.mrb[3].mxu1 }
 0x145   : > { %v746_v52 = vadd.f32 %v732_v48, %v412_v45  ;;  %v735_v53 = vadd.f32 %v1073_v47, %v734_v51 }
 0x147   : > { %750 = vst [vmem:[#allocation2] sm:$0xff] %v746_v52  ;;  %v747_v54 = vadd.f32 %v735_v53, %v413_v50  ;;  %v1074_v55 = vpop.f32.mrb[4].mxu0 }
 0x148   : > { %v1075_v56 = vpop.f32.mrb[5].mxu0 }
 0x149   : > { %751 = vst [vmem:[#allocation2 + $0x8] sm:$0xff] %v747_v54  ;;  %v1076_v57 = vadd.f32 %v1075_v56, %v1074_v55  ;;  %v1077_v58 = vpop.f32.mrb[6].mxu0 }
 0x14a   : > { %v1078_v60 = vpop.f32.mrb[7].mxu0 }
 0x14b   : > { %v740_v61 = vadd.f32 %v1108_v43, %v1076_v57  ;;  %v1079_v62 = vadd.f32 %v1078_v60, %v1077_v58  ;;  %757 = sbr.rel (%p1016_p12) target bundleno = 356 (0x164), region = 78 }
 0x14d   : > { %v748_v0 = vadd.f32 %v740_v61, %v414_v59  ;;  %v743_v1 = vadd.f32 %v1109_v49, %v1079_v62 }
 0x14e   : > { %v758_v3 = vld [vmem:[#allocation2] sm:$0xff] (!%p1016_p12) }
 0x14f   : > { %752 = vst [vmem:[#allocation2 + $0x10] sm:$0xff] %v748_v0  ;;  %v749_v2 = vadd.f32 %v743_v1, %v415_v63  ;;  %v769_v6 = vmul.f32 (!%p1016_p12), %v1017_v5, %v758_v3 }
 0x150   : > { %v759_v4 = vld [vmem:[#allocation2 + $0x8] sm:$0xff] (!%p1016_p12) }
 0x151   : > { %753 = vst [vmem:[#allocation2 + $0x18] sm:$0xff] %v749_v2  ;;  %v770_v7 = vmul.f32 (!%p1016_p12), %v1017_v5, %v759_v4  ;;  %v780_v16 = vadd.f32 (!%p1016_p12), %v1018_v8, %v769_v6 }
 0x153   : > { %v781_v17 = vadd.f32 %v1018_v8, %v770_v7  ;;  %v792_v22 = vadd.f32 %v1034_v11, %v780_v16 }
 0x155   : > { %v793_v23 = vadd.f32 %v1035_v12, %v781_v17  ;;  %v796_v26 = vmax.f32 %v792_v22, 0.0 }
 0x156   : > { %v760_v10 = vld [vmem:[#allocation2 + $0x10] sm:$0xff] }
 0x157   : > { %v771_v14 = vmul.f32 %v1017_v5, %v760_v10  ;;  %v797_v27 = vmax.f32 %v793_v23, 0.0 }
 0x158   : > { %v761_v13 = vld [vmem:[#allocation2 + $0x18] sm:$0xff] }
 0x159   : > { %v772_v18 = vmul.f32 %v1017_v5, %v761_v13  ;;  %v782_v20 = vadd.f32 %v1018_v8, %v771_v14  ;;  %v1043_v30 = vpack.c.bf16 %v797_v27, %v796_v26 }
 0x15b   : > { %v783_v24 = vadd.f32 %v1018_v8, %v772_v18  ;;  %v794_v25 = vadd.f32 %v1038_v19, %v782_v20  ;;  %1044 = vst [vmem:[%s1466_s5] sm:$0xff] %v1043_v30  }
 0x15d   : > { %v795_v28 = vadd.f32 %v1039_v21, %v783_v24  ;;  %v798_v29 = vmax.f32 %v794_v25, 0.0 }
 0x15f   : > { %v799_v31 = vmax.f32 %v795_v28, 0.0 }
 0x161   : > { %v1048_v32 = vpack.c.bf16 %v799_v31, %v798_v29 }
 0x163   : > { %1051 = vst [vmem:[%s1466_s5 + $0x8] sm:$0xff] %v1048_v32  }
 0x164 PF: > { %s16_s22 = sadd.s32 1, %s1266_s22   ;;  %s1477_s18 = smov %s1254_s19 }
 0x165   : > { %p13_p0 = scmp.ge.s32.totalorder %s16_s22, 5   ;;  %s1478_s19 = smov %s1350_s30 }
 0x166   : > { %s1479_s20 = smov %s1262_s21  ;;  %s1480_s21 = smov %s1482_s24 }
 0x167   :  { %15 = sbr.rel (!%p13_p0) target bundleno = 3 (0x3), region = 130 }
 0x16e   :  { %848 = vsyncpa [#allocation5], 1 }
 0x16f   :  { %850 = vsyncpa [#allocation5 + $0x1], 1 }

// kernel: pothole_detector_forward.31
= control target key start
LH: loop header
LB: loop body
LE: loop exit
PB: predicated region body
PF: predicated region fallthrough
CT: control target
= control target key end

     0   :  { %9 = vsyncpa [#allocation5], 0  ;;  %s1435_s0 = inlined_call_operand.vmem [shape: bf16[32,1152], index: 0, kind: input, shape index: {}]   ;;  %s1436_s1 = inlined_call_operand.vmem [shape: bf16[1152,128], index: 1, kind: input, shape index: {}]   ;;  %s1437_s2 = inlined_call_operand.hbm [shape: f32[1,128], index: 2, kind: input, shape index: {}]   ;;  %s1438_s3 = inlined_call_operand.hbm [shape: f32[1,128], index: 3, kind: input, shape index: {}]   ;;  %s1439_s4 = inlined_call_operand.vmem [shape: bf16[32,128], index: 4, kind: output, shape index: {}]  }
   0x1   :  { %10 = vsyncpa [#allocation7], 0  ;;  %s1245_s15 = smov 0   ;;  %s1247_s16 = smov 0  }
   0x2   :  { %s1249_s17 = smov 0   ;;  %s1251_s18 = smov 0  }
   0x3   :  { %s1253_s19 = smov 0  }
   0x4 LB: > { %s883_s20 = sadd.s32 4294967295, %s1215_s19   ;;  %s28_s21 = sadd.s32 1, %s1211_s18  ;;  %s1215_s19 = sphi %s1253_s19, %s16_s19   ;;  %s1211_s18 = sphi %s1251_s18, %s1453_s18   ;;  %s1207_s17 = sphi %s1249_s17, %s1452_s17   ;;  %s1203_s16 = sphi %s1247_s16, %s1451_s16   ;;  %s1199_s15 = sphi %s1245_s15, %s1450_s15  }
   0x5   : > { %p29_p0 = scmp.ge.s32.totalorder %s28_s21, 3  ;;  %s44_s22 = sadd.s32 1, %s1203_s16 }
   0x6   : > { %p51_p1 = scmp.ne.s32.totalorder %s1203_s16, %s1199_s15  ;;  %p52_p2 = scmp.eq.s32.totalorder %s1215_s19, 0 }
   0x7   : > { %s1455_s21 = smov (%p29_p0, %s28_s21), 0  ;;  %p884_p4 = scmp.ge.s32.totalorder %s1215_s19, 1 }
   0x8   : > { %p1278_p3 = por %p52_p2, %p51_p1  ;;  %s40_s24 = ssub.s32 %s1211_s18, %s1455_s21 }
   0x9   : > { %p176_p5 = scmp.lt.s32.totalorder %s1215_s19, 4  ;;  %p42_p6 = scmp.eq.s32.totalorder %s40_s24, 0 }
   0xa   : > { %s1443_s23 = scalar_select %p1278_p3, 1, 0 }
   0xb   : > { %p1286_p7 = pnand %p884_p4, %p176_p5  ;;  %p1290_p8 = scmp.eq.s32.totalorder %s883_s20, 0 }
   0xc   : > { %s1295_s27 = scalar_select %p42_p6, %s1203_s16, %s44_s22  }
   0xd   : > { %s1444_s25 = scalar_select %p1286_p7, 1, 0 }
   0xe   : > { %s1445_s26 = scalar_select %p1290_p8, 1, 0 }
   0xf   : > { %p1027_p9 = pneg %p1286_p7  ;;  %s1217_s28 = smov [#allocation4]  }
  0x10   : > { %s191_s29 = sshll.u32 %s1217_s28, 4  ;;  %s1218_s5 = smov [#allocation6]   ;;  %s192_s29 = int_to_ptr.vmem [resolvable:$true] %s191_s29 }
  0x11   : > { %p1301_p10 = pnand %p1290_p8, %p1027_p9  ;;  %s204_s6 = sshll.u32 %s1218_s5, 4  ;;  %s1305_s6 = int_to_ptr.vmem [resolvable:$true] %s204_s6 }
  0x12   : > { %s1113_s9 = scalar_lea.hbm %s1437_s2, 16 }
  0x13   : > { %p1114_p11 = scmp.ne.s32.totalorder %s1437_s2, %s1113_s9  ;;  %p1115_p12 = pneg %p1301_p10 }
  0x14   : > { %p1120_p1 = scmp.lt.u32.totalorder %s1113_s9, %s1437_s2 }
  0x15   : > { %p1116_p13 = pnand %p1115_p12, %p1114_p11 }
  0x17   : > { %p1117_p0 = pneg %p1116_p13 }
  0x19   : > { %p1122_p2 = pnand %p1120_p1, %p1117_p0 }
  0x1b   : > { %1125 = shalt.err (!%p1122_p2)
}
  0x1c   : > { %s1126_s14 = scalar_lea.vmem %s192_s29, 16  ;;  %s1133_s20 = scalar_lea.vmem %s192_s29, 32 }
  0x1d   : > { %p1127_p4 = scmp.ne.s32.totalorder %s192_s29, %s1126_s14  ;;  %p1134_p9 = scmp.lt.s32.totalorder %s192_s29, %s192_s29 }
  0x1e   : > { %p1135_p8 = scmp.lt.s32.totalorder %s1133_s20, %s1126_s14 }
  0x1f   : > { %p1129_p5 = pnand %p1127_p4, %p1115_p12 }
  0x20   : > { %p1136_p7 = por %p1135_p8, %p1134_p9 }
  0x21   : > { %p1130_p6 = pneg %p1129_p5 }
  0x23   : > { %p1137_p3 = pnand %p1136_p7, %p1130_p6 }
  0x25   : > { %1140 = shalt.err (!%p1137_p3)
}
  0x26   : > { %1030 = dma.hbm_to_vmem [thread:$0]  (!%p1301_p10), %s1437_s2, 16, %s192_s29, [#allocation5]  }
  0x27   : > { %s1141_s7 = scalar_lea.hbm %s1438_s3, 16 }
  0x28   : > { %p1142_p11 = scmp.ne.s32.totalorder %s1438_s3, %s1141_s7  ;;  %p1148_p3 = scmp.lt.u32.totalorder %s1141_s7, %s1438_s3 }
  0x2a   : > { %p1144_p8 = pnand %p1142_p11, %p1115_p12 }
  0x2c   : > { %p1145_p7 = pneg %p1144_p8 }
  0x2e   : > { %p1150_p13 = pnand %p1148_p3, %p1145_p7 }
  0x30   : > { %1153 = shalt.err (!%p1150_p13)
}
  0x31   : > { %s1154_s29 = scalar_lea.vmem %s1305_s6, 16  ;;  %s1161_s12 = scalar_lea.vmem %s1305_s6, 32 }
  0x32   : > { %p1155_p0 = scmp.ne.s32.totalorder %s1305_s6, %s1154_s29  ;;  %p1162_p4 = scmp.lt.s32.totalorder %s1305_s6, %s1305_s6 }
  0x33   : > { %p1163_p5 = scmp.lt.s32.totalorder %s1161_s12, %s1154_s29 }
  0x34   : > { %p1157_p1 = pnand %p1155_p0, %p1115_p12 }
  0x35   : > { %p1164_p6 = por %p1163_p5, %p1162_p4 }
  0x36   : > { %p1158_p2 = pneg %p1157_p1 }
  0x38   : > { %p1165_p9 = pnand %p1164_p6, %p1158_p2 }
  0x3a   : > { %1168 = shalt.err (!%p1165_p9)
}
  0x3b   : > { %1033 = dma.hbm_to_vmem [thread:$0]  (!%p1301_p10), %s1438_s3, 16, %s1305_s6, [#allocation7]  }
  0x3c   : > { %p887_p11 = scmp.ge.s32.totalorder %s1215_s19, 3 }
  0x3d   : > { %p1447_p12 = scmp.ne.s32.totalorder (!%p887_p11), %s1443_s23, 0 }
  0x3e   : > { %211 = sbr.rel (%p887_p11) target bundleno = 78 (0x4e), region = 24 }
  0x45   : > { %214 = sbr.rel (!%p1447_p12) target bundleno = 78 (0x4e), region = 28  ;;  %s216_s20 = sand.u32 (%p1447_p12), 1, %s1203_s16  }
  0x46   : > { %s943_s22 = smul.u32 (%p1447_p12), 12, %s1211_s18 }
  0x47   : > { %s1017_s24 = smul.u32 (%p1447_p12), 48, %s216_s20 }
  0x48   : > { %s224_s30 = scalar_lea.vmem (%p1447_p12), %s1435_s0, %s943_s22 }
  0x49   : > { %v239_v0 = vld [vmem:[%s224_s30] sm:$0xff] (%p1447_p12)  ;;  %v243_v2 = vld [vmem:[%s224_s30 + $0x48] sm:$0xff] (%p1447_p12)  ;;  %s218_s7 = scalar_lea.vmem (%p1447_p12), [#allocation3], %s1017_s24  ;;  %v893_v6 = vld [vmem:[%s224_s30 + $0x50] sm:$0xf] (%p1447_p12) }
  0x4a   : > { %v241_v1 = vld [vmem:[%s224_s30 + $0x24] sm:$0xff] (%p1447_p12)  ;;  %240 = vst [vmem:[%s218_s7] sm:$0xff] (%p1447_p12), %v239_v0  ;;  %244 = vst [vmem:[%s218_s7 + $0x18] sm:$0xff] (%p1447_p12), %v243_v2  ;;  %v245_v3 = vld [vmem:[%s224_s30 + $0x6c] sm:$0xff] (%p1447_p12) }
  0x4b   : > { %242 = vst [vmem:[%s218_s7 + $0xc] sm:$0xff] (%p1447_p12), %v241_v1  ;;  %v889_v4 = vld [vmem:[%s224_s30 + $0x8] sm:$0xf] (%p1447_p12)  ;;  %v891_v5 = vld [vmem:[%s224_s30 + $0x2c] sm:$0xf] (%p1447_p12)  ;;  %246 = vst [vmem:[%s218_s7 + $0x24] sm:$0xff] (%p1447_p12), %v245_v3 }
  0x4c   : > { %890 = vst [vmem:[%s218_s7 + $0x8] sm:$0xf] %v889_v4  ;;  %892 = vst [vmem:[%s218_s7 + $0x14] sm:$0xf] %v891_v5  ;;  %v895_v7 = vld [vmem:[%s224_s30 + $0x74] sm:$0xf] }
  0x4d   : > { %894 = vst [vmem:[%s218_s7 + $0x20] sm:$0xf] %v893_v6  ;;  %896 = vst [vmem:[%s218_s7 + $0x2c] sm:$0xf] %v895_v7 }
  0x4e PF: > { %p1448_p10 = scmp.ne.s32.totalorder %s1444_s25, 0 }
  0x4f   : > { %s285_s23 = sand.u32 (!%p1448_p10), 1, %s1199_s15   ;;  %p1449_p8 = scmp.ne.s32.totalorder (!%p1448_p10), %s1445_s26, 0 }
  0x50   : > { %282 = sbr.rel (%p1448_p10) target bundleno = 378 (0x17a), region = 58 }
  0x51   : > { %s1018_s6 = smul.u32 (!%p1448_p10), 48, %s285_s23 }
  0x53   : > { %s1366_s8 = scalar_lea.vmem (!%p1448_p10), [#allocation3], %s1018_s6 }
  0x57   : > { %1190 = dma.done.wait (%p1449_p8), [#allocation5], 16  }
  0x58   : > { %1192 = vsyncadd (%p1449_p8), [#allocation5], 4294967280 }
  0x59   : > { %1194 = dma.done.wait (%p1449_p8), [#allocation7], 16  }
  0x5a   : > { %1196 = vsyncadd (%p1449_p8), [#allocation7], 4294967280  ;;  %s331_s25 = smul.u32 48, %s1207_s17  ;;  %p901_p3 = scmp.ne.s32.totalorder %s1207_s17, 0 }
  0x5b   : > { %v1219_v8 = vmov (!%p901_p3), 0.0  }
  0x5c   : > { %p332_p7 = scmp.lt.s32.totalorder %s331_s25, 143  ;;  %353 = sbr.rel (%p901_p3) target bundleno = 99 (0x63), region = 74  ;;  %354 = vst [vmem:[#allocation2] sm:$0xff] (!%p901_p3), %v1219_v8  ;;  %355 = vst [vmem:[#allocation2 + $0x8] sm:$0xff] (!%p901_p3), %v1219_v8 }
  0x5d   : > { %356 = vst [vmem:[#allocation2 + $0x10] sm:$0xff] (!%p901_p3), %v1219_v8  ;;  %357 = vst [vmem:[#allocation2 + $0x18] sm:$0xff] (!%p901_p3), %v1219_v8 }
  0x5e   : > { %s1457_s25 = smov (!%p332_p7, %s331_s25), 143 }
  0x5f   : > { %s900_s9 = sshll.u32 %s1457_s25, 2 }
  0x60   : > { %s1380_s11 = scalar_lea.vmem %s1436_s1, %s900_s9 }
  0x63 PF: > { %v1081_v9 = vld [vmem:[%s1380_s11 + $0x40] sm:$0xff]   ;;  %v1084_v12 = vld [vmem:[%s1380_s11 + $0x48] sm:$0xff]   ;;  %v1087_v15 = vld [vmem:[%s1380_s11 + $0x50] sm:$0xff]   ;;  %p932_p13 = scmp.ne.s32.totalorder %s1207_s17, 2 }
  0x64   : > { %v1082_v10 = vld [vmem:[%s1380_s11] sm:$0xff]   ;;  %959 = vmatprep.subr.bf16.mxu0 %v1081_v9  ;;  %v1085_v13 = vld [vmem:[%s1380_s11 + $0x8] sm:$0xff]   ;;  %v1088_v16 = vld [vmem:[%s1380_s11 + $0x10] sm:$0xff]  }
  0x65   : > { %v1083_v11 = vld [vmem:[%s1380_s11 + $0x80] sm:$0xff]   ;;  %960 = vmatpush3.bf16.msra.mxu0 %v1082_v10  ;;  %v1086_v14 = vld [vmem:[%s1380_s11 + $0x88] sm:$0xff]   ;;  %v1089_v17 = vld [vmem:[%s1380_s11 + $0x90] sm:$0xff]  }
  0x66   : > { %997 = vmatprep.subr.bf16.mxu1 %v1083_v11  ;;  %961 = vmatprep.subr.bf16.mxu0 %v1084_v12  ;;  %v1090_v18 = vld [vmem:[%s1380_s11 + $0x58] sm:$0xff]   ;;  %v1093_v21 = vld [vmem:[%s1380_s11 + $0x60] sm:$0xff]   ;;  %v1096_v24 = vld [vmem:[%s1380_s11 + $0x68] sm:$0xff]  }
  0x67   : > { %998 = vmatpush3.bf16.msra.mxu1 %v1083_v11  ;;  %v1091_v19 = vld [vmem:[%s1380_s11 + $0x18] sm:$0xff]   ;;  %v1095_v22 = vld [vmem:[%s1380_s11 + $0xa0] sm:$0xff]   ;;  %v1098_v25 = vld [vmem:[%s1380_s11 + $0xa8] sm:$0xff]  }
  0x68   : > { %999 = vmatprep.subr.bf16.mxu1 %v1086_v14  ;;  %v1092_v20 = vld [vmem:[%s1380_s11 + $0x98] sm:$0xff]   ;;  %v1094_v23 = vld [vmem:[%s1380_s11 + $0x20] sm:$0xff]   ;;  %v1097_v26 = vld [vmem:[%s1380_s11 + $0x28] sm:$0xff]  }
  0x69   : > { %962 = vmatpush3.bf16.msra.mxu0 %v1085_v13  ;;  %v1099_v27 = vld [vmem:[%s1380_s11 + $0x70] sm:$0xff]   ;;  %v1102_v30 = vld [vmem:[%s1380_s11 + $0x78] sm:$0xff]   ;;  %v358_v45 = vld [vmem:[#allocation2] sm:$0xff] }
  0x6a   : > { %963 = vmatprep.subr.bf16.mxu0 %v1087_v15  ;;  %v1100_v28 = vld [vmem:[%s1380_s11 + $0x30] sm:$0xff]   ;;  %v1104_v31 = vld [vmem:[%s1380_s11 + $0xb8] sm:$0xff]   ;;  %v359_v50 = vld [vmem:[#allocation2 + $0x8] sm:$0xff] }
  0x6b   : > { %1000 = vmatpush3.bf16.msra.mxu1 %v1086_v14  ;;  %v1101_v29 = vld [vmem:[%s1380_s11 + $0xb0] sm:$0xff]   ;;  %v1103_v34 = vld [vmem:[%s1380_s11 + $0x38] sm:$0xff]   ;;  %v933_v5 = vld [vmem:[#allocation4] ss:$0 sm:$0xff] (!%p932_p13) }
  0x6c   : > { %1001 = vmatprep.subr.bf16.mxu1 %v1089_v17  ;;  %v1107_v32 = vld [vmem:[%s1366_s8 + $0x4] ss:$12 sps:$4 sm:$0xff]   ;;  %v1108_v33 = vld [vmem:[%s1366_s8 + $0x8] ss:$12 sps:$4 sm:$0xff]   ;;  %v1105_v35 = vld [vmem:[%s1366_s8] ss:$12 sps:$4 sm:$0xff]  }
  0x6d   : > { %964 = vmatpush3.bf16.msra.mxu0 %v1088_v16  ;;  %626 = vmatprep.mubr.bf16.mxu0 %v1107_v32  ;;  %v1110_v36 = vld [vmem:[%s1366_s8 + $0x1c] ss:$12 sps:$4 sm:$0xff]   ;;  %v1109_v37 = vld [vmem:[%s1366_s8 + $0x20] ss:$12 sps:$4 sm:$0xff]   ;;  %v1112_v38 = vld [vmem:[%s1366_s8 + $0x18] ss:$12 sps:$4 sm:$0xff]  }
  0x6e   : > { %965 = vmatprep.subr.bf16.mxu0 %v1090_v18  ;;  %1013 = vmatprep.mubr.bf16.mxu1 %v1108_v33  ;;  %v360_v59 = vld [vmem:[#allocation2 + $0x10] sm:$0xff]  ;;  %v361_v63 = vld [vmem:[#allocation2 + $0x18] sm:$0xff]  ;;  %v934_v8 = vld [vmem:[#allocation6] ss:$0 sm:$0xff] (!%p932_p13) }
  0x6f   : > { %1002 = vmatpush3.bf16.msra.mxu1 %v1089_v17 }
  0x70   : > { %1003 = vmatprep.subr.bf16.mxu1 %v1092_v20 }
  0x71   : > { %966 = vmatpush3.bf16.msra.mxu0 %v1091_v19 }
  0x72   : > { %967 = vmatprep.subr.bf16.mxu0 %v1093_v21 }
  0x73   : > { %1004 = vmatpush3.bf16.msra.mxu1 %v1092_v20 }
  0x74   : > { %1005 = vmatprep.subr.bf16.mxu1 %v1095_v22 }
  0x75   : > { %968 = vmatpush3.bf16.msra.mxu0 %v1094_v23 }
  0x76   : > { %969 = vmatprep.subr.bf16.mxu0 %v1096_v24 }
  0x77   : > { %1006 = vmatpush3.bf16.msra.mxu1 %v1095_v22 }
  0x78   : > { %1007 = vmatprep.subr.bf16.mxu1 %v1098_v25 }
  0x79   : > { %970 = vmatpush3.bf16.msra.mxu0 %v1097_v26 }
  0x7a   : > { %971 = vmatprep.subr.bf16.mxu0 %v1099_v27 }
  0x7b   : > { %1008 = vmatpush3.bf16.msra.mxu1 %v1098_v25 }
  0x7c   : > { %1009 = vmatprep.subr.bf16.mxu1 %v1101_v29 }
  0x7d   : > { %972 = vmatpush3.bf16.msra.mxu0 %v1100_v28 }
  0x7e   : > { %973 = vmatprep.subr.bf16.mxu0 %v1102_v30 }
  0x7f   : > { %1010 = vmatpush3.bf16.msra.mxu1 %v1101_v29 }
  0x80   : > { %1011 = vmatprep.subr.bf16.mxu1 %v1104_v31 }
  0x81   : > { %974 = vmatpush3.bf16.msra.mxu0 %v1103_v34 }
  0x83   : > { %1012 = vmatpush3.bf16.msra.mxu1 %v1104_v31 }
  0x84   : > { %627 = vmatmul.mubr.bf16.vlgmr.msra.gmra.mrb[0].mxu0 %v1105_v35 }
  0x85   : > { %634 = vmatprep.mubr.bf16.mxu0 %v1110_v36 }
  0x86   : > { %1014 = vmatmul.mubr.bf16.vlgmr.msra.gmra.mrb[0].mxu1 %v1109_v37 }
  0x8c   : > { %635 = vmatmul.mubr.bf16.gmra.mrb[4].mxu0 %v1112_v38 }
 0x157   : > { %v975_v39 = vpop.f32.mrb[0].mxu0 }
 0x158   : > { %v976_v40 = vpop.f32.mrb[1].mxu0 }
 0x159   : > { %v977_v41 = vadd.f32 %v976_v40, %v975_v39  ;;  %v978_v42 = vpop.f32.mrb[2].mxu0  ;;  %v1015_v43 = vpop.f32.mrb[0].mxu1 }
 0x15a   : > { %v979_v44 = vpop.f32.mrb[3].mxu0  ;;  %v677_v46 = vpop.f32.mrb[1].mxu1 }
 0x15b   : > { %v980_v47 = vadd.f32 %v979_v44, %v978_v42  ;;  %v678_v48 = vadd.f32 %v977_v41, %v677_v46  ;;  %v1016_v49 = vpop.f32.mrb[2].mxu1 }
 0x15c   : > { %v680_v51 = vpop.f32.mrb[3].mxu1 }
 0x15d   : > { %v692_v52 = vadd.f32 %v678_v48, %v358_v45  ;;  %v681_v53 = vadd.f32 %v980_v47, %v680_v51 }
 0x15f   : > { %696 = vst [vmem:[#allocation2] sm:$0xff] %v692_v52  ;;  %v693_v54 = vadd.f32 %v681_v53, %v359_v50  ;;  %v981_v55 = vpop.f32.mrb[4].mxu0 }
 0x160   : > { %v982_v56 = vpop.f32.mrb[5].mxu0 }
 0x161   : > { %697 = vst [vmem:[#allocation2 + $0x8] sm:$0xff] %v693_v54  ;;  %v983_v57 = vadd.f32 %v982_v56, %v981_v55  ;;  %v984_v58 = vpop.f32.mrb[6].mxu0 }
 0x162   : > { %v985_v60 = vpop.f32.mrb[7].mxu0 }
 0x163   : > { %v686_v61 = vadd.f32 %v1015_v43, %v983_v57  ;;  %v986_v62 = vadd.f32 %v985_v60, %v984_v58  ;;  %703 = sbr.rel (%p932_p13) target bundleno = 378 (0x17a), region = 78 }
 0x165   : > { %v694_v0 = vadd.f32 %v686_v61, %v360_v59  ;;  %v689_v1 = vadd.f32 %v1016_v49, %v986_v62 }
 0x166   : > { %v704_v3 = vld [vmem:[#allocation2] sm:$0xff] (!%p932_p13) }
 0x167   : > { %698 = vst [vmem:[#allocation2 + $0x10] sm:$0xff] %v694_v0  ;;  %v695_v2 = vadd.f32 %v689_v1, %v361_v63  ;;  %v715_v6 = vmul.f32 (!%p932_p13), %v933_v5, %v704_v3 }
 0x168   : > { %v705_v4 = vld [vmem:[#allocation2 + $0x8] sm:$0xff] (!%p932_p13) }
 0x169   : > { %699 = vst [vmem:[#allocation2 + $0x18] sm:$0xff] %v695_v2  ;;  %v716_v7 = vmul.f32 (!%p932_p13), %v933_v5, %v705_v4  ;;  %v726_v13 = vadd.f32 (!%p932_p13), %v934_v8, %v715_v6 }
 0x16b   : > { %v727_v14 = vadd.f32 %v934_v8, %v716_v7  ;;  %v730_v17 = vmax.f32 %v726_v13, 0.0 }
 0x16d   : > { %v731_v18 = vmax.f32 %v727_v14, 0.0 }
 0x16e   : > { %v706_v9 = vld [vmem:[#allocation2 + $0x10] sm:$0xff] }
 0x16f   : > { %v717_v11 = vmul.f32 %v933_v5, %v706_v9  ;;  %v951_v21 = vpack.c.bf16 %v731_v18, %v730_v17 }
 0x170   : > { %v707_v10 = vld [vmem:[#allocation2 + $0x18] sm:$0xff] }
 0x171   : > { %v718_v12 = vmul.f32 %v933_v5, %v707_v10  ;;  %v728_v15 = vadd.f32 %v934_v8, %v717_v11  ;;  %952 = vst [vmem:[%s1439_s4] sm:$0xff] %v951_v21  }
 0x173   : > { %v729_v16 = vadd.f32 %v934_v8, %v718_v12  ;;  %v732_v19 = vmax.f32 %v728_v15, 0.0 }
 0x175   : > { %v733_v20 = vmax.f32 %v729_v16, 0.0 }
 0x177   : > { %v956_v22 = vpack.c.bf16 %v733_v20, %v732_v19 }
 0x179   : > { %958 = vst [vmem:[%s1439_s4 + $0x8] sm:$0xff] %v956_v22  }
 0x17a PF: > { %s16_s19 = sadd.s32 1, %s1215_s19   ;;  %s1450_s15 = smov %s1203_s16 }
 0x17b   : > { %p13_p0 = scmp.ge.s32.totalorder %s16_s19, 5   ;;  %s1451_s16 = smov %s1295_s27 }
 0x17c   : > { %s1452_s17 = smov %s1211_s18  ;;  %s1453_s18 = smov %s1455_s21 }
 0x17d   :  { %15 = sbr.rel (!%p13_p0) target bundleno = 4 (0x4), region = 125 }
 0x184   :  { %782 = vsyncpa [#allocation5], 1 }
 0x185   :  { %784 = vsyncpa [#allocation5 + $0x1], 1 }
 0x186   :  { %785 = vsyncpa [#allocation7], 1 }

// kernel: pothole_detector_forward.32
= control target key start
LH: loop header
LB: loop body
LE: loop exit
PB: predicated region body
PF: predicated region fallthrough
CT: control target
= control target key end

     0   :  { %10 = vsyncpa [#allocation5], 0  ;;  %s1546_s0 = inlined_call_operand.vmem [shape: bf16[32,1152], index: 0, kind: input, shape index: {}]   ;;  %s1547_s1 = inlined_call_operand.vmem [shape: bf16[1152,128], index: 1, kind: input, shape index: {}]   ;;  %s1548_s2 = inlined_call_operand.hbm [shape: f32[1,128], index: 2, kind: input, shape index: {}]   ;;  %s1549_s3 = inlined_call_operand.hbm [shape: f32[1,128], index: 3, kind: input, shape index: {}]   ;;  %s1550_s4 = inlined_call_operand.vmem [shape: bf16[32,128], index: 4, kind: input, shape index: {}]   ;;  %s1551_s5 = inlined_call_operand.vmem [shape: bf16[32,128], index: 5, kind: output, shape index: {}]  }
   0x1   :  { %11 = vsyncpa [#allocation7], 0  ;;  %s1350_s18 = smov 0   ;;  %s1352_s19 = smov 0  }
   0x2   :  { %s1354_s20 = smov 0   ;;  %s1356_s21 = smov 0  }
   0x3   :  { %s1358_s22 = smov 0  }
   0x4 LB: > { %s973_s23 = sadd.s32 4294967295, %s1315_s22   ;;  %s29_s24 = sadd.s32 1, %s1311_s21  ;;  %s1315_s22 = sphi %s1358_s22, %s17_s22   ;;  %s1311_s21 = sphi %s1356_s21, %s1565_s21   ;;  %s1307_s20 = sphi %s1354_s20, %s1564_s20   ;;  %s1303_s19 = sphi %s1352_s19, %s1563_s19   ;;  %s1299_s18 = sphi %s1350_s18, %s1562_s18  }
   0x5   : > { %p30_p0 = scmp.ge.s32.totalorder %s29_s24, 3  ;;  %s45_s25 = sadd.s32 1, %s1303_s19 }
   0x6   : > { %p52_p1 = scmp.ne.s32.totalorder %s1303_s19, %s1299_s18  ;;  %p53_p2 = scmp.eq.s32.totalorder %s1315_s22, 0 }
   0x7   : > { %s1567_s24 = smov (%p30_p0, %s29_s24), 0  ;;  %p974_p4 = scmp.ge.s32.totalorder %s1315_s22, 1 }
   0x8   : > { %p1383_p3 = por %p53_p2, %p52_p1  ;;  %s41_s27 = ssub.s32 %s1311_s21, %s1567_s24 }
   0x9   : > { %p205_p5 = scmp.lt.s32.totalorder %s1315_s22, 4  ;;  %p43_p6 = scmp.eq.s32.totalorder %s41_s27, 0 }
   0xa   : > { %s1555_s26 = scalar_select %p1383_p3, 1, 0 }
   0xb   : > { %p1391_p7 = pnand %p974_p4, %p205_p5  ;;  %p1395_p8 = scmp.eq.s32.totalorder %s973_s23, 0 }
   0xc   : > { %s1400_s30 = scalar_select %p43_p6, %s1303_s19, %s45_s25  }
   0xd   : > { %s1556_s28 = scalar_select %p1391_p7, 1, 0 }
   0xe   : > { %s1557_s29 = scalar_select %p1395_p8, 1, 0 }
   0xf   : > { %p1127_p9 = pneg %p1391_p7  ;;  %s1317_s6 = smov [#allocation4]  }
  0x10   : > { %s220_s7 = sshll.u32 %s1317_s6, 4  ;;  %s1318_s9 = smov [#allocation6]   ;;  %s221_s7 = int_to_ptr.vmem [resolvable:$true] %s220_s7 }
  0x11   : > { %p1406_p10 = pnand %p1395_p8, %p1127_p9  ;;  %s233_s10 = sshll.u32 %s1318_s9, 4  ;;  %s1410_s10 = int_to_ptr.vmem [resolvable:$true] %s233_s10 }
  0x12   : > { %s1213_s13 = scalar_lea.hbm %s1548_s2, 16 }
  0x13   : > { %p1214_p11 = scmp.ne.s32.totalorder %s1548_s2, %s1213_s13  ;;  %p1215_p12 = pneg %p1406_p10 }
  0x14   : > { %p1220_p1 = scmp.lt.u32.totalorder %s1213_s13, %s1548_s2 }
  0x15   : > { %p1216_p13 = pnand %p1215_p12, %p1214_p11 }
  0x17   : > { %p1217_p0 = pneg %p1216_p13 }
  0x19   : > { %p1222_p2 = pnand %p1220_p1, %p1217_p0 }
  0x1b   : > { %1225 = shalt.err (!%p1222_p2)
}
  0x1c   : > { %s1226_s23 = scalar_lea.vmem %s221_s7, 16  ;;  %s1233_s25 = scalar_lea.vmem %s221_s7, 32 }
  0x1d   : > { %p1227_p4 = scmp.ne.s32.totalorder %s221_s7, %s1226_s23  ;;  %p1234_p9 = scmp.lt.s32.totalorder %s221_s7, %s221_s7 }
  0x1e   : > { %p1235_p8 = scmp.lt.s32.totalorder %s1233_s25, %s1226_s23 }
  0x1f   : > { %p1229_p5 = pnand %p1227_p4, %p1215_p12 }
  0x20   : > { %p1236_p7 = por %p1235_p8, %p1234_p9 }
  0x21   : > { %p1230_p6 = pneg %p1229_p5 }
  0x23   : > { %p1237_p3 = pnand %p1236_p7, %p1230_p6 }
  0x25   : > { %1240 = shalt.err (!%p1237_p3)
}
  0x26   : > { %1130 = dma.hbm_to_vmem [thread:$0]  (!%p1406_p10), %s1548_s2, 16, %s221_s7, [#allocation5]  }
  0x27   : > { %s1241_s12 = scalar_lea.hbm %s1549_s3, 16 }
  0x28   : > { %p1242_p11 = scmp.ne.s32.totalorder %s1549_s3, %s1241_s12  ;;  %p1248_p3 = scmp.lt.u32.totalorder %s1241_s12, %s1549_s3 }
  0x2a   : > { %p1244_p8 = pnand %p1242_p11, %p1215_p12 }
  0x2c   : > { %p1245_p7 = pneg %p1244_p8 }
  0x2e   : > { %p1250_p13 = pnand %p1248_p3, %p1245_p7 }
  0x30   : > { %1253 = shalt.err (!%p1250_p13)
}
  0x31   : > { %s1254_s7 = scalar_lea.vmem %s1410_s10, 16  ;;  %s1261_s17 = scalar_lea.vmem %s1410_s10, 32 }
  0x32   : > { %p1255_p0 = scmp.ne.s32.totalorder %s1410_s10, %s1254_s7  ;;  %p1262_p4 = scmp.lt.s32.totalorder %s1410_s10, %s1410_s10 }
  0x33   : > { %p1263_p5 = scmp.lt.s32.totalorder %s1261_s17, %s1254_s7 }
  0x34   : > { %p1257_p1 = pnand %p1255_p0, %p1215_p12 }
  0x35   : > { %p1264_p6 = por %p1263_p5, %p1262_p4 }
  0x36   : > { %p1258_p2 = pneg %p1257_p1 }
  0x38   : > { %p1265_p9 = pnand %p1264_p6, %p1258_p2 }
  0x3a   : > { %1268 = shalt.err (!%p1265_p9)
}
  0x3b   : > { %1133 = dma.hbm_to_vmem [thread:$0]  (!%p1406_p10), %s1549_s3, 16, %s1410_s10, [#allocation7]  }
  0x3c   : > { %p978_p11 = scmp.ge.s32.totalorder %s1315_s22, 3 }
  0x3d   : > { %p1559_p12 = scmp.ne.s32.totalorder (!%p978_p11), %s1555_s26, 0 }
  0x3e   : > { %252 = sbr.rel (%p978_p11) target bundleno = 78 (0x4e), region = 28 }
  0x45   : > { %255 = sbr.rel (!%p1559_p12) target bundleno = 78 (0x4e), region = 32  ;;  %s257_s27 = sand.u32 (%p1559_p12), 1, %s1303_s19  }
  0x46   : > { %s1034_s6 = smul.u32 (%p1559_p12), 12, %s1311_s21 }
  0x47   : > { %s1117_s9 = smul.u32 (%p1559_p12), 48, %s257_s27 }
  0x48   : > { %s265_s8 = scalar_lea.vmem (%p1559_p12), %s1546_s0, %s1034_s6 }
  0x49   : > { %v280_v0 = vld [vmem:[%s265_s8] sm:$0xff] (%p1559_p12)  ;;  %v284_v2 = vld [vmem:[%s265_s8 + $0x48] sm:$0xff] (%p1559_p12)  ;;  %s259_s13 = scalar_lea.vmem (%p1559_p12), [#allocation3], %s1117_s9  ;;  %v984_v6 = vld [vmem:[%s265_s8 + $0x50] sm:$0xf] (%p1559_p12) }
  0x4a   : > { %v282_v1 = vld [vmem:[%s265_s8 + $0x24] sm:$0xff] (%p1559_p12)  ;;  %281 = vst [vmem:[%s259_s13] sm:$0xff] (%p1559_p12), %v280_v0  ;;  %285 = vst [vmem:[%s259_s13 + $0x18] sm:$0xff] (%p1559_p12), %v284_v2  ;;  %v286_v3 = vld [vmem:[%s265_s8 + $0x6c] sm:$0xff] (%p1559_p12) }
  0x4b   : > { %283 = vst [vmem:[%s259_s13 + $0xc] sm:$0xff] (%p1559_p12), %v282_v1  ;;  %v980_v4 = vld [vmem:[%s265_s8 + $0x8] sm:$0xf] (%p1559_p12)  ;;  %v982_v5 = vld [vmem:[%s265_s8 + $0x2c] sm:$0xf] (%p1559_p12)  ;;  %287 = vst [vmem:[%s259_s13 + $0x24] sm:$0xff] (%p1559_p12), %v286_v3 }
  0x4c   : > { %981 = vst [vmem:[%s259_s13 + $0x8] sm:$0xf] %v980_v4  ;;  %983 = vst [vmem:[%s259_s13 + $0x14] sm:$0xf] %v982_v5  ;;  %v986_v7 = vld [vmem:[%s265_s8 + $0x74] sm:$0xf] }
  0x4d   : > { %985 = vst [vmem:[%s259_s13 + $0x20] sm:$0xf] %v984_v6  ;;  %987 = vst [vmem:[%s259_s13 + $0x2c] sm:$0xf] %v986_v7 }
  0x4e PF: > { %p1560_p10 = scmp.ne.s32.totalorder %s1556_s28, 0 }
  0x4f   : > { %s326_s26 = sand.u32 (!%p1560_p10), 1, %s1299_s18   ;;  %p1561_p8 = scmp.ne.s32.totalorder (!%p1560_p10), %s1557_s29, 0 }
  0x50   : > { %323 = sbr.rel (%p1560_p10) target bundleno = 380 (0x17c), region = 62 }
  0x51   : > { %s1118_s10 = smul.u32 (!%p1560_p10), 48, %s326_s26 }
  0x53   : > { %s1471_s14 = scalar_lea.vmem (!%p1560_p10), [#allocation3], %s1118_s10 }
  0x57   : > { %1290 = dma.done.wait (%p1561_p8), [#allocation5], 16  }
  0x58   : > { %1292 = vsyncadd (%p1561_p8), [#allocation5], 4294967280 }
  0x59   : > { %1294 = dma.done.wait (%p1561_p8), [#allocation7], 16  }
  0x5a   : > { %1296 = vsyncadd (%p1561_p8), [#allocation7], 4294967280  ;;  %s382_s28 = smul.u32 48, %s1307_s20  ;;  %p992_p3 = scmp.ne.s32.totalorder %s1307_s20, 0 }
  0x5b   : > { %v1319_v8 = vmov (!%p992_p3), 0.0  }
  0x5c   : > { %p383_p7 = scmp.lt.s32.totalorder %s382_s28, 143  ;;  %413 = sbr.rel (%p992_p3) target bundleno = 99 (0x63), region = 78  ;;  %414 = vst [vmem:[#allocation2] sm:$0xff] (!%p992_p3), %v1319_v8  ;;  %415 = vst [vmem:[#allocation2 + $0x8] sm:$0xff] (!%p992_p3), %v1319_v8 }
  0x5d   : > { %416 = vst [vmem:[#allocation2 + $0x10] sm:$0xff] (!%p992_p3), %v1319_v8  ;;  %417 = vst [vmem:[#allocation2 + $0x18] sm:$0xff] (!%p992_p3), %v1319_v8 }
  0x5e   : > { %s1569_s28 = smov (!%p383_p7, %s382_s28), 143 }
  0x5f   : > { %s991_s15 = sshll.u32 %s1569_s28, 2 }
  0x60   : > { %s1485_s7 = scalar_lea.vmem %s1547_s1, %s991_s15 }
  0x63 PF: > { %v1181_v9 = vld [vmem:[%s1485_s7 + $0x40] sm:$0xff]   ;;  %v1184_v12 = vld [vmem:[%s1485_s7 + $0x48] sm:$0xff]   ;;  %v1187_v15 = vld [vmem:[%s1485_s7 + $0x50] sm:$0xff]   ;;  %p1023_p13 = scmp.ne.s32.totalorder %s1307_s20, 2 }
  0x64   : > { %v1182_v10 = vld [vmem:[%s1485_s7] sm:$0xff]   ;;  %1059 = vmatprep.subr.bf16.mxu0 %v1181_v9  ;;  %v1185_v13 = vld [vmem:[%s1485_s7 + $0x8] sm:$0xff]   ;;  %v1188_v16 = vld [vmem:[%s1485_s7 + $0x10] sm:$0xff]  }
  0x65   : > { %v1183_v11 = vld [vmem:[%s1485_s7 + $0x80] sm:$0xff]   ;;  %1060 = vmatpush3.bf16.msra.mxu0 %v1182_v10  ;;  %v1186_v14 = vld [vmem:[%s1485_s7 + $0x88] sm:$0xff]   ;;  %v1189_v17 = vld [vmem:[%s1485_s7 + $0x90] sm:$0xff]  }
  0x66   : > { %1097 = vmatprep.subr.bf16.mxu1 %v1183_v11  ;;  %1061 = vmatprep.subr.bf16.mxu0 %v1184_v12  ;;  %v1190_v18 = vld [vmem:[%s1485_s7 + $0x58] sm:$0xff]   ;;  %v1193_v21 = vld [vmem:[%s1485_s7 + $0x60] sm:$0xff]   ;;  %v1196_v24 = vld [vmem:[%s1485_s7 + $0x68] sm:$0xff]  }
  0x67   : > { %1098 = vmatpush3.bf16.msra.mxu1 %v1183_v11  ;;  %v1191_v19 = vld [vmem:[%s1485_s7 + $0x18] sm:$0xff]   ;;  %v1195_v22 = vld [vmem:[%s1485_s7 + $0xa0] sm:$0xff]   ;;  %v1198_v25 = vld [vmem:[%s1485_s7 + $0xa8] sm:$0xff]  }
  0x68   : > { %1099 = vmatprep.subr.bf16.mxu1 %v1186_v14  ;;  %v1192_v20 = vld [vmem:[%s1485_s7 + $0x98] sm:$0xff]   ;;  %v1194_v23 = vld [vmem:[%s1485_s7 + $0x20] sm:$0xff]   ;;  %v1197_v26 = vld [vmem:[%s1485_s7 + $0x28] sm:$0xff]  }
  0x69   : > { %1062 = vmatpush3.bf16.msra.mxu0 %v1185_v13  ;;  %v1199_v27 = vld [vmem:[%s1485_s7 + $0x70] sm:$0xff]   ;;  %v1202_v30 = vld [vmem:[%s1485_s7 + $0x78] sm:$0xff]   ;;  %v418_v45 = vld [vmem:[#allocation2] sm:$0xff] }
  0x6a   : > { %1063 = vmatprep.subr.bf16.mxu0 %v1187_v15  ;;  %v1200_v28 = vld [vmem:[%s1485_s7 + $0x30] sm:$0xff]   ;;  %v1204_v31 = vld [vmem:[%s1485_s7 + $0xb8] sm:$0xff]   ;;  %v419_v50 = vld [vmem:[#allocation2 + $0x8] sm:$0xff] }
  0x6b   : > { %1100 = vmatpush3.bf16.msra.mxu1 %v1186_v14  ;;  %v1201_v29 = vld [vmem:[%s1485_s7 + $0xb0] sm:$0xff]   ;;  %v1203_v34 = vld [vmem:[%s1485_s7 + $0x38] sm:$0xff]   ;;  %v1024_v5 = vld [vmem:[#allocation4] ss:$0 sm:$0xff] (!%p1023_p13) }
  0x6c   : > { %1101 = vmatprep.subr.bf16.mxu1 %v1189_v17  ;;  %v1207_v32 = vld [vmem:[%s1471_s14 + $0x4] ss:$12 sps:$4 sm:$0xff]   ;;  %v1208_v33 = vld [vmem:[%s1471_s14 + $0x8] ss:$12 sps:$4 sm:$0xff]   ;;  %v1205_v35 = vld [vmem:[%s1471_s14] ss:$12 sps:$4 sm:$0xff]  }
  0x6d   : > { %1064 = vmatpush3.bf16.msra.mxu0 %v1188_v16  ;;  %686 = vmatprep.mubr.bf16.mxu0 %v1207_v32  ;;  %v1210_v36 = vld [vmem:[%s1471_s14 + $0x1c] ss:$12 sps:$4 sm:$0xff]   ;;  %v1209_v37 = vld [vmem:[%s1471_s14 + $0x20] ss:$12 sps:$4 sm:$0xff]   ;;  %v1212_v38 = vld [vmem:[%s1471_s14 + $0x18] ss:$12 sps:$4 sm:$0xff]  }
  0x6e   : > { %1065 = vmatprep.subr.bf16.mxu0 %v1190_v18  ;;  %1113 = vmatprep.mubr.bf16.mxu1 %v1208_v33  ;;  %v420_v59 = vld [vmem:[#allocation2 + $0x10] sm:$0xff]  ;;  %v421_v63 = vld [vmem:[#allocation2 + $0x18] sm:$0xff]  ;;  %v1025_v8 = vld [vmem:[#allocation6] ss:$0 sm:$0xff] (!%p1023_p13) }
  0x6f   : > { %1102 = vmatpush3.bf16.msra.mxu1 %v1189_v17  ;;  %v1040_v9 = vld [vmem:[%s1550_s4] sm:$0xff] (!%p1023_p13)   ;;  %v1057_v15 = vld [vmem:[%s1550_s4 + $0x8] sm:$0xff] (!%p1023_p13)  }
  0x70   : > { %1103 = vmatprep.subr.bf16.mxu1 %v1192_v20  ;;  %v1041_v11 = vunpack.c.l.bf16 (!%p1023_p13), %v1040_v9  ;;  %v1042_v12 = vunpack.c.h.bf16 (!%p1023_p13), %v1040_v9 }
  0x71   : > { %1066 = vmatpush3.bf16.msra.mxu0 %v1191_v19  ;;  %v1045_v19 = vunpack.c.l.bf16 (!%p1023_p13), %v1057_v15 }
  0x72   : > { %1067 = vmatprep.subr.bf16.mxu0 %v1193_v21  ;;  %v1046_v21 = vunpack.c.h.bf16 (!%p1023_p13), %v1057_v15 }
  0x73   : > { %1104 = vmatpush3.bf16.msra.mxu1 %v1192_v20 }
  0x74   : > { %1105 = vmatprep.subr.bf16.mxu1 %v1195_v22 }
  0x75   : > { %1068 = vmatpush3.bf16.msra.mxu0 %v1194_v23 }
  0x76   : > { %1069 = vmatprep.subr.bf16.mxu0 %v1196_v24 }
  0x77   : > { %1106 = vmatpush3.bf16.msra.mxu1 %v1195_v22 }
  0x78   : > { %1107 = vmatprep.subr.bf16.mxu1 %v1198_v25 }
  0x79   : > { %1070 = vmatpush3.bf16.msra.mxu0 %v1197_v26 }
  0x7a   : > { %1071 = vmatprep.subr.bf16.mxu0 %v1199_v27 }
  0x7b   : > { %1108 = vmatpush3.bf16.msra.mxu1 %v1198_v25 }
  0x7c   : > { %1109 = vmatprep.subr.bf16.mxu1 %v1201_v29 }
  0x7d   : > { %1072 = vmatpush3.bf16.msra.mxu0 %v1200_v28 }
  0x7e   : > { %1073 = vmatprep.subr.bf16.mxu0 %v1202_v30 }
  0x7f   : > { %1110 = vmatpush3.bf16.msra.mxu1 %v1201_v29 }
  0x80   : > { %1111 = vmatprep.subr.bf16.mxu1 %v1204_v31 }
  0x81   : > { %1074 = vmatpush3.bf16.msra.mxu0 %v1203_v34 }
  0x83   : > { %1112 = vmatpush3.bf16.msra.mxu1 %v1204_v31 }
  0x84   : > { %687 = vmatmul.mubr.bf16.vlgmr.msra.gmra.mrb[0].mxu0 %v1205_v35 }
  0x85   : > { %694 = vmatprep.mubr.bf16.mxu0 %v1210_v36 }
  0x86   : > { %1114 = vmatmul.mubr.bf16.vlgmr.msra.gmra.mrb[0].mxu1 %v1209_v37 }
  0x8c   : > { %695 = vmatmul.mubr.bf16.gmra.mrb[4].mxu0 %v1212_v38 }
 0x157   : > { %v1075_v39 = vpop.f32.mrb[0].mxu0 }
 0x158   : > { %v1076_v40 = vpop.f32.mrb[1].mxu0 }
 0x159   : > { %v1077_v41 = vadd.f32 %v1076_v40, %v1075_v39  ;;  %v1078_v42 = vpop.f32.mrb[2].mxu0  ;;  %v1115_v43 = vpop.f32.mrb[0].mxu1 }
 0x15a   : > { %v1079_v44 = vpop.f32.mrb[3].mxu0  ;;  %v737_v46 = vpop.f32.mrb[1].mxu1 }
 0x15b   : > { %v1080_v47 = vadd.f32 %v1079_v44, %v1078_v42  ;;  %v738_v48 = vadd.f32 %v1077_v41, %v737_v46  ;;  %v1116_v49 = vpop.f32.mrb[2].mxu1 }
 0x15c   : > { %v740_v51 = vpop.f32.mrb[3].mxu1 }
 0x15d   : > { %v752_v52 = vadd.f32 %v738_v48, %v418_v45  ;;  %v741_v53 = vadd.f32 %v1080_v47, %v740_v51 }
 0x15f   : > { %756 = vst [vmem:[#allocation2] sm:$0xff] %v752_v52  ;;  %v753_v54 = vadd.f32 %v741_v53, %v419_v50  ;;  %v1081_v55 = vpop.f32.mrb[4].mxu0 }
 0x160   : > { %v1082_v56 = vpop.f32.mrb[5].mxu0 }
 0x161   : > { %757 = vst [vmem:[#allocation2 + $0x8] sm:$0xff] %v753_v54  ;;  %v1083_v57 = vadd.f32 %v1082_v56, %v1081_v55  ;;  %v1084_v58 = vpop.f32.mrb[6].mxu0 }
 0x162   : > { %v1085_v60 = vpop.f32.mrb[7].mxu0 }
 0x163   : > { %v746_v61 = vadd.f32 %v1115_v43, %v1083_v57  ;;  %v1086_v62 = vadd.f32 %v1085_v60, %v1084_v58  ;;  %763 = sbr.rel (%p1023_p13) target bundleno = 380 (0x17c), region = 82 }
 0x165   : > { %v754_v0 = vadd.f32 %v746_v61, %v420_v59  ;;  %v749_v1 = vadd.f32 %v1116_v49, %v1086_v62 }
 0x166   : > { %v764_v3 = vld [vmem:[#allocation2] sm:$0xff] (!%p1023_p13) }
 0x167   : > { %758 = vst [vmem:[#allocation2 + $0x10] sm:$0xff] %v754_v0  ;;  %v755_v2 = vadd.f32 %v749_v1, %v421_v63  ;;  %v775_v6 = vmul.f32 (!%p1023_p13), %v1024_v5, %v764_v3 }
 0x168   : > { %v765_v4 = vld [vmem:[#allocation2 + $0x8] sm:$0xff] (!%p1023_p13) }
 0x169   : > { %759 = vst [vmem:[#allocation2 + $0x18] sm:$0xff] %v755_v2  ;;  %v776_v7 = vmul.f32 (!%p1023_p13), %v1024_v5, %v765_v4  ;;  %v786_v16 = vadd.f32 (!%p1023_p13), %v1025_v8, %v775_v6 }
 0x16b   : > { %v787_v17 = vadd.f32 %v1025_v8, %v776_v7  ;;  %v798_v22 = vadd.f32 %v1041_v11, %v786_v16 }
 0x16d   : > { %v799_v23 = vadd.f32 %v1042_v12, %v787_v17  ;;  %v802_v26 = vmax.f32 %v798_v22, 0.0 }
 0x16e   : > { %v766_v10 = vld [vmem:[#allocation2 + $0x10] sm:$0xff] }
 0x16f   : > { %v777_v14 = vmul.f32 %v1024_v5, %v766_v10  ;;  %v803_v27 = vmax.f32 %v799_v23, 0.0 }
 0x170   : > { %v767_v13 = vld [vmem:[#allocation2 + $0x18] sm:$0xff] }
 0x171   : > { %v778_v18 = vmul.f32 %v1024_v5, %v767_v13  ;;  %v788_v20 = vadd.f32 %v1025_v8, %v777_v14  ;;  %v1050_v30 = vpack.c.bf16 %v803_v27, %v802_v26 }
 0x173   : > { %v789_v24 = vadd.f32 %v1025_v8, %v778_v18  ;;  %v800_v25 = vadd.f32 %v1045_v19, %v788_v20  ;;  %1051 = vst [vmem:[%s1551_s5] sm:$0xff] %v1050_v30  }
 0x175   : > { %v801_v28 = vadd.f32 %v1046_v21, %v789_v24  ;;  %v804_v29 = vmax.f32 %v800_v25, 0.0 }
 0x177   : > { %v805_v31 = vmax.f32 %v801_v28, 0.0 }
 0x179   : > { %v1055_v32 = vpack.c.bf16 %v805_v31, %v804_v29 }
 0x17b   : > { %1058 = vst [vmem:[%s1551_s5 + $0x8] sm:$0xff] %v1055_v32  }
 0x17c PF: > { %s17_s22 = sadd.s32 1, %s1315_s22   ;;  %s1562_s18 = smov %s1303_s19 }
 0x17d   : > { %p14_p0 = scmp.ge.s32.totalorder %s17_s22, 5   ;;  %s1563_s19 = smov %s1400_s30 }
 0x17e   : > { %s1564_s20 = smov %s1311_s21  ;;  %s1565_s21 = smov %s1567_s24 }
 0x17f   :  { %16 = sbr.rel (!%p14_p0) target bundleno = 4 (0x4), region = 132 }
 0x186   :  { %854 = vsyncpa [#allocation5], 1 }
 0x187   :  { %856 = vsyncpa [#allocation5 + $0x1], 1 }
 0x188   :  { %857 = vsyncpa [#allocation7], 1 }

// kernel: pothole_detector_forward.34
= control target key start
LH: loop header
LB: loop body
LE: loop exit
PB: predicated region body
PF: predicated region fallthrough
CT: control target
= control target key end

     0   :  { %s1114_s15 = smov 0   ;;  %s1116_s16 = smov 0   ;;  %s1216_s0 = inlined_call_operand.vmem [shape: bf16[8,1152], index: 0, kind: input, shape index: {}]   ;;  %s1217_s1 = inlined_call_operand.vmem [shape: bf16[1152,256], index: 1, kind: input, shape index: {}]   ;;  %s1218_s2 = inlined_call_operand.vmem [shape: f32[1,256], index: 2, kind: input, shape index: {}]   ;;  %s1219_s3 = inlined_call_operand.vmem [shape: f32[1,256], index: 3, kind: input, shape index: {}]   ;;  %s1220_s4 = inlined_call_operand.vmem [shape: bf16[8,256], index: 4, kind: output, shape index: {}]  }
   0x1   :  { %s1118_s17 = smov 0  }
   0x2 LB: > { %s26_s18 = sadd.s32 1, %s1081_s16  ;;  %p898_p0 = scmp.ge.s32.totalorder %s1085_s17, 1  ;;  %s1085_s17 = sphi %s1118_s17, %s14_s17   ;;  %s1081_s16 = sphi %s1116_s16, %s1222_s16   ;;  %s1077_s15 = sphi %s1114_s15, %s1221_s15  }
   0x3   : > { %p27_p1 = scmp.ge.s32.totalorder %s26_s18, 3  ;;  %p229_p2 = scmp.lt.s32.totalorder %s1085_s17, 4 }
   0x5   : > { %s1224_s18 = smov (%p27_p1, %s26_s18), 0  ;;  %p230_p3 = pnand %p898_p0, %p229_p2 }
   0x6   : > { %s281_s19 = smul.u32 (!%p230_p3), 3, %s1077_s15  ;;  %p902_p6 = scmp.ne.s32.totalorder (!%p230_p3), %s1077_s15, 0 }
   0x7   : > { %233 = sbr.rel (%p230_p3) target bundleno = 323 (0x143), region = 36 }
   0x8   : > { %s291_s20 = smul.u32 (!%p230_p3), 48, %s1077_s15  ;;  %p284_p4 = scmp.lt.s32.totalorder (!%p230_p3), %s281_s19, 8 }
   0xa   : > { %p293_p5 = scmp.lt.s32.totalorder (!%p230_p3), %s291_s20, 143 }
   0xe   : > { %s1226_s19 = smov (!%p284_p4, %s281_s19), 8  ;;  %s1228_s20 = smov (!%p293_p5, %s291_s20), 143 }
   0xf   : > { %s899_s21 = sshll.u32 %s1226_s19, 2  ;;  %s960_s25 = sshll.u32 %s1228_s20, 3  ;;  %v1087_v0 = vmov (!%p902_p6), 0.0  }
  0x10   : > { %s1139_s24 = scalar_lea.vmem %s1216_s0, %s899_s21  ;;  %s1144_s28 = scalar_lea.vmem %s1217_s1, %s960_s25  ;;  %328 = vst [vmem:[#allocation2] sm:$0xff] (!%p902_p6), %v1087_v0  ;;  %329 = vst [vmem:[#allocation2 + $0x8] sm:$0xff] (!%p902_p6), %v1087_v0 }
  0x11   : > { %327 = sbr.rel (%p902_p6) target bundleno = 24 (0x18), region = 40 }
  0x18 PF: > { %v988_v1 = vld [vmem:[%s1144_s28 + $0x4] ss:$8 sps:$4 sm:$0xff]   ;;  %v990_v2 = vld [vmem:[%s1144_s28] ss:$8 sps:$4 sm:$0xff]   ;;  %v1088_v3 = vmov 0   ;;  %p954_p7 = scmp.ne.s32.totalorder %s1077_s15, 2 }
  0x19   : > { %706 = vmatprep.mubr.bf16.mxu1 %v1088_v3  ;;  %633 = vmatprep.subr.bf16.mxu0 %v988_v1  ;;  %v991_v4 = vld [vmem:[%s1144_s28 + $0x14] ss:$8 sps:$4 sm:$0xff]   ;;  %v993_v5 = vld [vmem:[%s1144_s28 + $0x10] ss:$8 sps:$4 sm:$0xff]   ;;  %v994_v6 = vld [vmem:[%s1144_s28 + $0x24] ss:$8 sps:$4 sm:$0xff]  }
  0x1a   : > { %634 = vmatpush1.bf16.msra.mxu0 %v990_v2  ;;  %v996_v7 = vld [vmem:[%s1144_s28 + $0x20] ss:$8 sps:$4 sm:$0xff]   ;;  %v997_v8 = vld [vmem:[%s1144_s28 + $0x34] ss:$8 sps:$4 sm:$0xff]   ;;  %v999_v9 = vld [vmem:[%s1144_s28 + $0x30] ss:$8 sps:$4 sm:$0xff]  }
  0x1b   : > { %635 = vmatprep.subr.bf16.mxu0 %v991_v4  ;;  %v1012_v10 = vld [vmem:[%s1144_s28 + $0x104] ss:$8 sps:$4 sm:$0xff]   ;;  %v1014_v11 = vld [vmem:[%s1144_s28 + $0x100] ss:$8 sps:$4 sm:$0xff]   ;;  %v1018_v13 = vld [vmem:[%s1144_s28 + $0x114] ss:$8 sps:$4 sm:$0xff]   ;;  %v727_v4 = vlaneseq (!%p954_p7) }
  0x1c   : > { %v1000_v12 = vld [vmem:[%s1144_s28 + $0x44] ss:$8 sps:$4 sm:$0xff]   ;;  %674 = vmatprep.subr.bf16.mxu1 %v1012_v10  ;;  %v1020_v14 = vld [vmem:[%s1144_s28 + $0x110] ss:$8 sps:$4 sm:$0xff]   ;;  %v1002_v15 = vld [vmem:[%s1144_s28 + $0x40] ss:$8 sps:$4 sm:$0xff]  }
  0x1d   : > { %675 = vmatpush1.bf16.msra.mxu1 %v1014_v11  ;;  %v1003_v16 = vld [vmem:[%s1144_s28 + $0x54] ss:$8 sps:$4 sm:$0xff]   ;;  %v1024_v17 = vld [vmem:[%s1144_s28 + $0x124] ss:$8 sps:$4 sm:$0xff]   ;;  %v1026_v18 = vld [vmem:[%s1144_s28 + $0x120] ss:$8 sps:$4 sm:$0xff]  }
  0x1e   : > { %636 = vmatpush1.bf16.msra.mxu0 %v993_v5  ;;  %676 = vmatprep.subr.bf16.mxu1 %v1018_v13  ;;  %v1005_v19 = vld [vmem:[%s1144_s28 + $0x50] ss:$8 sps:$4 sm:$0xff]   ;;  %v1030_v20 = vld [vmem:[%s1144_s28 + $0x134] ss:$8 sps:$4 sm:$0xff]   ;;  %v1006_v21 = vld [vmem:[%s1144_s28 + $0x64] ss:$8 sps:$4 sm:$0xff]  }
  0x1f   : > { %637 = vmatprep.subr.bf16.mxu0 %v994_v6  ;;  %v1032_v22 = vld [vmem:[%s1144_s28 + $0x130] ss:$8 sps:$4 sm:$0xff]   ;;  %v1008_v23 = vld [vmem:[%s1144_s28 + $0x60] ss:$8 sps:$4 sm:$0xff]   ;;  %v1036_v24 = vld [vmem:[%s1144_s28 + $0x144] ss:$8 sps:$4 sm:$0xff]  }
  0x20   : > { %v1009_v25 = vld [vmem:[%s1144_s28 + $0x74] ss:$8 sps:$4 sm:$0xff]   ;;  %v1038_v26 = vld [vmem:[%s1144_s28 + $0x140] ss:$8 sps:$4 sm:$0xff]   ;;  %v1011_v27 = vld [vmem:[%s1144_s28 + $0x70] ss:$8 sps:$4 sm:$0xff]  }
  0x21   : > { %677 = vmatpush1.bf16.msra.mxu1 %v1020_v14  ;;  %v1042_v28 = vld [vmem:[%s1144_s28 + $0x154] ss:$8 sps:$4 sm:$0xff]   ;;  %v1015_v29 = vld [vmem:[%s1144_s28 + $0x84] ss:$8 sps:$4 sm:$0xff]   ;;  %v1044_v30 = vld [vmem:[%s1144_s28 + $0x150] ss:$8 sps:$4 sm:$0xff]  }
  0x22   : > { %638 = vmatpush1.bf16.msra.mxu0 %v996_v7  ;;  %678 = vmatprep.subr.bf16.mxu1 %v1024_v17  ;;  %v1017_v31 = vld [vmem:[%s1144_s28 + $0x80] ss:$8 sps:$4 sm:$0xff]   ;;  %v1048_v32 = vld [vmem:[%s1144_s28 + $0x164] ss:$8 sps:$4 sm:$0xff]   ;;  %v1021_v33 = vld [vmem:[%s1144_s28 + $0x94] ss:$8 sps:$4 sm:$0xff]  }
  0x23   : > { %639 = vmatprep.subr.bf16.mxu0 %v997_v8  ;;  %v332_v34 = vld [vmem:[%s1139_s24] sm:$0xff]  ;;  %v1023_v37 = vld [vmem:[%s1144_s28 + $0x90] ss:$8 sps:$4 sm:$0xff]   ;;  %v1054_v38 = vld [vmem:[%s1144_s28 + $0x174] ss:$8 sps:$4 sm:$0xff]   ;;  %v728_v5 = vshrl.u32 (!%p954_p7), %v727_v4, 7 }
  0x24   : > { %v904_v35 = vcombine.high %v332_v34, %v332_v34  ;;  %v1050_v36 = vld [vmem:[%s1144_s28 + $0x160] ss:$8 sps:$4 sm:$0xff]   ;;  %v1027_v39 = vld [vmem:[%s1144_s28 + $0xa4] ss:$8 sps:$4 sm:$0xff]   ;;  %v1056_v40 = vld [vmem:[%s1144_s28 + $0x170] ss:$8 sps:$4 sm:$0xff]   ;;  %v903_v53 = vcombine.low %v332_v34, %v332_v34 }
  0x25   : > { %679 = vmatpush1.bf16.msra.mxu1 %v1026_v18  ;;  %v1029_v41 = vld [vmem:[%s1144_s28 + $0xa0] ss:$8 sps:$4 sm:$0xff]   ;;  %v1033_v42 = vld [vmem:[%s1144_s28 + $0xb4] ss:$8 sps:$4 sm:$0xff]   ;;  %v1035_v44 = vld [vmem:[%s1144_s28 + $0xb0] ss:$8 sps:$4 sm:$0xff]  }
  0x26   : > { %640 = vmatpush1.bf16.msra.mxu0 %v999_v9  ;;  %680 = vmatprep.subr.bf16.mxu1 %v1030_v20  ;;  %v1060_v43 = vld [vmem:[%s1139_s24 + $0x8] ss:$0 sps:$4 sm:$0xff]   ;;  %v1039_v45 = vld [vmem:[%s1144_s28 + $0xc4] ss:$8 sps:$4 sm:$0xff]   ;;  %v1045_v47 = vld [vmem:[%s1144_s28 + $0xd4] ss:$8 sps:$4 sm:$0xff]  }
  0x27   : > { %641 = vmatprep.subr.bf16.mxu0 %v1000_v12  ;;  %665 = vmatprep.mubr.bf16.mxu0 %v904_v35  ;;  %v1041_v46 = vld [vmem:[%s1144_s28 + $0xc0] ss:$8 sps:$4 sm:$0xff]   ;;  %v1047_v48 = vld [vmem:[%s1144_s28 + $0xd0] ss:$8 sps:$4 sm:$0xff]   ;;  %v1051_v49 = vld [vmem:[%s1144_s28 + $0xe4] ss:$8 sps:$4 sm:$0xff]  }
  0x28   : > { %v1053_v50 = vld [vmem:[%s1144_s28 + $0xe0] ss:$8 sps:$4 sm:$0xff]   ;;  %v1057_v51 = vld [vmem:[%s1144_s28 + $0xf4] ss:$8 sps:$4 sm:$0xff]   ;;  %v1059_v52 = vld [vmem:[%s1144_s28 + $0xf0] ss:$8 sps:$4 sm:$0xff]  }
  0x29   : > { %681 = vmatpush1.bf16.msra.mxu1 %v1032_v22  ;;  %v330_v58 = vld [vmem:[#allocation2] sm:$0xff]  ;;  %v331_v61 = vld [vmem:[#allocation2 + $0x8] sm:$0xff]  ;;  %v729_v8 = vsub.s32 (!%p954_p7), 0, %v728_v5  ;;  %v733_v9 = vsub.s32 (!%p954_p7), 1, %v728_v5 }
  0x2a   : > { %642 = vmatpush1.bf16.msra.mxu0 %v1002_v15  ;;  %682 = vmatprep.subr.bf16.mxu1 %v1036_v24  ;;  %v725_v6 = vld [vmem:[%s1218_s2] sm:$0x3] (!%p954_p7) }
  0x2b   : > { %643 = vmatprep.subr.bf16.mxu0 %v1003_v16  ;;  %v739_v7 = vld [vmem:[%s1219_s3] sm:$0x3] (!%p954_p7)  ;;  %v730_v12 = vrot.slane (!%p954_p7), %v725_v6, %v729_v8  ;;  %v734_v13 = vrot.slane (!%p954_p7), %v725_v6, %v733_v9 }
  0x2c   : > { %v744_v14 = vrot.slane (!%p954_p7), %v739_v7, %v729_v8  ;;  %v748_v15 = vrot.slane (!%p954_p7), %v739_v7, %v733_v9 }
  0x2d   : > { %683 = vmatpush1.bf16.msra.mxu1 %v1038_v26 }
  0x2e   : > { %644 = vmatpush1.bf16.msra.mxu0 %v1005_v19  ;;  %684 = vmatprep.subr.bf16.mxu1 %v1042_v28 }
  0x2f   : > { %645 = vmatprep.subr.bf16.mxu0 %v1006_v21 }
  0x31   : > { %685 = vmatpush1.bf16.msra.mxu1 %v1044_v30 }
  0x32   : > { %646 = vmatpush1.bf16.msra.mxu0 %v1008_v23  ;;  %686 = vmatprep.subr.bf16.mxu1 %v1048_v32 }
  0x33   : > { %647 = vmatprep.subr.bf16.mxu0 %v1009_v25 }
  0x35   : > { %687 = vmatpush1.bf16.msra.mxu1 %v1050_v36 }
  0x36   : > { %648 = vmatpush1.bf16.msra.mxu0 %v1011_v27  ;;  %688 = vmatprep.subr.bf16.mxu1 %v1054_v38 }
  0x37   : > { %649 = vmatprep.subr.bf16.mxu0 %v1015_v29 }
  0x39   : > { %689 = vmatpush1.bf16.msra.mxu1 %v1056_v40 }
  0x3a   : > { %650 = vmatpush1.bf16.msra.mxu0 %v1017_v31 }
  0x3b   : > { %651 = vmatprep.subr.bf16.mxu0 %v1021_v33 }
  0x3c   : > { %707 = vmatmul.mubr.bf16.vlgmr.msra.gmra.mrb[0].mxu1 %v1060_v43 }
  0x3e   : > { %652 = vmatpush1.bf16.msra.mxu0 %v1023_v37 }
  0x3f   : > { %653 = vmatprep.subr.bf16.mxu0 %v1027_v39 }
  0x42   : > { %654 = vmatpush1.bf16.msra.mxu0 %v1029_v41 }
  0x43   : > { %655 = vmatprep.subr.bf16.mxu0 %v1033_v42 }
  0x46   : > { %656 = vmatpush1.bf16.msra.mxu0 %v1035_v44 }
  0x47   : > { %657 = vmatprep.subr.bf16.mxu0 %v1039_v45 }
  0x4a   : > { %658 = vmatpush1.bf16.msra.mxu0 %v1041_v46 }
  0x4b   : > { %659 = vmatprep.subr.bf16.mxu0 %v1045_v47 }
  0x4e   : > { %660 = vmatpush1.bf16.msra.mxu0 %v1047_v48 }
  0x4f   : > { %661 = vmatprep.subr.bf16.mxu0 %v1051_v49 }
  0x52   : > { %662 = vmatpush1.bf16.msra.mxu0 %v1053_v50 }
  0x53   : > { %663 = vmatprep.subr.bf16.mxu0 %v1057_v51 }
  0x56   : > { %664 = vmatpush1.bf16.msra.mxu0 %v1059_v52 }
  0x59   : > { %666 = vmatmul.mubr.bf16.vlgmr.msra.gmra.mrb[0].mxu0 %v903_v53 }
 0x10f   : > { %v708_v54 = vpop.f32.mrb[0].mxu1 }
 0x110   : > { %v710_v55 = vpop.f32.mrb[1].mxu1 }
 0x111   : > { %v712_v56 = vpop.f32.mrb[2].mxu1 }
 0x112   : > { %v713_v57 = vpop.f32.mrb[3].mxu1 }
 0x12c   : > { %v667_v59 = vpop.f32.mrb[0].mxu0  ;;  %722 = sbr.rel (%p954_p7) target bundleno = 323 (0x143), region = 44 }
 0x12d   : > { %v709_v60 = vadd.f32 %v708_v54, %v667_v59  ;;  %v669_v62 = vpop.f32.mrb[1].mxu0 }
 0x12e   : > { %v711_v63 = vadd.f32 %v710_v55, %v669_v62  ;;  %v671_v0 = vpop.f32.mrb[2].mxu0 }
 0x12f   : > { %v715_v1 = vadd.f32 %v709_v60, %v330_v58  ;;  %v672_v2 = vpop.f32.mrb[3].mxu0 }
 0x130   : > { %v716_v3 = vadd.f32 %v711_v63, %v331_v61 }
 0x131   : > { %717 = vst [vmem:[#allocation2] sm:$0xff] %v715_v1 }
 0x132   : > { %718 = vst [vmem:[#allocation2 + $0x8] sm:$0xff] %v716_v3 }
 0x138   : > { %v723_v10 = vld [vmem:[#allocation2] sm:$0xff] }
 0x139   : > { %v724_v11 = vld [vmem:[#allocation2 + $0x8] sm:$0xff]  ;;  %v737_v16 = vmul.f32 %v730_v12, %v723_v10 }
 0x13a   : > { %v738_v17 = vmul.f32 %v734_v13, %v724_v11 }
 0x13b   : > { %v751_v18 = vadd.f32 %v744_v14, %v737_v16 }
 0x13c   : > { %v752_v19 = vadd.f32 %v748_v15, %v738_v17 }
 0x13d   : > { %v753_v20 = vmax.f32 %v751_v18, 0.0 }
 0x13e   : > { %v754_v21 = vmax.f32 %v752_v19, 0.0 }
 0x140   : > { %v961_v22 = vpack.c.bf16 %v754_v21, %v753_v20 }
 0x142   : > { %763 = vst [vmem:[%s1220_s4] sm:$0xff] %v961_v22 }
 0x143 PF: > { %s14_s17 = sadd.s32 1, %s1085_s17   ;;  %s1221_s15 = smov %s1081_s16 }
 0x144   : > { %p11_p8 = scmp.ge.s32.totalorder %s14_s17, 5   ;;  %s1222_s16 = smov %s1224_s18 }
 0x146   :  { %13 = sbr.rel (!%p11_p8) target bundleno = 2 (0x2), region = 83 }

// kernel: pothole_detector_forward.33
= control target key start
LH: loop header
LB: loop body
LE: loop exit
PB: predicated region body
PF: predicated region fallthrough
CT: control target
= control target key end

     0   :  { %v257_v1 = vmov 0   ;;  %v175_v18 = vlaneseq  ;;  %s343_s1 = inlined_call_operand.vmem [shape: bf16[128,256], index: 1, kind: input, shape index: {}]   ;;  %s344_s0 = inlined_call_operand.vmem [shape: bf16[8,128], index: 0, kind: input, shape index: {}]   ;;  %s345_s2 = inlined_call_operand.vmem [shape: f32[1,256], index: 2, kind: input, shape index: {}]   ;;  %s346_s3 = inlined_call_operand.vmem [shape: f32[1,256], index: 3, kind: input, shape index: {}]   ;;  %s347_s4 = inlined_call_operand.vmem [shape: bf16[8,256], index: 4, kind: output, shape index: {}]  }
   0x1   :  { %v233_v0 = vld [vmem:[%s343_s1 + $0x4] ss:$8 sps:$4 sm:$0xff]   ;;  %155 = vmatprep.mubr.bf16.mxu0 %v257_v1  ;;  %v235_v2 = vld [vmem:[%s343_s1] ss:$8 sps:$4 sm:$0xff]   ;;  %v236_v3 = vld [vmem:[%s343_s1 + $0x14] ss:$8 sps:$4 sm:$0xff]  }
   0x2   :  { %123 = vmatprep.subr.bf16.mxu0 %v233_v0  ;;  %v238_v4 = vld [vmem:[%s343_s1 + $0x10] ss:$8 sps:$4 sm:$0xff]   ;;  %v239_v5 = vld [vmem:[%s343_s1 + $0x24] ss:$8 sps:$4 sm:$0xff]   ;;  %v241_v6 = vld [vmem:[%s343_s1 + $0x20] ss:$8 sps:$4 sm:$0xff]  }
   0x3   :  { %124 = vmatpush1.bf16.msra.mxu0 %v235_v2  ;;  %v242_v7 = vld [vmem:[%s343_s1 + $0x34] ss:$8 sps:$4 sm:$0xff]   ;;  %v244_v8 = vld [vmem:[%s343_s1 + $0x30] ss:$8 sps:$4 sm:$0xff]   ;;  %v245_v9 = vld [vmem:[%s343_s1 + $0x44] ss:$8 sps:$4 sm:$0xff]  }
   0x4   :  { %125 = vmatprep.subr.bf16.mxu0 %v236_v3  ;;  %v247_v10 = vld [vmem:[%s343_s1 + $0x40] ss:$8 sps:$4 sm:$0xff]   ;;  %v248_v11 = vld [vmem:[%s343_s1 + $0x54] ss:$8 sps:$4 sm:$0xff]   ;;  %v250_v12 = vld [vmem:[%s343_s1 + $0x50] ss:$8 sps:$4 sm:$0xff]  }
   0x5   :  { %v251_v13 = vld [vmem:[%s343_s1 + $0x64] ss:$8 sps:$4 sm:$0xff]   ;;  %v253_v14 = vld [vmem:[%s343_s1 + $0x60] ss:$8 sps:$4 sm:$0xff]   ;;  %v254_v15 = vld [vmem:[%s343_s1 + $0x74] ss:$8 sps:$4 sm:$0xff]  }
   0x6   :  { %v256_v16 = vld [vmem:[%s343_s1 + $0x70] ss:$8 sps:$4 sm:$0xff]   ;;  %v26_v17 = vld [vmem:[%s344_s0] sm:$0xf]  ;;  %v176_v19 = vshrl.u32 %v175_v18, 7 }
   0x7   :  { %126 = vmatpush1.bf16.msra.mxu0 %v238_v4  ;;  %v173_v21 = vld [vmem:[%s345_s2] sm:$0x3] }
   0x8   :  { %127 = vmatprep.subr.bf16.mxu0 %v239_v5  ;;  %v177_v20 = vsub.s32 0, %v176_v19  ;;  %v181_v22 = vsub.s32 1, %v176_v19  ;;  %v187_v23 = vld [vmem:[%s346_s3] sm:$0x3] }
   0xa   :  { %v178_v24 = vrot.slane %v173_v21, %v177_v20  ;;  %v182_v25 = vrot.slane %v173_v21, %v181_v22  ;;  %v192_v26 = vrot.slane %v187_v23, %v177_v20  ;;  %v196_v28 = vrot.slane %v187_v23, %v181_v22 }
   0xb   :  { %128 = vmatpush1.bf16.msra.mxu0 %v241_v6 }
   0xc   :  { %129 = vmatprep.subr.bf16.mxu0 %v242_v7 }
   0xf   :  { %130 = vmatpush1.bf16.msra.mxu0 %v244_v8 }
  0x10   :  { %131 = vmatprep.subr.bf16.mxu0 %v245_v9 }
  0x13   :  { %132 = vmatpush1.bf16.msra.mxu0 %v247_v10 }
  0x14   :  { %133 = vmatprep.subr.bf16.mxu0 %v248_v11 }
  0x17   :  { %134 = vmatpush1.bf16.msra.mxu0 %v250_v12 }
  0x18   :  { %135 = vmatprep.subr.bf16.mxu0 %v251_v13 }
  0x1b   :  { %136 = vmatpush1.bf16.msra.mxu0 %v253_v14 }
  0x1c   :  { %137 = vmatprep.subr.bf16.mxu0 %v254_v15 }
  0x1f   :  { %138 = vmatpush1.bf16.msra.mxu0 %v256_v16 }
  0x22   :  { %156 = vmatmul.mubr.bf16.vlgmr.msra.gmra.mrb[0].mxu0 %v26_v17 }
  0xf5   :  { %v157_v27 = vpop.f32.mrb[0].mxu0 }
  0xf6   :  { %v185_v29 = vmul.f32 %v178_v24, %v157_v27  ;;  %v159_v30 = vpop.f32.mrb[1].mxu0 }
  0xf7   :  { %v186_v31 = vmul.f32 %v182_v25, %v159_v30  ;;  %v161_v32 = vpop.f32.mrb[2].mxu0 }
  0xf8   :  { %v199_v33 = vadd.f32 %v192_v26, %v185_v29  ;;  %v162_v34 = vpop.f32.mrb[3].mxu0 }
  0xf9   :  { %v200_v35 = vadd.f32 %v196_v28, %v186_v31 }
  0xfb   :  { %v231_v36 = vpack.c.bf16 %v200_v35, %v199_v33 }
  0xfd   :  { %209 = vst [vmem:[%s347_s4] sm:$0xff] %v231_v36 }

// kernel: pothole_detector_forward.35
= control target key start
LH: loop header
LB: loop body
LE: loop exit
PB: predicated region body
PF: predicated region fallthrough
CT: control target
= control target key end

     0   :  { %s1209_s18 = smov 0   ;;  %s1211_s19 = smov 0   ;;  %s1314_s0 = inlined_call_operand.vmem [shape: bf16[8,2304], index: 0, kind: input, shape index: {}]   ;;  %s1315_s1 = inlined_call_operand.vmem [shape: bf16[2304,256], index: 1, kind: input, shape index: {}]   ;;  %s1316_s2 = inlined_call_operand.vmem [shape: f32[1,256], index: 2, kind: input, shape index: {}]   ;;  %s1317_s3 = inlined_call_operand.vmem [shape: f32[1,256], index: 3, kind: input, shape index: {}]   ;;  %s1318_s4 = inlined_call_operand.vmem [shape: bf16[8,256], index: 4, kind: input, shape index: {}]   ;;  %s1319_s5 = inlined_call_operand.vmem [shape: bf16[8,256], index: 5, kind: output, shape index: {}]  }
   0x1   :  { %s1213_s20 = smov 0  }
   0x2 LB: > { %s27_s21 = sadd.s32 1, %s1171_s19  ;;  %p988_p0 = scmp.ge.s32.totalorder %s1175_s20, 1  ;;  %s1175_s20 = sphi %s1213_s20, %s15_s20   ;;  %s1171_s19 = sphi %s1211_s19, %s1321_s19   ;;  %s1167_s18 = sphi %s1209_s18, %s1320_s18  }
   0x3   : > { %p28_p1 = scmp.ge.s32.totalorder %s27_s21, 6  ;;  %p271_p2 = scmp.lt.s32.totalorder %s1175_s20, 7 }
   0x5   : > { %s1323_s21 = smov (%p28_p1, %s27_s21), 0  ;;  %p272_p3 = pnand %p988_p0, %p271_p2 }
   0x6   : > { %s334_s22 = smul.u32 (!%p272_p3), 3, %s1167_s18  ;;  %p992_p6 = scmp.ne.s32.totalorder (!%p272_p3), %s1167_s18, 0 }
   0x7   : > { %275 = sbr.rel (%p272_p3) target bundleno = 325 (0x145), region = 40 }
   0x8   : > { %s344_s23 = smul.u32 (!%p272_p3), 48, %s1167_s18  ;;  %p337_p4 = scmp.lt.s32.totalorder (!%p272_p3), %s334_s22, 17 }
   0xa   : > { %p346_p5 = scmp.lt.s32.totalorder (!%p272_p3), %s344_s23, 287 }
   0xe   : > { %s1325_s22 = smov (!%p337_p4, %s334_s22), 17  ;;  %s1327_s23 = smov (!%p346_p5, %s344_s23), 287 }
   0xf   : > { %s989_s24 = sshll.u32 %s1325_s22, 2  ;;  %s1050_s28 = sshll.u32 %s1327_s23, 3  ;;  %v1177_v0 = vmov (!%p992_p6), 0.0  }
  0x10   : > { %s1234_s27 = scalar_lea.vmem %s1314_s0, %s989_s24  ;;  %s1239_s6 = scalar_lea.vmem %s1315_s1, %s1050_s28  ;;  %391 = vst [vmem:[#allocation2] sm:$0xff] (!%p992_p6), %v1177_v0  ;;  %392 = vst [vmem:[#allocation2 + $0x8] sm:$0xff] (!%p992_p6), %v1177_v0 }
  0x11   : > { %390 = sbr.rel (%p992_p6) target bundleno = 24 (0x18), region = 44 }
  0x18 PF: > { %v1078_v1 = vld [vmem:[%s1239_s6 + $0x4] ss:$8 sps:$4 sm:$0xff]   ;;  %v1080_v2 = vld [vmem:[%s1239_s6] ss:$8 sps:$4 sm:$0xff]   ;;  %v1178_v3 = vmov 0   ;;  %p1044_p7 = scmp.ne.s32.totalorder %s1167_s18, 5 }
  0x19   : > { %769 = vmatprep.mubr.bf16.mxu1 %v1178_v3  ;;  %696 = vmatprep.subr.bf16.mxu0 %v1078_v1  ;;  %v1081_v4 = vld [vmem:[%s1239_s6 + $0x14] ss:$8 sps:$4 sm:$0xff]   ;;  %v1083_v5 = vld [vmem:[%s1239_s6 + $0x10] ss:$8 sps:$4 sm:$0xff]   ;;  %v1084_v6 = vld [vmem:[%s1239_s6 + $0x24] ss:$8 sps:$4 sm:$0xff]  }
  0x1a   : > { %697 = vmatpush1.bf16.msra.mxu0 %v1080_v2  ;;  %v1086_v7 = vld [vmem:[%s1239_s6 + $0x20] ss:$8 sps:$4 sm:$0xff]   ;;  %v1087_v8 = vld [vmem:[%s1239_s6 + $0x34] ss:$8 sps:$4 sm:$0xff]   ;;  %v1089_v9 = vld [vmem:[%s1239_s6 + $0x30] ss:$8 sps:$4 sm:$0xff]  }
  0x1b   : > { %698 = vmatprep.subr.bf16.mxu0 %v1081_v4  ;;  %v1102_v10 = vld [vmem:[%s1239_s6 + $0x104] ss:$8 sps:$4 sm:$0xff]   ;;  %v1104_v11 = vld [vmem:[%s1239_s6 + $0x100] ss:$8 sps:$4 sm:$0xff]   ;;  %v1108_v13 = vld [vmem:[%s1239_s6 + $0x114] ss:$8 sps:$4 sm:$0xff]   ;;  %v790_v4 = vlaneseq (!%p1044_p7) }
  0x1c   : > { %v1090_v12 = vld [vmem:[%s1239_s6 + $0x44] ss:$8 sps:$4 sm:$0xff]   ;;  %737 = vmatprep.subr.bf16.mxu1 %v1102_v10  ;;  %v1110_v14 = vld [vmem:[%s1239_s6 + $0x110] ss:$8 sps:$4 sm:$0xff]   ;;  %v1092_v15 = vld [vmem:[%s1239_s6 + $0x40] ss:$8 sps:$4 sm:$0xff]  }
  0x1d   : > { %738 = vmatpush1.bf16.msra.mxu1 %v1104_v11  ;;  %v1093_v16 = vld [vmem:[%s1239_s6 + $0x54] ss:$8 sps:$4 sm:$0xff]   ;;  %v1114_v17 = vld [vmem:[%s1239_s6 + $0x124] ss:$8 sps:$4 sm:$0xff]   ;;  %v1116_v18 = vld [vmem:[%s1239_s6 + $0x120] ss:$8 sps:$4 sm:$0xff]  }
  0x1e   : > { %699 = vmatpush1.bf16.msra.mxu0 %v1083_v5  ;;  %739 = vmatprep.subr.bf16.mxu1 %v1108_v13  ;;  %v1095_v19 = vld [vmem:[%s1239_s6 + $0x50] ss:$8 sps:$4 sm:$0xff]   ;;  %v1120_v20 = vld [vmem:[%s1239_s6 + $0x134] ss:$8 sps:$4 sm:$0xff]   ;;  %v1096_v21 = vld [vmem:[%s1239_s6 + $0x64] ss:$8 sps:$4 sm:$0xff]  }
  0x1f   : > { %700 = vmatprep.subr.bf16.mxu0 %v1084_v6  ;;  %v1122_v22 = vld [vmem:[%s1239_s6 + $0x130] ss:$8 sps:$4 sm:$0xff]   ;;  %v1098_v23 = vld [vmem:[%s1239_s6 + $0x60] ss:$8 sps:$4 sm:$0xff]   ;;  %v1126_v24 = vld [vmem:[%s1239_s6 + $0x144] ss:$8 sps:$4 sm:$0xff]  }
  0x20   : > { %v1099_v25 = vld [vmem:[%s1239_s6 + $0x74] ss:$8 sps:$4 sm:$0xff]   ;;  %v1128_v26 = vld [vmem:[%s1239_s6 + $0x140] ss:$8 sps:$4 sm:$0xff]   ;;  %v1101_v27 = vld [vmem:[%s1239_s6 + $0x70] ss:$8 sps:$4 sm:$0xff]  }
  0x21   : > { %740 = vmatpush1.bf16.msra.mxu1 %v1110_v14  ;;  %v1132_v28 = vld [vmem:[%s1239_s6 + $0x154] ss:$8 sps:$4 sm:$0xff]   ;;  %v1105_v29 = vld [vmem:[%s1239_s6 + $0x84] ss:$8 sps:$4 sm:$0xff]   ;;  %v1134_v30 = vld [vmem:[%s1239_s6 + $0x150] ss:$8 sps:$4 sm:$0xff]  }
  0x22   : > { %701 = vmatpush1.bf16.msra.mxu0 %v1086_v7  ;;  %741 = vmatprep.subr.bf16.mxu1 %v1114_v17  ;;  %v1107_v31 = vld [vmem:[%s1239_s6 + $0x80] ss:$8 sps:$4 sm:$0xff]   ;;  %v1138_v32 = vld [vmem:[%s1239_s6 + $0x164] ss:$8 sps:$4 sm:$0xff]   ;;  %v1111_v33 = vld [vmem:[%s1239_s6 + $0x94] ss:$8 sps:$4 sm:$0xff]  }
  0x23   : > { %702 = vmatprep.subr.bf16.mxu0 %v1087_v8  ;;  %v395_v34 = vld [vmem:[%s1234_s27] sm:$0xff]  ;;  %v1113_v37 = vld [vmem:[%s1239_s6 + $0x90] ss:$8 sps:$4 sm:$0xff]   ;;  %v1144_v38 = vld [vmem:[%s1239_s6 + $0x174] ss:$8 sps:$4 sm:$0xff]   ;;  %v791_v5 = vshrl.u32 (!%p1044_p7), %v790_v4, 7 }
  0x24   : > { %v994_v35 = vcombine.high %v395_v34, %v395_v34  ;;  %v1140_v36 = vld [vmem:[%s1239_s6 + $0x160] ss:$8 sps:$4 sm:$0xff]   ;;  %v1117_v39 = vld [vmem:[%s1239_s6 + $0xa4] ss:$8 sps:$4 sm:$0xff]   ;;  %v1146_v40 = vld [vmem:[%s1239_s6 + $0x170] ss:$8 sps:$4 sm:$0xff]   ;;  %v993_v53 = vcombine.low %v395_v34, %v395_v34 }
  0x25   : > { %742 = vmatpush1.bf16.msra.mxu1 %v1116_v18  ;;  %v1119_v41 = vld [vmem:[%s1239_s6 + $0xa0] ss:$8 sps:$4 sm:$0xff]   ;;  %v1123_v42 = vld [vmem:[%s1239_s6 + $0xb4] ss:$8 sps:$4 sm:$0xff]   ;;  %v1125_v44 = vld [vmem:[%s1239_s6 + $0xb0] ss:$8 sps:$4 sm:$0xff]  }
  0x26   : > { %703 = vmatpush1.bf16.msra.mxu0 %v1089_v9  ;;  %743 = vmatprep.subr.bf16.mxu1 %v1120_v20  ;;  %v1150_v43 = vld [vmem:[%s1234_s27 + $0x8] ss:$0 sps:$4 sm:$0xff]   ;;  %v1129_v45 = vld [vmem:[%s1239_s6 + $0xc4] ss:$8 sps:$4 sm:$0xff]   ;;  %v1135_v47 = vld [vmem:[%s1239_s6 + $0xd4] ss:$8 sps:$4 sm:$0xff]  }
  0x27   : > { %704 = vmatprep.subr.bf16.mxu0 %v1090_v12  ;;  %728 = vmatprep.mubr.bf16.mxu0 %v994_v35  ;;  %v1131_v46 = vld [vmem:[%s1239_s6 + $0xc0] ss:$8 sps:$4 sm:$0xff]   ;;  %v1137_v48 = vld [vmem:[%s1239_s6 + $0xd0] ss:$8 sps:$4 sm:$0xff]   ;;  %v1141_v49 = vld [vmem:[%s1239_s6 + $0xe4] ss:$8 sps:$4 sm:$0xff]  }
  0x28   : > { %v1143_v50 = vld [vmem:[%s1239_s6 + $0xe0] ss:$8 sps:$4 sm:$0xff]   ;;  %v1147_v51 = vld [vmem:[%s1239_s6 + $0xf4] ss:$8 sps:$4 sm:$0xff]   ;;  %v1149_v52 = vld [vmem:[%s1239_s6 + $0xf0] ss:$8 sps:$4 sm:$0xff]  }
  0x29   : > { %744 = vmatpush1.bf16.msra.mxu1 %v1122_v22  ;;  %v393_v58 = vld [vmem:[#allocation2] sm:$0xff]  ;;  %v394_v61 = vld [vmem:[#allocation2 + $0x8] sm:$0xff]  ;;  %v792_v8 = vsub.s32 (!%p1044_p7), 0, %v791_v5  ;;  %v796_v9 = vsub.s32 (!%p1044_p7), 1, %v791_v5 }
  0x2a   : > { %705 = vmatpush1.bf16.msra.mxu0 %v1092_v15  ;;  %745 = vmatprep.subr.bf16.mxu1 %v1126_v24  ;;  %v788_v6 = vld [vmem:[%s1316_s2] sm:$0x3] (!%p1044_p7) }
  0x2b   : > { %706 = vmatprep.subr.bf16.mxu0 %v1093_v16  ;;  %v802_v7 = vld [vmem:[%s1317_s3] sm:$0x3] (!%p1044_p7)  ;;  %v793_v13 = vrot.slane (!%p1044_p7), %v788_v6, %v792_v8  ;;  %v797_v14 = vrot.slane (!%p1044_p7), %v788_v6, %v796_v9 }
  0x2c   : > { %v816_v12 = vld [vmem:[%s1318_s4] sm:$0xff] (!%p1044_p7)  ;;  %v807_v15 = vrot.slane (!%p1044_p7), %v802_v7, %v792_v8  ;;  %v811_v16 = vrot.slane (!%p1044_p7), %v802_v7, %v796_v9 }
  0x2d   : > { %746 = vmatpush1.bf16.msra.mxu1 %v1128_v26  ;;  %v818_v20 = vunpack.c.h.bf16 (!%p1044_p7), %v816_v12 }
  0x2e   : > { %707 = vmatpush1.bf16.msra.mxu0 %v1095_v19  ;;  %747 = vmatprep.subr.bf16.mxu1 %v1132_v28  ;;  %v817_v19 = vunpack.c.l.bf16 (!%p1044_p7), %v816_v12 }
  0x2f   : > { %708 = vmatprep.subr.bf16.mxu0 %v1096_v21 }
  0x31   : > { %748 = vmatpush1.bf16.msra.mxu1 %v1134_v30 }
  0x32   : > { %709 = vmatpush1.bf16.msra.mxu0 %v1098_v23  ;;  %749 = vmatprep.subr.bf16.mxu1 %v1138_v32 }
  0x33   : > { %710 = vmatprep.subr.bf16.mxu0 %v1099_v25 }
  0x35   : > { %750 = vmatpush1.bf16.msra.mxu1 %v1140_v36 }
  0x36   : > { %711 = vmatpush1.bf16.msra.mxu0 %v1101_v27  ;;  %751 = vmatprep.subr.bf16.mxu1 %v1144_v38 }
  0x37   : > { %712 = vmatprep.subr.bf16.mxu0 %v1105_v29 }
  0x39   : > { %752 = vmatpush1.bf16.msra.mxu1 %v1146_v40 }
  0x3a   : > { %713 = vmatpush1.bf16.msra.mxu0 %v1107_v31 }
  0x3b   : > { %714 = vmatprep.subr.bf16.mxu0 %v1111_v33 }
  0x3c   : > { %770 = vmatmul.mubr.bf16.vlgmr.msra.gmra.mrb[0].mxu1 %v1150_v43 }
  0x3e   : > { %715 = vmatpush1.bf16.msra.mxu0 %v1113_v37 }
  0x3f   : > { %716 = vmatprep.subr.bf16.mxu0 %v1117_v39 }
  0x42   : > { %717 = vmatpush1.bf16.msra.mxu0 %v1119_v41 }
  0x43   : > { %718 = vmatprep.subr.bf16.mxu0 %v1123_v42 }
  0x46   : > { %719 = vmatpush1.bf16.msra.mxu0 %v1125_v44 }
  0x47   : > { %720 = vmatprep.subr.bf16.mxu0 %v1129_v45 }
  0x4a   : > { %721 = vmatpush1.bf16.msra.mxu0 %v1131_v46 }
  0x4b   : > { %722 = vmatprep.subr.bf16.mxu0 %v1135_v47 }
  0x4e   : > { %723 = vmatpush1.bf16.msra.mxu0 %v1137_v48 }
  0x4f   : > { %724 = vmatprep.subr.bf16.mxu0 %v1141_v49 }
  0x52   : > { %725 = vmatpush1.bf16.msra.mxu0 %v1143_v50 }
  0x53   : > { %726 = vmatprep.subr.bf16.mxu0 %v1147_v51 }
  0x56   : > { %727 = vmatpush1.bf16.msra.mxu0 %v1149_v52 }
  0x59   : > { %729 = vmatmul.mubr.bf16.vlgmr.msra.gmra.mrb[0].mxu0 %v993_v53 }
 0x10f   : > { %v771_v54 = vpop.f32.mrb[0].mxu1 }
 0x110   : > { %v773_v55 = vpop.f32.mrb[1].mxu1 }
 0x111   : > { %v775_v56 = vpop.f32.mrb[2].mxu1 }
 0x112   : > { %v776_v57 = vpop.f32.mrb[3].mxu1 }
 0x12c   : > { %v730_v59 = vpop.f32.mrb[0].mxu0  ;;  %785 = sbr.rel (%p1044_p7) target bundleno = 325 (0x145), region = 48 }
 0x12d   : > { %v772_v60 = vadd.f32 %v771_v54, %v730_v59  ;;  %v732_v62 = vpop.f32.mrb[1].mxu0 }
 0x12e   : > { %v774_v63 = vadd.f32 %v773_v55, %v732_v62  ;;  %v734_v0 = vpop.f32.mrb[2].mxu0 }
 0x12f   : > { %v778_v1 = vadd.f32 %v772_v60, %v393_v58  ;;  %v735_v2 = vpop.f32.mrb[3].mxu0 }
 0x130   : > { %v779_v3 = vadd.f32 %v774_v63, %v394_v61 }
 0x131   : > { %780 = vst [vmem:[#allocation2] sm:$0xff] %v778_v1 }
 0x132   : > { %781 = vst [vmem:[#allocation2 + $0x8] sm:$0xff] %v779_v3 }
 0x138   : > { %v786_v10 = vld [vmem:[#allocation2] sm:$0xff] }
 0x139   : > { %v787_v11 = vld [vmem:[#allocation2 + $0x8] sm:$0xff]  ;;  %v800_v17 = vmul.f32 %v793_v13, %v786_v10 }
 0x13a   : > { %v801_v18 = vmul.f32 %v797_v14, %v787_v11 }
 0x13b   : > { %v814_v21 = vadd.f32 %v807_v15, %v800_v17 }
 0x13c   : > { %v815_v22 = vadd.f32 %v811_v16, %v801_v18 }
 0x13d   : > { %v819_v23 = vadd.f32 %v817_v19, %v814_v21 }
 0x13e   : > { %v820_v24 = vadd.f32 %v818_v20, %v815_v22 }
 0x13f   : > { %v821_v25 = vmax.f32 %v819_v23, 0.0 }
 0x140   : > { %v822_v26 = vmax.f32 %v820_v24, 0.0 }
 0x142   : > { %v1051_v27 = vpack.c.bf16 %v822_v26, %v821_v25 }
 0x144   : > { %831 = vst [vmem:[%s1319_s5] sm:$0xff] %v1051_v27 }
 0x145 PF: > { %s15_s20 = sadd.s32 1, %s1175_s20   ;;  %s1320_s18 = smov %s1171_s19 }
 0x146   : > { %p12_p8 = scmp.ge.s32.totalorder %s15_s20, 8   ;;  %s1321_s19 = smov %s1323_s21 }
 0x148   :  { %14 = sbr.rel (!%p12_p8) target bundleno = 2 (0x2), region = 90 }

// kernel: pothole_detector_forward.36
= control target key start
LH: loop header
LB: loop body
LE: loop exit
PB: predicated region body
PF: predicated region fallthrough
CT: control target
= control target key end

     0   :  { %s1114_s15 = smov 0   ;;  %s1116_s16 = smov 0   ;;  %s1216_s0 = inlined_call_operand.vmem [shape: bf16[8,2304], index: 0, kind: input, shape index: {}]   ;;  %s1217_s1 = inlined_call_operand.vmem [shape: bf16[2304,256], index: 1, kind: input, shape index: {}]   ;;  %s1218_s2 = inlined_call_operand.vmem [shape: f32[1,256], index: 2, kind: input, shape index: {}]   ;;  %s1219_s3 = inlined_call_operand.vmem [shape: f32[1,256], index: 3, kind: input, shape index: {}]   ;;  %s1220_s4 = inlined_call_operand.vmem [shape: bf16[8,256], index: 4, kind: output, shape index: {}]  }
   0x1   :  { %s1118_s17 = smov 0  }
   0x2 LB: > { %s26_s18 = sadd.s32 1, %s1081_s16  ;;  %p898_p0 = scmp.ge.s32.totalorder %s1085_s17, 1  ;;  %s1085_s17 = sphi %s1118_s17, %s14_s17   ;;  %s1081_s16 = sphi %s1116_s16, %s1222_s16   ;;  %s1077_s15 = sphi %s1114_s15, %s1221_s15  }
   0x3   : > { %p27_p1 = scmp.ge.s32.totalorder %s26_s18, 6  ;;  %p229_p2 = scmp.lt.s32.totalorder %s1085_s17, 7 }
   0x5   : > { %s1224_s18 = smov (%p27_p1, %s26_s18), 0  ;;  %p230_p3 = pnand %p898_p0, %p229_p2 }
   0x6   : > { %s281_s19 = smul.u32 (!%p230_p3), 3, %s1077_s15  ;;  %p902_p6 = scmp.ne.s32.totalorder (!%p230_p3), %s1077_s15, 0 }
   0x7   : > { %233 = sbr.rel (%p230_p3) target bundleno = 323 (0x143), region = 36 }
   0x8   : > { %s291_s20 = smul.u32 (!%p230_p3), 48, %s1077_s15  ;;  %p284_p4 = scmp.lt.s32.totalorder (!%p230_p3), %s281_s19, 17 }
   0xa   : > { %p293_p5 = scmp.lt.s32.totalorder (!%p230_p3), %s291_s20, 287 }
   0xe   : > { %s1226_s19 = smov (!%p284_p4, %s281_s19), 17  ;;  %s1228_s20 = smov (!%p293_p5, %s291_s20), 287 }
   0xf   : > { %s899_s21 = sshll.u32 %s1226_s19, 2  ;;  %s960_s25 = sshll.u32 %s1228_s20, 3  ;;  %v1087_v0 = vmov (!%p902_p6), 0.0  }
  0x10   : > { %s1139_s24 = scalar_lea.vmem %s1216_s0, %s899_s21  ;;  %s1144_s28 = scalar_lea.vmem %s1217_s1, %s960_s25  ;;  %328 = vst [vmem:[#allocation2] sm:$0xff] (!%p902_p6), %v1087_v0  ;;  %329 = vst [vmem:[#allocation2 + $0x8] sm:$0xff] (!%p902_p6), %v1087_v0 }
  0x11   : > { %327 = sbr.rel (%p902_p6) target bundleno = 24 (0x18), region = 40 }
  0x18 PF: > { %v988_v1 = vld [vmem:[%s1144_s28 + $0x4] ss:$8 sps:$4 sm:$0xff]   ;;  %v990_v2 = vld [vmem:[%s1144_s28] ss:$8 sps:$4 sm:$0xff]   ;;  %v1088_v3 = vmov 0   ;;  %p954_p7 = scmp.ne.s32.totalorder %s1077_s15, 5 }
  0x19   : > { %706 = vmatprep.mubr.bf16.mxu1 %v1088_v3  ;;  %633 = vmatprep.subr.bf16.mxu0 %v988_v1  ;;  %v991_v4 = vld [vmem:[%s1144_s28 + $0x14] ss:$8 sps:$4 sm:$0xff]   ;;  %v993_v5 = vld [vmem:[%s1144_s28 + $0x10] ss:$8 sps:$4 sm:$0xff]   ;;  %v994_v6 = vld [vmem:[%s1144_s28 + $0x24] ss:$8 sps:$4 sm:$0xff]  }
  0x1a   : > { %634 = vmatpush1.bf16.msra.mxu0 %v990_v2  ;;  %v996_v7 = vld [vmem:[%s1144_s28 + $0x20] ss:$8 sps:$4 sm:$0xff]   ;;  %v997_v8 = vld [vmem:[%s1144_s28 + $0x34] ss:$8 sps:$4 sm:$0xff]   ;;  %v999_v9 = vld [vmem:[%s1144_s28 + $0x30] ss:$8 sps:$4 sm:$0xff]  }
  0x1b   : > { %635 = vmatprep.subr.bf16.mxu0 %v991_v4  ;;  %v1012_v10 = vld [vmem:[%s1144_s28 + $0x104] ss:$8 sps:$4 sm:$0xff]   ;;  %v1014_v11 = vld [vmem:[%s1144_s28 + $0x100] ss:$8 sps:$4 sm:$0xff]   ;;  %v1018_v13 = vld [vmem:[%s1144_s28 + $0x114] ss:$8 sps:$4 sm:$0xff]   ;;  %v727_v4 = vlaneseq (!%p954_p7) }
  0x1c   : > { %v1000_v12 = vld [vmem:[%s1144_s28 + $0x44] ss:$8 sps:$4 sm:$0xff]   ;;  %674 = vmatprep.subr.bf16.mxu1 %v1012_v10  ;;  %v1020_v14 = vld [vmem:[%s1144_s28 + $0x110] ss:$8 sps:$4 sm:$0xff]   ;;  %v1002_v15 = vld [vmem:[%s1144_s28 + $0x40] ss:$8 sps:$4 sm:$0xff]  }
  0x1d   : > { %675 = vmatpush1.bf16.msra.mxu1 %v1014_v11  ;;  %v1003_v16 = vld [vmem:[%s1144_s28 + $0x54] ss:$8 sps:$4 sm:$0xff]   ;;  %v1024_v17 = vld [vmem:[%s1144_s28 + $0x124] ss:$8 sps:$4 sm:$0xff]   ;;  %v1026_v18 = vld [vmem:[%s1144_s28 + $0x120] ss:$8 sps:$4 sm:$0xff]  }
  0x1e   : > { %636 = vmatpush1.bf16.msra.mxu0 %v993_v5  ;;  %676 = vmatprep.subr.bf16.mxu1 %v1018_v13  ;;  %v1005_v19 = vld [vmem:[%s1144_s28 + $0x50] ss:$8 sps:$4 sm:$0xff]   ;;  %v1030_v20 = vld [vmem:[%s1144_s28 + $0x134] ss:$8 sps:$4 sm:$0xff]   ;;  %v1006_v21 = vld [vmem:[%s1144_s28 + $0x64] ss:$8 sps:$4 sm:$0xff]  }
  0x1f   : > { %637 = vmatprep.subr.bf16.mxu0 %v994_v6  ;;  %v1032_v22 = vld [vmem:[%s1144_s28 + $0x130] ss:$8 sps:$4 sm:$0xff]   ;;  %v1008_v23 = vld [vmem:[%s1144_s28 + $0x60] ss:$8 sps:$4 sm:$0xff]   ;;  %v1036_v24 = vld [vmem:[%s1144_s28 + $0x144] ss:$8 sps:$4 sm:$0xff]  }
  0x20   : > { %v1009_v25 = vld [vmem:[%s1144_s28 + $0x74] ss:$8 sps:$4 sm:$0xff]   ;;  %v1038_v26 = vld [vmem:[%s1144_s28 + $0x140] ss:$8 sps:$4 sm:$0xff]   ;;  %v1011_v27 = vld [vmem:[%s1144_s28 + $0x70] ss:$8 sps:$4 sm:$0xff]  }
  0x21   : > { %677 = vmatpush1.bf16.msra.mxu1 %v1020_v14  ;;  %v1042_v28 = vld [vmem:[%s1144_s28 + $0x154] ss:$8 sps:$4 sm:$0xff]   ;;  %v1015_v29 = vld [vmem:[%s1144_s28 + $0x84] ss:$8 sps:$4 sm:$0xff]   ;;  %v1044_v30 = vld [vmem:[%s1144_s28 + $0x150] ss:$8 sps:$4 sm:$0xff]  }
  0x22   : > { %638 = vmatpush1.bf16.msra.mxu0 %v996_v7  ;;  %678 = vmatprep.subr.bf16.mxu1 %v1024_v17  ;;  %v1017_v31 = vld [vmem:[%s1144_s28 + $0x80] ss:$8 sps:$4 sm:$0xff]   ;;  %v1048_v32 = vld [vmem:[%s1144_s28 + $0x164] ss:$8 sps:$4 sm:$0xff]   ;;  %v1021_v33 = vld [vmem:[%s1144_s28 + $0x94] ss:$8 sps:$4 sm:$0xff]  }
  0x23   : > { %639 = vmatprep.subr.bf16.mxu0 %v997_v8  ;;  %v332_v34 = vld [vmem:[%s1139_s24] sm:$0xff]  ;;  %v1023_v37 = vld [vmem:[%s1144_s28 + $0x90] ss:$8 sps:$4 sm:$0xff]   ;;  %v1054_v38 = vld [vmem:[%s1144_s28 + $0x174] ss:$8 sps:$4 sm:$0xff]   ;;  %v728_v5 = vshrl.u32 (!%p954_p7), %v727_v4, 7 }
  0x24   : > { %v904_v35 = vcombine.high %v332_v34, %v332_v34  ;;  %v1050_v36 = vld [vmem:[%s1144_s28 + $0x160] ss:$8 sps:$4 sm:$0xff]   ;;  %v1027_v39 = vld [vmem:[%s1144_s28 + $0xa4] ss:$8 sps:$4 sm:$0xff]   ;;  %v1056_v40 = vld [vmem:[%s1144_s28 + $0x170] ss:$8 sps:$4 sm:$0xff]   ;;  %v903_v53 = vcombine.low %v332_v34, %v332_v34 }
  0x25   : > { %679 = vmatpush1.bf16.msra.mxu1 %v1026_v18  ;;  %v1029_v41 = vld [vmem:[%s1144_s28 + $0xa0] ss:$8 sps:$4 sm:$0xff]   ;;  %v1033_v42 = vld [vmem:[%s1144_s28 + $0xb4] ss:$8 sps:$4 sm:$0xff]   ;;  %v1035_v44 = vld [vmem:[%s1144_s28 + $0xb0] ss:$8 sps:$4 sm:$0xff]  }
  0x26   : > { %640 = vmatpush1.bf16.msra.mxu0 %v999_v9  ;;  %680 = vmatprep.subr.bf16.mxu1 %v1030_v20  ;;  %v1060_v43 = vld [vmem:[%s1139_s24 + $0x8] ss:$0 sps:$4 sm:$0xff]   ;;  %v1039_v45 = vld [vmem:[%s1144_s28 + $0xc4] ss:$8 sps:$4 sm:$0xff]   ;;  %v1045_v47 = vld [vmem:[%s1144_s28 + $0xd4] ss:$8 sps:$4 sm:$0xff]  }
  0x27   : > { %641 = vmatprep.subr.bf16.mxu0 %v1000_v12  ;;  %665 = vmatprep.mubr.bf16.mxu0 %v904_v35  ;;  %v1041_v46 = vld [vmem:[%s1144_s28 + $0xc0] ss:$8 sps:$4 sm:$0xff]   ;;  %v1047_v48 = vld [vmem:[%s1144_s28 + $0xd0] ss:$8 sps:$4 sm:$0xff]   ;;  %v1051_v49 = vld [vmem:[%s1144_s28 + $0xe4] ss:$8 sps:$4 sm:$0xff]  }
  0x28   : > { %v1053_v50 = vld [vmem:[%s1144_s28 + $0xe0] ss:$8 sps:$4 sm:$0xff]   ;;  %v1057_v51 = vld [vmem:[%s1144_s28 + $0xf4] ss:$8 sps:$4 sm:$0xff]   ;;  %v1059_v52 = vld [vmem:[%s1144_s28 + $0xf0] ss:$8 sps:$4 sm:$0xff]  }
  0x29   : > { %681 = vmatpush1.bf16.msra.mxu1 %v1032_v22  ;;  %v330_v58 = vld [vmem:[#allocation2] sm:$0xff]  ;;  %v331_v61 = vld [vmem:[#allocation2 + $0x8] sm:$0xff]  ;;  %v729_v8 = vsub.s32 (!%p954_p7), 0, %v728_v5  ;;  %v733_v9 = vsub.s32 (!%p954_p7), 1, %v728_v5 }
  0x2a   : > { %642 = vmatpush1.bf16.msra.mxu0 %v1002_v15  ;;  %682 = vmatprep.subr.bf16.mxu1 %v1036_v24  ;;  %v725_v6 = vld [vmem:[%s1218_s2] sm:$0x3] (!%p954_p7) }
  0x2b   : > { %643 = vmatprep.subr.bf16.mxu0 %v1003_v16  ;;  %v739_v7 = vld [vmem:[%s1219_s3] sm:$0x3] (!%p954_p7)  ;;  %v730_v12 = vrot.slane (!%p954_p7), %v725_v6, %v729_v8  ;;  %v734_v13 = vrot.slane (!%p954_p7), %v725_v6, %v733_v9 }
  0x2c   : > { %v744_v14 = vrot.slane (!%p954_p7), %v739_v7, %v729_v8  ;;  %v748_v15 = vrot.slane (!%p954_p7), %v739_v7, %v733_v9 }
  0x2d   : > { %683 = vmatpush1.bf16.msra.mxu1 %v1038_v26 }
  0x2e   : > { %644 = vmatpush1.bf16.msra.mxu0 %v1005_v19  ;;  %684 = vmatprep.subr.bf16.mxu1 %v1042_v28 }
  0x2f   : > { %645 = vmatprep.subr.bf16.mxu0 %v1006_v21 }
  0x31   : > { %685 = vmatpush1.bf16.msra.mxu1 %v1044_v30 }
  0x32   : > { %646 = vmatpush1.bf16.msra.mxu0 %v1008_v23  ;;  %686 = vmatprep.subr.bf16.mxu1 %v1048_v32 }
  0x33   : > { %647 = vmatprep.subr.bf16.mxu0 %v1009_v25 }
  0x35   : > { %687 = vmatpush1.bf16.msra.mxu1 %v1050_v36 }
  0x36   : > { %648 = vmatpush1.bf16.msra.mxu0 %v1011_v27  ;;  %688 = vmatprep.subr.bf16.mxu1 %v1054_v38 }
  0x37   : > { %649 = vmatprep.subr.bf16.mxu0 %v1015_v29 }
  0x39   : > { %689 = vmatpush1.bf16.msra.mxu1 %v1056_v40 }
  0x3a   : > { %650 = vmatpush1.bf16.msra.mxu0 %v1017_v31 }
  0x3b   : > { %651 = vmatprep.subr.bf16.mxu0 %v1021_v33 }
  0x3c   : > { %707 = vmatmul.mubr.bf16.vlgmr.msra.gmra.mrb[0].mxu1 %v1060_v43 }
  0x3e   : > { %652 = vmatpush1.bf16.msra.mxu0 %v1023_v37 }
  0x3f   : > { %653 = vmatprep.subr.bf16.mxu0 %v1027_v39 }
  0x42   : > { %654 = vmatpush1.bf16.msra.mxu0 %v1029_v41 }
  0x43   : > { %655 = vmatprep.subr.bf16.mxu0 %v1033_v42 }
  0x46   : > { %656 = vmatpush1.bf16.msra.mxu0 %v1035_v44 }
  0x47   : > { %657 = vmatprep.subr.bf16.mxu0 %v1039_v45 }
  0x4a   : > { %658 = vmatpush1.bf16.msra.mxu0 %v1041_v46 }
  0x4b   : > { %659 = vmatprep.subr.bf16.mxu0 %v1045_v47 }
  0x4e   : > { %660 = vmatpush1.bf16.msra.mxu0 %v1047_v48 }
  0x4f   : > { %661 = vmatprep.subr.bf16.mxu0 %v1051_v49 }
  0x52   : > { %662 = vmatpush1.bf16.msra.mxu0 %v1053_v50 }
  0x53   : > { %663 = vmatprep.subr.bf16.mxu0 %v1057_v51 }
  0x56   : > { %664 = vmatpush1.bf16.msra.mxu0 %v1059_v52 }
  0x59   : > { %666 = vmatmul.mubr.bf16.vlgmr.msra.gmra.mrb[0].mxu0 %v903_v53 }
 0x10f   : > { %v708_v54 = vpop.f32.mrb[0].mxu1 }
 0x110   : > { %v710_v55 = vpop.f32.mrb[1].mxu1 }
 0x111   : > { %v712_v56 = vpop.f32.mrb[2].mxu1 }
 0x112   : > { %v713_v57 = vpop.f32.mrb[3].mxu1 }
 0x12c   : > { %v667_v59 = vpop.f32.mrb[0].mxu0  ;;  %722 = sbr.rel (%p954_p7) target bundleno = 323 (0x143), region = 44 }
 0x12d   : > { %v709_v60 = vadd.f32 %v708_v54, %v667_v59  ;;  %v669_v62 = vpop.f32.mrb[1].mxu0 }
 0x12e   : > { %v711_v63 = vadd.f32 %v710_v55, %v669_v62  ;;  %v671_v0 = vpop.f32.mrb[2].mxu0 }
 0x12f   : > { %v715_v1 = vadd.f32 %v709_v60, %v330_v58  ;;  %v672_v2 = vpop.f32.mrb[3].mxu0 }
 0x130   : > { %v716_v3 = vadd.f32 %v711_v63, %v331_v61 }
 0x131   : > { %717 = vst [vmem:[#allocation2] sm:$0xff] %v715_v1 }
 0x132   : > { %718 = vst [vmem:[#allocation2 + $0x8] sm:$0xff] %v716_v3 }
 0x138   : > { %v723_v10 = vld [vmem:[#allocation2] sm:$0xff] }
 0x139   : > { %v724_v11 = vld [vmem:[#allocation2 + $0x8] sm:$0xff]  ;;  %v737_v16 = vmul.f32 %v730_v12, %v723_v10 }
 0x13a   : > { %v738_v17 = vmul.f32 %v734_v13, %v724_v11 }
 0x13b   : > { %v751_v18 = vadd.f32 %v744_v14, %v737_v16 }
 0x13c   : > { %v752_v19 = vadd.f32 %v748_v15, %v738_v17 }
 0x13d   : > { %v753_v20 = vmax.f32 %v751_v18, 0.0 }
 0x13e   : > { %v754_v21 = vmax.f32 %v752_v19, 0.0 }
 0x140   : > { %v961_v22 = vpack.c.bf16 %v754_v21, %v753_v20 }
 0x142   : > { %763 = vst [vmem:[%s1220_s4] sm:$0xff] %v961_v22 }
 0x143 PF: > { %s14_s17 = sadd.s32 1, %s1085_s17   ;;  %s1221_s15 = smov %s1081_s16 }
 0x144   : > { %p11_p8 = scmp.ge.s32.totalorder %s14_s17, 8   ;;  %s1222_s16 = smov %s1224_s18 }
 0x146   :  { %13 = sbr.rel (!%p11_p8) target bundleno = 2 (0x2), region = 83 }

// kernel: pothole_detector_forward.39
= control target key start
LH: loop header
LB: loop body
LE: loop exit
PB: predicated region body
PF: predicated region fallthrough
CT: control target
= control target key end

     0   :  { %s1434_s15 = smov 0   ;;  %s1436_s16 = smov 0   ;;  %s1723_s0 = inlined_call_operand.vmem [shape: bf16[2,2304], index: 0, kind: input, shape index: {}]   ;;  %s1724_s1 = inlined_call_operand.vmem [shape: bf16[2304,512], index: 1, kind: input, shape index: {}]   ;;  %s1725_s2 = inlined_call_operand.vmem [shape: f32[1,512], index: 2, kind: input, shape index: {}]   ;;  %s1726_s3 = inlined_call_operand.vmem [shape: f32[1,512], index: 3, kind: input, shape index: {}]   ;;  %s1727_s4 = inlined_call_operand.vmem [shape: bf16[2,512], index: 4, kind: output, shape index: {}]  }
   0x1   :  { %s1438_s17 = smov 0   ;;  %s1440_s18 = smov 0  }
   0x2   :  { %s1442_s19 = smov 0   ;;  %s1444_s20 = smov 0  }
   0x3   :  { %s1446_s21 = smov 0  }
   0x4 LB: > { %s26_s22 = sadd.s32 1, %s1395_s19  ;;  %s29_s23 = sadd.s32 1, %s1399_s20  ;;  %s1403_s21 = sphi %s1446_s21, %s14_s21   ;;  %s1399_s20 = sphi %s1444_s20, %s1733_s20   ;;  %s1395_s19 = sphi %s1442_s19, %s1732_s19   ;;  %s1391_s18 = sphi %s1440_s18, %s1731_s18   ;;  %s1387_s17 = sphi %s1438_s17, %s1730_s17   ;;  %s1383_s16 = sphi %s1436_s16, %s1729_s16   ;;  %s1379_s15 = sphi %s1434_s15, %s1728_s15  }
   0x5   : > { %p27_p0 = scmp.ge.s32.totalorder %s26_s22, 6  ;;  %p77_p1 = scmp.ne.s32.totalorder %s1383_s16, %s1379_s15 }
   0x6   : > { %p78_p2 = scmp.eq.s32.totalorder %s1403_s21, 0  ;;  %s70_s27 = sadd.s32 1, %s1383_s16 }
   0x7   : > { %s1735_s22 = smov (%p27_p0, %s26_s22), 0  ;;  %s1737_s23 = smov (!%p27_p0, %s29_s23), %s1399_s20 }
   0x8   : > { %p79_p3 = por %p78_p2, %p77_p1  ;;  %p31_p4 = scmp.ge.s32.totalorder %s1737_s23, 2 }
   0x9   : > { %s65_s24 = ssub.s32 %s1395_s19, %s1735_s22  ;;  %p1149_p6 = scmp.ge.s32.totalorder %s1403_s21, 12 }
   0xa   : > { %s1739_s23 = smov (%p31_p4, %s1737_s23), 0 }
   0xb   : > { %s66_s25 = ssub.s32 %s1399_s20, %s1739_s23  ;;  %183 = sbr.rel (%p1149_p6) target bundleno = 50 (0x32), region = 16 }
   0xc   : > { %s67_s26 = sor.u32 %s66_s25, %s65_s24 }
   0xd   : > { %p68_p5 = scmp.eq.s32.totalorder %s67_s26, 0 }
   0xf   : > { %s1485_s28 = scalar_select %p68_p5, %s1383_s16, %s70_s27  }
  0x12   : > { %198 = sbr.rel (!%p79_p3) target bundleno = 50 (0x32), region = 24  ;;  %s200_s29 = sand.u32 (%p79_p3), 1, %s1383_s16  }
  0x13   : > { %s1215_s30 = smul.u32 (%p79_p3), 384, %s200_s29  ;;  %s1150_s5 = sshll.u32 (%p79_p3), %s1399_s20, 1 }
  0x14   : > { %s1212_s6 = smul.u32 (%p79_p3), 192, %s1395_s19 }
  0x15   : > { %s1499_s12 = scalar_lea.vmem (%p79_p3), [#allocation3], %s1215_s30 }
  0x16   : > { %s206_s7 = sadd.s32 (%p79_p3), %s1212_s6, %s1150_s5 }
  0x17   : > { %s1152_s8 = sshll.u32 (%p79_p3), %s206_s7, 2 }
  0x18   : > { %s1494_s11 = scalar_lea.vmem (%p79_p3), %s1724_s1, %s1152_s8 }
  0x19   : > { %v330_v0 = vld [vmem:[%s1494_s11] sm:$0xff]  ;;  %v332_v1 = vld [vmem:[%s1494_s11 + $0x10] sm:$0xff] }
  0x1a   : > { %v334_v2 = vld [vmem:[%s1494_s11 + $0x20] sm:$0xff]  ;;  %331 = vst [vmem:[%s1499_s12] sm:$0xff] %v330_v0  ;;  %333 = vst [vmem:[%s1499_s12 + $0x8] sm:$0xff] %v332_v1  ;;  %v336_v3 = vld [vmem:[%s1494_s11 + $0x30] sm:$0xff] }
  0x1b   : > { %335 = vst [vmem:[%s1499_s12 + $0x10] sm:$0xff] %v334_v2  ;;  %v338_v4 = vld [vmem:[%s1494_s11 + $0x40] sm:$0xff]  ;;  %v340_v5 = vld [vmem:[%s1494_s11 + $0x50] sm:$0xff]  ;;  %337 = vst [vmem:[%s1499_s12 + $0x18] sm:$0xff] %v336_v3 }
  0x1c   : > { %339 = vst [vmem:[%s1499_s12 + $0x20] sm:$0xff] %v338_v4  ;;  %341 = vst [vmem:[%s1499_s12 + $0x28] sm:$0xff] %v340_v5  ;;  %v342_v6 = vld [vmem:[%s1494_s11 + $0x60] sm:$0xff]  ;;  %v344_v7 = vld [vmem:[%s1494_s11 + $0x70] sm:$0xff] }
  0x1d   : > { %v346_v8 = vld [vmem:[%s1494_s11 + $0x80] sm:$0xff]  ;;  %343 = vst [vmem:[%s1499_s12 + $0x30] sm:$0xff] %v342_v6  ;;  %345 = vst [vmem:[%s1499_s12 + $0x38] sm:$0xff] %v344_v7  ;;  %v348_v9 = vld [vmem:[%s1494_s11 + $0x90] sm:$0xff] }
  0x1e   : > { %347 = vst [vmem:[%s1499_s12 + $0x40] sm:$0xff] %v346_v8  ;;  %v350_v10 = vld [vmem:[%s1494_s11 + $0xa0] sm:$0xff]  ;;  %v352_v11 = vld [vmem:[%s1494_s11 + $0xb0] sm:$0xff]  ;;  %349 = vst [vmem:[%s1499_s12 + $0x48] sm:$0xff] %v348_v9 }
  0x1f   : > { %351 = vst [vmem:[%s1499_s12 + $0x50] sm:$0xff] %v350_v10  ;;  %353 = vst [vmem:[%s1499_s12 + $0x58] sm:$0xff] %v352_v11  ;;  %v354_v12 = vld [vmem:[%s1494_s11 + $0xc0] sm:$0xff]  ;;  %v356_v13 = vld [vmem:[%s1494_s11 + $0xd0] sm:$0xff] }
  0x20   : > { %v358_v14 = vld [vmem:[%s1494_s11 + $0xe0] sm:$0xff]  ;;  %355 = vst [vmem:[%s1499_s12 + $0x60] sm:$0xff] %v354_v12  ;;  %357 = vst [vmem:[%s1499_s12 + $0x68] sm:$0xff] %v356_v13  ;;  %v360_v15 = vld [vmem:[%s1494_s11 + $0xf0] sm:$0xff] }
  0x21   : > { %359 = vst [vmem:[%s1499_s12 + $0x70] sm:$0xff] %v358_v14  ;;  %v362_v16 = vld [vmem:[%s1494_s11 + $0x100] sm:$0xff]  ;;  %v364_v17 = vld [vmem:[%s1494_s11 + $0x110] sm:$0xff]  ;;  %361 = vst [vmem:[%s1499_s12 + $0x78] sm:$0xff] %v360_v15 }
  0x22   : > { %363 = vst [vmem:[%s1499_s12 + $0x80] sm:$0xff] %v362_v16  ;;  %365 = vst [vmem:[%s1499_s12 + $0x88] sm:$0xff] %v364_v17  ;;  %v366_v18 = vld [vmem:[%s1494_s11 + $0x120] sm:$0xff]  ;;  %v368_v19 = vld [vmem:[%s1494_s11 + $0x130] sm:$0xff] }
  0x23   : > { %v370_v20 = vld [vmem:[%s1494_s11 + $0x140] sm:$0xff]  ;;  %367 = vst [vmem:[%s1499_s12 + $0x90] sm:$0xff] %v366_v18  ;;  %369 = vst [vmem:[%s1499_s12 + $0x98] sm:$0xff] %v368_v19  ;;  %v372_v21 = vld [vmem:[%s1494_s11 + $0x150] sm:$0xff] }
  0x24   : > { %371 = vst [vmem:[%s1499_s12 + $0xa0] sm:$0xff] %v370_v20  ;;  %v374_v22 = vld [vmem:[%s1494_s11 + $0x160] sm:$0xff]  ;;  %v376_v23 = vld [vmem:[%s1494_s11 + $0x170] sm:$0xff]  ;;  %373 = vst [vmem:[%s1499_s12 + $0xa8] sm:$0xff] %v372_v21 }
  0x25   : > { %375 = vst [vmem:[%s1499_s12 + $0xb0] sm:$0xff] %v374_v22  ;;  %377 = vst [vmem:[%s1499_s12 + $0xb8] sm:$0xff] %v376_v23  ;;  %v378_v24 = vld [vmem:[%s1494_s11 + $0x180] sm:$0xff]  ;;  %v380_v25 = vld [vmem:[%s1494_s11 + $0x190] sm:$0xff] }
  0x26   : > { %v382_v26 = vld [vmem:[%s1494_s11 + $0x1a0] sm:$0xff]  ;;  %379 = vst [vmem:[%s1499_s12 + $0xc0] sm:$0xff] %v378_v24  ;;  %381 = vst [vmem:[%s1499_s12 + $0xc8] sm:$0xff] %v380_v25  ;;  %v384_v27 = vld [vmem:[%s1494_s11 + $0x1b0] sm:$0xff] }
  0x27   : > { %383 = vst [vmem:[%s1499_s12 + $0xd0] sm:$0xff] %v382_v26  ;;  %v386_v28 = vld [vmem:[%s1494_s11 + $0x1c0] sm:$0xff]  ;;  %v388_v29 = vld [vmem:[%s1494_s11 + $0x1d0] sm:$0xff]  ;;  %385 = vst [vmem:[%s1499_s12 + $0xd8] sm:$0xff] %v384_v27 }
  0x28   : > { %387 = vst [vmem:[%s1499_s12 + $0xe0] sm:$0xff] %v386_v28  ;;  %389 = vst [vmem:[%s1499_s12 + $0xe8] sm:$0xff] %v388_v29  ;;  %v390_v30 = vld [vmem:[%s1494_s11 + $0x1e0] sm:$0xff]  ;;  %v392_v31 = vld [vmem:[%s1494_s11 + $0x1f0] sm:$0xff] }
  0x29   : > { %v394_v32 = vld [vmem:[%s1494_s11 + $0x200] sm:$0xff]  ;;  %391 = vst [vmem:[%s1499_s12 + $0xf0] sm:$0xff] %v390_v30  ;;  %393 = vst [vmem:[%s1499_s12 + $0xf8] sm:$0xff] %v392_v31  ;;  %v396_v33 = vld [vmem:[%s1494_s11 + $0x210] sm:$0xff] }
  0x2a   : > { %395 = vst [vmem:[%s1499_s12 + $0x100] sm:$0xff] %v394_v32  ;;  %v398_v34 = vld [vmem:[%s1494_s11 + $0x220] sm:$0xff]  ;;  %v400_v35 = vld [vmem:[%s1494_s11 + $0x230] sm:$0xff]  ;;  %397 = vst [vmem:[%s1499_s12 + $0x108] sm:$0xff] %v396_v33 }
  0x2b   : > { %399 = vst [vmem:[%s1499_s12 + $0x110] sm:$0xff] %v398_v34  ;;  %401 = vst [vmem:[%s1499_s12 + $0x118] sm:$0xff] %v400_v35  ;;  %v402_v36 = vld [vmem:[%s1494_s11 + $0x240] sm:$0xff]  ;;  %v404_v37 = vld [vmem:[%s1494_s11 + $0x250] sm:$0xff] }
  0x2c   : > { %v406_v38 = vld [vmem:[%s1494_s11 + $0x260] sm:$0xff]  ;;  %403 = vst [vmem:[%s1499_s12 + $0x120] sm:$0xff] %v402_v36  ;;  %405 = vst [vmem:[%s1499_s12 + $0x128] sm:$0xff] %v404_v37  ;;  %v408_v39 = vld [vmem:[%s1494_s11 + $0x270] sm:$0xff] }
  0x2d   : > { %407 = vst [vmem:[%s1499_s12 + $0x130] sm:$0xff] %v406_v38  ;;  %v410_v40 = vld [vmem:[%s1494_s11 + $0x280] sm:$0xff]  ;;  %v412_v41 = vld [vmem:[%s1494_s11 + $0x290] sm:$0xff]  ;;  %409 = vst [vmem:[%s1499_s12 + $0x138] sm:$0xff] %v408_v39 }
  0x2e   : > { %411 = vst [vmem:[%s1499_s12 + $0x140] sm:$0xff] %v410_v40  ;;  %413 = vst [vmem:[%s1499_s12 + $0x148] sm:$0xff] %v412_v41  ;;  %v414_v42 = vld [vmem:[%s1494_s11 + $0x2a0] sm:$0xff]  ;;  %v416_v43 = vld [vmem:[%s1494_s11 + $0x2b0] sm:$0xff] }
  0x2f   : > { %v418_v44 = vld [vmem:[%s1494_s11 + $0x2c0] sm:$0xff]  ;;  %415 = vst [vmem:[%s1499_s12 + $0x150] sm:$0xff] %v414_v42  ;;  %417 = vst [vmem:[%s1499_s12 + $0x158] sm:$0xff] %v416_v43  ;;  %v420_v45 = vld [vmem:[%s1494_s11 + $0x2d0] sm:$0xff] }
  0x30   : > { %419 = vst [vmem:[%s1499_s12 + $0x160] sm:$0xff] %v418_v44  ;;  %v422_v46 = vld [vmem:[%s1494_s11 + $0x2e0] sm:$0xff]  ;;  %v424_v47 = vld [vmem:[%s1494_s11 + $0x2f0] sm:$0xff]  ;;  %421 = vst [vmem:[%s1499_s12 + $0x168] sm:$0xff] %v420_v45 }
  0x31   : > { %423 = vst [vmem:[%s1499_s12 + $0x170] sm:$0xff] %v422_v46  ;;  %425 = vst [vmem:[%s1499_s12 + $0x178] sm:$0xff] %v424_v47 }
  0x32 PF: > { %p1153_p7 = scmp.ge.s32.totalorder %s1403_s21, 1  ;;  %p446_p8 = scmp.lt.s32.totalorder %s1403_s21, 13 }
  0x34   : > { %p447_p9 = pnand %p1153_p7, %p446_p8 }
  0x35   : > { %s453_s13 = sand.u32 (!%p447_p9), 1, %s1379_s15   ;;  %s497_s14 = smul.u32 (!%p447_p9), 3, %s1387_s17 }
  0x36   : > { %450 = sbr.rel (%p447_p9) target bundleno = 380 (0x17c), region = 70  ;;  %s1154_s25 = sshll.u32 (!%p447_p9), %s1391_s18, 1 }
  0x37   : > { %s1216_s24 = smul.u32 (!%p447_p9), 384, %s453_s13  ;;  %p500_p10 = scmp.lt.s32.totalorder (!%p447_p9), %s497_s14, 17 }
  0x38   : > { %p509_p11 = scmp.lt.s32.totalorder (!%p447_p9), %s1154_s25, 3  ;;  %p1157_p12 = scmp.ne.s32.totalorder (!%p447_p9), %s1387_s17, 0 }
  0x39   : > { %s1619_s11 = scalar_lea.vmem (!%p447_p9), [#allocation3], %s1216_s24 }
  0x3d   : > { %s1741_s14 = smov (!%p500_p10, %s497_s14), 17  ;;  %s1743_s25 = smov (!%p509_p11, %s1154_s25), 3 }
  0x3e   : > { %s504_s29 = scalar_lea.vmem %s1723_s0, %s1741_s14  ;;  %s511_s15 = scalar_lea.vmem %s1725_s2, %s1743_s25  ;;  %v1405_v48 = vmov (!%p1157_p12), 0.0  }
  0x3f   : > { %s516_s7 = scalar_lea.vmem %s1726_s3, %s1743_s25  ;;  %s525_s10 = scalar_lea.vmem %s1727_s4, %s1743_s25  ;;  %532 = vst [vmem:[#allocation2] sm:$0xf] (!%p1157_p12), %v1405_v48 }
  0x40   : > { %531 = sbr.rel (%p1157_p12) target bundleno = 71 (0x47), region = 78 }
  0x47 PF: > { %v1277_v49 = vld [vmem:[%s1619_s11 + $0x4] ss:$8 sps:$4 sm:$0xff]   ;;  %v1279_v50 = vld [vmem:[%s1619_s11] ss:$8 sps:$4 sm:$0xff]   ;;  %v1406_v51 = vmov 0   ;;  %v595_v12 = vlaneseq  ;;  %p1207_p13 = scmp.ne.s32.totalorder %s1387_s17, 5 }
  0x48   : > { %923 = vmatprep.mubr.bf16.mxu0 %v1406_v51  ;;  %850 = vmatprep.subr.bf16.mxu1 %v1277_v49  ;;  %v1280_v52 = vld [vmem:[%s1619_s11 + $0x14] ss:$8 sps:$4 sm:$0xff]   ;;  %v1282_v53 = vld [vmem:[%s1619_s11 + $0x10] ss:$8 sps:$4 sm:$0xff]   ;;  %v1283_v54 = vld [vmem:[%s1619_s11 + $0x24] ss:$8 sps:$4 sm:$0xff]  }
  0x49   : > { %851 = vmatpush1.bf16.msra.mxu1 %v1279_v50  ;;  %v1285_v55 = vld [vmem:[%s1619_s11 + $0x20] ss:$8 sps:$4 sm:$0xff]   ;;  %v1286_v56 = vld [vmem:[%s1619_s11 + $0x34] ss:$8 sps:$4 sm:$0xff]   ;;  %v1288_v57 = vld [vmem:[%s1619_s11 + $0x30] ss:$8 sps:$4 sm:$0xff]  }
  0x4a   : > { %852 = vmatprep.subr.bf16.mxu1 %v1280_v52  ;;  %v1301_v58 = vld [vmem:[%s1619_s11 + $0x104] ss:$8 sps:$4 sm:$0xff]   ;;  %v1303_v59 = vld [vmem:[%s1619_s11 + $0x100] ss:$8 sps:$4 sm:$0xff]   ;;  %v1307_v61 = vld [vmem:[%s1619_s11 + $0x114] ss:$8 sps:$4 sm:$0xff]  }
  0x4b   : > { %v1289_v60 = vld [vmem:[%s1619_s11 + $0x44] ss:$8 sps:$4 sm:$0xff]   ;;  %891 = vmatprep.subr.bf16.mxu0 %v1301_v58  ;;  %v1309_v62 = vld [vmem:[%s1619_s11 + $0x110] ss:$8 sps:$4 sm:$0xff]   ;;  %v1291_v63 = vld [vmem:[%s1619_s11 + $0x40] ss:$8 sps:$4 sm:$0xff]  }
  0x4c   : > { %892 = vmatpush1.bf16.msra.mxu0 %v1303_v59  ;;  %v1292_v0 = vld [vmem:[%s1619_s11 + $0x54] ss:$8 sps:$4 sm:$0xff]   ;;  %v1313_v1 = vld [vmem:[%s1619_s11 + $0x124] ss:$8 sps:$4 sm:$0xff]   ;;  %v1315_v2 = vld [vmem:[%s1619_s11 + $0x120] ss:$8 sps:$4 sm:$0xff]  }
  0x4d   : > { %853 = vmatpush1.bf16.msra.mxu1 %v1282_v53  ;;  %893 = vmatprep.subr.bf16.mxu0 %v1307_v61  ;;  %v1294_v3 = vld [vmem:[%s1619_s11 + $0x50] ss:$8 sps:$4 sm:$0xff]   ;;  %v1319_v4 = vld [vmem:[%s1619_s11 + $0x134] ss:$8 sps:$4 sm:$0xff]   ;;  %v1295_v5 = vld [vmem:[%s1619_s11 + $0x64] ss:$8 sps:$4 sm:$0xff]  }
  0x4e   : > { %854 = vmatprep.subr.bf16.mxu1 %v1283_v54  ;;  %v1321_v6 = vld [vmem:[%s1619_s11 + $0x130] ss:$8 sps:$4 sm:$0xff]   ;;  %v1297_v7 = vld [vmem:[%s1619_s11 + $0x60] ss:$8 sps:$4 sm:$0xff]   ;;  %v1325_v8 = vld [vmem:[%s1619_s11 + $0x144] ss:$8 sps:$4 sm:$0xff]  }
  0x4f   : > { %v1298_v9 = vld [vmem:[%s1619_s11 + $0x74] ss:$8 sps:$4 sm:$0xff]   ;;  %v1407_v10 = vmov 1966171168   ;;  %v1327_v13 = vld [vmem:[%s1619_s11 + $0x140] ss:$8 sps:$4 sm:$0xff]  }
  0x50   : > { %894 = vmatpush1.bf16.msra.mxu0 %v1309_v62  ;;  %v593_v11 = vunpack.c.l.s4 %v1407_v10  ;;  %v1300_v14 = vld [vmem:[%s1619_s11 + $0x70] ss:$8 sps:$4 sm:$0xff]   ;;  %v1331_v15 = vld [vmem:[%s1619_s11 + $0x154] ss:$8 sps:$4 sm:$0xff]   ;;  %v1304_v16 = vld [vmem:[%s1619_s11 + $0x84] ss:$8 sps:$4 sm:$0xff]  }
  0x51   : > { %855 = vmatpush1.bf16.msra.mxu1 %v1285_v55  ;;  %895 = vmatprep.subr.bf16.mxu0 %v1313_v1  ;;  %v1650_v18 = vshrl.u32 %v595_v12, 7  ;;  %v1333_v19 = vld [vmem:[%s1619_s11 + $0x150] ss:$8 sps:$4 sm:$0xff]   ;;  %v1306_v20 = vld [vmem:[%s1619_s11 + $0x80] ss:$8 sps:$4 sm:$0xff]  }
  0x52   : > { %856 = vmatprep.subr.bf16.mxu1 %v1286_v56  ;;  %v594_v17 = vunpack.c.0.s8 %v593_v11  ;;  %v1337_v21 = vld [vmem:[%s1619_s11 + $0x164] ss:$8 sps:$4 sm:$0xff]   ;;  %v1310_v22 = vld [vmem:[%s1619_s11 + $0x94] ss:$8 sps:$4 sm:$0xff]   ;;  %v1339_v26 = vld [vmem:[%s1619_s11 + $0x160] ss:$8 sps:$4 sm:$0xff]  }
  0x53   : > { %v1158_v23 = vld.sshfl [vmem:[%s504_s29] sm:$0x13 pattern:$0x75316420]  ;;  %v1312_v27 = vld [vmem:[%s1619_s11 + $0x90] ss:$8 sps:$4 sm:$0xff]  }
  0x54   : > { %896 = vmatpush1.bf16.msra.mxu0 %v1315_v2  ;;  %v1662_v24 = vsub.s32 %v594_v17, %v1650_v18  ;;  %v591_v25 = vcombine.high %v1158_v23, %v1158_v23  ;;  %v1343_v28 = vld [vmem:[%s1619_s11 + $0x174] ss:$8 sps:$4 sm:$0xff]   ;;  %v1316_v30 = vld [vmem:[%s1619_s11 + $0xa4] ss:$8 sps:$4 sm:$0xff]   ;;  %v1345_v32 = vld [vmem:[%s1619_s11 + $0x170] ss:$8 sps:$4 sm:$0xff]  }
  0x55   : > { %857 = vmatpush1.bf16.msra.mxu1 %v1288_v57  ;;  %897 = vmatprep.subr.bf16.mxu0 %v1319_v4  ;;  %v1318_v33 = vld [vmem:[%s1619_s11 + $0xa0] ss:$8 sps:$4 sm:$0xff]   ;;  %v1322_v34 = vld [vmem:[%s1619_s11 + $0xb4] ss:$8 sps:$4 sm:$0xff]   ;;  %v1324_v36 = vld [vmem:[%s1619_s11 + $0xb0] ss:$8 sps:$4 sm:$0xff]  }
  0x56   : > { %858 = vmatprep.subr.bf16.mxu1 %v1289_v60  ;;  %v605_v29 = vrot.slane %v591_v25, %v1662_v24  ;;  %v598_v31 = vrot.slane %v1158_v23, %v1662_v24  ;;  %v1328_v37 = vld [vmem:[%s1619_s11 + $0xc4] ss:$8 sps:$4 sm:$0xff]   ;;  %v1330_v38 = vld [vmem:[%s1619_s11 + $0xc0] ss:$8 sps:$4 sm:$0xff]   ;;  %v1334_v39 = vld [vmem:[%s1619_s11 + $0xd4] ss:$8 sps:$4 sm:$0xff]  }
  0x57   : > { %v1336_v40 = vld [vmem:[%s1619_s11 + $0xd0] ss:$8 sps:$4 sm:$0xff]   ;;  %v1340_v41 = vld [vmem:[%s1619_s11 + $0xe4] ss:$8 sps:$4 sm:$0xff]   ;;  %v1342_v42 = vld [vmem:[%s1619_s11 + $0xe0] ss:$8 sps:$4 sm:$0xff]  }
  0x58   : > { %898 = vmatpush1.bf16.msra.mxu0 %v1321_v6  ;;  %882 = vmatprep.mubr.bf16.mxu1 %v605_v29  ;;  %v606_v35 = vcombine.high %v598_v31, %v598_v31  ;;  %v1346_v43 = vld [vmem:[%s1619_s11 + $0xf4] ss:$8 sps:$4 sm:$0xff]   ;;  %v1348_v44 = vld [vmem:[%s1619_s11 + $0xf0] ss:$8 sps:$4 sm:$0xff]   ;;  %v1408_v49 = vmov 1983009808  }
  0x59   : > { %859 = vmatpush1.bf16.msra.mxu1 %v1291_v63  ;;  %899 = vmatprep.subr.bf16.mxu0 %v1325_v8  ;;  %v936_v50 = vunpack.c.l.s4 %v1408_v49  ;;  %v533_v60 = vld [vmem:[#allocation2] sm:$0xf]  ;;  %v958_v1 = vsub.s32 (!%p1207_p13), 1, %v1650_v18 }
  0x5a   : > { %860 = vmatprep.subr.bf16.mxu1 %v1292_v0  ;;  %v950_v63 = vld [vmem:[%s511_s15] sm:$0x3] (!%p1207_p13)  ;;  %v954_v0 = vsub.s32 (!%p1207_p13), 0, %v1650_v18 }
  0x5b   : > { %v937_v51 = vunpack.c.0.s8 %v936_v50  ;;  %v970_v2 = vld [vmem:[%s516_s7] sm:$0x3] (!%p1207_p13)  ;;  %v959_v4 = vrot.slane (!%p1207_p13), %v950_v63, %v958_v1 }
  0x5c   : > { %900 = vmatpush1.bf16.msra.mxu0 %v1327_v13  ;;  %v979_v6 = vrot.slane (!%p1207_p13), %v970_v2, %v958_v1 }
  0x5d   : > { %861 = vmatpush1.bf16.msra.mxu1 %v1294_v3  ;;  %901 = vmatprep.subr.bf16.mxu0 %v1331_v15  ;;  %v940_v56 = vsub.s32 %v937_v51, %v1650_v18  ;;  %v955_v3 = vrot.slane (!%p1207_p13), %v950_v63, %v954_v0 }
  0x5e   : > { %862 = vmatprep.subr.bf16.mxu1 %v1295_v5  ;;  %v975_v5 = vrot.slane (!%p1207_p13), %v970_v2, %v954_v0 }
  0x60   : > { %902 = vmatpush1.bf16.msra.mxu0 %v1333_v19  ;;  %v980_v8 = vcombine.low (!%p1207_p13), %v975_v5, %v979_v6 }
  0x61   : > { %863 = vmatpush1.bf16.msra.mxu1 %v1297_v7  ;;  %903 = vmatprep.subr.bf16.mxu0 %v1337_v21  ;;  %v960_v7 = vcombine.low (!%p1207_p13), %v955_v3, %v959_v4 }
  0x62   : > { %864 = vmatprep.subr.bf16.mxu1 %v1298_v9  ;;  %v987_v11 = vrot.slane (!%p1207_p13), %v980_v8, %v940_v56 }
  0x63   : > { %v967_v10 = vrot.slane (!%p1207_p13), %v960_v7, %v940_v56 }
  0x64   : > { %904 = vmatpush1.bf16.msra.mxu0 %v1339_v26 }
  0x65   : > { %865 = vmatpush1.bf16.msra.mxu1 %v1300_v14  ;;  %905 = vmatprep.subr.bf16.mxu0 %v1343_v28 }
  0x66   : > { %866 = vmatprep.subr.bf16.mxu1 %v1304_v16 }
  0x68   : > { %906 = vmatpush1.bf16.msra.mxu0 %v1345_v32 }
  0x69   : > { %867 = vmatpush1.bf16.msra.mxu1 %v1306_v20 }
  0x6a   : > { %868 = vmatprep.subr.bf16.mxu1 %v1310_v22 }
  0x6b   : > { %924 = vmatmul.mubr.bf16.vlgmr.msra.gmra.mrb[0].mxu0 %v606_v35 }
  0x6d   : > { %869 = vmatpush1.bf16.msra.mxu1 %v1312_v27 }
  0x6e   : > { %870 = vmatprep.subr.bf16.mxu1 %v1316_v30 }
  0x71   : > { %871 = vmatpush1.bf16.msra.mxu1 %v1318_v33 }
  0x72   : > { %872 = vmatprep.subr.bf16.mxu1 %v1322_v34 }
  0x75   : > { %873 = vmatpush1.bf16.msra.mxu1 %v1324_v36 }
  0x76   : > { %874 = vmatprep.subr.bf16.mxu1 %v1328_v37 }
  0x79   : > { %875 = vmatpush1.bf16.msra.mxu1 %v1330_v38 }
  0x7a   : > { %876 = vmatprep.subr.bf16.mxu1 %v1334_v39 }
  0x7d   : > { %877 = vmatpush1.bf16.msra.mxu1 %v1336_v40 }
  0x7e   : > { %878 = vmatprep.subr.bf16.mxu1 %v1340_v41 }
  0x81   : > { %879 = vmatpush1.bf16.msra.mxu1 %v1342_v42 }
  0x82   : > { %880 = vmatprep.subr.bf16.mxu1 %v1346_v43 }
  0x85   : > { %881 = vmatpush1.bf16.msra.mxu1 %v1348_v44 }
  0x88   : > { %883 = vmatmul.mubr.bf16.vlgmr.msra.gmra.mrb[0].mxu1 %v598_v31 }
 0x13e   : > { %v925_v45 = vpop.f32.mrb[0].mxu0 }
 0x13f   : > { %v927_v46 = vpop.f32.mrb[1].mxu0 }
 0x140   : > { %v929_v47 = vpop.f32.mrb[2].mxu0 }
 0x141   : > { %v930_v48 = vpop.f32.mrb[3].mxu0 }
 0x15b   : > { %v884_v52 = vpop.f32.mrb[0].mxu1 }
 0x15c   : > { %v926_v53 = vadd.f32 %v925_v45, %v884_v52  ;;  %v886_v54 = vpop.f32.mrb[1].mxu1 }
 0x15d   : > { %v928_v55 = vadd.f32 %v927_v46, %v886_v54  ;;  %v888_v57 = vpop.f32.mrb[2].mxu1 }
 0x15e   : > { %v889_v58 = vpop.f32.mrb[3].mxu1 }
 0x15f   : > { %v934_v59 = vcombine.low %v926_v53, %v928_v55  ;;  %948 = sbr.rel (%p1207_p13) target bundleno = 380 (0x17c), region = 82 }
 0x161   : > { %v941_v61 = vrot.slane %v934_v59, %v940_v56 }
 0x163   : > { %v943_v62 = vadd.f32 %v941_v61, %v533_v60 }
 0x165   : > { %944 = vst [vmem:[#allocation2] sm:$0xf] %v943_v62 }
 0x16c   : > { %v949_v9 = vld [vmem:[#allocation2] sm:$0xf] }
 0x16d   : > { %v969_v12 = vmul.f32 %v967_v10, %v949_v9 }
 0x16f   : > { %v989_v13 = vadd.f32 %v987_v11, %v969_v12 }
 0x171   : > { %v990_v14 = vmax.f32 %v989_v13, 0.0 }
 0x173   : > { %v998_v15 = vrot.slane %v990_v14, %v940_v56 }
 0x175   : > { %v999_v16 = vcombine.high %v998_v15, %v998_v15 }
 0x177   : > { %v1208_v17 = vpack.c.bf16 %v999_v16, %v998_v15 }
 0x179   : > { %v1013_v18 = vrot.slane %v1208_v17, %v1662_v24 }
 0x17b   : > { %1209 = vst.sshfl [vmem:[%s525_s10] sm:$0x5 pattern:$0x73625140] %v1013_v18 }
 0x17c PF: > { %s14_s21 = sadd.s32 1, %s1403_s21   ;;  %s1728_s15 = smov %s1383_s16 }
 0x17d   : > { %p11_p0 = scmp.ge.s32.totalorder %s14_s21, 14   ;;  %s1729_s16 = smov %s1485_s28 }
 0x17e   : > { %s1730_s17 = smov %s1395_s19  ;;  %s1731_s18 = smov %s1399_s20 }
 0x17f   : > { %s1732_s19 = smov %s1735_s22  ;;  %s1733_s20 = smov %s1739_s23 }
 0x180   :  { %13 = sbr.rel (!%p11_p0) target bundleno = 4 (0x4), region = 126 }

// kernel: pothole_detector_forward.38
= control target key start
LH: loop header
LB: loop body
LE: loop exit
PB: predicated region body
PF: predicated region fallthrough
CT: control target
= control target key end

     0   :  { %s1150_s15 = smov 0   ;;  %s1152_s16 = smov 0   ;;  %s1347_s0 = inlined_call_operand.vmem [shape: bf16[2,256], index: 0, kind: input, shape index: {}]   ;;  %s1348_s1 = inlined_call_operand.vmem [shape: bf16[256,512], index: 1, kind: input, shape index: {}]   ;;  %s1349_s2 = inlined_call_operand.vmem [shape: f32[1,512], index: 2, kind: input, shape index: {}]   ;;  %s1350_s3 = inlined_call_operand.vmem [shape: f32[1,512], index: 3, kind: input, shape index: {}]   ;;  %s1351_s4 = inlined_call_operand.vmem [shape: bf16[2,512], index: 4, kind: output, shape index: {}]  }
   0x1   :  { %s1154_s17 = smov 0   ;;  %s1156_s18 = smov 0  }
   0x2   :  { %s1158_s19 = smov 0  }
   0x3 LB: > { %s29_s20 = sadd.s32 1, %s1116_s18  ;;  %p77_p1 = scmp.ne.s32.totalorder %s1108_s16, %s1104_s15  ;;  %s1120_s19 = sphi %s1158_s19, %s14_s19   ;;  %s1116_s18 = sphi %s1156_s18, %s1355_s18   ;;  %s1112_s17 = sphi %s1154_s17, %s1354_s17   ;;  %s1108_s16 = sphi %s1152_s16, %s1353_s16   ;;  %s1104_s15 = sphi %s1150_s15, %s1352_s15  }
   0x4   : > { %p31_p0 = scmp.ge.s32.totalorder %s29_s20, 2  ;;  %p78_p2 = scmp.eq.s32.totalorder %s1120_s19, 0 }
   0x5   : > { %s70_s22 = sadd.s32 1, %s1108_s16  ;;  %p944_p5 = scmp.ge.s32.totalorder %s1120_s19, 2 }
   0x6   : > { %s1357_s20 = smov (%p31_p0, %s29_s20), 0  ;;  %p79_p3 = por %p78_p2, %p77_p1 }
   0x7   : > { %s66_s21 = ssub.s32 %s1116_s18, %s1357_s20  ;;  %195 = sbr.rel (%p944_p5) target bundleno = 34 (0x22), region = 20 }
   0x8   : > { %p68_p4 = scmp.eq.s32.totalorder %s66_s21, 0 }
   0xa   : > { %s1185_s23 = scalar_select %p68_p4, %s1108_s16, %s70_s22  }
   0xe   : > { %198 = sbr.rel (!%p79_p3) target bundleno = 34 (0x22), region = 24  ;;  %s200_s24 = sand.u32 (%p79_p3), 1, %s1108_s16  }
   0xf   : > { %s990_s25 = sshll.u32 (%p79_p3), %s1116_s18, 3  ;;  %s945_s26 = sshll.u32 (%p79_p3), %s200_s24, 8 }
  0x10   : > { %s1193_s29 = scalar_lea.vmem (%p79_p3), %s1348_s1, %s990_s25  ;;  %s1198_s30 = scalar_lea.vmem (%p79_p3), [#allocation3], %s945_s26 }
  0x11   : > { %v298_v0 = vld [vmem:[%s1193_s29] sm:$0xff] (%p79_p3)  ;;  %v300_v1 = vld [vmem:[%s1193_s29 + $0x10] sm:$0xff] (%p79_p3) }
  0x12   : > { %v302_v2 = vld [vmem:[%s1193_s29 + $0x20] sm:$0xff] (%p79_p3)  ;;  %299 = vst [vmem:[%s1198_s30] sm:$0xff] (%p79_p3), %v298_v0  ;;  %301 = vst [vmem:[%s1198_s30 + $0x8] sm:$0xff] (%p79_p3), %v300_v1  ;;  %v304_v3 = vld [vmem:[%s1193_s29 + $0x30] sm:$0xff] (%p79_p3) }
  0x13   : > { %303 = vst [vmem:[%s1198_s30 + $0x10] sm:$0xff] (%p79_p3), %v302_v2  ;;  %v306_v4 = vld [vmem:[%s1193_s29 + $0x40] sm:$0xff] (%p79_p3)  ;;  %v308_v5 = vld [vmem:[%s1193_s29 + $0x50] sm:$0xff] (%p79_p3)  ;;  %305 = vst [vmem:[%s1198_s30 + $0x18] sm:$0xff] (%p79_p3), %v304_v3 }
  0x14   : > { %307 = vst [vmem:[%s1198_s30 + $0x20] sm:$0xff] (%p79_p3), %v306_v4  ;;  %309 = vst [vmem:[%s1198_s30 + $0x28] sm:$0xff] (%p79_p3), %v308_v5  ;;  %v310_v6 = vld [vmem:[%s1193_s29 + $0x60] sm:$0xff] (%p79_p3)  ;;  %v312_v7 = vld [vmem:[%s1193_s29 + $0x70] sm:$0xff] (%p79_p3) }
  0x15   : > { %v314_v8 = vld [vmem:[%s1193_s29 + $0x80] sm:$0xff]  ;;  %311 = vst [vmem:[%s1198_s30 + $0x30] sm:$0xff] %v310_v6  ;;  %313 = vst [vmem:[%s1198_s30 + $0x38] sm:$0xff] %v312_v7  ;;  %v316_v9 = vld [vmem:[%s1193_s29 + $0x90] sm:$0xff] }
  0x16   : > { %315 = vst [vmem:[%s1198_s30 + $0x40] sm:$0xff] %v314_v8  ;;  %v318_v10 = vld [vmem:[%s1193_s29 + $0xa0] sm:$0xff]  ;;  %v320_v11 = vld [vmem:[%s1193_s29 + $0xb0] sm:$0xff]  ;;  %317 = vst [vmem:[%s1198_s30 + $0x48] sm:$0xff] %v316_v9 }
  0x17   : > { %319 = vst [vmem:[%s1198_s30 + $0x50] sm:$0xff] %v318_v10  ;;  %321 = vst [vmem:[%s1198_s30 + $0x58] sm:$0xff] %v320_v11  ;;  %v322_v12 = vld [vmem:[%s1193_s29 + $0xc0] sm:$0xff]  ;;  %v324_v13 = vld [vmem:[%s1193_s29 + $0xd0] sm:$0xff] }
  0x18   : > { %v326_v14 = vld [vmem:[%s1193_s29 + $0xe0] sm:$0xff]  ;;  %323 = vst [vmem:[%s1198_s30 + $0x60] sm:$0xff] %v322_v12  ;;  %325 = vst [vmem:[%s1198_s30 + $0x68] sm:$0xff] %v324_v13  ;;  %v328_v15 = vld [vmem:[%s1193_s29 + $0xf0] sm:$0xff] }
  0x19   : > { %327 = vst [vmem:[%s1198_s30 + $0x70] sm:$0xff] %v326_v14  ;;  %v330_v16 = vld [vmem:[%s1193_s29 + $0x100] sm:$0xff]  ;;  %v332_v17 = vld [vmem:[%s1193_s29 + $0x110] sm:$0xff]  ;;  %329 = vst [vmem:[%s1198_s30 + $0x78] sm:$0xff] %v328_v15 }
  0x1a   : > { %331 = vst [vmem:[%s1198_s30 + $0x80] sm:$0xff] %v330_v16  ;;  %333 = vst [vmem:[%s1198_s30 + $0x88] sm:$0xff] %v332_v17  ;;  %v334_v18 = vld [vmem:[%s1193_s29 + $0x120] sm:$0xff]  ;;  %v336_v19 = vld [vmem:[%s1193_s29 + $0x130] sm:$0xff] }
  0x1b   : > { %v338_v20 = vld [vmem:[%s1193_s29 + $0x140] sm:$0xff]  ;;  %335 = vst [vmem:[%s1198_s30 + $0x90] sm:$0xff] %v334_v18  ;;  %337 = vst [vmem:[%s1198_s30 + $0x98] sm:$0xff] %v336_v19  ;;  %v340_v21 = vld [vmem:[%s1193_s29 + $0x150] sm:$0xff] }
  0x1c   : > { %339 = vst [vmem:[%s1198_s30 + $0xa0] sm:$0xff] %v338_v20  ;;  %v342_v22 = vld [vmem:[%s1193_s29 + $0x160] sm:$0xff]  ;;  %v344_v23 = vld [vmem:[%s1193_s29 + $0x170] sm:$0xff]  ;;  %341 = vst [vmem:[%s1198_s30 + $0xa8] sm:$0xff] %v340_v21 }
  0x1d   : > { %343 = vst [vmem:[%s1198_s30 + $0xb0] sm:$0xff] %v342_v22  ;;  %345 = vst [vmem:[%s1198_s30 + $0xb8] sm:$0xff] %v344_v23  ;;  %v346_v24 = vld [vmem:[%s1193_s29 + $0x180] sm:$0xff]  ;;  %v348_v25 = vld [vmem:[%s1193_s29 + $0x190] sm:$0xff] }
  0x1e   : > { %v350_v26 = vld [vmem:[%s1193_s29 + $0x1a0] sm:$0xff]  ;;  %347 = vst [vmem:[%s1198_s30 + $0xc0] sm:$0xff] %v346_v24  ;;  %349 = vst [vmem:[%s1198_s30 + $0xc8] sm:$0xff] %v348_v25  ;;  %v352_v27 = vld [vmem:[%s1193_s29 + $0x1b0] sm:$0xff] }
  0x1f   : > { %351 = vst [vmem:[%s1198_s30 + $0xd0] sm:$0xff] %v350_v26  ;;  %v354_v28 = vld [vmem:[%s1193_s29 + $0x1c0] sm:$0xff]  ;;  %v356_v29 = vld [vmem:[%s1193_s29 + $0x1d0] sm:$0xff]  ;;  %353 = vst [vmem:[%s1198_s30 + $0xd8] sm:$0xff] %v352_v27 }
  0x20   : > { %355 = vst [vmem:[%s1198_s30 + $0xe0] sm:$0xff] %v354_v28  ;;  %357 = vst [vmem:[%s1198_s30 + $0xe8] sm:$0xff] %v356_v29  ;;  %v358_v30 = vld [vmem:[%s1193_s29 + $0x1e0] sm:$0xff]  ;;  %v360_v31 = vld [vmem:[%s1193_s29 + $0x1f0] sm:$0xff] }
  0x21   : > { %359 = vst [vmem:[%s1198_s30 + $0xf0] sm:$0xff] %v358_v30  ;;  %361 = vst [vmem:[%s1198_s30 + $0xf8] sm:$0xff] %v360_v31 }
  0x22 PF: > { %p948_p6 = scmp.ge.s32.totalorder %s1120_s19, 1  ;;  %p382_p7 = scmp.lt.s32.totalorder %s1120_s19, 3 }
  0x24   : > { %p383_p8 = pnand %p948_p6, %p382_p7 }
  0x25   : > { %s389_s5 = sand.u32 (!%p383_p8), 1, %s1104_s15   ;;  %v1267_v32 = vld.sshfl [vmem:[%s1347_s0] sm:$0x11 pattern:$0x75316420] (!%p383_p8)  ;;  %v514_v33 = vlaneseq (!%p383_p8)  ;;  %v1123_v10 = vmov (!%p383_p8), 0.0  }
  0x26   : > { %386 = sbr.rel (%p383_p8) target bundleno = 345 (0x159), region = 70  ;;  %s949_s8 = sshll.u32 (!%p383_p8), %s389_s5, 8  ;;  %v1122_v34 = vmov (!%p383_p8), 1966171168   ;;  %v510_v39 = vcombine.high (!%p383_p8), %v1267_v32, %v1267_v32  ;;  %467 = vst [vmem:[#allocation2] sm:$0xf] (!%p383_p8), %v1123_v10 }
  0x27   : > { %v512_v35 = vunpack.c.l.s4 (!%p383_p8), %v1122_v34  ;;  %v1269_v36 = vshrl.u32 (!%p383_p8), %v514_v33, 7  ;;  %s1271_s9 = scalar_lea.vmem (!%p383_p8), [#allocation3], %s949_s8  ;;  %s950_s10 = sshll.u32 (!%p383_p8), %s1112_s17, 1  ;;  %v1124_v11 = vmov (!%p383_p8), 1983009808  }
  0x28   : > { %v1034_v37 = vld [vmem:[%s1271_s9 + $0x4] ss:$8 sps:$4 sm:$0xff] (!%p383_p8)   ;;  %v1036_v38 = vld [vmem:[%s1271_s9] ss:$8 sps:$4 sm:$0xff] (!%p383_p8)   ;;  %v1037_v41 = vld [vmem:[%s1271_s9 + $0x14] ss:$8 sps:$4 sm:$0xff] (!%p383_p8)   ;;  %v732_v12 = vunpack.c.l.s4 (!%p383_p8), %v1124_v11 }
  0x29   : > { %v513_v40 = vunpack.c.0.s8 (!%p383_p8), %v512_v35  ;;  %687 = vmatprep.subr.bf16.mxu0 (!%p383_p8), %v1034_v37  ;;  %v1039_v42 = vld [vmem:[%s1271_s9 + $0x10] ss:$8 sps:$4 sm:$0xff] (!%p383_p8)   ;;  %v1040_v44 = vld [vmem:[%s1271_s9 + $0x24] ss:$8 sps:$4 sm:$0xff] (!%p383_p8)   ;;  %v1042_v46 = vld [vmem:[%s1271_s9 + $0x20] ss:$8 sps:$4 sm:$0xff] (!%p383_p8)  }
  0x2a   : > { %688 = vmatpush1.bf16.msra.mxu0 (!%p383_p8), %v1036_v38  ;;  %v1043_v47 = vld [vmem:[%s1271_s9 + $0x34] ss:$8 sps:$4 sm:$0xff] (!%p383_p8)   ;;  %v1045_v48 = vld [vmem:[%s1271_s9 + $0x30] ss:$8 sps:$4 sm:$0xff] (!%p383_p8)   ;;  %v1046_v49 = vld [vmem:[%s1271_s9 + $0x44] ss:$8 sps:$4 sm:$0xff] (!%p383_p8)   ;;  %v733_v13 = vunpack.c.0.s8 (!%p383_p8), %v732_v12 }
  0x2b   : > { %v1280_v43 = vsub.s32 (!%p383_p8), %v513_v40, %v1269_v36  ;;  %689 = vmatprep.subr.bf16.mxu0 (!%p383_p8), %v1037_v41  ;;  %v1048_v50 = vld [vmem:[%s1271_s9 + $0x40] ss:$8 sps:$4 sm:$0xff] (!%p383_p8)   ;;  %v1049_v51 = vld [vmem:[%s1271_s9 + $0x54] ss:$8 sps:$4 sm:$0xff] (!%p383_p8)   ;;  %v1051_v52 = vld [vmem:[%s1271_s9 + $0x50] ss:$8 sps:$4 sm:$0xff] (!%p383_p8)  }
  0x2c   : > { %v1052_v53 = vld [vmem:[%s1271_s9 + $0x64] ss:$8 sps:$4 sm:$0xff] (!%p383_p8)   ;;  %v1054_v54 = vld [vmem:[%s1271_s9 + $0x60] ss:$8 sps:$4 sm:$0xff] (!%p383_p8)   ;;  %v1055_v55 = vld [vmem:[%s1271_s9 + $0x74] ss:$8 sps:$4 sm:$0xff] (!%p383_p8)   ;;  %v736_v17 = vsub.s32 (!%p383_p8), %v733_v13, %v1269_v36 }
  0x2d   : > { %v524_v45 = vrot.slane %v510_v39, %v1280_v43  ;;  %v1057_v56 = vld [vmem:[%s1271_s9 + $0x70] ss:$8 sps:$4 sm:$0xff]   ;;  %v1058_v57 = vld [vmem:[%s1271_s9 + $0x84] ss:$8 sps:$4 sm:$0xff]   ;;  %v1060_v58 = vld [vmem:[%s1271_s9 + $0x80] ss:$8 sps:$4 sm:$0xff]   ;;  %v517_v9 = vrot.slane %v1267_v32, %v1280_v43 }
  0x2e   : > { %690 = vmatpush1.bf16.msra.mxu0 %v1039_v42  ;;  %v1061_v59 = vld [vmem:[%s1271_s9 + $0x94] ss:$8 sps:$4 sm:$0xff]   ;;  %v1063_v60 = vld [vmem:[%s1271_s9 + $0x90] ss:$8 sps:$4 sm:$0xff]   ;;  %v1064_v61 = vld [vmem:[%s1271_s9 + $0xa4] ss:$8 sps:$4 sm:$0xff]  }
  0x2f   : > { %719 = vmatprep.mubr.bf16.mxu0 %v524_v45  ;;  %691 = vmatprep.subr.bf16.mxu0 %v1040_v44  ;;  %v1066_v62 = vld [vmem:[%s1271_s9 + $0xa0] ss:$8 sps:$4 sm:$0xff]   ;;  %v1067_v63 = vld [vmem:[%s1271_s9 + $0xb4] ss:$8 sps:$4 sm:$0xff]   ;;  %v1069_v0 = vld [vmem:[%s1271_s9 + $0xb0] ss:$8 sps:$4 sm:$0xff]  }
  0x30   : > { %v1070_v1 = vld [vmem:[%s1271_s9 + $0xc4] ss:$8 sps:$4 sm:$0xff]   ;;  %v1072_v2 = vld [vmem:[%s1271_s9 + $0xc0] ss:$8 sps:$4 sm:$0xff]   ;;  %v1073_v3 = vld [vmem:[%s1271_s9 + $0xd4] ss:$8 sps:$4 sm:$0xff]  }
  0x31   : > { %v1075_v4 = vld [vmem:[%s1271_s9 + $0xd0] ss:$8 sps:$4 sm:$0xff]   ;;  %v1076_v5 = vld [vmem:[%s1271_s9 + $0xe4] ss:$8 sps:$4 sm:$0xff]   ;;  %v1078_v6 = vld [vmem:[%s1271_s9 + $0xe0] ss:$8 sps:$4 sm:$0xff]  }
  0x32   : > { %692 = vmatpush1.bf16.msra.mxu0 %v1042_v46  ;;  %v1079_v7 = vld [vmem:[%s1271_s9 + $0xf4] ss:$8 sps:$4 sm:$0xff]   ;;  %v1081_v8 = vld [vmem:[%s1271_s9 + $0xf0] ss:$8 sps:$4 sm:$0xff]   ;;  %p445_p9 = scmp.lt.s32.totalorder %s950_s10, 3  ;;  %v749_v14 = vsub.s32 0, %v1269_v36 }
  0x33   : > { %693 = vmatprep.subr.bf16.mxu0 %v1043_v47  ;;  %v753_v15 = vsub.s32 1, %v1269_v36  ;;  %v468_v22 = vld [vmem:[#allocation2] sm:$0xf] }
  0x34   : > { %s1359_s10 = smov (!%p445_p9, %s950_s10), 3 }
  0x35   : > { %s447_s13 = scalar_lea.vmem %s1349_s2, %s1359_s10  ;;  %s452_s17 = scalar_lea.vmem %s1350_s3, %s1359_s10 }
  0x36   : > { %694 = vmatpush1.bf16.msra.mxu0 %v1045_v48  ;;  %v745_v19 = vld [vmem:[%s447_s13] sm:$0x3]  ;;  %s461_s24 = scalar_lea.vmem %s1351_s4, %s1359_s10 }
  0x37   : > { %695 = vmatprep.subr.bf16.mxu0 %v1046_v49  ;;  %v765_v23 = vld [vmem:[%s452_s17] sm:$0x3]  ;;  %v750_v26 = vrot.slane %v745_v19, %v749_v14  ;;  %v754_v27 = vrot.slane %v745_v19, %v753_v15 }
  0x38   : > { %v770_v29 = vrot.slane %v765_v23, %v749_v14  ;;  %v774_v30 = vrot.slane %v765_v23, %v753_v15 }
  0x39   : > { %v755_v31 = vcombine.low %v750_v26, %v754_v27 }
  0x3a   : > { %696 = vmatpush1.bf16.msra.mxu0 %v1048_v50  ;;  %v775_v32 = vcombine.low %v770_v29, %v774_v30 }
  0x3b   : > { %697 = vmatprep.subr.bf16.mxu0 %v1049_v51  ;;  %v762_v33 = vrot.slane %v755_v31, %v736_v17 }
  0x3c   : > { %v782_v34 = vrot.slane %v775_v32, %v736_v17 }
  0x3e   : > { %698 = vmatpush1.bf16.msra.mxu0 %v1051_v52 }
  0x3f   : > { %699 = vmatprep.subr.bf16.mxu0 %v1052_v53 }
  0x42   : > { %700 = vmatpush1.bf16.msra.mxu0 %v1054_v54 }
  0x43   : > { %701 = vmatprep.subr.bf16.mxu0 %v1055_v55 }
  0x46   : > { %702 = vmatpush1.bf16.msra.mxu0 %v1057_v56 }
  0x47   : > { %703 = vmatprep.subr.bf16.mxu0 %v1058_v57 }
  0x4a   : > { %704 = vmatpush1.bf16.msra.mxu0 %v1060_v58 }
  0x4b   : > { %705 = vmatprep.subr.bf16.mxu0 %v1061_v59 }
  0x4e   : > { %706 = vmatpush1.bf16.msra.mxu0 %v1063_v60 }
  0x4f   : > { %707 = vmatprep.subr.bf16.mxu0 %v1064_v61 }
  0x52   : > { %708 = vmatpush1.bf16.msra.mxu0 %v1066_v62 }
  0x53   : > { %709 = vmatprep.subr.bf16.mxu0 %v1067_v63 }
  0x56   : > { %710 = vmatpush1.bf16.msra.mxu0 %v1069_v0 }
  0x57   : > { %711 = vmatprep.subr.bf16.mxu0 %v1070_v1 }
  0x5a   : > { %712 = vmatpush1.bf16.msra.mxu0 %v1072_v2 }
  0x5b   : > { %713 = vmatprep.subr.bf16.mxu0 %v1073_v3 }
  0x5e   : > { %714 = vmatpush1.bf16.msra.mxu0 %v1075_v4 }
  0x5f   : > { %715 = vmatprep.subr.bf16.mxu0 %v1076_v5 }
  0x62   : > { %716 = vmatpush1.bf16.msra.mxu0 %v1078_v6 }
  0x63   : > { %717 = vmatprep.subr.bf16.mxu0 %v1079_v7 }
  0x66   : > { %718 = vmatpush1.bf16.msra.mxu0 %v1081_v8 }
  0x69   : > { %720 = vmatmul.mubr.bf16.vlgmr.msra.gmra.mrb[0].mxu0 %v517_v9 }
 0x13c   : > { %v721_v16 = vpop.f32.mrb[0].mxu0 }
 0x13d   : > { %v723_v18 = vpop.f32.mrb[1].mxu0 }
 0x13e   : > { %v730_v20 = vcombine.low %v721_v16, %v723_v18  ;;  %v725_v21 = vpop.f32.mrb[2].mxu0 }
 0x13f   : > { %v726_v24 = vpop.f32.mrb[3].mxu0 }
 0x140   : > { %v737_v25 = vrot.slane %v730_v20, %v736_v17 }
 0x142   : > { %v739_v28 = vadd.f32 %v737_v25, %v468_v22 }
 0x144   : > { %740 = vst [vmem:[#allocation2] sm:$0xf] %v739_v28 }
 0x14b   : > { %v744_v35 = vld [vmem:[#allocation2] sm:$0xf] }
 0x14c   : > { %v764_v36 = vmul.f32 %v762_v33, %v744_v35 }
 0x14e   : > { %v784_v37 = vadd.f32 %v782_v34, %v764_v36 }
 0x150   : > { %v792_v38 = vrot.slane %v784_v37, %v736_v17 }
 0x152   : > { %v793_v39 = vcombine.high %v792_v38, %v792_v38 }
 0x154   : > { %v986_v40 = vpack.c.bf16 %v793_v39, %v792_v38 }
 0x156   : > { %v807_v41 = vrot.slane %v986_v40, %v1280_v43 }
 0x158   : > { %987 = vst.sshfl [vmem:[%s461_s24] sm:$0x5 pattern:$0x73625140] %v807_v41 }
 0x159 PF: > { %s14_s19 = sadd.s32 1, %s1120_s19   ;;  %s1352_s15 = smov %s1108_s16 }
 0x15a   : > { %p11_p10 = scmp.ge.s32.totalorder %s14_s19, 4   ;;  %s1353_s16 = smov %s1185_s23 }
 0x15b   : > { %s1354_s17 = smov %s1116_s18  ;;  %s1355_s18 = smov %s1357_s20 }
 0x15c   :  { %13 = sbr.rel (!%p11_p10) target bundleno = 3 (0x3), region = 126 }

// kernel: pothole_detector_forward.40
= control target key start
LH: loop header
LB: loop body
LE: loop exit
PB: predicated region body
PF: predicated region fallthrough
CT: control target
= control target key end

     0   :  { %s1719_s18 = smov 0   ;;  %s1721_s19 = smov 0   ;;  %s2065_s0 = inlined_call_operand.vmem [shape: bf16[2,4608], index: 0, kind: input, shape index: {}]   ;;  %s2066_s1 = inlined_call_operand.vmem [shape: bf16[4608,512], index: 1, kind: input, shape index: {}]   ;;  %s2067_s2 = inlined_call_operand.vmem [shape: f32[1,512], index: 2, kind: input, shape index: {}]   ;;  %s2068_s3 = inlined_call_operand.vmem [shape: f32[1,512], index: 3, kind: input, shape index: {}]   ;;  %s2069_s4 = inlined_call_operand.vmem [shape: bf16[2,512], index: 4, kind: input, shape index: {}]   ;;  %s2070_s5 = inlined_call_operand.vmem [shape: bf16[2,512], index: 5, kind: output, shape index: {}]  }
   0x1   :  { %s1723_s20 = smov 0   ;;  %s1725_s21 = smov 0  }
   0x2   :  { %s1727_s22 = smov 0   ;;  %s1729_s23 = smov 0  }
   0x3   :  { %s1731_s24 = smov 0  }
   0x4 LB: > { %s27_s25 = sadd.s32 1, %s1676_s22  ;;  %s30_s26 = sadd.s32 1, %s1680_s23  ;;  %s1684_s24 = sphi %s1731_s24, %s15_s24   ;;  %s1680_s23 = sphi %s1729_s23, %s2076_s23   ;;  %s1676_s22 = sphi %s1727_s22, %s2075_s22   ;;  %s1672_s21 = sphi %s1725_s21, %s2074_s21   ;;  %s1668_s20 = sphi %s1723_s20, %s2073_s20   ;;  %s1664_s19 = sphi %s1721_s19, %s2072_s19   ;;  %s1660_s18 = sphi %s1719_s18, %s2071_s18  }
   0x5   : > { %p28_p0 = scmp.ge.s32.totalorder %s27_s25, 9  ;;  %p78_p1 = scmp.ne.s32.totalorder %s1664_s19, %s1660_s18 }
   0x6   : > { %p79_p2 = scmp.eq.s32.totalorder %s1684_s24, 0  ;;  %s71_s30 = sadd.s32 1, %s1664_s19 }
   0x7   : > { %s2078_s25 = smov (%p28_p0, %s27_s25), 0  ;;  %s2080_s26 = smov (!%p28_p0, %s30_s26), %s1680_s23 }
   0x8   : > { %p80_p3 = por %p79_p2, %p78_p1  ;;  %p32_p4 = scmp.ge.s32.totalorder %s2080_s26, 2 }
   0x9   : > { %s66_s27 = ssub.s32 %s1676_s22, %s2078_s25  ;;  %p1388_p6 = scmp.ge.s32.totalorder %s1684_s24, 18 }
   0xa   : > { %s2082_s26 = smov (%p32_p4, %s2080_s26), 0 }
   0xb   : > { %s67_s28 = ssub.s32 %s1680_s23, %s2082_s26  ;;  %212 = sbr.rel (%p1388_p6) target bundleno = 57 (0x39), region = 16 }
   0xc   : > { %s68_s29 = sor.u32 %s67_s28, %s66_s27 }
   0xd   : > { %p69_p5 = scmp.eq.s32.totalorder %s68_s29, 0 }
   0xf   : > { %s1770_s6 = scalar_select %p69_p5, %s1664_s19, %s71_s30  }
  0x12   : > { %227 = sbr.rel (!%p80_p3) target bundleno = 57 (0x39), region = 24  ;;  %s229_s7 = sand.u32 (%p80_p3), 1, %s1664_s19  }
  0x13   : > { %s1391_s8 = sshll.u32 (%p80_p3), %s1680_s23, 1  ;;  %s1389_s9 = sshll.u32 (%p80_p3), %s229_s7, 9 }
  0x14   : > { %s1472_s10 = sshll.u32 (%p80_p3), %s1676_s22, 8  ;;  %s1784_s16 = scalar_lea.vmem (%p80_p3), [#allocation3], %s1389_s9 }
  0x15   : > { %s235_s11 = sadd.s32 (%p80_p3), %s1472_s10, %s1391_s8 }
  0x16   : > { %s1393_s12 = sshll.u32 (%p80_p3), %s235_s11, 2 }
  0x17   : > { %s1779_s15 = scalar_lea.vmem (%p80_p3), %s2066_s1, %s1393_s12 }
  0x18   : > { %v391_v0 = vld [vmem:[%s1779_s15] sm:$0xff] (%p80_p3)  ;;  %v393_v1 = vld [vmem:[%s1779_s15 + $0x10] sm:$0xff] (%p80_p3) }
  0x19   : > { %v395_v2 = vld [vmem:[%s1779_s15 + $0x20] sm:$0xff]  ;;  %392 = vst [vmem:[%s1784_s16] sm:$0xff] %v391_v0  ;;  %394 = vst [vmem:[%s1784_s16 + $0x8] sm:$0xff] %v393_v1  ;;  %v397_v3 = vld [vmem:[%s1779_s15 + $0x30] sm:$0xff] }
  0x1a   : > { %396 = vst [vmem:[%s1784_s16 + $0x10] sm:$0xff] %v395_v2  ;;  %v399_v4 = vld [vmem:[%s1779_s15 + $0x40] sm:$0xff]  ;;  %v401_v5 = vld [vmem:[%s1779_s15 + $0x50] sm:$0xff]  ;;  %398 = vst [vmem:[%s1784_s16 + $0x18] sm:$0xff] %v397_v3 }
  0x1b   : > { %400 = vst [vmem:[%s1784_s16 + $0x20] sm:$0xff] %v399_v4  ;;  %402 = vst [vmem:[%s1784_s16 + $0x28] sm:$0xff] %v401_v5  ;;  %v403_v6 = vld [vmem:[%s1779_s15 + $0x60] sm:$0xff]  ;;  %v405_v7 = vld [vmem:[%s1779_s15 + $0x70] sm:$0xff] }
  0x1c   : > { %v407_v8 = vld [vmem:[%s1779_s15 + $0x80] sm:$0xff]  ;;  %404 = vst [vmem:[%s1784_s16 + $0x30] sm:$0xff] %v403_v6  ;;  %406 = vst [vmem:[%s1784_s16 + $0x38] sm:$0xff] %v405_v7  ;;  %v409_v9 = vld [vmem:[%s1779_s15 + $0x90] sm:$0xff] }
  0x1d   : > { %408 = vst [vmem:[%s1784_s16 + $0x40] sm:$0xff] %v407_v8  ;;  %v411_v10 = vld [vmem:[%s1779_s15 + $0xa0] sm:$0xff]  ;;  %v413_v11 = vld [vmem:[%s1779_s15 + $0xb0] sm:$0xff]  ;;  %410 = vst [vmem:[%s1784_s16 + $0x48] sm:$0xff] %v409_v9 }
  0x1e   : > { %412 = vst [vmem:[%s1784_s16 + $0x50] sm:$0xff] %v411_v10  ;;  %414 = vst [vmem:[%s1784_s16 + $0x58] sm:$0xff] %v413_v11  ;;  %v415_v12 = vld [vmem:[%s1779_s15 + $0xc0] sm:$0xff]  ;;  %v417_v13 = vld [vmem:[%s1779_s15 + $0xd0] sm:$0xff] }
  0x1f   : > { %v419_v14 = vld [vmem:[%s1779_s15 + $0xe0] sm:$0xff]  ;;  %416 = vst [vmem:[%s1784_s16 + $0x60] sm:$0xff] %v415_v12  ;;  %418 = vst [vmem:[%s1784_s16 + $0x68] sm:$0xff] %v417_v13  ;;  %v421_v15 = vld [vmem:[%s1779_s15 + $0xf0] sm:$0xff] }
  0x20   : > { %420 = vst [vmem:[%s1784_s16 + $0x70] sm:$0xff] %v419_v14  ;;  %v423_v16 = vld [vmem:[%s1779_s15 + $0x100] sm:$0xff]  ;;  %v425_v17 = vld [vmem:[%s1779_s15 + $0x110] sm:$0xff]  ;;  %422 = vst [vmem:[%s1784_s16 + $0x78] sm:$0xff] %v421_v15 }
  0x21   : > { %424 = vst [vmem:[%s1784_s16 + $0x80] sm:$0xff] %v423_v16  ;;  %426 = vst [vmem:[%s1784_s16 + $0x88] sm:$0xff] %v425_v17  ;;  %v427_v18 = vld [vmem:[%s1779_s15 + $0x120] sm:$0xff]  ;;  %v429_v19 = vld [vmem:[%s1779_s15 + $0x130] sm:$0xff] }
  0x22   : > { %v431_v20 = vld [vmem:[%s1779_s15 + $0x140] sm:$0xff]  ;;  %428 = vst [vmem:[%s1784_s16 + $0x90] sm:$0xff] %v427_v18  ;;  %430 = vst [vmem:[%s1784_s16 + $0x98] sm:$0xff] %v429_v19  ;;  %v433_v21 = vld [vmem:[%s1779_s15 + $0x150] sm:$0xff] }
  0x23   : > { %432 = vst [vmem:[%s1784_s16 + $0xa0] sm:$0xff] %v431_v20  ;;  %v435_v22 = vld [vmem:[%s1779_s15 + $0x160] sm:$0xff]  ;;  %v437_v23 = vld [vmem:[%s1779_s15 + $0x170] sm:$0xff]  ;;  %434 = vst [vmem:[%s1784_s16 + $0xa8] sm:$0xff] %v433_v21 }
  0x24   : > { %436 = vst [vmem:[%s1784_s16 + $0xb0] sm:$0xff] %v435_v22  ;;  %438 = vst [vmem:[%s1784_s16 + $0xb8] sm:$0xff] %v437_v23  ;;  %v439_v24 = vld [vmem:[%s1779_s15 + $0x180] sm:$0xff]  ;;  %v441_v25 = vld [vmem:[%s1779_s15 + $0x190] sm:$0xff] }
  0x25   : > { %v443_v26 = vld [vmem:[%s1779_s15 + $0x1a0] sm:$0xff]  ;;  %440 = vst [vmem:[%s1784_s16 + $0xc0] sm:$0xff] %v439_v24  ;;  %442 = vst [vmem:[%s1784_s16 + $0xc8] sm:$0xff] %v441_v25  ;;  %v445_v27 = vld [vmem:[%s1779_s15 + $0x1b0] sm:$0xff] }
  0x26   : > { %444 = vst [vmem:[%s1784_s16 + $0xd0] sm:$0xff] %v443_v26  ;;  %v447_v28 = vld [vmem:[%s1779_s15 + $0x1c0] sm:$0xff]  ;;  %v449_v29 = vld [vmem:[%s1779_s15 + $0x1d0] sm:$0xff]  ;;  %446 = vst [vmem:[%s1784_s16 + $0xd8] sm:$0xff] %v445_v27 }
  0x27   : > { %448 = vst [vmem:[%s1784_s16 + $0xe0] sm:$0xff] %v447_v28  ;;  %450 = vst [vmem:[%s1784_s16 + $0xe8] sm:$0xff] %v449_v29  ;;  %v451_v30 = vld [vmem:[%s1779_s15 + $0x1e0] sm:$0xff]  ;;  %v453_v31 = vld [vmem:[%s1779_s15 + $0x1f0] sm:$0xff] }
  0x28   : > { %v455_v32 = vld [vmem:[%s1779_s15 + $0x200] sm:$0xff]  ;;  %452 = vst [vmem:[%s1784_s16 + $0xf0] sm:$0xff] %v451_v30  ;;  %454 = vst [vmem:[%s1784_s16 + $0xf8] sm:$0xff] %v453_v31  ;;  %v457_v33 = vld [vmem:[%s1779_s15 + $0x210] sm:$0xff] }
  0x29   : > { %456 = vst [vmem:[%s1784_s16 + $0x100] sm:$0xff] %v455_v32  ;;  %v459_v34 = vld [vmem:[%s1779_s15 + $0x220] sm:$0xff]  ;;  %v461_v35 = vld [vmem:[%s1779_s15 + $0x230] sm:$0xff]  ;;  %458 = vst [vmem:[%s1784_s16 + $0x108] sm:$0xff] %v457_v33 }
  0x2a   : > { %460 = vst [vmem:[%s1784_s16 + $0x110] sm:$0xff] %v459_v34  ;;  %462 = vst [vmem:[%s1784_s16 + $0x118] sm:$0xff] %v461_v35  ;;  %v463_v36 = vld [vmem:[%s1779_s15 + $0x240] sm:$0xff]  ;;  %v465_v37 = vld [vmem:[%s1779_s15 + $0x250] sm:$0xff] }
  0x2b   : > { %v467_v38 = vld [vmem:[%s1779_s15 + $0x260] sm:$0xff]  ;;  %464 = vst [vmem:[%s1784_s16 + $0x120] sm:$0xff] %v463_v36  ;;  %466 = vst [vmem:[%s1784_s16 + $0x128] sm:$0xff] %v465_v37  ;;  %v469_v39 = vld [vmem:[%s1779_s15 + $0x270] sm:$0xff] }
  0x2c   : > { %468 = vst [vmem:[%s1784_s16 + $0x130] sm:$0xff] %v467_v38  ;;  %v471_v40 = vld [vmem:[%s1779_s15 + $0x280] sm:$0xff]  ;;  %v473_v41 = vld [vmem:[%s1779_s15 + $0x290] sm:$0xff]  ;;  %470 = vst [vmem:[%s1784_s16 + $0x138] sm:$0xff] %v469_v39 }
  0x2d   : > { %472 = vst [vmem:[%s1784_s16 + $0x140] sm:$0xff] %v471_v40  ;;  %474 = vst [vmem:[%s1784_s16 + $0x148] sm:$0xff] %v473_v41  ;;  %v475_v42 = vld [vmem:[%s1779_s15 + $0x2a0] sm:$0xff]  ;;  %v477_v43 = vld [vmem:[%s1779_s15 + $0x2b0] sm:$0xff] }
  0x2e   : > { %v479_v44 = vld [vmem:[%s1779_s15 + $0x2c0] sm:$0xff]  ;;  %476 = vst [vmem:[%s1784_s16 + $0x150] sm:$0xff] %v475_v42  ;;  %478 = vst [vmem:[%s1784_s16 + $0x158] sm:$0xff] %v477_v43  ;;  %v481_v45 = vld [vmem:[%s1779_s15 + $0x2d0] sm:$0xff] }
  0x2f   : > { %480 = vst [vmem:[%s1784_s16 + $0x160] sm:$0xff] %v479_v44  ;;  %v483_v46 = vld [vmem:[%s1779_s15 + $0x2e0] sm:$0xff]  ;;  %v485_v47 = vld [vmem:[%s1779_s15 + $0x2f0] sm:$0xff]  ;;  %482 = vst [vmem:[%s1784_s16 + $0x168] sm:$0xff] %v481_v45 }
  0x30   : > { %484 = vst [vmem:[%s1784_s16 + $0x170] sm:$0xff] %v483_v46  ;;  %486 = vst [vmem:[%s1784_s16 + $0x178] sm:$0xff] %v485_v47  ;;  %v487_v48 = vld [vmem:[%s1779_s15 + $0x300] sm:$0xff]  ;;  %v489_v49 = vld [vmem:[%s1779_s15 + $0x310] sm:$0xff] }
  0x31   : > { %v491_v50 = vld [vmem:[%s1779_s15 + $0x320] sm:$0xff]  ;;  %488 = vst [vmem:[%s1784_s16 + $0x180] sm:$0xff] %v487_v48  ;;  %490 = vst [vmem:[%s1784_s16 + $0x188] sm:$0xff] %v489_v49  ;;  %v493_v51 = vld [vmem:[%s1779_s15 + $0x330] sm:$0xff] }
  0x32   : > { %492 = vst [vmem:[%s1784_s16 + $0x190] sm:$0xff] %v491_v50  ;;  %v495_v52 = vld [vmem:[%s1779_s15 + $0x340] sm:$0xff]  ;;  %v497_v53 = vld [vmem:[%s1779_s15 + $0x350] sm:$0xff]  ;;  %494 = vst [vmem:[%s1784_s16 + $0x198] sm:$0xff] %v493_v51 }
  0x33   : > { %496 = vst [vmem:[%s1784_s16 + $0x1a0] sm:$0xff] %v495_v52  ;;  %498 = vst [vmem:[%s1784_s16 + $0x1a8] sm:$0xff] %v497_v53  ;;  %v499_v54 = vld [vmem:[%s1779_s15 + $0x360] sm:$0xff]  ;;  %v501_v55 = vld [vmem:[%s1779_s15 + $0x370] sm:$0xff] }
  0x34   : > { %v503_v56 = vld [vmem:[%s1779_s15 + $0x380] sm:$0xff]  ;;  %500 = vst [vmem:[%s1784_s16 + $0x1b0] sm:$0xff] %v499_v54  ;;  %502 = vst [vmem:[%s1784_s16 + $0x1b8] sm:$0xff] %v501_v55  ;;  %v505_v57 = vld [vmem:[%s1779_s15 + $0x390] sm:$0xff] }
  0x35   : > { %504 = vst [vmem:[%s1784_s16 + $0x1c0] sm:$0xff] %v503_v56  ;;  %v507_v58 = vld [vmem:[%s1779_s15 + $0x3a0] sm:$0xff]  ;;  %v509_v59 = vld [vmem:[%s1779_s15 + $0x3b0] sm:$0xff]  ;;  %506 = vst [vmem:[%s1784_s16 + $0x1c8] sm:$0xff] %v505_v57 }
  0x36   : > { %508 = vst [vmem:[%s1784_s16 + $0x1d0] sm:$0xff] %v507_v58  ;;  %510 = vst [vmem:[%s1784_s16 + $0x1d8] sm:$0xff] %v509_v59  ;;  %v511_v60 = vld [vmem:[%s1779_s15 + $0x3c0] sm:$0xff]  ;;  %v513_v61 = vld [vmem:[%s1779_s15 + $0x3d0] sm:$0xff] }
  0x37   : > { %v515_v62 = vld [vmem:[%s1779_s15 + $0x3e0] sm:$0xff]  ;;  %512 = vst [vmem:[%s1784_s16 + $0x1e0] sm:$0xff] %v511_v60  ;;  %514 = vst [vmem:[%s1784_s16 + $0x1e8] sm:$0xff] %v513_v61  ;;  %v517_v63 = vld [vmem:[%s1779_s15 + $0x3f0] sm:$0xff] }
  0x38   : > { %516 = vst [vmem:[%s1784_s16 + $0x1f0] sm:$0xff] %v515_v62  ;;  %518 = vst [vmem:[%s1784_s16 + $0x1f8] sm:$0xff] %v517_v63 }
  0x39 PF: > { %p1394_p7 = scmp.ge.s32.totalorder %s1684_s24, 1  ;;  %p551_p8 = scmp.lt.s32.totalorder %s1684_s24, 19 }
  0x3b   : > { %p552_p9 = pnand %p1394_p7, %p551_p8 }
  0x3c   : > { %s558_s17 = sand.u32 (!%p552_p9), 1, %s1660_s18   ;;  %s1396_s27 = sshll.u32 (!%p552_p9), %s1668_s20, 2 }
  0x3d   : > { %555 = sbr.rel (%p552_p9) target bundleno = 390 (0x186), region = 74  ;;  %s1395_s28 = sshll.u32 (!%p552_p9), %s558_s17, 9 }
  0x3e   : > { %p615_p10 = scmp.lt.s32.totalorder (!%p552_p9), %s1396_s27, 35  ;;  %s1397_s29 = sshll.u32 (!%p552_p9), %s1672_s21, 1 }
  0x3f   : > { %p624_p11 = scmp.lt.s32.totalorder (!%p552_p9), %s1397_s29, 3  ;;  %s1940_s7 = scalar_lea.vmem (!%p552_p9), [#allocation3], %s1395_s28 }
  0x40   : > { %p1401_p12 = scmp.ne.s32.totalorder (!%p552_p9), %s1668_s20, 0 }
  0x44   : > { %s2084_s27 = smov (!%p615_p10, %s1396_s27), 35  ;;  %s2086_s29 = smov (!%p624_p11, %s1397_s29), 3 }
  0x45   : > { %s619_s8 = scalar_lea.vmem %s2065_s0, %s2084_s27  ;;  %s626_s18 = scalar_lea.vmem %s2067_s2, %s2086_s29  ;;  %v1686_v0 = vmov (!%p1401_p12), 0.0  }
  0x46   : > { %s631_s12 = scalar_lea.vmem %s2068_s3, %s2086_s29  ;;  %s640_s15 = scalar_lea.vmem %s2069_s4, %s2086_s29  ;;  %655 = vst [vmem:[#allocation2] sm:$0xf] (!%p1401_p12), %v1686_v0 }
  0x47   : > { %s649_s30 = scalar_lea.vmem %s2070_s5, %s2086_s29  ;;  %654 = sbr.rel (%p1401_p12) target bundleno = 78 (0x4e), region = 82 }
  0x4e PF: > { %v1534_v1 = vld [vmem:[%s1940_s7 + $0x4] ss:$8 sps:$4 sm:$0xff]   ;;  %v1538_v3 = vld [vmem:[%s1940_s7] ss:$8 sps:$4 sm:$0xff]   ;;  %v1540_v5 = vld [vmem:[%s1940_s7 + $0x14] ss:$8 sps:$4 sm:$0xff]   ;;  %v734_v41 = vlaneseq }
  0x4f   : > { %v1536_v2 = vld [vmem:[%s1940_s7 + $0x104] ss:$8 sps:$4 sm:$0xff]   ;;  %1071 = vmatprep.subr.bf16.mxu1 %v1534_v1  ;;  %v1539_v4 = vld [vmem:[%s1940_s7 + $0x100] ss:$8 sps:$4 sm:$0xff]   ;;  %v1542_v6 = vld [vmem:[%s1940_s7 + $0x114] ss:$8 sps:$4 sm:$0xff]  }
  0x50   : > { %1112 = vmatprep.subr.bf16.mxu0 %v1536_v2  ;;  %1072 = vmatpush1.bf16.msra.mxu1 %v1538_v3  ;;  %v1544_v7 = vld [vmem:[%s1940_s7 + $0x10] ss:$8 sps:$4 sm:$0xff]   ;;  %v1546_v9 = vld [vmem:[%s1940_s7 + $0x24] ss:$8 sps:$4 sm:$0xff]   ;;  %v1550_v11 = vld [vmem:[%s1940_s7 + $0x20] ss:$8 sps:$4 sm:$0xff]  }
  0x51   : > { %1113 = vmatpush1.bf16.msra.mxu0 %v1539_v4  ;;  %1073 = vmatprep.subr.bf16.mxu1 %v1540_v5  ;;  %v1545_v8 = vld [vmem:[%s1940_s7 + $0x110] ss:$8 sps:$4 sm:$0xff]   ;;  %v1548_v10 = vld [vmem:[%s1940_s7 + $0x124] ss:$8 sps:$4 sm:$0xff]   ;;  %v1551_v12 = vld [vmem:[%s1940_s7 + $0x120] ss:$8 sps:$4 sm:$0xff]  }
  0x52   : > { %1114 = vmatprep.subr.bf16.mxu0 %v1542_v6  ;;  %v1552_v13 = vld [vmem:[%s1940_s7 + $0x34] ss:$8 sps:$4 sm:$0xff]   ;;  %v1556_v15 = vld [vmem:[%s1940_s7 + $0x30] ss:$8 sps:$4 sm:$0xff]   ;;  %v1558_v17 = vld [vmem:[%s1940_s7 + $0x44] ss:$8 sps:$4 sm:$0xff]  }
  0x53   : > { %v1554_v14 = vld [vmem:[%s1940_s7 + $0x134] ss:$8 sps:$4 sm:$0xff]   ;;  %v1557_v16 = vld [vmem:[%s1940_s7 + $0x130] ss:$8 sps:$4 sm:$0xff]   ;;  %v1560_v18 = vld [vmem:[%s1940_s7 + $0x144] ss:$8 sps:$4 sm:$0xff]  }
  0x54   : > { %1074 = vmatpush1.bf16.msra.mxu1 %v1544_v7  ;;  %v1562_v19 = vld [vmem:[%s1940_s7 + $0x40] ss:$8 sps:$4 sm:$0xff]   ;;  %v1564_v21 = vld [vmem:[%s1940_s7 + $0x54] ss:$8 sps:$4 sm:$0xff]   ;;  %v1568_v23 = vld [vmem:[%s1940_s7 + $0x50] ss:$8 sps:$4 sm:$0xff]  }
  0x55   : > { %1115 = vmatpush1.bf16.msra.mxu0 %v1545_v8  ;;  %1075 = vmatprep.subr.bf16.mxu1 %v1546_v9  ;;  %v1563_v20 = vld [vmem:[%s1940_s7 + $0x140] ss:$8 sps:$4 sm:$0xff]   ;;  %v1566_v22 = vld [vmem:[%s1940_s7 + $0x154] ss:$8 sps:$4 sm:$0xff]   ;;  %v1569_v24 = vld [vmem:[%s1940_s7 + $0x150] ss:$8 sps:$4 sm:$0xff]  }
  0x56   : > { %1116 = vmatprep.subr.bf16.mxu0 %v1548_v10  ;;  %v1570_v25 = vld [vmem:[%s1940_s7 + $0x64] ss:$8 sps:$4 sm:$0xff]   ;;  %v1574_v27 = vld [vmem:[%s1940_s7 + $0x60] ss:$8 sps:$4 sm:$0xff]   ;;  %v1576_v29 = vld [vmem:[%s1940_s7 + $0x74] ss:$8 sps:$4 sm:$0xff]  }
  0x57   : > { %v1572_v26 = vld [vmem:[%s1940_s7 + $0x164] ss:$8 sps:$4 sm:$0xff]   ;;  %v1575_v28 = vld [vmem:[%s1940_s7 + $0x160] ss:$8 sps:$4 sm:$0xff]   ;;  %v1578_v30 = vld [vmem:[%s1940_s7 + $0x174] ss:$8 sps:$4 sm:$0xff]  }
  0x58   : > { %1076 = vmatpush1.bf16.msra.mxu1 %v1550_v11  ;;  %v1580_v31 = vld [vmem:[%s1940_s7 + $0x70] ss:$8 sps:$4 sm:$0xff]   ;;  %v1582_v33 = vld [vmem:[%s1940_s7 + $0x84] ss:$8 sps:$4 sm:$0xff]   ;;  %v1586_v35 = vld [vmem:[%s1940_s7 + $0x80] ss:$8 sps:$4 sm:$0xff]  }
  0x59   : > { %1117 = vmatpush1.bf16.msra.mxu0 %v1551_v12  ;;  %1077 = vmatprep.subr.bf16.mxu1 %v1552_v13  ;;  %v1581_v32 = vld [vmem:[%s1940_s7 + $0x170] ss:$8 sps:$4 sm:$0xff]   ;;  %v1584_v34 = vld [vmem:[%s1940_s7 + $0x184] ss:$8 sps:$4 sm:$0xff]   ;;  %v1587_v36 = vld [vmem:[%s1940_s7 + $0x180] ss:$8 sps:$4 sm:$0xff]  }
  0x5a   : > { %1118 = vmatprep.subr.bf16.mxu0 %v1554_v14  ;;  %v1588_v37 = vld [vmem:[%s1940_s7 + $0x94] ss:$8 sps:$4 sm:$0xff]   ;;  %v1687_v39 = vmov 1966171168   ;;  %v1592_v42 = vld [vmem:[%s1940_s7 + $0x90] ss:$8 sps:$4 sm:$0xff]  }
  0x5b   : > { %v1590_v38 = vld [vmem:[%s1940_s7 + $0x194] ss:$8 sps:$4 sm:$0xff]   ;;  %v732_v40 = vunpack.c.l.s4 %v1687_v39  ;;  %v1593_v43 = vld [vmem:[%s1940_s7 + $0x190] ss:$8 sps:$4 sm:$0xff]   ;;  %v1594_v44 = vld [vmem:[%s1940_s7 + $0xa4] ss:$8 sps:$4 sm:$0xff]  }
  0x5c   : > { %1078 = vmatpush1.bf16.msra.mxu1 %v1556_v15  ;;  %v1596_v45 = vld [vmem:[%s1940_s7 + $0x1a4] ss:$8 sps:$4 sm:$0xff]   ;;  %v1985_v47 = vshrl.u32 %v734_v41, 7  ;;  %v1598_v48 = vld [vmem:[%s1940_s7 + $0xa0] ss:$8 sps:$4 sm:$0xff]   ;;  %p1467_p13 = scmp.ne.s32.totalorder %s1668_s20, 8 }
  0x5d   : > { %1119 = vmatpush1.bf16.msra.mxu0 %v1557_v16  ;;  %1079 = vmatprep.subr.bf16.mxu1 %v1558_v17  ;;  %v733_v46 = vunpack.c.0.s8 %v732_v40  ;;  %v1599_v49 = vld [vmem:[%s1940_s7 + $0x1a0] ss:$8 sps:$4 sm:$0xff]   ;;  %v1600_v50 = vld [vmem:[%s1940_s7 + $0xb4] ss:$8 sps:$4 sm:$0xff]   ;;  %v1604_v54 = vld [vmem:[%s1940_s7 + $0xb0] ss:$8 sps:$4 sm:$0xff]  }
  0x5e   : > { %1120 = vmatprep.subr.bf16.mxu0 %v1560_v18  ;;  %v1602_v51 = vld [vmem:[%s1940_s7 + $0x1b4] ss:$8 sps:$4 sm:$0xff]   ;;  %v1605_v55 = vld [vmem:[%s1940_s7 + $0x1b0] ss:$8 sps:$4 sm:$0xff]   ;;  %v1606_v57 = vld [vmem:[%s1940_s7 + $0xc4] ss:$8 sps:$4 sm:$0xff]  }
  0x5f   : > { %v1992_v52 = vsub.s32 %v733_v46, %v1985_v47  ;;  %v1402_v53 = vld.sshfl [vmem:[%s619_s8] sm:$0x33 pattern:$0x75316420]  ;;  %v1608_v58 = vld [vmem:[%s1940_s7 + $0x1c4] ss:$8 sps:$4 sm:$0xff]  }
  0x60   : > { %1080 = vmatpush1.bf16.msra.mxu1 %v1562_v19  ;;  %v730_v56 = vcombine.high %v1402_v53, %v1402_v53  ;;  %v1610_v60 = vld [vmem:[%s1940_s7 + $0xc0] ss:$8 sps:$4 sm:$0xff]   ;;  %v1612_v63 = vld [vmem:[%s1940_s7 + $0xd4] ss:$8 sps:$4 sm:$0xff]   ;;  %v1616_v1 = vld [vmem:[%s1940_s7 + $0xd0] ss:$8 sps:$4 sm:$0xff]  }
  0x61   : > { %1121 = vmatpush1.bf16.msra.mxu0 %v1563_v20  ;;  %1081 = vmatprep.subr.bf16.mxu1 %v1564_v21  ;;  %v1611_v61 = vld [vmem:[%s1940_s7 + $0x1c0] ss:$8 sps:$4 sm:$0xff]   ;;  %v1614_v0 = vld [vmem:[%s1940_s7 + $0x1d4] ss:$8 sps:$4 sm:$0xff]   ;;  %v1617_v2 = vld [vmem:[%s1940_s7 + $0x1d0] ss:$8 sps:$4 sm:$0xff]   ;;  %v737_v9 = vrot.slane %v1402_v53, %v1992_v52 }
  0x62   : > { %1122 = vmatprep.subr.bf16.mxu0 %v1566_v22  ;;  %v744_v59 = vrot.slane %v730_v56, %v1992_v52  ;;  %v1618_v3 = vld [vmem:[%s1940_s7 + $0xe4] ss:$8 sps:$4 sm:$0xff]   ;;  %v1622_v5 = vld [vmem:[%s1940_s7 + $0xe0] ss:$8 sps:$4 sm:$0xff]   ;;  %v1624_v7 = vld [vmem:[%s1940_s7 + $0xf4] ss:$8 sps:$4 sm:$0xff]  }
  0x63   : > { %v1620_v4 = vld [vmem:[%s1940_s7 + $0x1e4] ss:$8 sps:$4 sm:$0xff]   ;;  %v1623_v6 = vld [vmem:[%s1940_s7 + $0x1e0] ss:$8 sps:$4 sm:$0xff]   ;;  %v1626_v8 = vld [vmem:[%s1940_s7 + $0x1f4] ss:$8 sps:$4 sm:$0xff]   ;;  %v745_v12 = vcombine.high %v737_v9, %v737_v9 }
  0x64   : > { %1082 = vmatpush1.bf16.msra.mxu1 %v1568_v23  ;;  %v746_v62 = vcombine.high %v744_v59, %v744_v59  ;;  %1103 = vmatprep.mubr.bf16.mxu1 %v744_v59  ;;  %v1628_v10 = vld [vmem:[%s1940_s7 + $0xf0] ss:$8 sps:$4 sm:$0xff]   ;;  %v1688_v13 = vmov 1983009808  }
  0x65   : > { %1123 = vmatpush1.bf16.msra.mxu0 %v1569_v24  ;;  %1083 = vmatprep.subr.bf16.mxu1 %v1570_v25  ;;  %v1629_v11 = vld [vmem:[%s1940_s7 + $0x1f0] ss:$8 sps:$4 sm:$0xff]   ;;  %v1157_v14 = vunpack.c.l.s4 %v1688_v13 }
  0x66   : > { %1124 = vmatprep.subr.bf16.mxu0 %v1572_v26  ;;  %1144 = vmatprep.mubr.bf16.mxu0 %v746_v62 }
  0x67   : > { %v1158_v15 = vunpack.c.0.s8 %v1157_v14 }
  0x68   : > { %1084 = vmatpush1.bf16.msra.mxu1 %v1574_v27 }
  0x69   : > { %1125 = vmatpush1.bf16.msra.mxu0 %v1575_v28  ;;  %1085 = vmatprep.subr.bf16.mxu1 %v1576_v29  ;;  %v1161_v22 = vsub.s32 %v1158_v15, %v1985_v47  ;;  %v656_v28 = vld [vmem:[#allocation2] sm:$0xf] }
  0x6a   : > { %1126 = vmatprep.subr.bf16.mxu0 %v1578_v30 }
  0x6c   : > { %1086 = vmatpush1.bf16.msra.mxu1 %v1580_v31  ;;  %v1171_v31 = vld [vmem:[%s626_s18] sm:$0x3] (!%p1467_p13) }
  0x6d   : > { %1127 = vmatpush1.bf16.msra.mxu0 %v1581_v32  ;;  %1087 = vmatprep.subr.bf16.mxu1 %v1582_v33  ;;  %v1175_v32 = vsub.s32 (!%p1467_p13), 0, %v1985_v47  ;;  %v1179_v33 = vsub.s32 (!%p1467_p13), 1, %v1985_v47 }
  0x6e   : > { %1128 = vmatprep.subr.bf16.mxu0 %v1584_v34  ;;  %v1191_v34 = vld [vmem:[%s631_s12] sm:$0x3] (!%p1467_p13) }
  0x70   : > { %1088 = vmatpush1.bf16.msra.mxu1 %v1586_v35  ;;  %v1176_v35 = vrot.slane (!%p1467_p13), %v1171_v31, %v1175_v32 }
  0x71   : > { %1129 = vmatpush1.bf16.msra.mxu0 %v1587_v36  ;;  %1089 = vmatprep.subr.bf16.mxu1 %v1588_v37  ;;  %v1180_v36 = vrot.slane (!%p1467_p13), %v1171_v31, %v1179_v33  ;;  %v1196_v37 = vrot.slane (!%p1467_p13), %v1191_v34, %v1175_v32 }
  0x72   : > { %1130 = vmatprep.subr.bf16.mxu0 %v1590_v38  ;;  %v1200_v38 = vrot.slane (!%p1467_p13), %v1191_v34, %v1179_v33 }
  0x73   : > { %v1181_v39 = vcombine.low (!%p1467_p13), %v1176_v35, %v1180_v36 }
  0x74   : > { %1090 = vmatpush1.bf16.msra.mxu1 %v1592_v42  ;;  %v1201_v40 = vcombine.low (!%p1467_p13), %v1196_v37, %v1200_v38  ;;  %v1211_v42 = vld [vmem:[%s640_s15] sm:$0x3] (!%p1467_p13) }
  0x75   : > { %1131 = vmatpush1.bf16.msra.mxu0 %v1593_v43  ;;  %1091 = vmatprep.subr.bf16.mxu1 %v1594_v44  ;;  %v1188_v43 = vrot.slane (!%p1467_p13), %v1181_v39, %v1161_v22  ;;  %v1212_v46 = vunpack.c.l.bf16 (!%p1467_p13), %v1211_v42 }
  0x76   : > { %1132 = vmatprep.subr.bf16.mxu0 %v1596_v45  ;;  %v1208_v44 = vrot.slane (!%p1467_p13), %v1201_v40, %v1161_v22 }
  0x78   : > { %1092 = vmatpush1.bf16.msra.mxu1 %v1598_v48 }
  0x79   : > { %1133 = vmatpush1.bf16.msra.mxu0 %v1599_v49  ;;  %1093 = vmatprep.subr.bf16.mxu1 %v1600_v50 }
  0x7a   : > { %1134 = vmatprep.subr.bf16.mxu0 %v1602_v51 }
  0x7c   : > { %1094 = vmatpush1.bf16.msra.mxu1 %v1604_v54 }
  0x7d   : > { %1135 = vmatpush1.bf16.msra.mxu0 %v1605_v55  ;;  %1095 = vmatprep.subr.bf16.mxu1 %v1606_v57 }
  0x7e   : > { %1136 = vmatprep.subr.bf16.mxu0 %v1608_v58 }
  0x80   : > { %1096 = vmatpush1.bf16.msra.mxu1 %v1610_v60 }
  0x81   : > { %1137 = vmatpush1.bf16.msra.mxu0 %v1611_v61  ;;  %1097 = vmatprep.subr.bf16.mxu1 %v1612_v63 }
  0x82   : > { %1138 = vmatprep.subr.bf16.mxu0 %v1614_v0 }
  0x84   : > { %1098 = vmatpush1.bf16.msra.mxu1 %v1616_v1 }
  0x85   : > { %1139 = vmatpush1.bf16.msra.mxu0 %v1617_v2  ;;  %1099 = vmatprep.subr.bf16.mxu1 %v1618_v3 }
  0x86   : > { %1140 = vmatprep.subr.bf16.mxu0 %v1620_v4 }
  0x88   : > { %1100 = vmatpush1.bf16.msra.mxu1 %v1622_v5 }
  0x89   : > { %1141 = vmatpush1.bf16.msra.mxu0 %v1623_v6  ;;  %1101 = vmatprep.subr.bf16.mxu1 %v1624_v7 }
  0x8a   : > { %1142 = vmatprep.subr.bf16.mxu0 %v1626_v8 }
  0x8c   : > { %1102 = vmatpush1.bf16.msra.mxu1 %v1628_v10 }
  0x8d   : > { %1143 = vmatpush1.bf16.msra.mxu0 %v1629_v11 }
  0x8f   : > { %1104 = vmatmul.mubr.bf16.vlgmr.msra.gmra.mrb[0].mxu1 %v737_v9 }
  0x90   : > { %1145 = vmatmul.mubr.bf16.vlgmr.msra.gmra.mrb[0].mxu0 %v745_v12 }
 0x162   : > { %v1105_v16 = vpop.f32.mrb[0].mxu1 }
 0x163   : > { %v1146_v17 = vpop.f32.mrb[0].mxu0  ;;  %v1107_v19 = vpop.f32.mrb[1].mxu1 }
 0x164   : > { %v1147_v18 = vadd.f32 %v1146_v17, %v1105_v16  ;;  %v1148_v20 = vpop.f32.mrb[1].mxu0  ;;  %v1109_v23 = vpop.f32.mrb[2].mxu1 }
 0x165   : > { %v1149_v21 = vadd.f32 %v1148_v20, %v1107_v19  ;;  %v1150_v24 = vpop.f32.mrb[2].mxu0  ;;  %v1110_v25 = vpop.f32.mrb[3].mxu1 }
 0x166   : > { %v1151_v26 = vpop.f32.mrb[3].mxu0 }
 0x167   : > { %v1155_v27 = vcombine.low %v1147_v18, %v1149_v21  ;;  %1169 = sbr.rel (%p1467_p13) target bundleno = 390 (0x186), region = 86 }
 0x169   : > { %v1162_v29 = vrot.slane %v1155_v27, %v1161_v22 }
 0x16b   : > { %v1164_v30 = vadd.f32 %v1162_v29, %v656_v28 }
 0x16d   : > { %1165 = vst [vmem:[#allocation2] sm:$0xf] %v1164_v30 }
 0x174   : > { %v1170_v41 = vld [vmem:[#allocation2] sm:$0xf] }
 0x175   : > { %v1190_v45 = vmul.f32 %v1188_v43, %v1170_v41 }
 0x177   : > { %v1210_v47 = vadd.f32 %v1208_v44, %v1190_v45 }
 0x179   : > { %v1213_v48 = vadd.f32 %v1212_v46, %v1210_v47 }
 0x17b   : > { %v1214_v49 = vmax.f32 %v1213_v48, 0.0 }
 0x17d   : > { %v1222_v50 = vrot.slane %v1214_v49, %v1161_v22 }
 0x17f   : > { %v1223_v51 = vcombine.high %v1222_v50, %v1222_v50 }
 0x181   : > { %v1468_v53 = vpack.c.bf16 %v1223_v51, %v1222_v50 }
 0x183   : > { %v1237_v54 = vrot.slane %v1468_v53, %v1992_v52 }
 0x185   : > { %1469 = vst.sshfl [vmem:[%s649_s30] sm:$0x5 pattern:$0x73625140] %v1237_v54 }
 0x186 PF: > { %s15_s24 = sadd.s32 1, %s1684_s24   ;;  %s2071_s18 = smov %s1664_s19 }
 0x187   : > { %p12_p0 = scmp.ge.s32.totalorder %s15_s24, 20   ;;  %s2072_s19 = smov %s1770_s6 }
 0x188   : > { %s2073_s20 = smov %s1676_s22  ;;  %s2074_s21 = smov %s1680_s23 }
 0x189   : > { %s2075_s22 = smov %s2078_s25  ;;  %s2076_s23 = smov %s2082_s26 }
 0x18a   :  { %14 = sbr.rel (!%p12_p0) target bundleno = 4 (0x4), region = 133 }

// kernel: pothole_detector_forward.41
= control target key start
LH: loop header
LB: loop body
LE: loop exit
PB: predicated region body
PF: predicated region fallthrough
CT: control target
= control target key end

     0   :  { %s1635_s15 = smov 0   ;;  %s1637_s16 = smov 0   ;;  %s1972_s0 = inlined_call_operand.vmem [shape: bf16[2,4608], index: 0, kind: input, shape index: {}]   ;;  %s1973_s1 = inlined_call_operand.vmem [shape: bf16[4608,512], index: 1, kind: input, shape index: {}]   ;;  %s1974_s2 = inlined_call_operand.vmem [shape: f32[1,512], index: 2, kind: input, shape index: {}]   ;;  %s1975_s3 = inlined_call_operand.vmem [shape: f32[1,512], index: 3, kind: input, shape index: {}]   ;;  %s1976_s4 = inlined_call_operand.vmem [shape: bf16[2,512], index: 4, kind: output, shape index: {}]  }
   0x1   :  { %s1639_s17 = smov 0   ;;  %s1641_s18 = smov 0  }
   0x2   :  { %s1643_s19 = smov 0   ;;  %s1645_s20 = smov 0  }
   0x3   :  { %s1647_s21 = smov 0  }
   0x4 LB: > { %s26_s22 = sadd.s32 1, %s1597_s19  ;;  %s29_s23 = sadd.s32 1, %s1601_s20  ;;  %s1605_s21 = sphi %s1647_s21, %s14_s21   ;;  %s1601_s20 = sphi %s1645_s20, %s1982_s20   ;;  %s1597_s19 = sphi %s1643_s19, %s1981_s19   ;;  %s1593_s18 = sphi %s1641_s18, %s1980_s18   ;;  %s1589_s17 = sphi %s1639_s17, %s1979_s17   ;;  %s1585_s16 = sphi %s1637_s16, %s1978_s16   ;;  %s1581_s15 = sphi %s1635_s15, %s1977_s15  }
   0x5   : > { %p27_p0 = scmp.ge.s32.totalorder %s26_s22, 9  ;;  %p77_p1 = scmp.ne.s32.totalorder %s1585_s16, %s1581_s15 }
   0x6   : > { %p78_p2 = scmp.eq.s32.totalorder %s1605_s21, 0  ;;  %s70_s27 = sadd.s32 1, %s1585_s16 }
   0x7   : > { %s1984_s22 = smov (%p27_p0, %s26_s22), 0  ;;  %s1986_s23 = smov (!%p27_p0, %s29_s23), %s1601_s20 }
   0x8   : > { %p79_p3 = por %p78_p2, %p77_p1  ;;  %p31_p4 = scmp.ge.s32.totalorder %s1986_s23, 2 }
   0x9   : > { %s65_s24 = ssub.s32 %s1597_s19, %s1984_s22  ;;  %p1310_p6 = scmp.ge.s32.totalorder %s1605_s21, 18 }
   0xa   : > { %s1988_s23 = smov (%p31_p4, %s1986_s23), 0 }
   0xb   : > { %s66_s25 = ssub.s32 %s1601_s20, %s1988_s23  ;;  %183 = sbr.rel (%p1310_p6) target bundleno = 57 (0x39), region = 16 }
   0xc   : > { %s67_s26 = sor.u32 %s66_s25, %s65_s24 }
   0xd   : > { %p68_p5 = scmp.eq.s32.totalorder %s67_s26, 0 }
   0xf   : > { %s1686_s28 = scalar_select %p68_p5, %s1585_s16, %s70_s27  }
  0x12   : > { %198 = sbr.rel (!%p79_p3) target bundleno = 57 (0x39), region = 24  ;;  %s200_s29 = sand.u32 (%p79_p3), 1, %s1585_s16  }
  0x13   : > { %s1313_s30 = sshll.u32 (%p79_p3), %s1601_s20, 1  ;;  %s1311_s5 = sshll.u32 (%p79_p3), %s200_s29, 9 }
  0x14   : > { %s1393_s6 = sshll.u32 (%p79_p3), %s1597_s19, 8  ;;  %s1700_s12 = scalar_lea.vmem (%p79_p3), [#allocation3], %s1311_s5 }
  0x15   : > { %s206_s7 = sadd.s32 (%p79_p3), %s1393_s6, %s1313_s30 }
  0x16   : > { %s1315_s8 = sshll.u32 (%p79_p3), %s206_s7, 2 }
  0x17   : > { %s1695_s11 = scalar_lea.vmem (%p79_p3), %s1973_s1, %s1315_s8 }
  0x18   : > { %v362_v0 = vld [vmem:[%s1695_s11] sm:$0xff] (%p79_p3)  ;;  %v364_v1 = vld [vmem:[%s1695_s11 + $0x10] sm:$0xff] (%p79_p3) }
  0x19   : > { %v366_v2 = vld [vmem:[%s1695_s11 + $0x20] sm:$0xff]  ;;  %363 = vst [vmem:[%s1700_s12] sm:$0xff] %v362_v0  ;;  %365 = vst [vmem:[%s1700_s12 + $0x8] sm:$0xff] %v364_v1  ;;  %v368_v3 = vld [vmem:[%s1695_s11 + $0x30] sm:$0xff] }
  0x1a   : > { %367 = vst [vmem:[%s1700_s12 + $0x10] sm:$0xff] %v366_v2  ;;  %v370_v4 = vld [vmem:[%s1695_s11 + $0x40] sm:$0xff]  ;;  %v372_v5 = vld [vmem:[%s1695_s11 + $0x50] sm:$0xff]  ;;  %369 = vst [vmem:[%s1700_s12 + $0x18] sm:$0xff] %v368_v3 }
  0x1b   : > { %371 = vst [vmem:[%s1700_s12 + $0x20] sm:$0xff] %v370_v4  ;;  %373 = vst [vmem:[%s1700_s12 + $0x28] sm:$0xff] %v372_v5  ;;  %v374_v6 = vld [vmem:[%s1695_s11 + $0x60] sm:$0xff]  ;;  %v376_v7 = vld [vmem:[%s1695_s11 + $0x70] sm:$0xff] }
  0x1c   : > { %v378_v8 = vld [vmem:[%s1695_s11 + $0x80] sm:$0xff]  ;;  %375 = vst [vmem:[%s1700_s12 + $0x30] sm:$0xff] %v374_v6  ;;  %377 = vst [vmem:[%s1700_s12 + $0x38] sm:$0xff] %v376_v7  ;;  %v380_v9 = vld [vmem:[%s1695_s11 + $0x90] sm:$0xff] }
  0x1d   : > { %379 = vst [vmem:[%s1700_s12 + $0x40] sm:$0xff] %v378_v8  ;;  %v382_v10 = vld [vmem:[%s1695_s11 + $0xa0] sm:$0xff]  ;;  %v384_v11 = vld [vmem:[%s1695_s11 + $0xb0] sm:$0xff]  ;;  %381 = vst [vmem:[%s1700_s12 + $0x48] sm:$0xff] %v380_v9 }
  0x1e   : > { %383 = vst [vmem:[%s1700_s12 + $0x50] sm:$0xff] %v382_v10  ;;  %385 = vst [vmem:[%s1700_s12 + $0x58] sm:$0xff] %v384_v11  ;;  %v386_v12 = vld [vmem:[%s1695_s11 + $0xc0] sm:$0xff]  ;;  %v388_v13 = vld [vmem:[%s1695_s11 + $0xd0] sm:$0xff] }
  0x1f   : > { %v390_v14 = vld [vmem:[%s1695_s11 + $0xe0] sm:$0xff]  ;;  %387 = vst [vmem:[%s1700_s12 + $0x60] sm:$0xff] %v386_v12  ;;  %389 = vst [vmem:[%s1700_s12 + $0x68] sm:$0xff] %v388_v13  ;;  %v392_v15 = vld [vmem:[%s1695_s11 + $0xf0] sm:$0xff] }
  0x20   : > { %391 = vst [vmem:[%s1700_s12 + $0x70] sm:$0xff] %v390_v14  ;;  %v394_v16 = vld [vmem:[%s1695_s11 + $0x100] sm:$0xff]  ;;  %v396_v17 = vld [vmem:[%s1695_s11 + $0x110] sm:$0xff]  ;;  %393 = vst [vmem:[%s1700_s12 + $0x78] sm:$0xff] %v392_v15 }
  0x21   : > { %395 = vst [vmem:[%s1700_s12 + $0x80] sm:$0xff] %v394_v16  ;;  %397 = vst [vmem:[%s1700_s12 + $0x88] sm:$0xff] %v396_v17  ;;  %v398_v18 = vld [vmem:[%s1695_s11 + $0x120] sm:$0xff]  ;;  %v400_v19 = vld [vmem:[%s1695_s11 + $0x130] sm:$0xff] }
  0x22   : > { %v402_v20 = vld [vmem:[%s1695_s11 + $0x140] sm:$0xff]  ;;  %399 = vst [vmem:[%s1700_s12 + $0x90] sm:$0xff] %v398_v18  ;;  %401 = vst [vmem:[%s1700_s12 + $0x98] sm:$0xff] %v400_v19  ;;  %v404_v21 = vld [vmem:[%s1695_s11 + $0x150] sm:$0xff] }
  0x23   : > { %403 = vst [vmem:[%s1700_s12 + $0xa0] sm:$0xff] %v402_v20  ;;  %v406_v22 = vld [vmem:[%s1695_s11 + $0x160] sm:$0xff]  ;;  %v408_v23 = vld [vmem:[%s1695_s11 + $0x170] sm:$0xff]  ;;  %405 = vst [vmem:[%s1700_s12 + $0xa8] sm:$0xff] %v404_v21 }
  0x24   : > { %407 = vst [vmem:[%s1700_s12 + $0xb0] sm:$0xff] %v406_v22  ;;  %409 = vst [vmem:[%s1700_s12 + $0xb8] sm:$0xff] %v408_v23  ;;  %v410_v24 = vld [vmem:[%s1695_s11 + $0x180] sm:$0xff]  ;;  %v412_v25 = vld [vmem:[%s1695_s11 + $0x190] sm:$0xff] }
  0x25   : > { %v414_v26 = vld [vmem:[%s1695_s11 + $0x1a0] sm:$0xff]  ;;  %411 = vst [vmem:[%s1700_s12 + $0xc0] sm:$0xff] %v410_v24  ;;  %413 = vst [vmem:[%s1700_s12 + $0xc8] sm:$0xff] %v412_v25  ;;  %v416_v27 = vld [vmem:[%s1695_s11 + $0x1b0] sm:$0xff] }
  0x26   : > { %415 = vst [vmem:[%s1700_s12 + $0xd0] sm:$0xff] %v414_v26  ;;  %v418_v28 = vld [vmem:[%s1695_s11 + $0x1c0] sm:$0xff]  ;;  %v420_v29 = vld [vmem:[%s1695_s11 + $0x1d0] sm:$0xff]  ;;  %417 = vst [vmem:[%s1700_s12 + $0xd8] sm:$0xff] %v416_v27 }
  0x27   : > { %419 = vst [vmem:[%s1700_s12 + $0xe0] sm:$0xff] %v418_v28  ;;  %421 = vst [vmem:[%s1700_s12 + $0xe8] sm:$0xff] %v420_v29  ;;  %v422_v30 = vld [vmem:[%s1695_s11 + $0x1e0] sm:$0xff]  ;;  %v424_v31 = vld [vmem:[%s1695_s11 + $0x1f0] sm:$0xff] }
  0x28   : > { %v426_v32 = vld [vmem:[%s1695_s11 + $0x200] sm:$0xff]  ;;  %423 = vst [vmem:[%s1700_s12 + $0xf0] sm:$0xff] %v422_v30  ;;  %425 = vst [vmem:[%s1700_s12 + $0xf8] sm:$0xff] %v424_v31  ;;  %v428_v33 = vld [vmem:[%s1695_s11 + $0x210] sm:$0xff] }
  0x29   : > { %427 = vst [vmem:[%s1700_s12 + $0x100] sm:$0xff] %v426_v32  ;;  %v430_v34 = vld [vmem:[%s1695_s11 + $0x220] sm:$0xff]  ;;  %v432_v35 = vld [vmem:[%s1695_s11 + $0x230] sm:$0xff]  ;;  %429 = vst [vmem:[%s1700_s12 + $0x108] sm:$0xff] %v428_v33 }
  0x2a   : > { %431 = vst [vmem:[%s1700_s12 + $0x110] sm:$0xff] %v430_v34  ;;  %433 = vst [vmem:[%s1700_s12 + $0x118] sm:$0xff] %v432_v35  ;;  %v434_v36 = vld [vmem:[%s1695_s11 + $0x240] sm:$0xff]  ;;  %v436_v37 = vld [vmem:[%s1695_s11 + $0x250] sm:$0xff] }
  0x2b   : > { %v438_v38 = vld [vmem:[%s1695_s11 + $0x260] sm:$0xff]  ;;  %435 = vst [vmem:[%s1700_s12 + $0x120] sm:$0xff] %v434_v36  ;;  %437 = vst [vmem:[%s1700_s12 + $0x128] sm:$0xff] %v436_v37  ;;  %v440_v39 = vld [vmem:[%s1695_s11 + $0x270] sm:$0xff] }
  0x2c   : > { %439 = vst [vmem:[%s1700_s12 + $0x130] sm:$0xff] %v438_v38  ;;  %v442_v40 = vld [vmem:[%s1695_s11 + $0x280] sm:$0xff]  ;;  %v444_v41 = vld [vmem:[%s1695_s11 + $0x290] sm:$0xff]  ;;  %441 = vst [vmem:[%s1700_s12 + $0x138] sm:$0xff] %v440_v39 }
  0x2d   : > { %443 = vst [vmem:[%s1700_s12 + $0x140] sm:$0xff] %v442_v40  ;;  %445 = vst [vmem:[%s1700_s12 + $0x148] sm:$0xff] %v444_v41  ;;  %v446_v42 = vld [vmem:[%s1695_s11 + $0x2a0] sm:$0xff]  ;;  %v448_v43 = vld [vmem:[%s1695_s11 + $0x2b0] sm:$0xff] }
  0x2e   : > { %v450_v44 = vld [vmem:[%s1695_s11 + $0x2c0] sm:$0xff]  ;;  %447 = vst [vmem:[%s1700_s12 + $0x150] sm:$0xff] %v446_v42  ;;  %449 = vst [vmem:[%s1700_s12 + $0x158] sm:$0xff] %v448_v43  ;;  %v452_v45 = vld [vmem:[%s1695_s11 + $0x2d0] sm:$0xff] }
  0x2f   : > { %451 = vst [vmem:[%s1700_s12 + $0x160] sm:$0xff] %v450_v44  ;;  %v454_v46 = vld [vmem:[%s1695_s11 + $0x2e0] sm:$0xff]  ;;  %v456_v47 = vld [vmem:[%s1695_s11 + $0x2f0] sm:$0xff]  ;;  %453 = vst [vmem:[%s1700_s12 + $0x168] sm:$0xff] %v452_v45 }
  0x30   : > { %455 = vst [vmem:[%s1700_s12 + $0x170] sm:$0xff] %v454_v46  ;;  %457 = vst [vmem:[%s1700_s12 + $0x178] sm:$0xff] %v456_v47  ;;  %v458_v48 = vld [vmem:[%s1695_s11 + $0x300] sm:$0xff]  ;;  %v460_v49 = vld [vmem:[%s1695_s11 + $0x310] sm:$0xff] }
  0x31   : > { %v462_v50 = vld [vmem:[%s1695_s11 + $0x320] sm:$0xff]  ;;  %459 = vst [vmem:[%s1700_s12 + $0x180] sm:$0xff] %v458_v48  ;;  %461 = vst [vmem:[%s1700_s12 + $0x188] sm:$0xff] %v460_v49  ;;  %v464_v51 = vld [vmem:[%s1695_s11 + $0x330] sm:$0xff] }
  0x32   : > { %463 = vst [vmem:[%s1700_s12 + $0x190] sm:$0xff] %v462_v50  ;;  %v466_v52 = vld [vmem:[%s1695_s11 + $0x340] sm:$0xff]  ;;  %v468_v53 = vld [vmem:[%s1695_s11 + $0x350] sm:$0xff]  ;;  %465 = vst [vmem:[%s1700_s12 + $0x198] sm:$0xff] %v464_v51 }
  0x33   : > { %467 = vst [vmem:[%s1700_s12 + $0x1a0] sm:$0xff] %v466_v52  ;;  %469 = vst [vmem:[%s1700_s12 + $0x1a8] sm:$0xff] %v468_v53  ;;  %v470_v54 = vld [vmem:[%s1695_s11 + $0x360] sm:$0xff]  ;;  %v472_v55 = vld [vmem:[%s1695_s11 + $0x370] sm:$0xff] }
  0x34   : > { %v474_v56 = vld [vmem:[%s1695_s11 + $0x380] sm:$0xff]  ;;  %471 = vst [vmem:[%s1700_s12 + $0x1b0] sm:$0xff] %v470_v54  ;;  %473 = vst [vmem:[%s1700_s12 + $0x1b8] sm:$0xff] %v472_v55  ;;  %v476_v57 = vld [vmem:[%s1695_s11 + $0x390] sm:$0xff] }
  0x35   : > { %475 = vst [vmem:[%s1700_s12 + $0x1c0] sm:$0xff] %v474_v56  ;;  %v478_v58 = vld [vmem:[%s1695_s11 + $0x3a0] sm:$0xff]  ;;  %v480_v59 = vld [vmem:[%s1695_s11 + $0x3b0] sm:$0xff]  ;;  %477 = vst [vmem:[%s1700_s12 + $0x1c8] sm:$0xff] %v476_v57 }
  0x36   : > { %479 = vst [vmem:[%s1700_s12 + $0x1d0] sm:$0xff] %v478_v58  ;;  %481 = vst [vmem:[%s1700_s12 + $0x1d8] sm:$0xff] %v480_v59  ;;  %v482_v60 = vld [vmem:[%s1695_s11 + $0x3c0] sm:$0xff]  ;;  %v484_v61 = vld [vmem:[%s1695_s11 + $0x3d0] sm:$0xff] }
  0x37   : > { %v486_v62 = vld [vmem:[%s1695_s11 + $0x3e0] sm:$0xff]  ;;  %483 = vst [vmem:[%s1700_s12 + $0x1e0] sm:$0xff] %v482_v60  ;;  %485 = vst [vmem:[%s1700_s12 + $0x1e8] sm:$0xff] %v484_v61  ;;  %v488_v63 = vld [vmem:[%s1695_s11 + $0x3f0] sm:$0xff] }
  0x38   : > { %487 = vst [vmem:[%s1700_s12 + $0x1f0] sm:$0xff] %v486_v62  ;;  %489 = vst [vmem:[%s1700_s12 + $0x1f8] sm:$0xff] %v488_v63 }
  0x39 PF: > { %p1316_p7 = scmp.ge.s32.totalorder %s1605_s21, 1  ;;  %p510_p8 = scmp.lt.s32.totalorder %s1605_s21, 19 }
  0x3b   : > { %p511_p9 = pnand %p1316_p7, %p510_p8 }
  0x3c   : > { %s517_s13 = sand.u32 (!%p511_p9), 1, %s1581_s15   ;;  %s1318_s14 = sshll.u32 (!%p511_p9), %s1589_s17, 2 }
  0x3d   : > { %514 = sbr.rel (%p511_p9) target bundleno = 388 (0x184), region = 70  ;;  %s1317_s24 = sshll.u32 (!%p511_p9), %s517_s13, 9 }
  0x3e   : > { %p564_p10 = scmp.lt.s32.totalorder (!%p511_p9), %s1318_s14, 35  ;;  %s1319_s25 = sshll.u32 (!%p511_p9), %s1593_s18, 1 }
  0x3f   : > { %p573_p11 = scmp.lt.s32.totalorder (!%p511_p9), %s1319_s25, 3  ;;  %s1852_s11 = scalar_lea.vmem (!%p511_p9), [#allocation3], %s1317_s24 }
  0x40   : > { %p1322_p12 = scmp.ne.s32.totalorder (!%p511_p9), %s1589_s17, 0 }
  0x44   : > { %s1990_s14 = smov (!%p564_p10, %s1318_s14), 35  ;;  %s1992_s25 = smov (!%p573_p11, %s1319_s25), 3 }
  0x45   : > { %s568_s29 = scalar_lea.vmem %s1972_s0, %s1990_s14  ;;  %s575_s15 = scalar_lea.vmem %s1974_s2, %s1992_s25  ;;  %v1607_v0 = vmov (!%p1322_p12), 0.0  }
  0x46   : > { %s580_s18 = scalar_lea.vmem %s1975_s3, %s1992_s25  ;;  %s589_s10 = scalar_lea.vmem %s1976_s4, %s1992_s25  ;;  %595 = vst [vmem:[#allocation2] sm:$0xf] (!%p1322_p12), %v1607_v0 }
  0x47   : > { %594 = sbr.rel (%p1322_p12) target bundleno = 78 (0x4e), region = 78 }
  0x4e PF: > { %v1455_v1 = vld [vmem:[%s1852_s11 + $0x4] ss:$8 sps:$4 sm:$0xff]   ;;  %v1459_v3 = vld [vmem:[%s1852_s11] ss:$8 sps:$4 sm:$0xff]   ;;  %v1461_v5 = vld [vmem:[%s1852_s11 + $0x14] ss:$8 sps:$4 sm:$0xff]   ;;  %v674_v41 = vlaneseq }
  0x4f   : > { %v1457_v2 = vld [vmem:[%s1852_s11 + $0x104] ss:$8 sps:$4 sm:$0xff]   ;;  %1011 = vmatprep.subr.bf16.mxu1 %v1455_v1  ;;  %v1460_v4 = vld [vmem:[%s1852_s11 + $0x100] ss:$8 sps:$4 sm:$0xff]   ;;  %v1463_v6 = vld [vmem:[%s1852_s11 + $0x114] ss:$8 sps:$4 sm:$0xff]  }
  0x50   : > { %1052 = vmatprep.subr.bf16.mxu0 %v1457_v2  ;;  %1012 = vmatpush1.bf16.msra.mxu1 %v1459_v3  ;;  %v1465_v7 = vld [vmem:[%s1852_s11 + $0x10] ss:$8 sps:$4 sm:$0xff]   ;;  %v1467_v9 = vld [vmem:[%s1852_s11 + $0x24] ss:$8 sps:$4 sm:$0xff]   ;;  %v1471_v11 = vld [vmem:[%s1852_s11 + $0x20] ss:$8 sps:$4 sm:$0xff]  }
  0x51   : > { %1053 = vmatpush1.bf16.msra.mxu0 %v1460_v4  ;;  %1013 = vmatprep.subr.bf16.mxu1 %v1461_v5  ;;  %v1466_v8 = vld [vmem:[%s1852_s11 + $0x110] ss:$8 sps:$4 sm:$0xff]   ;;  %v1469_v10 = vld [vmem:[%s1852_s11 + $0x124] ss:$8 sps:$4 sm:$0xff]   ;;  %v1472_v12 = vld [vmem:[%s1852_s11 + $0x120] ss:$8 sps:$4 sm:$0xff]  }
  0x52   : > { %1054 = vmatprep.subr.bf16.mxu0 %v1463_v6  ;;  %v1473_v13 = vld [vmem:[%s1852_s11 + $0x34] ss:$8 sps:$4 sm:$0xff]   ;;  %v1477_v15 = vld [vmem:[%s1852_s11 + $0x30] ss:$8 sps:$4 sm:$0xff]   ;;  %v1479_v17 = vld [vmem:[%s1852_s11 + $0x44] ss:$8 sps:$4 sm:$0xff]  }
  0x53   : > { %v1475_v14 = vld [vmem:[%s1852_s11 + $0x134] ss:$8 sps:$4 sm:$0xff]   ;;  %v1478_v16 = vld [vmem:[%s1852_s11 + $0x130] ss:$8 sps:$4 sm:$0xff]   ;;  %v1481_v18 = vld [vmem:[%s1852_s11 + $0x144] ss:$8 sps:$4 sm:$0xff]  }
  0x54   : > { %1014 = vmatpush1.bf16.msra.mxu1 %v1465_v7  ;;  %v1483_v19 = vld [vmem:[%s1852_s11 + $0x40] ss:$8 sps:$4 sm:$0xff]   ;;  %v1485_v21 = vld [vmem:[%s1852_s11 + $0x54] ss:$8 sps:$4 sm:$0xff]   ;;  %v1489_v23 = vld [vmem:[%s1852_s11 + $0x50] ss:$8 sps:$4 sm:$0xff]  }
  0x55   : > { %1055 = vmatpush1.bf16.msra.mxu0 %v1466_v8  ;;  %1015 = vmatprep.subr.bf16.mxu1 %v1467_v9  ;;  %v1484_v20 = vld [vmem:[%s1852_s11 + $0x140] ss:$8 sps:$4 sm:$0xff]   ;;  %v1487_v22 = vld [vmem:[%s1852_s11 + $0x154] ss:$8 sps:$4 sm:$0xff]   ;;  %v1490_v24 = vld [vmem:[%s1852_s11 + $0x150] ss:$8 sps:$4 sm:$0xff]  }
  0x56   : > { %1056 = vmatprep.subr.bf16.mxu0 %v1469_v10  ;;  %v1491_v25 = vld [vmem:[%s1852_s11 + $0x64] ss:$8 sps:$4 sm:$0xff]   ;;  %v1495_v27 = vld [vmem:[%s1852_s11 + $0x60] ss:$8 sps:$4 sm:$0xff]   ;;  %v1497_v29 = vld [vmem:[%s1852_s11 + $0x74] ss:$8 sps:$4 sm:$0xff]  }
  0x57   : > { %v1493_v26 = vld [vmem:[%s1852_s11 + $0x164] ss:$8 sps:$4 sm:$0xff]   ;;  %v1496_v28 = vld [vmem:[%s1852_s11 + $0x160] ss:$8 sps:$4 sm:$0xff]   ;;  %v1499_v30 = vld [vmem:[%s1852_s11 + $0x174] ss:$8 sps:$4 sm:$0xff]  }
  0x58   : > { %1016 = vmatpush1.bf16.msra.mxu1 %v1471_v11  ;;  %v1501_v31 = vld [vmem:[%s1852_s11 + $0x70] ss:$8 sps:$4 sm:$0xff]   ;;  %v1503_v33 = vld [vmem:[%s1852_s11 + $0x84] ss:$8 sps:$4 sm:$0xff]   ;;  %v1507_v35 = vld [vmem:[%s1852_s11 + $0x80] ss:$8 sps:$4 sm:$0xff]  }
  0x59   : > { %1057 = vmatpush1.bf16.msra.mxu0 %v1472_v12  ;;  %1017 = vmatprep.subr.bf16.mxu1 %v1473_v13  ;;  %v1502_v32 = vld [vmem:[%s1852_s11 + $0x170] ss:$8 sps:$4 sm:$0xff]   ;;  %v1505_v34 = vld [vmem:[%s1852_s11 + $0x184] ss:$8 sps:$4 sm:$0xff]   ;;  %v1508_v36 = vld [vmem:[%s1852_s11 + $0x180] ss:$8 sps:$4 sm:$0xff]  }
  0x5a   : > { %1058 = vmatprep.subr.bf16.mxu0 %v1475_v14  ;;  %v1509_v37 = vld [vmem:[%s1852_s11 + $0x94] ss:$8 sps:$4 sm:$0xff]   ;;  %v1608_v39 = vmov 1966171168   ;;  %v1513_v42 = vld [vmem:[%s1852_s11 + $0x90] ss:$8 sps:$4 sm:$0xff]  }
  0x5b   : > { %v1511_v38 = vld [vmem:[%s1852_s11 + $0x194] ss:$8 sps:$4 sm:$0xff]   ;;  %v672_v40 = vunpack.c.l.s4 %v1608_v39  ;;  %v1514_v43 = vld [vmem:[%s1852_s11 + $0x190] ss:$8 sps:$4 sm:$0xff]   ;;  %v1515_v44 = vld [vmem:[%s1852_s11 + $0xa4] ss:$8 sps:$4 sm:$0xff]  }
  0x5c   : > { %1018 = vmatpush1.bf16.msra.mxu1 %v1477_v15  ;;  %v1517_v45 = vld [vmem:[%s1852_s11 + $0x1a4] ss:$8 sps:$4 sm:$0xff]   ;;  %v1897_v47 = vshrl.u32 %v674_v41, 7  ;;  %v1519_v48 = vld [vmem:[%s1852_s11 + $0xa0] ss:$8 sps:$4 sm:$0xff]   ;;  %p1388_p13 = scmp.ne.s32.totalorder %s1589_s17, 8 }
  0x5d   : > { %1059 = vmatpush1.bf16.msra.mxu0 %v1478_v16  ;;  %1019 = vmatprep.subr.bf16.mxu1 %v1479_v17  ;;  %v673_v46 = vunpack.c.0.s8 %v672_v40  ;;  %v1520_v49 = vld [vmem:[%s1852_s11 + $0x1a0] ss:$8 sps:$4 sm:$0xff]   ;;  %v1521_v50 = vld [vmem:[%s1852_s11 + $0xb4] ss:$8 sps:$4 sm:$0xff]   ;;  %v1525_v54 = vld [vmem:[%s1852_s11 + $0xb0] ss:$8 sps:$4 sm:$0xff]  }
  0x5e   : > { %1060 = vmatprep.subr.bf16.mxu0 %v1481_v18  ;;  %v1523_v51 = vld [vmem:[%s1852_s11 + $0x1b4] ss:$8 sps:$4 sm:$0xff]   ;;  %v1526_v55 = vld [vmem:[%s1852_s11 + $0x1b0] ss:$8 sps:$4 sm:$0xff]   ;;  %v1527_v57 = vld [vmem:[%s1852_s11 + $0xc4] ss:$8 sps:$4 sm:$0xff]  }
  0x5f   : > { %v1904_v52 = vsub.s32 %v673_v46, %v1897_v47  ;;  %v1323_v53 = vld.sshfl [vmem:[%s568_s29] sm:$0x33 pattern:$0x75316420]  ;;  %v1529_v58 = vld [vmem:[%s1852_s11 + $0x1c4] ss:$8 sps:$4 sm:$0xff]  }
  0x60   : > { %1020 = vmatpush1.bf16.msra.mxu1 %v1483_v19  ;;  %v670_v56 = vcombine.high %v1323_v53, %v1323_v53  ;;  %v1531_v60 = vld [vmem:[%s1852_s11 + $0xc0] ss:$8 sps:$4 sm:$0xff]   ;;  %v1533_v63 = vld [vmem:[%s1852_s11 + $0xd4] ss:$8 sps:$4 sm:$0xff]   ;;  %v1537_v1 = vld [vmem:[%s1852_s11 + $0xd0] ss:$8 sps:$4 sm:$0xff]  }
  0x61   : > { %1061 = vmatpush1.bf16.msra.mxu0 %v1484_v20  ;;  %1021 = vmatprep.subr.bf16.mxu1 %v1485_v21  ;;  %v1532_v61 = vld [vmem:[%s1852_s11 + $0x1c0] ss:$8 sps:$4 sm:$0xff]   ;;  %v1535_v0 = vld [vmem:[%s1852_s11 + $0x1d4] ss:$8 sps:$4 sm:$0xff]   ;;  %v1538_v2 = vld [vmem:[%s1852_s11 + $0x1d0] ss:$8 sps:$4 sm:$0xff]   ;;  %v677_v9 = vrot.slane %v1323_v53, %v1904_v52 }
  0x62   : > { %1062 = vmatprep.subr.bf16.mxu0 %v1487_v22  ;;  %v684_v59 = vrot.slane %v670_v56, %v1904_v52  ;;  %v1539_v3 = vld [vmem:[%s1852_s11 + $0xe4] ss:$8 sps:$4 sm:$0xff]   ;;  %v1543_v5 = vld [vmem:[%s1852_s11 + $0xe0] ss:$8 sps:$4 sm:$0xff]   ;;  %v1545_v7 = vld [vmem:[%s1852_s11 + $0xf4] ss:$8 sps:$4 sm:$0xff]  }
  0x63   : > { %v1541_v4 = vld [vmem:[%s1852_s11 + $0x1e4] ss:$8 sps:$4 sm:$0xff]   ;;  %v1544_v6 = vld [vmem:[%s1852_s11 + $0x1e0] ss:$8 sps:$4 sm:$0xff]   ;;  %v1547_v8 = vld [vmem:[%s1852_s11 + $0x1f4] ss:$8 sps:$4 sm:$0xff]   ;;  %v685_v12 = vcombine.high %v677_v9, %v677_v9 }
  0x64   : > { %1022 = vmatpush1.bf16.msra.mxu1 %v1489_v23  ;;  %v686_v62 = vcombine.high %v684_v59, %v684_v59  ;;  %1043 = vmatprep.mubr.bf16.mxu1 %v684_v59  ;;  %v1549_v10 = vld [vmem:[%s1852_s11 + $0xf0] ss:$8 sps:$4 sm:$0xff]   ;;  %v1609_v13 = vmov 1983009808  }
  0x65   : > { %1063 = vmatpush1.bf16.msra.mxu0 %v1490_v24  ;;  %1023 = vmatprep.subr.bf16.mxu1 %v1491_v25  ;;  %v1550_v11 = vld [vmem:[%s1852_s11 + $0x1f0] ss:$8 sps:$4 sm:$0xff]   ;;  %v1097_v14 = vunpack.c.l.s4 %v1609_v13 }
  0x66   : > { %1064 = vmatprep.subr.bf16.mxu0 %v1493_v26  ;;  %1084 = vmatprep.mubr.bf16.mxu0 %v686_v62 }
  0x67   : > { %v1098_v15 = vunpack.c.0.s8 %v1097_v14 }
  0x68   : > { %1024 = vmatpush1.bf16.msra.mxu1 %v1495_v27 }
  0x69   : > { %1065 = vmatpush1.bf16.msra.mxu0 %v1496_v28  ;;  %1025 = vmatprep.subr.bf16.mxu1 %v1497_v29  ;;  %v1101_v22 = vsub.s32 %v1098_v15, %v1897_v47  ;;  %v596_v28 = vld [vmem:[#allocation2] sm:$0xf] }
  0x6a   : > { %1066 = vmatprep.subr.bf16.mxu0 %v1499_v30 }
  0x6c   : > { %1026 = vmatpush1.bf16.msra.mxu1 %v1501_v31  ;;  %v1111_v31 = vld [vmem:[%s575_s15] sm:$0x3] (!%p1388_p13) }
  0x6d   : > { %1067 = vmatpush1.bf16.msra.mxu0 %v1502_v32  ;;  %1027 = vmatprep.subr.bf16.mxu1 %v1503_v33  ;;  %v1115_v32 = vsub.s32 (!%p1388_p13), 0, %v1897_v47  ;;  %v1119_v33 = vsub.s32 (!%p1388_p13), 1, %v1897_v47 }
  0x6e   : > { %1068 = vmatprep.subr.bf16.mxu0 %v1505_v34  ;;  %v1131_v34 = vld [vmem:[%s580_s18] sm:$0x3] (!%p1388_p13) }
  0x70   : > { %1028 = vmatpush1.bf16.msra.mxu1 %v1507_v35  ;;  %v1116_v35 = vrot.slane (!%p1388_p13), %v1111_v31, %v1115_v32 }
  0x71   : > { %1069 = vmatpush1.bf16.msra.mxu0 %v1508_v36  ;;  %1029 = vmatprep.subr.bf16.mxu1 %v1509_v37  ;;  %v1120_v36 = vrot.slane (!%p1388_p13), %v1111_v31, %v1119_v33  ;;  %v1136_v37 = vrot.slane (!%p1388_p13), %v1131_v34, %v1115_v32 }
  0x72   : > { %1070 = vmatprep.subr.bf16.mxu0 %v1511_v38  ;;  %v1140_v38 = vrot.slane (!%p1388_p13), %v1131_v34, %v1119_v33 }
  0x73   : > { %v1121_v39 = vcombine.low (!%p1388_p13), %v1116_v35, %v1120_v36 }
  0x74   : > { %1030 = vmatpush1.bf16.msra.mxu1 %v1513_v42  ;;  %v1141_v40 = vcombine.low (!%p1388_p13), %v1136_v37, %v1140_v38 }
  0x75   : > { %1071 = vmatpush1.bf16.msra.mxu0 %v1514_v43  ;;  %1031 = vmatprep.subr.bf16.mxu1 %v1515_v44  ;;  %v1128_v42 = vrot.slane (!%p1388_p13), %v1121_v39, %v1101_v22 }
  0x76   : > { %1072 = vmatprep.subr.bf16.mxu0 %v1517_v45  ;;  %v1148_v43 = vrot.slane (!%p1388_p13), %v1141_v40, %v1101_v22 }
  0x78   : > { %1032 = vmatpush1.bf16.msra.mxu1 %v1519_v48 }
  0x79   : > { %1073 = vmatpush1.bf16.msra.mxu0 %v1520_v49  ;;  %1033 = vmatprep.subr.bf16.mxu1 %v1521_v50 }
  0x7a   : > { %1074 = vmatprep.subr.bf16.mxu0 %v1523_v51 }
  0x7c   : > { %1034 = vmatpush1.bf16.msra.mxu1 %v1525_v54 }
  0x7d   : > { %1075 = vmatpush1.bf16.msra.mxu0 %v1526_v55  ;;  %1035 = vmatprep.subr.bf16.mxu1 %v1527_v57 }
  0x7e   : > { %1076 = vmatprep.subr.bf16.mxu0 %v1529_v58 }
  0x80   : > { %1036 = vmatpush1.bf16.msra.mxu1 %v1531_v60 }
  0x81   : > { %1077 = vmatpush1.bf16.msra.mxu0 %v1532_v61  ;;  %1037 = vmatprep.subr.bf16.mxu1 %v1533_v63 }
  0x82   : > { %1078 = vmatprep.subr.bf16.mxu0 %v1535_v0 }
  0x84   : > { %1038 = vmatpush1.bf16.msra.mxu1 %v1537_v1 }
  0x85   : > { %1079 = vmatpush1.bf16.msra.mxu0 %v1538_v2  ;;  %1039 = vmatprep.subr.bf16.mxu1 %v1539_v3 }
  0x86   : > { %1080 = vmatprep.subr.bf16.mxu0 %v1541_v4 }
  0x88   : > { %1040 = vmatpush1.bf16.msra.mxu1 %v1543_v5 }
  0x89   : > { %1081 = vmatpush1.bf16.msra.mxu0 %v1544_v6  ;;  %1041 = vmatprep.subr.bf16.mxu1 %v1545_v7 }
  0x8a   : > { %1082 = vmatprep.subr.bf16.mxu0 %v1547_v8 }
  0x8c   : > { %1042 = vmatpush1.bf16.msra.mxu1 %v1549_v10 }
  0x8d   : > { %1083 = vmatpush1.bf16.msra.mxu0 %v1550_v11 }
  0x8f   : > { %1044 = vmatmul.mubr.bf16.vlgmr.msra.gmra.mrb[0].mxu1 %v677_v9 }
  0x90   : > { %1085 = vmatmul.mubr.bf16.vlgmr.msra.gmra.mrb[0].mxu0 %v685_v12 }
 0x162   : > { %v1045_v16 = vpop.f32.mrb[0].mxu1 }
 0x163   : > { %v1086_v17 = vpop.f32.mrb[0].mxu0  ;;  %v1047_v19 = vpop.f32.mrb[1].mxu1 }
 0x164   : > { %v1087_v18 = vadd.f32 %v1086_v17, %v1045_v16  ;;  %v1088_v20 = vpop.f32.mrb[1].mxu0  ;;  %v1049_v23 = vpop.f32.mrb[2].mxu1 }
 0x165   : > { %v1089_v21 = vadd.f32 %v1088_v20, %v1047_v19  ;;  %v1090_v24 = vpop.f32.mrb[2].mxu0  ;;  %v1050_v25 = vpop.f32.mrb[3].mxu1 }
 0x166   : > { %v1091_v26 = vpop.f32.mrb[3].mxu0 }
 0x167   : > { %v1095_v27 = vcombine.low %v1087_v18, %v1089_v21  ;;  %1109 = sbr.rel (%p1388_p13) target bundleno = 388 (0x184), region = 82 }
 0x169   : > { %v1102_v29 = vrot.slane %v1095_v27, %v1101_v22 }
 0x16b   : > { %v1104_v30 = vadd.f32 %v1102_v29, %v596_v28 }
 0x16d   : > { %1105 = vst [vmem:[#allocation2] sm:$0xf] %v1104_v30 }
 0x174   : > { %v1110_v41 = vld [vmem:[#allocation2] sm:$0xf] }
 0x175   : > { %v1130_v44 = vmul.f32 %v1128_v42, %v1110_v41 }
 0x177   : > { %v1150_v45 = vadd.f32 %v1148_v43, %v1130_v44 }
 0x179   : > { %v1151_v46 = vmax.f32 %v1150_v45, 0.0 }
 0x17b   : > { %v1159_v48 = vrot.slane %v1151_v46, %v1101_v22 }
 0x17d   : > { %v1160_v47 = vcombine.high %v1159_v48, %v1159_v48 }
 0x17f   : > { %v1389_v49 = vpack.c.bf16 %v1160_v47, %v1159_v48 }
 0x181   : > { %v1174_v50 = vrot.slane %v1389_v49, %v1904_v52 }
 0x183   : > { %1390 = vst.sshfl [vmem:[%s589_s10] sm:$0x5 pattern:$0x73625140] %v1174_v50 }
 0x184 PF: > { %s14_s21 = sadd.s32 1, %s1605_s21   ;;  %s1977_s15 = smov %s1585_s16 }
 0x185   : > { %p11_p0 = scmp.ge.s32.totalorder %s14_s21, 20   ;;  %s1978_s16 = smov %s1686_s28 }
 0x186   : > { %s1979_s17 = smov %s1597_s19  ;;  %s1980_s18 = smov %s1601_s20 }
 0x187   : > { %s1981_s19 = smov %s1984_s22  ;;  %s1982_s20 = smov %s1988_s23 }
 0x188   :  { %13 = sbr.rel (!%p11_p0) target bundleno = 4 (0x4), region = 126 }

// kernel: pothole_detector_forward.43
= control target key start
LH: loop header
LB: loop body
LE: loop exit
PB: predicated region body
PF: predicated region fallthrough
CT: control target
= control target key end

     0   :  { %v103_v30 = vlaneseq  ;;  %v568_v34 = vmov 1966171168   ;;  %s716_s0 = inlined_call_operand.vmem [shape: bf16[2,512], index: 0, kind: input, shape index: {}]   ;;  %s717_s1 = inlined_call_operand.vmem [shape: bf16[512,2], index: 1, kind: input, shape index: {}]   ;;  %s718_s2 = inlined_call_operand.vmem [shape: f32[1,2], index: 2, kind: input, shape index: {}]   ;;  %s719_s3 = inlined_call_operand.vmem [shape: f32[1,2], index: 3, kind: input, shape index: {}]   ;;  %s720_s4 = inlined_call_operand.hbm [shape: f32[2,2], index: 4, kind: output, shape index: {}]  }
   0x1   :  { %v512_v0 = vld [vmem:[%s717_s1 + $0x40] sm:$0xff]   ;;  %v516_v4 = vld [vmem:[%s717_s1 + $0x48] sm:$0xff]   ;;  %v520_v8 = vld [vmem:[%s717_s1 + $0x50] sm:$0xff]   ;;  %v101_v35 = vunpack.c.l.s4 %v568_v34 }
   0x2   :  { %v513_v1 = vld [vmem:[%s717_s1 + $0xc0] sm:$0xff]   ;;  %465 = vmatprep.subr.bf16.mxu0 %v512_v0  ;;  %v517_v5 = vld [vmem:[%s717_s1 + $0xc8] sm:$0xff]   ;;  %v521_v9 = vld [vmem:[%s717_s1 + $0xd0] sm:$0xff]   ;;  %v104_v36 = vshrl.u32 %v103_v30, 7 }
   0x3   :  { %v514_v2 = vld [vmem:[%s717_s1] sm:$0xff]   ;;  %487 = vmatprep.subr.bf16.mxu1 %v513_v1  ;;  %v518_v6 = vld [vmem:[%s717_s1 + $0x8] sm:$0xff]   ;;  %v522_v10 = vld [vmem:[%s717_s1 + $0x10] sm:$0xff]  }
   0x4   :  { %v515_v3 = vld [vmem:[%s717_s1 + $0x80] sm:$0xff]   ;;  %466 = vmatpush3.bf16.msra.mxu0 %v514_v2  ;;  %v519_v7 = vld [vmem:[%s717_s1 + $0x88] sm:$0xff]   ;;  %v523_v11 = vld [vmem:[%s717_s1 + $0x90] sm:$0xff]  }
   0x5   :  { %488 = vmatpush3.bf16.msra.mxu1 %v515_v3  ;;  %467 = vmatprep.subr.bf16.mxu0 %v516_v4  ;;  %v524_v12 = vld [vmem:[%s717_s1 + $0x58] sm:$0xff]   ;;  %v528_v16 = vld [vmem:[%s717_s1 + $0x60] sm:$0xff]   ;;  %v532_v20 = vld [vmem:[%s717_s1 + $0x68] sm:$0xff]  }
   0x6   :  { %489 = vmatprep.subr.bf16.mxu1 %v517_v5  ;;  %v525_v13 = vld [vmem:[%s717_s1 + $0xd8] sm:$0xff]   ;;  %v529_v17 = vld [vmem:[%s717_s1 + $0xe0] sm:$0xff]   ;;  %v533_v21 = vld [vmem:[%s717_s1 + $0xe8] sm:$0xff]  }
   0x7   :  { %v526_v14 = vld [vmem:[%s717_s1 + $0x18] sm:$0xff]   ;;  %v530_v18 = vld [vmem:[%s717_s1 + $0x20] sm:$0xff]   ;;  %v534_v22 = vld [vmem:[%s717_s1 + $0x28] sm:$0xff]  }
   0x8   :  { %468 = vmatpush3.bf16.msra.mxu0 %v518_v6  ;;  %v527_v15 = vld [vmem:[%s717_s1 + $0x98] sm:$0xff]   ;;  %v531_v19 = vld [vmem:[%s717_s1 + $0xa0] sm:$0xff]   ;;  %v535_v23 = vld [vmem:[%s717_s1 + $0xa8] sm:$0xff]  }
   0x9   :  { %490 = vmatpush3.bf16.msra.mxu1 %v519_v7  ;;  %469 = vmatprep.subr.bf16.mxu0 %v520_v8  ;;  %v536_v24 = vld [vmem:[%s717_s1 + $0x70] sm:$0xff]   ;;  %v540_v28 = vld [vmem:[%s717_s1 + $0x78] sm:$0xff]   ;;  %v430_v33 = vld.sshfl [vmem:[%s716_s0] sm:$0x33 pattern:$0x75316420] }
   0xa   :  { %491 = vmatprep.subr.bf16.mxu1 %v521_v9  ;;  %v537_v25 = vld [vmem:[%s717_s1 + $0xf0] sm:$0xff]   ;;  %v541_v29 = vld [vmem:[%s717_s1 + $0xf8] sm:$0xff]  }
   0xb   :  { %v538_v26 = vld [vmem:[%s717_s1 + $0x30] sm:$0xff]   ;;  %v542_v31 = vld [vmem:[%s717_s1 + $0x38] sm:$0xff]  }
   0xc   :  { %470 = vmatpush3.bf16.msra.mxu0 %v522_v10  ;;  %v539_v27 = vld [vmem:[%s717_s1 + $0xb0] sm:$0xff]   ;;  %v543_v32 = vld [vmem:[%s717_s1 + $0xb8] sm:$0xff]  }
   0xd   :  { %492 = vmatpush3.bf16.msra.mxu1 %v523_v11  ;;  %471 = vmatprep.subr.bf16.mxu0 %v524_v12 }
   0xe   :  { %493 = vmatprep.subr.bf16.mxu1 %v525_v13 }
  0x10   :  { %472 = vmatpush3.bf16.msra.mxu0 %v526_v14 }
  0x11   :  { %494 = vmatpush3.bf16.msra.mxu1 %v527_v15  ;;  %473 = vmatprep.subr.bf16.mxu0 %v528_v16 }
  0x12   :  { %495 = vmatprep.subr.bf16.mxu1 %v529_v17 }
  0x14   :  { %474 = vmatpush3.bf16.msra.mxu0 %v530_v18 }
  0x15   :  { %496 = vmatpush3.bf16.msra.mxu1 %v531_v19  ;;  %475 = vmatprep.subr.bf16.mxu0 %v532_v20 }
  0x16   :  { %497 = vmatprep.subr.bf16.mxu1 %v533_v21 }
  0x18   :  { %476 = vmatpush3.bf16.msra.mxu0 %v534_v22 }
  0x19   :  { %498 = vmatpush3.bf16.msra.mxu1 %v535_v23  ;;  %477 = vmatprep.subr.bf16.mxu0 %v536_v24 }
  0x1a   :  { %499 = vmatprep.subr.bf16.mxu1 %v537_v25 }
  0x1c   :  { %478 = vmatpush3.bf16.msra.mxu0 %v538_v26 }
  0x1d   :  { %500 = vmatpush3.bf16.msra.mxu1 %v539_v27  ;;  %479 = vmatprep.subr.bf16.mxu0 %v540_v28 }
  0x1e   :  { %501 = vmatprep.subr.bf16.mxu1 %v541_v29 }
  0x20   :  { %480 = vmatpush3.bf16.msra.mxu0 %v542_v31 }
  0x21   :  { %502 = vmatpush3.bf16.msra.mxu1 %v543_v32 }
  0x22   :  { %9 = vsyncpa [#allocation4], 0  ;;  %v99_v37 = vcombine.high %v430_v33, %v430_v33  ;;  %v102_v38 = vunpack.c.0.s8 %v101_v35  ;;  %vm23_vm0 = vcmask 9216   ;;  %v569_v44 = vmov 0.0   ;;  %v463_v58 = vld [vmem:[%s718_s2] ss:$0 sm:$0xff] }
  0x23   :  { %24 = vst.msk [vmem:[#allocation2] sm:$0x3] %vm23_vm0, %v569_v44  ;;  %v464_v60 = vld [vmem:[%s719_s3] ss:$0 sm:$0xff]  ;;  %s570_s5 = smov [#allocation3]  }
  0x24   :  { %v105_v39 = vsub.s32 %v102_v38, %v104_v36  ;;  %s422_s6 = sshll.u32 %s570_s5, 4  ;;  %s423_s6 = int_to_ptr.vmem [resolvable:$true] %s422_s6 }
  0x25   :  { %s544_s7 = scalar_lea.vmem %s423_s6, 32  ;;  %p549_p1 = scmp.lt.s32.totalorder %s423_s6, %s423_s6 }
  0x26   :  { %v113_v40 = vrot.slane %v99_v37, %v105_v39  ;;  %v106_v41 = vrot.slane %v430_v33, %v105_v39  ;;  %p545_p0 = scmp.ne.s32.totalorder %s423_s6, %s544_s7  ;;  %p550_p2 = scmp.lt.s32.totalorder %s544_s7, %s544_s7 }
  0x28   :  { %344 = vmatprep.mubr.bf16.mxu0 %v113_v40  ;;  %v115_v42 = vcombine.high %v113_v40, %v113_v40  ;;  %v114_v43 = vcombine.high %v106_v41, %v106_v41  ;;  %p551_p3 = por %p550_p2, %p549_p1 }
  0x29   :  { %345 = vmatmul.mubr.bf16.vlgmr.msra.gmra.mrb[0].mxu0 %v106_v41 }
  0x2a   :  { %384 = vmatprep.mubr.bf16.mxu1 %v115_v42  ;;  %v25_v55 = vld [vmem:[#allocation2] sm:$0x3]  ;;  %p552_p4 = pnand %p551_p3, %p545_p0 }
  0x2b   :  { %385 = vmatmul.mubr.bf16.vlgmr.msra.gmra.mrb[0].mxu1 %v114_v43 }
  0xfc   :  { %v481_v45 = vpop.f32.mrb[0].mxu0 }
  0xfd   :  { %v482_v46 = vpop.f32.mrb[1].mxu0 }
  0xfe   :  { %v503_v47 = vpop.f32.mrb[0].mxu1  ;;  %v483_v48 = vadd.f32 %v482_v46, %v481_v45  ;;  %v484_v49 = vpop.f32.mrb[2].mxu0 }
  0xff   :  { %v504_v50 = vpop.f32.mrb[1].mxu1  ;;  %v485_v51 = vpop.f32.mrb[3].mxu0 }
 0x100   :  { %v505_v52 = vadd.f32 %v504_v50, %v503_v47  ;;  %v506_v53 = vpop.f32.mrb[2].mxu1 }
 0x101   :  { %v507_v54 = vpop.f32.mrb[3].mxu1 }
 0x102   :  { %v387_v56 = vadd.f32 %v505_v52, %v483_v48 }
 0x104   :  { %v392_v57 = vadd.f32 %v387_v56, %v25_v55 }
 0x106   :  { %394 = vst.msk [vmem:[#allocation2] sm:$0x3] %vm23_vm0, %v392_v57 }
 0x10d   :  { %v398_v59 = vld [vmem:[#allocation2] sm:$0x3] }
 0x10e   :  { %v406_v61 = vmul.f32 %v463_v58, %v398_v59 }
 0x110   :  { %v414_v62 = vadd.f32 %v464_v60, %v406_v61 }
 0x112   :  { %415 = vst.msk [vmem:[#allocation3] sm:$0x3] %vm23_vm0, %v414_v62 }
 0x113   :  { %555 = shalt.err (!%p552_p4)
}
 0x114   :  { %s556_s9 = scalar_lea.hbm %s720_s4, 32 }
 0x115   :  { %p557_p5 = scmp.ne.s32.totalorder %s720_s4, %s556_s9  ;;  %p560_p6 = scmp.lt.u32.totalorder %s556_s9, %s720_s4 }
 0x117   :  { %p562_p7 = pnand %p560_p6, %p557_p5 }
 0x119   :  { %565 = shalt.err (!%p562_p7)
}
 0x11a   :  { %425 = dma.vmem_to_hbm [thread:$0]  %s423_s6, 32, %s720_s4, [#allocation4]  }
 0x11b   :  { %566 = dma.done.wait [#allocation4], 32  }
 0x11c   :  { %567 = vsyncadd [#allocation4], 4294967264 }
 0x11d   :  { %429 = vsyncpa [#allocation4], 1 }

</bundles_post_ra>
